<compile_context>
chip_gen: v6e
topology: v6e:2x2x1
jax: 0.10.0
libtpu: 0.0.40
codegen_flags: <defaults>
</compile_context>

<pallas_src>
import math
from functools import partial

import jax
import jax.numpy as jnp
from jax.experimental import pallas as pl
from jax.experimental.pallas import tpu as pltpu


def _round_up(x, m):
    return ((x + m - 1) // m) * m


def _pick_tm(m):
    """Pick an M tile: multiple of 8 sublanes, <= 512, dividing M when possible
    (avoids XLA-side pad + output-slice copies), and giving >= 2 grid steps
    when M >= 256 so the 'parallel' M axis can shard across both v7x cores."""
    cap = 512 if m < 256 else min(512, m // 2)
    cap = max(8, min(cap, m))
    best = None
    for t in range(8, cap + 1, 8):
        if m % t == 0:
            best = t
    if best is not None:
        return best, m
    tm = min(512, _round_up(m, 8))
    return tm, _round_up(m, tm)


# ----------------------------- Pallas kernels ------------------------------

def _mm1_kernel(x_ref, w_ref, s_ref, b_ref, *rest, relu, has_res):
    """Single-K-step matmul + fused BN scale/bias (+residual) (+ReLU).
    f32 accumulate/epilogue, cast to the output dtype at the store."""
    if has_res:
        r_ref, o_ref = rest
    else:
        (o_ref,) = rest
    out = jnp.dot(x_ref[...], w_ref[...], preferred_element_type=jnp.float32)
    out = out * s_ref[...] + b_ref[...]
    if has_res:
        out = out + r_ref[...].astype(jnp.float32)
    if relu:
        out = jnp.maximum(out, 0.0)
    o_ref[...] = out.astype(o_ref.dtype)


def _mmk_kernel(x_ref, w_ref, s_ref, b_ref, *rest, relu, has_res):
    """K-tiled matmul with f32 VMEM accumulator and fused epilogue (only used
    when K > 1024; no layer in this config hits it, kept for generality)."""
    if has_res:
        r_ref, o_ref, acc_ref = rest
    else:
        o_ref, acc_ref = rest

    @pl.when(pl.program_id(1) == 0)
    def _():
        acc_ref[...] = jnp.zeros_like(acc_ref)

    acc_ref[...] += jnp.dot(x_ref[...], w_ref[...],
                            preferred_element_type=jnp.float32)

    @pl.when(pl.program_id(1) == pl.num_programs(1) - 1)
    def _():
        out = acc_ref[...] * s_ref[...] + b_ref[...]
        if has_res:
            out = out + r_ref[...].astype(jnp.float32)
        if relu:
            out = jnp.maximum(out, 0.0)
        o_ref[...] = out.astype(o_ref.dtype)


def _max9_kernel(*refs):
    # 9 pooling taps, each (TM, C); elementwise max on the VPU.
    *in_refs, o_ref = refs
    acc = in_refs[0][...]
    for r in in_refs[1:]:
        acc = jnp.maximum(acc, r[...])
    o_ref[...] = acc


def _mean_kernel(x_ref, o_ref):
    # x: (1, H*W, C) bf16 -> (1, 1, C) f32 global average over spatial.
    o_ref[...] = jnp.mean(x_ref[...].astype(jnp.float32), axis=1,
                          keepdims=True)


# ----------------------------- fused matmul wrapper -------------------------

def matmul_scale_bias(x, w, scale, bias, *, relu, residual=None,
                      out_dtype=jnp.bfloat16):
    """(M,K) @ (K,N) * scale + bias (+residual) (+ReLU) -> (M,N) out_dtype."""
    M, K = x.shape
    N = w.shape[1]

    tm, m_pad = _pick_tm(M)

    xb = x if x.dtype == jnp.bfloat16 else x.astype(jnp.bfloat16)
    wb = w if w.dtype == jnp.bfloat16 else w.astype(jnp.bfloat16)

    single_k = K <= 1024
    if single_k:
        tk, k_pad = K, K
    else:
        tk = 512
        k_pad = _round_up(K, tk)
        xb = jnp.pad(xb, ((0, 0), (0, k_pad - K)))
        wb = jnp.pad(wb, ((0, k_pad - K), (0, 0)))
    if m_pad != M:
        xb = jnp.pad(xb, ((0, m_pad - M), (0, 0)))

    scale = scale.reshape(1, N).astype(jnp.float32)
    bias = bias.reshape(1, N).astype(jnp.float32)

    has_res = residual is not None
    inputs = [xb, wb, scale, bias]
    if single_k:
        in_specs = [
            pl.BlockSpec((tm, K), lambda m: (m, 0)),
            pl.BlockSpec((K, N), lambda m: (0, 0)),
            pl.BlockSpec((1, N), lambda m: (0, 0)),
            pl.BlockSpec((1, N), lambda m: (0, 0)),
        ]
    else:
        in_specs = [
            pl.BlockSpec((tm, tk), lambda m, k: (m, k)),
            pl.BlockSpec((tk, N), lambda m, k: (k, 0)),
            pl.BlockSpec((1, N), lambda m, k: (0, 0)),
            pl.BlockSpec((1, N), lambda m, k: (0, 0)),
        ]
    if has_res:
        res = (residual if residual.dtype == jnp.bfloat16
               else residual.astype(jnp.bfloat16))
        if m_pad != M:
            res = jnp.pad(res, ((0, m_pad - M), (0, 0)))
        inputs.append(res)
        in_specs.append(pl.BlockSpec(
            (tm, N), (lambda m: (m, 0)) if single_k else (lambda m, k: (m, 0))))

    out_bytes = m_pad * N * jnp.dtype(out_dtype).itemsize
    bytes_accessed = int((m_pad * k_pad + k_pad * N) * 2 + 2 * N * 4
                         + (m_pad * N * 2 if has_res else 0) + out_bytes)
    cost = pl.CostEstimate(flops=2 * m_pad * k_pad * N, transcendentals=0,
                           bytes_accessed=bytes_accessed)

    if single_k:
        out = pl.pallas_call(
            partial(_mm1_kernel, relu=relu, has_res=has_res),
            out_shape=jax.ShapeDtypeStruct((m_pad, N), out_dtype),
            grid=(m_pad // tm,),
            in_specs=in_specs,
            out_specs=pl.BlockSpec((tm, N), lambda m: (m, 0)),
            compiler_params=pltpu.CompilerParams(
                dimension_semantics=("parallel",),
                vmem_limit_bytes=32 * 1024 * 1024),
            cost_estimate=cost,
        )(*inputs)
    else:
        out = pl.pallas_call(
            partial(_mmk_kernel, relu=relu, has_res=has_res),
            out_shape=jax.ShapeDtypeStruct((m_pad, N), out_dtype),
            grid=(m_pad // tm, k_pad // tk),
            in_specs=in_specs,
            out_specs=pl.BlockSpec((tm, N), lambda m, k: (m, 0)),
            scratch_shapes=[pltpu.VMEM((tm, N), jnp.float32)],
            compiler_params=pltpu.CompilerParams(
                dimension_semantics=("parallel", "arbitrary"),
                vmem_limit_bytes=32 * 1024 * 1024),
            cost_estimate=cost,
        )(*inputs)
    return out[:M] if m_pad != M else out


# ----------------------------- conv / pooling glue -------------------------

def _extract_patches(x, kh, kw, stride, pad):
    # x: (N,H,W,C) bf16 -> (N,Ho,Wo,kh,kw,C).  bf16 halves the im2col traffic.
    # TODO(synk): move patch extraction inside the kernel (overlapping row-band
    # reads) to remove the kh*kw im2col HBM amplification entirely.
    n, h, w, c = x.shape
    xp = jnp.pad(x, ((0, 0), (pad, pad), (pad, pad), (0, 0)))
    ho = (h + 2 * pad - kh) // stride + 1
    wo = (w + 2 * pad - kw) // stride + 1
    rows = []
    for i in range(kh):
        cols = []
        for j in range(kw):
            cols.append(xp[:, i:i + stride * ho:stride,
                           j:j + stride * wo:stride, :])
        rows.append(jnp.stack(cols, axis=3))          # (N,Ho,Wo,kw,C)
    patches = jnp.stack(rows, axis=3)                 # (N,Ho,Wo,kh,kw,C)
    return patches, ho, wo


def conv2d_bn_act(x, wm, scale, bias, *, kh, kw, stride, pad, relu,
                  residual=None):
    """NHWC conv as one fused Pallas matmul.  `wm` is the prepared dense
    (kh*kw*cin, cout) bf16 matrix (block-diagonal for grouped convs); BN is
    pre-folded into scale/bias.  1x1 convs skip im2col entirely."""
    n, h, w_, c = x.shape
    cout = wm.shape[1]
    if kh == 1 and kw == 1 and pad == 0:
        if stride > 1:
            x = x[:, ::stride, ::stride, :]
        _, ho, wo, _ = x.shape
        xm = x.reshape(n * ho * wo, c)
    else:
        patches, ho, wo = _extract_patches(x, kh, kw, stride, pad)
        xm = patches.reshape(n * ho * wo, kh * kw * c)
    res = None if residual is None else residual.reshape(n * ho * wo, cout)
    out = matmul_scale_bias(xm, wm, scale, bias, relu=relu, residual=res)
    return out.reshape(n, ho, wo, cout)


def maxpool_3x3_s2_p1(x):
    # TODO(synk): move the 9-tap extraction inside the kernel (shifted
    # row-band reads) to drop the remaining XLA-side tap copies.
    n, h, w, c = x.shape
    xp = jnp.pad(x, ((0, 0), (1, 1), (1, 1), (0, 0)),
                 constant_values=-jnp.inf)
    ho = (h + 2 - 3) // 2 + 1
    wo = (w + 2 - 3) // 2 + 1
    m = n * ho * wo
    taps = [xp[:, i:i + 2 * ho:2, j:j + 2 * wo:2, :].reshape(m, c)
            for i in range(3) for j in range(3)]
    tm, m_pad = _pick_tm(m)
    if m_pad != m:
        taps = [jnp.pad(t, ((0, m_pad - m), (0, 0))) for t in taps]
    out = pl.pallas_call(
        _max9_kernel,
        out_shape=jax.ShapeDtypeStruct((m_pad, c), x.dtype),
        grid=(m_pad // tm,),
        in_specs=[pl.BlockSpec((tm, c), lambda i: (i, 0))] * 9,
        out_specs=pl.BlockSpec((tm, c), lambda i: (i, 0)),
        compiler_params=pltpu.CompilerParams(
            dimension_semantics=("parallel",)),
    )(*taps)
    if m_pad != m:
        out = out[:m]
    return out.reshape(n, ho, wo, c)


def global_avgpool(x):
    n, h, w, c = x.shape
    out = pl.pallas_call(
        _mean_kernel,
        out_shape=jax.ShapeDtypeStruct((n, 1, c), jnp.float32),
        grid=(n,),
        in_specs=[pl.BlockSpec((1, h * w, c), lambda i: (i, 0, 0))],
        out_specs=pl.BlockSpec((1, 1, c), lambda i: (i, 0, 0)),
        compiler_params=pltpu.CompilerParams(
            dimension_semantics=("parallel",)),
    )(x.reshape(n, h * w, c))
    return out.reshape(n, c)


def linear(x, wt, bias, *, relu, out_dtype):
    dout = wt.shape[1]
    return matmul_scale_bias(x, wt, jnp.ones((1, dout), jnp.float32),
                             bias, relu=relu, out_dtype=out_dtype)


# ----------------------------- parameters ----------------------------------

class KeyGen:
    def __init__(self, seed):
        self._key = jax.random.PRNGKey(seed)

    def next(self):
        self._key, sub = jax.random.split(self._key)
        return sub


def _conv_w(kg, cout, cin, k):
    std = 1.0 / math.sqrt(cin * k * k)
    return std * jax.random.normal(kg.next(), (cout, cin, k, k), jnp.float32)


def _bn_p(kg, c):
    return {
        "gamma": 1.0 + 0.1 * jax.random.normal(kg.next(), (c,), jnp.float32),
        "beta": 0.1 * jax.random.normal(kg.next(), (c,), jnp.float32),
        "mean": 0.1 * jax.random.normal(kg.next(), (c,), jnp.float32),
        "var": 1.0 + 0.1 * jnp.abs(jax.random.normal(kg.next(), (c,), jnp.float32)),
    }


def _linear_p(kg, dout, din):
    std = 1.0 / math.sqrt(din)
    return (std * jax.random.normal(kg.next(), (dout, din), jnp.float32),
            std * jax.random.normal(kg.next(), (dout,), jnp.float32))


def init_resnext(kg, input_channels, num_blocks, cardinality, bottleneck_width,
                 num_classes):
    params = {"conv1": _conv_w(kg, 64, input_channels, 7), "bn1": _bn_p(kg, 64)}
    in_planes = 64
    bw = bottleneck_width
    layers = []
    for li, nb in enumerate(num_blocks):
        strides = [1 if li == 0 else 2] + [1] * (nb - 1)
        blocks = []
        for s in strides:
            gw = cardinality * bw
            bp = {
                "stride": s,
                "conv1": _conv_w(kg, gw, in_planes, 1), "bn1": _bn_p(kg, gw),
                "conv2": _conv_w(kg, gw, bw, 3),        "bn2": _bn_p(kg, gw),
                "conv3": _conv_w(kg, 2 * gw, gw, 1),    "bn3": _bn_p(kg, 2 * gw),
            }
            if s != 1 or in_planes != 2 * gw:
                bp["shortcut_conv"] = _conv_w(kg, 2 * gw, in_planes, 1)
                bp["shortcut_bn"] = _bn_p(kg, 2 * gw)
            blocks.append(bp)
            in_planes = 2 * gw
        layers.append(blocks)
        bw *= 2
    params["layers"] = layers
    params["fc1"] = _linear_p(kg, cardinality * bottleneck_width * 4,
                              cardinality * bottleneck_width * 16)
    params["fc2"] = _linear_p(kg, num_classes, cardinality * bottleneck_width * 4)
    return params


# ----------------------------- one-time weight preparation ------------------

def _bn_fold(p, eps=1e-5):
    scale = p["gamma"] / jnp.sqrt(p["var"] + eps)
    bias = p["beta"] - p["mean"] * scale
    return (scale.reshape(1, -1).astype(jnp.float32),
            bias.reshape(1, -1).astype(jnp.float32))


def _dense_weight(weight, groups, cin_total):
    """OIHW (possibly grouped) conv weight -> dense (kh*kw*cin_total, cout)
    bf16 matrix (block-diagonal over channel groups) matching the (ki,kj,c)
    patch layout.  Keeps the matmul output lane-dense in channel order."""
    cout, cin_g, kh, kw = weight.shape
    wt = jnp.transpose(weight, (2, 3, 1, 0))          # (kh, kw, cin_g, cout)
    if groups == 1:
        wd = wt
    else:
        cout_g = cout // groups
        wd = jnp.zeros((kh, kw, cin_total, cout), weight.dtype)
        for g in range(groups):
            wd = wd.at[:, :, g * cin_g:(g + 1) * cin_g,
                       g * cout_g:(g + 1) * cout_g].set(
                wt[:, :, :, g * cout_g:(g + 1) * cout_g])
    return wd.reshape(kh * kw * cin_total, cout).astype(jnp.bfloat16)


def prepare_params(params, cardinality):
    """Fold BN into f32 scale/bias and build dense bf16 matmul weights ONCE,
    outside the jitted forward (no per-call weight reconstruction)."""
    prep = {}
    s, b = _bn_fold(params["bn1"])
    prep["stem"] = {"w": _dense_weight(params["conv1"], 1,
                                       params["conv1"].shape[1]),
                    "s": s, "b": b}
    layers = []
    for blocks in params["layers"]:
        pblocks = []
        for bp in blocks:
            s1, b1 = _bn_fold(bp["bn1"])
            s2, b2 = _bn_fold(bp["bn2"])
            s3, b3 = _bn_fold(bp["bn3"])
            pb = {
                "stride": int(bp["stride"]),
                "w1": _dense_weight(bp["conv1"], 1, bp["conv1"].shape[1]),
                "s1": s1, "b1": b1,
                "w2": _dense_weight(bp["conv2"], cardinality,
                                    cardinality * bp["conv2"].shape[1]),
                "s2": s2, "b2": b2,
                "w3": _dense_weight(bp["conv3"], 1, bp["conv3"].shape[1]),
                "s3": s3, "b3": b3,
            }
            if "shortcut_conv" in bp:
                ss, sb = _bn_fold(bp["shortcut_bn"])
                pb["wsc"] = _dense_weight(bp["shortcut_conv"], 1,
                                          bp["shortcut_conv"].shape[1])
                pb["ssc"], pb["bsc"] = ss, sb
            pblocks.append(pb)
        layers.append(pblocks)
    prep["layers"] = layers
    w1, b1 = params["fc1"]
    prep["fc1"] = {"wt": jnp.transpose(w1).astype(jnp.bfloat16),
                   "b": b1.reshape(1, -1).astype(jnp.float32)}
    w2, b2 = params["fc2"]
    prep["fc2"] = {"wt": jnp.transpose(w2).astype(jnp.bfloat16),
                   "b": b2.reshape(1, -1).astype(jnp.float32)}
    return prep


# ----------------------------- model forward -------------------------------

def block_forward(x, pb):
    # TODO(synk): fuse the full bottleneck (1x1 -> grouped 3x3 -> 1x1 +
    # shortcut + ReLU) into a single pallas_call keeping the tiny gw-channel
    # intermediates in VMEM; per-call overhead still dominates at this size.
    out = conv2d_bn_act(x, pb["w1"], pb["s1"], pb["b1"], kh=1, kw=1,
                        stride=1, pad=0, relu=True)
    out = conv2d_bn_act(out, pb["w2"], pb["s2"], pb["b2"], kh=3, kw=3,
                        stride=pb["stride"], pad=1, relu=True)
    if "wsc" in pb:
        sc = conv2d_bn_act(x, pb["wsc"], pb["ssc"], pb["bsc"], kh=1, kw=1,
                           stride=pb["stride"], pad=0, relu=False)
    else:
        sc = x
    # Residual add + final ReLU fused into the conv3 matmul epilogue.
    out = conv2d_bn_act(out, pb["w3"], pb["s3"], pb["b3"], kh=1, kw=1,
                        stride=1, pad=0, relu=True, residual=sc)
    return out


def resnext_forward(x_nchw, prep):
    x = jnp.transpose(x_nchw, (0, 2, 3, 1)).astype(jnp.bfloat16)  # NCHW->NHWC
    st = prep["stem"]
    out = conv2d_bn_act(x, st["w"], st["s"], st["b"], kh=7, kw=7, stride=2,
                        pad=3, relu=True)
    out = maxpool_3x3_s2_p1(out)
    for blocks in prep["layers"]:
        for pb in blocks:
            out = block_forward(out, pb)
    out = global_avgpool(out)                  # AdaptiveAvgPool2d(1) + view
    fc1 = prep["fc1"]
    out = linear(out, fc1["wt"], fc1["b"], relu=True,
                 out_dtype=jnp.bfloat16)       # Linear -> Dropout -> ReLU
    # TODO(synk): nn.Dropout(0.5) modeled in eval mode (identity); train-mode
    # RNG dropout and train-mode batch-stat BN are not implemented.
    fc2 = prep["fc2"]
    return linear(out, fc2["wt"], fc2["b"], relu=False,
                  out_dtype=jnp.float32)


# ----------------------------- main -----------------------------------------

if __name__ == "__main__":
    input_channels = 3
    cardinality = 4
    bottleneck_width = 2
    num_blocks = [1, 1, 1, 1]
    num_classes = 10

    kg = KeyGen(0)
    params = init_resnext(kg, input_channels, num_blocks, cardinality,
                          bottleneck_width, num_classes)
    prep = prepare_params(params, cardinality)

    x = jax.random.normal(jax.random.PRNGKey(0),
                          (2, input_channels, 64, 64), jnp.float32)

    # jit the whole forward: folded weights are baked in as constants, all the
    # XLA-side glue (transpose, im2col slices, pooling taps) fuses/pipelines.
    forward = jax.jit(lambda inp: resnext_forward(inp, prep))

    logits = forward(x)
    jax.block_until_ready(logits)
    assert logits.shape == (2, num_classes), logits.shape
    assert bool(jnp.all(jnp.isfinite(logits)))
    print("KERNEL_OK")
</pallas_src>

<mosaic_0001>
module attributes {stable_mosaic.version = 11 : i64} {
  func.func @_mm1_kernel(%arg0: i32, %arg1: memref<512x147xbf16, #tpu.memory_space<vmem>>, %arg2: memref<147x64xbf16, #tpu.memory_space<vmem>>, %arg3: memref<1x64xf32, #tpu.memory_space<vmem>>, %arg4: memref<1x64xf32, #tpu.memory_space<vmem>>, %arg5: memref<512x64xbf16, #tpu.memory_space<vmem>>) attributes {dimension_semantics = [#tpu.dimension_semantics<parallel>], iteration_bounds = array<i64: 4>, scalar_prefetch = 0 : i64, scratch_operands = 0 : i64, tpu.core_type = #tpu.core_type<tc>, window_params = [{transform_indices = @transform_0, window_bounds = array<i64: 512, 147>}, {pipeline_mode = #tpu.pipeline_mode<synchronous>, transform_indices = @transform_1, window_bounds = array<i64: 147, 64>}, {pipeline_mode = #tpu.pipeline_mode<synchronous>, transform_indices = @transform_2, window_bounds = array<i64: 1, 64>}, {pipeline_mode = #tpu.pipeline_mode<synchronous>, transform_indices = @transform_3, window_bounds = array<i64: 1, 64>}, {transform_indices = @transform_4, window_bounds = array<i64: 512, 64>}]} {
    %c0 = arith.constant 0 : index
    %c0_0 = arith.constant 0 : index
    %0 = vector.load %arg1[%c0, %c0_0] : memref<512x147xbf16, #tpu.memory_space<vmem>>, vector<512x147xbf16>
    %c0_1 = arith.constant 0 : index
    %c0_2 = arith.constant 0 : index
    %1 = vector.load %arg2[%c0_1, %c0_2] : memref<147x64xbf16, #tpu.memory_space<vmem>>, vector<147x64xbf16>
    %cst = arith.constant dense<0.000000e+00> : vector<512x64xf32>
    %2 = tpu.matmul %0, %1, %cst {dimension_numbers = #tpu.dot_dimension_numbers<[1], [0], [0], [1], [0, 0, 1, 1], [], []>} : vector<512x147xbf16>, vector<147x64xbf16>, vector<512x64xf32> -> vector<512x64xf32>
    %c0_3 = arith.constant 0 : index
    %c0_4 = arith.constant 0 : index
    %3 = vector.load %arg3[%c0_3, %c0_4] : memref<1x64xf32, #tpu.memory_space<vmem>>, vector<1x64xf32>
    %4 = vector.broadcast %3 : vector<1x64xf32> to vector<512x64xf32>
    %5 = arith.mulf %2, %4 : vector<512x64xf32>
    %c0_5 = arith.constant 0 : index
    %c0_6 = arith.constant 0 : index
    %6 = vector.load %arg4[%c0_5, %c0_6] : memref<1x64xf32, #tpu.memory_space<vmem>>, vector<1x64xf32>
    %7 = vector.broadcast %6 : vector<1x64xf32> to vector<512x64xf32>
    %8 = arith.addf %5, %7 : vector<512x64xf32>
    %cst_7 = arith.constant 0.000000e+00 : f32
    %9 = vector.broadcast %cst_7 : f32 to vector<512x64xf32>
    %10 = arith.maximumf %8, %9 : vector<512x64xf32>
    %11 = arith.truncf %10 : vector<512x64xf32> to vector<512x64xbf16>
    %c0_8 = arith.constant 0 : index
    %c0_9 = arith.constant 0 : index
    %12 = vector.load %arg5[%c0_8, %c0_9] : memref<512x64xbf16, #tpu.memory_space<vmem>>, vector<512x64xbf16>
    tpu.vector_store %arg5[%c0_8, %c0_9], %11 {strides = array<i32>} : memref<512x64xbf16, #tpu.memory_space<vmem>>, vector<512x64xbf16>,
    return
  }
  func.func @transform_0(%arg0: i32) -> (i32, i32) {
    %c0_i32 = arith.constant 0 : i32
    %c0_i32_0 = arith.constant 0 : i32
    return %arg0, %c0_i32 : i32, i32
  }
  func.func @transform_1(%arg0: i32) -> (i32, i32) {
    %c0_i32 = arith.constant 0 : i32
    %c0_i32_0 = arith.constant 0 : i32
    %c0_i32_1 = arith.constant 0 : i32
    return %c0_i32, %c0_i32_0 : i32, i32
  }
  func.func @transform_2(%arg0: i32) -> (i32, i32) {
    %c0_i32 = arith.constant 0 : i32
    %c0_i32_0 = arith.constant 0 : i32
    %c0_i32_1 = arith.constant 0 : i32
    return %c0_i32, %c0_i32_0 : i32, i32
  }
  func.func @transform_3(%arg0: i32) -> (i32, i32) {
    %c0_i32 = arith.constant 0 : i32
    %c0_i32_0 = arith.constant 0 : i32
    %c0_i32_1 = arith.constant 0 : i32
    return %c0_i32, %c0_i32_0 : i32, i32
  }
  func.func @transform_4(%arg0: i32) -> (i32, i32) {
    %c0_i32 = arith.constant 0 : i32
    %c0_i32_0 = arith.constant 0 : i32
    return %arg0, %c0_i32 : i32, i32
  }
}

module attributes {stable_mosaic.version = 11 : i64} {
  func.func @_mm1_kernel(%arg0: i32, %arg1: memref<256x64xbf16, #tpu.memory_space<vmem>>, %arg2: memref<64x8xbf16, #tpu.memory_space<vmem>>, %arg3: memref<1x8xf32, #tpu.memory_space<vmem>>, %arg4: memref<1x8xf32, #tpu.memory_space<vmem>>, %arg5: memref<256x8xbf16, #tpu.memory_space<vmem>>) attributes {dimension_semantics = [#tpu.dimension_semantics<parallel>], iteration_bounds = array<i64: 2>, scalar_prefetch = 0 : i64, scratch_operands = 0 : i64, tpu.core_type = #tpu.core_type<tc>, window_params = [{transform_indices = @transform_0, window_bounds = array<i64: 256, 64>}, {pipeline_mode = #tpu.pipeline_mode<synchronous>, transform_indices = @transform_1, window_bounds = array<i64: 64, 8>}, {pipeline_mode = #tpu.pipeline_mode<synchronous>, transform_indices = @transform_2, window_bounds = array<i64: 1, 8>}, {pipeline_mode = #tpu.pipeline_mode<synchronous>, transform_indices = @transform_3, window_bounds = array<i64: 1, 8>}, {transform_indices = @transform_4, window_bounds = array<i64: 256, 8>}]} {
    %c0 = arith.constant 0 : index
    %c0_0 = arith.constant 0 : index
    %0 = vector.load %arg1[%c0, %c0_0] : memref<256x64xbf16, #tpu.memory_space<vmem>>, vector<256x64xbf16>
    %c0_1 = arith.constant 0 : index
    %c0_2 = arith.constant 0 : index
    %1 = vector.load %arg2[%c0_1, %c0_2] : memref<64x8xbf16, #tpu.memory_space<vmem>>, vector<64x8xbf16>
    %cst = arith.constant dense<0.000000e+00> : vector<256x8xf32>
    %2 = tpu.matmul %0, %1, %cst {dimension_numbers = #tpu.dot_dimension_numbers<[1], [0], [0], [1], [0, 0, 1, 1], [], []>} : vector<256x64xbf16>, vector<64x8xbf16>, vector<256x8xf32> -> vector<256x8xf32>
    %c0_3 = arith.constant 0 : index
    %c0_4 = arith.constant 0 : index
    %3 = vector.load %arg3[%c0_3, %c0_4] : memref<1x8xf32, #tpu.memory_space<vmem>>, vector<1x8xf32>
    %4 = vector.broadcast %3 : vector<1x8xf32> to vector<256x8xf32>
    %5 = arith.mulf %2, %4 : vector<256x8xf32>
    %c0_5 = arith.constant 0 : index
    %c0_6 = arith.constant 0 : index
    %6 = vector.load %arg4[%c0_5, %c0_6] : memref<1x8xf32, #tpu.memory_space<vmem>>, vector<1x8xf32>
    %7 = vector.broadcast %6 : vector<1x8xf32> to vector<256x8xf32>
    %8 = arith.addf %5, %7 : vector<256x8xf32>
    %cst_7 = arith.constant 0.000000e+00 : f32
    %9 = vector.broadcast %cst_7 : f32 to vector<256x8xf32>
    %10 = arith.maximumf %8, %9 : vector<256x8xf32>
    %11 = arith.truncf %10 : vector<256x8xf32> to vector<256x8xbf16>
    %c0_8 = arith.constant 0 : index
    %c0_9 = arith.constant 0 : index
    %12 = vector.load %arg5[%c0_8, %c0_9] : memref<256x8xbf16, #tpu.memory_space<vmem>>, vector<256x8xbf16>
    tpu.vector_store %arg5[%c0_8, %c0_9], %11 {strides = array<i32>} : memref<256x8xbf16, #tpu.memory_space<vmem>>, vector<256x8xbf16>,
    return
  }
  func.func @transform_0(%arg0: i32) -> (i32, i32) {
    %c0_i32 = arith.constant 0 : i32
    %c0_i32_0 = arith.constant 0 : i32
    return %arg0, %c0_i32 : i32, i32
  }
  func.func @transform_1(%arg0: i32) -> (i32, i32) {
    %c0_i32 = arith.constant 0 : i32
    %c0_i32_0 = arith.constant 0 : i32
    %c0_i32_1 = arith.constant 0 : i32
    return %c0_i32, %c0_i32_0 : i32, i32
  }
  func.func @transform_2(%arg0: i32) -> (i32, i32) {
    %c0_i32 = arith.constant 0 : i32
    %c0_i32_0 = arith.constant 0 : i32
    %c0_i32_1 = arith.constant 0 : i32
    return %c0_i32, %c0_i32_0 : i32, i32
  }
  func.func @transform_3(%arg0: i32) -> (i32, i32) {
    %c0_i32 = arith.constant 0 : i32
    %c0_i32_0 = arith.constant 0 : i32
    %c0_i32_1 = arith.constant 0 : i32
    return %c0_i32, %c0_i32_0 : i32, i32
  }
  func.func @transform_4(%arg0: i32) -> (i32, i32) {
    %c0_i32 = arith.constant 0 : i32
    %c0_i32_0 = arith.constant 0 : i32
    return %arg0, %c0_i32 : i32, i32
  }
}

module attributes {stable_mosaic.version = 11 : i64} {
  func.func @_max9_kernel(%arg0: i32, %arg1: memref<256x64xbf16, #tpu.memory_space<vmem>>, %arg2: memref<256x64xbf16, #tpu.memory_space<vmem>>, %arg3: memref<256x64xbf16, #tpu.memory_space<vmem>>, %arg4: memref<256x64xbf16, #tpu.memory_space<vmem>>, %arg5: memref<256x64xbf16, #tpu.memory_space<vmem>>, %arg6: memref<256x64xbf16, #tpu.memory_space<vmem>>, %arg7: memref<256x64xbf16, #tpu.memory_space<vmem>>, %arg8: memref<256x64xbf16, #tpu.memory_space<vmem>>, %arg9: memref<256x64xbf16, #tpu.memory_space<vmem>>, %arg10: memref<256x64xbf16, #tpu.memory_space<vmem>>) attributes {dimension_semantics = [#tpu.dimension_semantics<parallel>], iteration_bounds = array<i64: 2>, scalar_prefetch = 0 : i64, scratch_operands = 0 : i64, tpu.core_type = #tpu.core_type<tc>, window_params = [{transform_indices = @transform_0, window_bounds = array<i64: 256, 64>}, {transform_indices = @transform_1, window_bounds = array<i64: 256, 64>}, {transform_indices = @transform_2, window_bounds = array<i64: 256, 64>}, {transform_indices = @transform_3, window_bounds = array<i64: 256, 64>}, {transform_indices = @transform_4, window_bounds = array<i64: 256, 64>}, {transform_indices = @transform_5, window_bounds = array<i64: 256, 64>}, {transform_indices = @transform_6, window_bounds = array<i64: 256, 64>}, {transform_indices = @transform_7, window_bounds = array<i64: 256, 64>}, {transform_indices = @transform_8, window_bounds = array<i64: 256, 64>}, {transform_indices = @transform_9, window_bounds = array<i64: 256, 64>}]} {
    %c0 = arith.constant 0 : index
    %c0_0 = arith.constant 0 : index
    %0 = vector.load %arg1[%c0, %c0_0] : memref<256x64xbf16, #tpu.memory_space<vmem>>, vector<256x64xbf16>
    %c0_1 = arith.constant 0 : index
    %c0_2 = arith.constant 0 : index
    %1 = vector.load %arg2[%c0_1, %c0_2] : memref<256x64xbf16, #tpu.memory_space<vmem>>, vector<256x64xbf16>
    %2 = arith.maximumf %0, %1 : vector<256x64xbf16>
    %c0_3 = arith.constant 0 : index
    %c0_4 = arith.constant 0 : index
    %3 = vector.load %arg3[%c0_3, %c0_4] : memref<256x64xbf16, #tpu.memory_space<vmem>>, vector<256x64xbf16>
    %4 = arith.maximumf %2, %3 : vector<256x64xbf16>
    %c0_5 = arith.constant 0 : index
    %c0_6 = arith.constant 0 : index
    %5 = vector.load %arg4[%c0_5, %c0_6] : memref<256x64xbf16, #tpu.memory_space<vmem>>, vector<256x64xbf16>
    %6 = arith.maximumf %4, %5 : vector<256x64xbf16>
    %c0_7 = arith.constant 0 : index
    %c0_8 = arith.constant 0 : index
    %7 = vector.load %arg5[%c0_7, %c0_8] : memref<256x64xbf16, #tpu.memory_space<vmem>>, vector<256x64xbf16>
    %8 = arith.maximumf %6, %7 : vector<256x64xbf16>
    %c0_9 = arith.constant 0 : index
    %c0_10 = arith.constant 0 : index
    %9 = vector.load %arg6[%c0_9, %c0_10] : memref<256x64xbf16, #tpu.memory_space<vmem>>, vector<256x64xbf16>
    %10 = arith.maximumf %8, %9 : vector<256x64xbf16>
    %c0_11 = arith.constant 0 : index
    %c0_12 = arith.constant 0 : index
    %11 = vector.load %arg7[%c0_11, %c0_12] : memref<256x64xbf16, #tpu.memory_space<vmem>>, vector<256x64xbf16>
    %12 = arith.maximumf %10, %11 : vector<256x64xbf16>
    %c0_13 = arith.constant 0 : index
    %c0_14 = arith.constant 0 : index
    %13 = vector.load %arg8[%c0_13, %c0_14] : memref<256x64xbf16, #tpu.memory_space<vmem>>, vector<256x64xbf16>
    %14 = arith.maximumf %12, %13 : vector<256x64xbf16>
    %c0_15 = arith.constant 0 : index
    %c0_16 = arith.constant 0 : index
    %15 = vector.load %arg9[%c0_15, %c0_16] : memref<256x64xbf16, #tpu.memory_space<vmem>>, vector<256x64xbf16>
    %16 = arith.maximumf %14, %15 : vector<256x64xbf16>
    %c0_17 = arith.constant 0 : index
    %c0_18 = arith.constant 0 : index
    %17 = vector.load %arg10[%c0_17, %c0_18] : memref<256x64xbf16, #tpu.memory_space<vmem>>, vector<256x64xbf16>
    tpu.vector_store %arg10[%c0_17, %c0_18], %16 {strides = array<i32>} : memref<256x64xbf16, #tpu.memory_space<vmem>>, vector<256x64xbf16>,
    return
  }
  func.func @transform_0(%arg0: i32) -> (i32, i32) {
    %c0_i32 = arith.constant 0 : i32
    %c0_i32_0 = arith.constant 0 : i32
    return %arg0, %c0_i32 : i32, i32
  }
  func.func @transform_1(%arg0: i32) -> (i32, i32) {
    %c0_i32 = arith.constant 0 : i32
    %c0_i32_0 = arith.constant 0 : i32
    return %arg0, %c0_i32 : i32, i32
  }
  func.func @transform_2(%arg0: i32) -> (i32, i32) {
    %c0_i32 = arith.constant 0 : i32
    %c0_i32_0 = arith.constant 0 : i32
    return %arg0, %c0_i32 : i32, i32
  }
  func.func @transform_3(%arg0: i32) -> (i32, i32) {
    %c0_i32 = arith.constant 0 : i32
    %c0_i32_0 = arith.constant 0 : i32
    return %arg0, %c0_i32 : i32, i32
  }
  func.func @transform_4(%arg0: i32) -> (i32, i32) {
    %c0_i32 = arith.constant 0 : i32
    %c0_i32_0 = arith.constant 0 : i32
    return %arg0, %c0_i32 : i32, i32
  }
  func.func @transform_5(%arg0: i32) -> (i32, i32) {
    %c0_i32 = arith.constant 0 : i32
    %c0_i32_0 = arith.constant 0 : i32
    return %arg0, %c0_i32 : i32, i32
  }
  func.func @transform_6(%arg0: i32) -> (i32, i32) {
    %c0_i32 = arith.constant 0 : i32
    %c0_i32_0 = arith.constant 0 : i32
    return %arg0, %c0_i32 : i32, i32
  }
  func.func @transform_7(%arg0: i32) -> (i32, i32) {
    %c0_i32 = arith.constant 0 : i32
    %c0_i32_0 = arith.constant 0 : i32
    return %arg0, %c0_i32 : i32, i32
  }
  func.func @transform_8(%arg0: i32) -> (i32, i32) {
    %c0_i32 = arith.constant 0 : i32
    %c0_i32_0 = arith.constant 0 : i32
    return %arg0, %c0_i32 : i32, i32
  }
  func.func @transform_9(%arg0: i32) -> (i32, i32) {
    %c0_i32 = arith.constant 0 : i32
    %c0_i32_0 = arith.constant 0 : i32
    return %arg0, %c0_i32 : i32, i32
  }
}

module attributes {stable_mosaic.version = 11 : i64} {
  func.func @_mm1_kernel(%arg0: i32, %arg1: memref<256x72xbf16, #tpu.memory_space<vmem>>, %arg2: memref<72x8xbf16, #tpu.memory_space<vmem>>, %arg3: memref<1x8xf32, #tpu.memory_space<vmem>>, %arg4: memref<1x8xf32, #tpu.memory_space<vmem>>, %arg5: memref<256x8xbf16, #tpu.memory_space<vmem>>) attributes {dimension_semantics = [#tpu.dimension_semantics<parallel>], iteration_bounds = array<i64: 2>, scalar_prefetch = 0 : i64, scratch_operands = 0 : i64, tpu.core_type = #tpu.core_type<tc>, window_params = [{transform_indices = @transform_0, window_bounds = array<i64: 256, 72>}, {pipeline_mode = #tpu.pipeline_mode<synchronous>, transform_indices = @transform_1, window_bounds = array<i64: 72, 8>}, {pipeline_mode = #tpu.pipeline_mode<synchronous>, transform_indices = @transform_2, window_bounds = array<i64: 1, 8>}, {pipeline_mode = #tpu.pipeline_mode<synchronous>, transform_indices = @transform_3, window_bounds = array<i64: 1, 8>}, {transform_indices = @transform_4, window_bounds = array<i64: 256, 8>}]} {
    %c0 = arith.constant 0 : index
    %c0_0 = arith.constant 0 : index
    %0 = vector.load %arg1[%c0, %c0_0] : memref<256x72xbf16, #tpu.memory_space<vmem>>, vector<256x72xbf16>
    %c0_1 = arith.constant 0 : index
    %c0_2 = arith.constant 0 : index
    %1 = vector.load %arg2[%c0_1, %c0_2] : memref<72x8xbf16, #tpu.memory_space<vmem>>, vector<72x8xbf16>
    %cst = arith.constant dense<0.000000e+00> : vector<256x8xf32>
    %2 = tpu.matmul %0, %1, %cst {dimension_numbers = #tpu.dot_dimension_numbers<[1], [0], [0], [1], [0, 0, 1, 1], [], []>} : vector<256x72xbf16>, vector<72x8xbf16>, vector<256x8xf32> -> vector<256x8xf32>
    %c0_3 = arith.constant 0 : index
    %c0_4 = arith.constant 0 : index
    %3 = vector.load %arg3[%c0_3, %c0_4] : memref<1x8xf32, #tpu.memory_space<vmem>>, vector<1x8xf32>
    %4 = vector.broadcast %3 : vector<1x8xf32> to vector<256x8xf32>
    %5 = arith.mulf %2, %4 : vector<256x8xf32>
    %c0_5 = arith.constant 0 : index
    %c0_6 = arith.constant 0 : index
    %6 = vector.load %arg4[%c0_5, %c0_6] : memref<1x8xf32, #tpu.memory_space<vmem>>, vector<1x8xf32>
    %7 = vector.broadcast %6 : vector<1x8xf32> to vector<256x8xf32>
    %8 = arith.addf %5, %7 : vector<256x8xf32>
    %cst_7 = arith.constant 0.000000e+00 : f32
    %9 = vector.broadcast %cst_7 : f32 to vector<256x8xf32>
    %10 = arith.maximumf %8, %9 : vector<256x8xf32>
    %11 = arith.truncf %10 : vector<256x8xf32> to vector<256x8xbf16>
    %c0_8 = arith.constant 0 : index
    %c0_9 = arith.constant 0 : index
    %12 = vector.load %arg5[%c0_8, %c0_9] : memref<256x8xbf16, #tpu.memory_space<vmem>>, vector<256x8xbf16>
    tpu.vector_store %arg5[%c0_8, %c0_9], %11 {strides = array<i32>} : memref<256x8xbf16, #tpu.memory_space<vmem>>, vector<256x8xbf16>,
    return
  }
  func.func @transform_0(%arg0: i32) -> (i32, i32) {
    %c0_i32 = arith.constant 0 : i32
    %c0_i32_0 = arith.constant 0 : i32
    return %arg0, %c0_i32 : i32, i32
  }
  func.func @transform_1(%arg0: i32) -> (i32, i32) {
    %c0_i32 = arith.constant 0 : i32
    %c0_i32_0 = arith.constant 0 : i32
    %c0_i32_1 = arith.constant 0 : i32
    return %c0_i32, %c0_i32_0 : i32, i32
  }
  func.func @transform_2(%arg0: i32) -> (i32, i32) {
    %c0_i32 = arith.constant 0 : i32
    %c0_i32_0 = arith.constant 0 : i32
    %c0_i32_1 = arith.constant 0 : i32
    return %c0_i32, %c0_i32_0 : i32, i32
  }
  func.func @transform_3(%arg0: i32) -> (i32, i32) {
    %c0_i32 = arith.constant 0 : i32
    %c0_i32_0 = arith.constant 0 : i32
    %c0_i32_1 = arith.constant 0 : i32
    return %c0_i32, %c0_i32_0 : i32, i32
  }
  func.func @transform_4(%arg0: i32) -> (i32, i32) {
    %c0_i32 = arith.constant 0 : i32
    %c0_i32_0 = arith.constant 0 : i32
    return %arg0, %c0_i32 : i32, i32
  }
}

module attributes {stable_mosaic.version = 11 : i64} {
  func.func @_mm1_kernel(%arg0: i32, %arg1: memref<256x64xbf16, #tpu.memory_space<vmem>>, %arg2: memref<64x16xbf16, #tpu.memory_space<vmem>>, %arg3: memref<1x16xf32, #tpu.memory_space<vmem>>, %arg4: memref<1x16xf32, #tpu.memory_space<vmem>>, %arg5: memref<256x16xbf16, #tpu.memory_space<vmem>>) attributes {dimension_semantics = [#tpu.dimension_semantics<parallel>], iteration_bounds = array<i64: 2>, scalar_prefetch = 0 : i64, scratch_operands = 0 : i64, tpu.core_type = #tpu.core_type<tc>, window_params = [{transform_indices = @transform_0, window_bounds = array<i64: 256, 64>}, {pipeline_mode = #tpu.pipeline_mode<synchronous>, transform_indices = @transform_1, window_bounds = array<i64: 64, 16>}, {pipeline_mode = #tpu.pipeline_mode<synchronous>, transform_indices = @transform_2, window_bounds = array<i64: 1, 16>}, {pipeline_mode = #tpu.pipeline_mode<synchronous>, transform_indices = @transform_3, window_bounds = array<i64: 1, 16>}, {transform_indices = @transform_4, window_bounds = array<i64: 256, 16>}]} {
    %c0 = arith.constant 0 : index
    %c0_0 = arith.constant 0 : index
    %0 = vector.load %arg1[%c0, %c0_0] : memref<256x64xbf16, #tpu.memory_space<vmem>>, vector<256x64xbf16>
    %c0_1 = arith.constant 0 : index
    %c0_2 = arith.constant 0 : index
    %1 = vector.load %arg2[%c0_1, %c0_2] : memref<64x16xbf16, #tpu.memory_space<vmem>>, vector<64x16xbf16>
    %cst = arith.constant dense<0.000000e+00> : vector<256x16xf32>
    %2 = tpu.matmul %0, %1, %cst {dimension_numbers = #tpu.dot_dimension_numbers<[1], [0], [0], [1], [0, 0, 1, 1], [], []>} : vector<256x64xbf16>, vector<64x16xbf16>, vector<256x16xf32> -> vector<256x16xf32>
    %c0_3 = arith.constant 0 : index
    %c0_4 = arith.constant 0 : index
    %3 = vector.load %arg3[%c0_3, %c0_4] : memref<1x16xf32, #tpu.memory_space<vmem>>, vector<1x16xf32>
    %4 = vector.broadcast %3 : vector<1x16xf32> to vector<256x16xf32>
    %5 = arith.mulf %2, %4 : vector<256x16xf32>
    %c0_5 = arith.constant 0 : index
    %c0_6 = arith.constant 0 : index
    %6 = vector.load %arg4[%c0_5, %c0_6] : memref<1x16xf32, #tpu.memory_space<vmem>>, vector<1x16xf32>
    %7 = vector.broadcast %6 : vector<1x16xf32> to vector<256x16xf32>
    %8 = arith.addf %5, %7 : vector<256x16xf32>
    %9 = arith.truncf %8 : vector<256x16xf32> to vector<256x16xbf16>
    %c0_7 = arith.constant 0 : index
    %c0_8 = arith.constant 0 : index
    %10 = vector.load %arg5[%c0_7, %c0_8] : memref<256x16xbf16, #tpu.memory_space<vmem>>, vector<256x16xbf16>
    tpu.vector_store %arg5[%c0_7, %c0_8], %9 {strides = array<i32>} : memref<256x16xbf16, #tpu.memory_space<vmem>>, vector<256x16xbf16>,
    return
  }
  func.func @transform_0(%arg0: i32) -> (i32, i32) {
    %c0_i32 = arith.constant 0 : i32
    %c0_i32_0 = arith.constant 0 : i32
    return %arg0, %c0_i32 : i32, i32
  }
  func.func @transform_1(%arg0: i32) -> (i32, i32) {
    %c0_i32 = arith.constant 0 : i32
    %c0_i32_0 = arith.constant 0 : i32
    %c0_i32_1 = arith.constant 0 : i32
    return %c0_i32, %c0_i32_0 : i32, i32
  }
  func.func @transform_2(%arg0: i32) -> (i32, i32) {
    %c0_i32 = arith.constant 0 : i32
    %c0_i32_0 = arith.constant 0 : i32
    %c0_i32_1 = arith.constant 0 : i32
    return %c0_i32, %c0_i32_0 : i32, i32
  }
  func.func @transform_3(%arg0: i32) -> (i32, i32) {
    %c0_i32 = arith.constant 0 : i32
    %c0_i32_0 = arith.constant 0 : i32
    %c0_i32_1 = arith.constant 0 : i32
    return %c0_i32, %c0_i32_0 : i32, i32
  }
  func.func @transform_4(%arg0: i32) -> (i32, i32) {
    %c0_i32 = arith.constant 0 : i32
    %c0_i32_0 = arith.constant 0 : i32
    return %arg0, %c0_i32 : i32, i32
  }
}

module attributes {stable_mosaic.version = 11 : i64} {
  func.func @_mm1_kernel(%arg0: i32, %arg1: memref<256x8xbf16, #tpu.memory_space<vmem>>, %arg2: memref<8x16xbf16, #tpu.memory_space<vmem>>, %arg3: memref<1x16xf32, #tpu.memory_space<vmem>>, %arg4: memref<1x16xf32, #tpu.memory_space<vmem>>, %arg5: memref<256x16xbf16, #tpu.memory_space<vmem>>, %arg6: memref<256x16xbf16, #tpu.memory_space<vmem>>) attributes {dimension_semantics = [#tpu.dimension_semantics<parallel>], iteration_bounds = array<i64: 2>, scalar_prefetch = 0 : i64, scratch_operands = 0 : i64, tpu.core_type = #tpu.core_type<tc>, window_params = [{transform_indices = @transform_0, window_bounds = array<i64: 256, 8>}, {pipeline_mode = #tpu.pipeline_mode<synchronous>, transform_indices = @transform_1, window_bounds = array<i64: 8, 16>}, {pipeline_mode = #tpu.pipeline_mode<synchronous>, transform_indices = @transform_2, window_bounds = array<i64: 1, 16>}, {pipeline_mode = #tpu.pipeline_mode<synchronous>, transform_indices = @transform_3, window_bounds = array<i64: 1, 16>}, {transform_indices = @transform_4, window_bounds = array<i64: 256, 16>}, {transform_indices = @transform_5, window_bounds = array<i64: 256, 16>}]} {
    %c0 = arith.constant 0 : index
    %c0_0 = arith.constant 0 : index
    %0 = vector.load %arg1[%c0, %c0_0] : memref<256x8xbf16, #tpu.memory_space<vmem>>, vector<256x8xbf16>
    %c0_1 = arith.constant 0 : index
    %c0_2 = arith.constant 0 : index
    %1 = vector.load %arg2[%c0_1, %c0_2] : memref<8x16xbf16, #tpu.memory_space<vmem>>, vector<8x16xbf16>
    %cst = arith.constant dense<0.000000e+00> : vector<256x16xf32>
    %2 = tpu.matmul %0, %1, %cst {dimension_numbers = #tpu.dot_dimension_numbers<[1], [0], [0], [1], [0, 0, 1, 1], [], []>} : vector<256x8xbf16>, vector<8x16xbf16>, vector<256x16xf32> -> vector<256x16xf32>
    %c0_3 = arith.constant 0 : index
    %c0_4 = arith.constant 0 : index
    %3 = vector.load %arg3[%c0_3, %c0_4] : memref<1x16xf32, #tpu.memory_space<vmem>>, vector<1x16xf32>
    %4 = vector.broadcast %3 : vector<1x16xf32> to vector<256x16xf32>
    %5 = arith.mulf %2, %4 : vector<256x16xf32>
    %c0_5 = arith.constant 0 : index
    %c0_6 = arith.constant 0 : index
    %6 = vector.load %arg4[%c0_5, %c0_6] : memref<1x16xf32, #tpu.memory_space<vmem>>, vector<1x16xf32>
    %7 = vector.broadcast %6 : vector<1x16xf32> to vector<256x16xf32>
    %8 = arith.addf %5, %7 : vector<256x16xf32>
    %c0_7 = arith.constant 0 : index
    %c0_8 = arith.constant 0 : index
    %9 = vector.load %arg5[%c0_7, %c0_8] : memref<256x16xbf16, #tpu.memory_space<vmem>>, vector<256x16xbf16>
    %10 = arith.extf %9 : vector<256x16xbf16> to vector<256x16xf32>
    %11 = arith.addf %8, %10 : vector<256x16xf32>
    %cst_9 = arith.constant 0.000000e+00 : f32
    %12 = vector.broadcast %cst_9 : f32 to vector<256x16xf32>
    %13 = arith.maximumf %11, %12 : vector<256x16xf32>
    %14 = arith.truncf %13 : vector<256x16xf32> to vector<256x16xbf16>
    %c0_10 = arith.constant 0 : index
    %c0_11 = arith.constant 0 : index
    %15 = vector.load %arg6[%c0_10, %c0_11] : memref<256x16xbf16, #tpu.memory_space<vmem>>, vector<256x16xbf16>
    tpu.vector_store %arg6[%c0_10, %c0_11], %14 {strides = array<i32>} : memref<256x16xbf16, #tpu.memory_space<vmem>>, vector<256x16xbf16>,
    return
  }
  func.func @transform_0(%arg0: i32) -> (i32, i32) {
    %c0_i32 = arith.constant 0 : i32
    %c0_i32_0 = arith.constant 0 : i32
    return %arg0, %c0_i32 : i32, i32
  }
  func.func @transform_1(%arg0: i32) -> (i32, i32) {
    %c0_i32 = arith.constant 0 : i32
    %c0_i32_0 = arith.constant 0 : i32
    %c0_i32_1 = arith.constant 0 : i32
    return %c0_i32, %c0_i32_0 : i32, i32
  }
  func.func @transform_2(%arg0: i32) -> (i32, i32) {
    %c0_i32 = arith.constant 0 : i32
    %c0_i32_0 = arith.constant 0 : i32
    %c0_i32_1 = arith.constant 0 : i32
    return %c0_i32, %c0_i32_0 : i32, i32
  }
  func.func @transform_3(%arg0: i32) -> (i32, i32) {
    %c0_i32 = arith.constant 0 : i32
    %c0_i32_0 = arith.constant 0 : i32
    %c0_i32_1 = arith.constant 0 : i32
    return %c0_i32, %c0_i32_0 : i32, i32
  }
  func.func @transform_4(%arg0: i32) -> (i32, i32) {
    %c0_i32 = arith.constant 0 : i32
    %c0_i32_0 = arith.constant 0 : i32
    return %arg0, %c0_i32 : i32, i32
  }
  func.func @transform_5(%arg0: i32) -> (i32, i32) {
    %c0_i32 = arith.constant 0 : i32
    %c0_i32_0 = arith.constant 0 : i32
    return %arg0, %c0_i32 : i32, i32
  }
}

module attributes {stable_mosaic.version = 11 : i64} {
  func.func @_mm1_kernel(%arg0: i32, %arg1: memref<256x16xbf16, #tpu.memory_space<vmem>>, %arg2: memref<16x16xbf16, #tpu.memory_space<vmem>>, %arg3: memref<1x16xf32, #tpu.memory_space<vmem>>, %arg4: memref<1x16xf32, #tpu.memory_space<vmem>>, %arg5: memref<256x16xbf16, #tpu.memory_space<vmem>>) attributes {dimension_semantics = [#tpu.dimension_semantics<parallel>], iteration_bounds = array<i64: 2>, scalar_prefetch = 0 : i64, scratch_operands = 0 : i64, tpu.core_type = #tpu.core_type<tc>, window_params = [{transform_indices = @transform_0, window_bounds = array<i64: 256, 16>}, {pipeline_mode = #tpu.pipeline_mode<synchronous>, transform_indices = @transform_1, window_bounds = array<i64: 16, 16>}, {pipeline_mode = #tpu.pipeline_mode<synchronous>, transform_indices = @transform_2, window_bounds = array<i64: 1, 16>}, {pipeline_mode = #tpu.pipeline_mode<synchronous>, transform_indices = @transform_3, window_bounds = array<i64: 1, 16>}, {transform_indices = @transform_4, window_bounds = array<i64: 256, 16>}]} {
    %c0 = arith.constant 0 : index
    %c0_0 = arith.constant 0 : index
    %0 = vector.load %arg1[%c0, %c0_0] : memref<256x16xbf16, #tpu.memory_space<vmem>>, vector<256x16xbf16>
    %c0_1 = arith.constant 0 : index
    %c0_2 = arith.constant 0 : index
    %1 = vector.load %arg2[%c0_1, %c0_2] : memref<16x16xbf16, #tpu.memory_space<vmem>>, vector<16x16xbf16>
    %cst = arith.constant dense<0.000000e+00> : vector<256x16xf32>
    %2 = tpu.matmul %0, %1, %cst {dimension_numbers = #tpu.dot_dimension_numbers<[1], [0], [0], [1], [0, 0, 1, 1], [], []>} : vector<256x16xbf16>, vector<16x16xbf16>, vector<256x16xf32> -> vector<256x16xf32>
    %c0_3 = arith.constant 0 : index
    %c0_4 = arith.constant 0 : index
    %3 = vector.load %arg3[%c0_3, %c0_4] : memref<1x16xf32, #tpu.memory_space<vmem>>, vector<1x16xf32>
    %4 = vector.broadcast %3 : vector<1x16xf32> to vector<256x16xf32>
    %5 = arith.mulf %2, %4 : vector<256x16xf32>
    %c0_5 = arith.constant 0 : index
    %c0_6 = arith.constant 0 : index
    %6 = vector.load %arg4[%c0_5, %c0_6] : memref<1x16xf32, #tpu.memory_space<vmem>>, vector<1x16xf32>
    %7 = vector.broadcast %6 : vector<1x16xf32> to vector<256x16xf32>
    %8 = arith.addf %5, %7 : vector<256x16xf32>
    %cst_7 = arith.constant 0.000000e+00 : f32
    %9 = vector.broadcast %cst_7 : f32 to vector<256x16xf32>
    %10 = arith.maximumf %8, %9 : vector<256x16xf32>
    %11 = arith.truncf %10 : vector<256x16xf32> to vector<256x16xbf16>
    %c0_8 = arith.constant 0 : index
    %c0_9 = arith.constant 0 : index
    %12 = vector.load %arg5[%c0_8, %c0_9] : memref<256x16xbf16, #tpu.memory_space<vmem>>, vector<256x16xbf16>
    tpu.vector_store %arg5[%c0_8, %c0_9], %11 {strides = array<i32>} : memref<256x16xbf16, #tpu.memory_space<vmem>>, vector<256x16xbf16>,
    return
  }
  func.func @transform_0(%arg0: i32) -> (i32, i32) {
    %c0_i32 = arith.constant 0 : i32
    %c0_i32_0 = arith.constant 0 : i32
    return %arg0, %c0_i32 : i32, i32
  }
  func.func @transform_1(%arg0: i32) -> (i32, i32) {
    %c0_i32 = arith.constant 0 : i32
    %c0_i32_0 = arith.constant 0 : i32
    %c0_i32_1 = arith.constant 0 : i32
    return %c0_i32, %c0_i32_0 : i32, i32
  }
  func.func @transform_2(%arg0: i32) -> (i32, i32) {
    %c0_i32 = arith.constant 0 : i32
    %c0_i32_0 = arith.constant 0 : i32
    %c0_i32_1 = arith.constant 0 : i32
    return %c0_i32, %c0_i32_0 : i32, i32
  }
  func.func @transform_3(%arg0: i32) -> (i32, i32) {
    %c0_i32 = arith.constant 0 : i32
    %c0_i32_0 = arith.constant 0 : i32
    %c0_i32_1 = arith.constant 0 : i32
    return %c0_i32, %c0_i32_0 : i32, i32
  }
  func.func @transform_4(%arg0: i32) -> (i32, i32) {
    %c0_i32 = arith.constant 0 : i32
    %c0_i32_0 = arith.constant 0 : i32
    return %arg0, %c0_i32 : i32, i32
  }
}

module attributes {stable_mosaic.version = 11 : i64} {
  func.func @_mm1_kernel(%arg0: i32, %arg1: memref<128x144xbf16, #tpu.memory_space<vmem>>, %arg2: memref<144x16xbf16, #tpu.memory_space<vmem>>, %arg3: memref<1x16xf32, #tpu.memory_space<vmem>>, %arg4: memref<1x16xf32, #tpu.memory_space<vmem>>, %arg5: memref<128x16xbf16, #tpu.memory_space<vmem>>) attributes {dimension_semantics = [#tpu.dimension_semantics<parallel>], iteration_bounds = array<i64: 1>, scalar_prefetch = 0 : i64, scratch_operands = 0 : i64, tpu.core_type = #tpu.core_type<tc>, window_params = [{transform_indices = @transform_0, window_bounds = array<i64: 128, 144>}, {pipeline_mode = #tpu.pipeline_mode<synchronous>, transform_indices = @transform_1, window_bounds = array<i64: 144, 16>}, {pipeline_mode = #tpu.pipeline_mode<synchronous>, transform_indices = @transform_2, window_bounds = array<i64: 1, 16>}, {pipeline_mode = #tpu.pipeline_mode<synchronous>, transform_indices = @transform_3, window_bounds = array<i64: 1, 16>}, {transform_indices = @transform_4, window_bounds = array<i64: 128, 16>}]} {
    %c0 = arith.constant 0 : index
    %c0_0 = arith.constant 0 : index
    %0 = vector.load %arg1[%c0, %c0_0] : memref<128x144xbf16, #tpu.memory_space<vmem>>, vector<128x144xbf16>
    %c0_1 = arith.constant 0 : index
    %c0_2 = arith.constant 0 : index
    %1 = vector.load %arg2[%c0_1, %c0_2] : memref<144x16xbf16, #tpu.memory_space<vmem>>, vector<144x16xbf16>
    %cst = arith.constant dense<0.000000e+00> : vector<128x16xf32>
    %2 = tpu.matmul %0, %1, %cst {dimension_numbers = #tpu.dot_dimension_numbers<[1], [0], [0], [1], [0, 0, 1, 1], [], []>} : vector<128x144xbf16>, vector<144x16xbf16>, vector<128x16xf32> -> vector<128x16xf32>
    %c0_3 = arith.constant 0 : index
    %c0_4 = arith.constant 0 : index
    %3 = vector.load %arg3[%c0_3, %c0_4] : memref<1x16xf32, #tpu.memory_space<vmem>>, vector<1x16xf32>
    %4 = vector.broadcast %3 : vector<1x16xf32> to vector<128x16xf32>
    %5 = arith.mulf %2, %4 : vector<128x16xf32>
    %c0_5 = arith.constant 0 : index
    %c0_6 = arith.constant 0 : index
    %6 = vector.load %arg4[%c0_5, %c0_6] : memref<1x16xf32, #tpu.memory_space<vmem>>, vector<1x16xf32>
    %7 = vector.broadcast %6 : vector<1x16xf32> to vector<128x16xf32>
    %8 = arith.addf %5, %7 : vector<128x16xf32>
    %cst_7 = arith.constant 0.000000e+00 : f32
    %9 = vector.broadcast %cst_7 : f32 to vector<128x16xf32>
    %10 = arith.maximumf %8, %9 : vector<128x16xf32>
    %11 = arith.truncf %10 : vector<128x16xf32> to vector<128x16xbf16>
    %c0_8 = arith.constant 0 : index
    %c0_9 = arith.constant 0 : index
    %12 = vector.load %arg5[%c0_8, %c0_9] : memref<128x16xbf16, #tpu.memory_space<vmem>>, vector<128x16xbf16>
    tpu.vector_store %arg5[%c0_8, %c0_9], %11 {strides = array<i32>} : memref<128x16xbf16, #tpu.memory_space<vmem>>, vector<128x16xbf16>,
    return
  }
  func.func @transform_0(%arg0: i32) -> (i32, i32) {
    %c0_i32 = arith.constant 0 : i32
    %c0_i32_0 = arith.constant 0 : i32
    return %arg0, %c0_i32 : i32, i32
  }
  func.func @transform_1(%arg0: i32) -> (i32, i32) {
    %c0_i32 = arith.constant 0 : i32
    %c0_i32_0 = arith.constant 0 : i32
    %c0_i32_1 = arith.constant 0 : i32
    return %c0_i32, %c0_i32_0 : i32, i32
  }
  func.func @transform_2(%arg0: i32) -> (i32, i32) {
    %c0_i32 = arith.constant 0 : i32
    %c0_i32_0 = arith.constant 0 : i32
    %c0_i32_1 = arith.constant 0 : i32
    return %c0_i32, %c0_i32_0 : i32, i32
  }
  func.func @transform_3(%arg0: i32) -> (i32, i32) {
    %c0_i32 = arith.constant 0 : i32
    %c0_i32_0 = arith.constant 0 : i32
    %c0_i32_1 = arith.constant 0 : i32
    return %c0_i32, %c0_i32_0 : i32, i32
  }
  func.func @transform_4(%arg0: i32) -> (i32, i32) {
    %c0_i32 = arith.constant 0 : i32
    %c0_i32_0 = arith.constant 0 : i32
    return %arg0, %c0_i32 : i32, i32
  }
}

module attributes {stable_mosaic.version = 11 : i64} {
  func.func @_mm1_kernel(%arg0: i32, %arg1: memref<128x16xbf16, #tpu.memory_space<vmem>>, %arg2: memref<16x32xbf16, #tpu.memory_space<vmem>>, %arg3: memref<1x32xf32, #tpu.memory_space<vmem>>, %arg4: memref<1x32xf32, #tpu.memory_space<vmem>>, %arg5: memref<128x32xbf16, #tpu.memory_space<vmem>>) attributes {dimension_semantics = [#tpu.dimension_semantics<parallel>], iteration_bounds = array<i64: 1>, scalar_prefetch = 0 : i64, scratch_operands = 0 : i64, tpu.core_type = #tpu.core_type<tc>, window_params = [{transform_indices = @transform_0, window_bounds = array<i64: 128, 16>}, {pipeline_mode = #tpu.pipeline_mode<synchronous>, transform_indices = @transform_1, window_bounds = array<i64: 16, 32>}, {pipeline_mode = #tpu.pipeline_mode<synchronous>, transform_indices = @transform_2, window_bounds = array<i64: 1, 32>}, {pipeline_mode = #tpu.pipeline_mode<synchronous>, transform_indices = @transform_3, window_bounds = array<i64: 1, 32>}, {transform_indices = @transform_4, window_bounds = array<i64: 128, 32>}]} {
    %c0 = arith.constant 0 : index
    %c0_0 = arith.constant 0 : index
    %0 = vector.load %arg1[%c0, %c0_0] : memref<128x16xbf16, #tpu.memory_space<vmem>>, vector<128x16xbf16>
    %c0_1 = arith.constant 0 : index
    %c0_2 = arith.constant 0 : index
    %1 = vector.load %arg2[%c0_1, %c0_2] : memref<16x32xbf16, #tpu.memory_space<vmem>>, vector<16x32xbf16>
    %cst = arith.constant dense<0.000000e+00> : vector<128x32xf32>
    %2 = tpu.matmul %0, %1, %cst {dimension_numbers = #tpu.dot_dimension_numbers<[1], [0], [0], [1], [0, 0, 1, 1], [], []>} : vector<128x16xbf16>, vector<16x32xbf16>, vector<128x32xf32> -> vector<128x32xf32>
    %c0_3 = arith.constant 0 : index
    %c0_4 = arith.constant 0 : index
    %3 = vector.load %arg3[%c0_3, %c0_4] : memref<1x32xf32, #tpu.memory_space<vmem>>, vector<1x32xf32>
    %4 = vector.broadcast %3 : vector<1x32xf32> to vector<128x32xf32>
    %5 = arith.mulf %2, %4 : vector<128x32xf32>
    %c0_5 = arith.constant 0 : index
    %c0_6 = arith.constant 0 : index
    %6 = vector.load %arg4[%c0_5, %c0_6] : memref<1x32xf32, #tpu.memory_space<vmem>>, vector<1x32xf32>
    %7 = vector.broadcast %6 : vector<1x32xf32> to vector<128x32xf32>
    %8 = arith.addf %5, %7 : vector<128x32xf32>
    %9 = arith.truncf %8 : vector<128x32xf32> to vector<128x32xbf16>
    %c0_7 = arith.constant 0 : index
    %c0_8 = arith.constant 0 : index
    %10 = vector.load %arg5[%c0_7, %c0_8] : memref<128x32xbf16, #tpu.memory_space<vmem>>, vector<128x32xbf16>
    tpu.vector_store %arg5[%c0_7, %c0_8], %9 {strides = array<i32>} : memref<128x32xbf16, #tpu.memory_space<vmem>>, vector<128x32xbf16>,
    return
  }
  func.func @transform_0(%arg0: i32) -> (i32, i32) {
    %c0_i32 = arith.constant 0 : i32
    %c0_i32_0 = arith.constant 0 : i32
    return %arg0, %c0_i32 : i32, i32
  }
  func.func @transform_1(%arg0: i32) -> (i32, i32) {
    %c0_i32 = arith.constant 0 : i32
    %c0_i32_0 = arith.constant 0 : i32
    %c0_i32_1 = arith.constant 0 : i32
    return %c0_i32, %c0_i32_0 : i32, i32
  }
  func.func @transform_2(%arg0: i32) -> (i32, i32) {
    %c0_i32 = arith.constant 0 : i32
    %c0_i32_0 = arith.constant 0 : i32
    %c0_i32_1 = arith.constant 0 : i32
    return %c0_i32, %c0_i32_0 : i32, i32
  }
  func.func @transform_3(%arg0: i32) -> (i32, i32) {
    %c0_i32 = arith.constant 0 : i32
    %c0_i32_0 = arith.constant 0 : i32
    %c0_i32_1 = arith.constant 0 : i32
    return %c0_i32, %c0_i32_0 : i32, i32
  }
  func.func @transform_4(%arg0: i32) -> (i32, i32) {
    %c0_i32 = arith.constant 0 : i32
    %c0_i32_0 = arith.constant 0 : i32
    return %arg0, %c0_i32 : i32, i32
  }
}

module attributes {stable_mosaic.version = 11 : i64} {
  func.func @_mm1_kernel(%arg0: i32, %arg1: memref<128x16xbf16, #tpu.memory_space<vmem>>, %arg2: memref<16x32xbf16, #tpu.memory_space<vmem>>, %arg3: memref<1x32xf32, #tpu.memory_space<vmem>>, %arg4: memref<1x32xf32, #tpu.memory_space<vmem>>, %arg5: memref<128x32xbf16, #tpu.memory_space<vmem>>, %arg6: memref<128x32xbf16, #tpu.memory_space<vmem>>) attributes {dimension_semantics = [#tpu.dimension_semantics<parallel>], iteration_bounds = array<i64: 1>, scalar_prefetch = 0 : i64, scratch_operands = 0 : i64, tpu.core_type = #tpu.core_type<tc>, window_params = [{transform_indices = @transform_0, window_bounds = array<i64: 128, 16>}, {pipeline_mode = #tpu.pipeline_mode<synchronous>, transform_indices = @transform_1, window_bounds = array<i64: 16, 32>}, {pipeline_mode = #tpu.pipeline_mode<synchronous>, transform_indices = @transform_2, window_bounds = array<i64: 1, 32>}, {pipeline_mode = #tpu.pipeline_mode<synchronous>, transform_indices = @transform_3, window_bounds = array<i64: 1, 32>}, {transform_indices = @transform_4, window_bounds = array<i64: 128, 32>}, {transform_indices = @transform_5, window_bounds = array<i64: 128, 32>}]} {
    %c0 = arith.constant 0 : index
    %c0_0 = arith.constant 0 : index
    %0 = vector.load %arg1[%c0, %c0_0] : memref<128x16xbf16, #tpu.memory_space<vmem>>, vector<128x16xbf16>
    %c0_1 = arith.constant 0 : index
    %c0_2 = arith.constant 0 : index
    %1 = vector.load %arg2[%c0_1, %c0_2] : memref<16x32xbf16, #tpu.memory_space<vmem>>, vector<16x32xbf16>
    %cst = arith.constant dense<0.000000e+00> : vector<128x32xf32>
    %2 = tpu.matmul %0, %1, %cst {dimension_numbers = #tpu.dot_dimension_numbers<[1], [0], [0], [1], [0, 0, 1, 1], [], []>} : vector<128x16xbf16>, vector<16x32xbf16>, vector<128x32xf32> -> vector<128x32xf32>
    %c0_3 = arith.constant 0 : index
    %c0_4 = arith.constant 0 : index
    %3 = vector.load %arg3[%c0_3, %c0_4] : memref<1x32xf32, #tpu.memory_space<vmem>>, vector<1x32xf32>
    %4 = vector.broadcast %3 : vector<1x32xf32> to vector<128x32xf32>
    %5 = arith.mulf %2, %4 : vector<128x32xf32>
    %c0_5 = arith.constant 0 : index
    %c0_6 = arith.constant 0 : index
    %6 = vector.load %arg4[%c0_5, %c0_6] : memref<1x32xf32, #tpu.memory_space<vmem>>, vector<1x32xf32>
    %7 = vector.broadcast %6 : vector<1x32xf32> to vector<128x32xf32>
    %8 = arith.addf %5, %7 : vector<128x32xf32>
    %c0_7 = arith.constant 0 : index
    %c0_8 = arith.constant 0 : index
    %9 = vector.load %arg5[%c0_7, %c0_8] : memref<128x32xbf16, #tpu.memory_space<vmem>>, vector<128x32xbf16>
    %10 = arith.extf %9 : vector<128x32xbf16> to vector<128x32xf32>
    %11 = arith.addf %8, %10 : vector<128x32xf32>
    %cst_9 = arith.constant 0.000000e+00 : f32
    %12 = vector.broadcast %cst_9 : f32 to vector<128x32xf32>
    %13 = arith.maximumf %11, %12 : vector<128x32xf32>
    %14 = arith.truncf %13 : vector<128x32xf32> to vector<128x32xbf16>
    %c0_10 = arith.constant 0 : index
    %c0_11 = arith.constant 0 : index
    %15 = vector.load %arg6[%c0_10, %c0_11] : memref<128x32xbf16, #tpu.memory_space<vmem>>, vector<128x32xbf16>
    tpu.vector_store %arg6[%c0_10, %c0_11], %14 {strides = array<i32>} : memref<128x32xbf16, #tpu.memory_space<vmem>>, vector<128x32xbf16>,
    return
  }
  func.func @transform_0(%arg0: i32) -> (i32, i32) {
    %c0_i32 = arith.constant 0 : i32
    %c0_i32_0 = arith.constant 0 : i32
    return %arg0, %c0_i32 : i32, i32
  }
  func.func @transform_1(%arg0: i32) -> (i32, i32) {
    %c0_i32 = arith.constant 0 : i32
    %c0_i32_0 = arith.constant 0 : i32
    %c0_i32_1 = arith.constant 0 : i32
    return %c0_i32, %c0_i32_0 : i32, i32
  }
  func.func @transform_2(%arg0: i32) -> (i32, i32) {
    %c0_i32 = arith.constant 0 : i32
    %c0_i32_0 = arith.constant 0 : i32
    %c0_i32_1 = arith.constant 0 : i32
    return %c0_i32, %c0_i32_0 : i32, i32
  }
  func.func @transform_3(%arg0: i32) -> (i32, i32) {
    %c0_i32 = arith.constant 0 : i32
    %c0_i32_0 = arith.constant 0 : i32
    %c0_i32_1 = arith.constant 0 : i32
    return %c0_i32, %c0_i32_0 : i32, i32
  }
  func.func @transform_4(%arg0: i32) -> (i32, i32) {
    %c0_i32 = arith.constant 0 : i32
    %c0_i32_0 = arith.constant 0 : i32
    return %arg0, %c0_i32 : i32, i32
  }
  func.func @transform_5(%arg0: i32) -> (i32, i32) {
    %c0_i32 = arith.constant 0 : i32
    %c0_i32_0 = arith.constant 0 : i32
    return %arg0, %c0_i32 : i32, i32
  }
}

module attributes {stable_mosaic.version = 11 : i64} {
  func.func @_mm1_kernel(%arg0: i32, %arg1: memref<128x32xbf16, #tpu.memory_space<vmem>>, %arg2: memref<32x32xbf16, #tpu.memory_space<vmem>>, %arg3: memref<1x32xf32, #tpu.memory_space<vmem>>, %arg4: memref<1x32xf32, #tpu.memory_space<vmem>>, %arg5: memref<128x32xbf16, #tpu.memory_space<vmem>>) attributes {dimension_semantics = [#tpu.dimension_semantics<parallel>], iteration_bounds = array<i64: 1>, scalar_prefetch = 0 : i64, scratch_operands = 0 : i64, tpu.core_type = #tpu.core_type<tc>, window_params = [{transform_indices = @transform_0, window_bounds = array<i64: 128, 32>}, {pipeline_mode = #tpu.pipeline_mode<synchronous>, transform_indices = @transform_1, window_bounds = array<i64: 32, 32>}, {pipeline_mode = #tpu.pipeline_mode<synchronous>, transform_indices = @transform_2, window_bounds = array<i64: 1, 32>}, {pipeline_mode = #tpu.pipeline_mode<synchronous>, transform_indices = @transform_3, window_bounds = array<i64: 1, 32>}, {transform_indices = @transform_4, window_bounds = array<i64: 128, 32>}]} {
    %c0 = arith.constant 0 : index
    %c0_0 = arith.constant 0 : index
    %0 = vector.load %arg1[%c0, %c0_0] : memref<128x32xbf16, #tpu.memory_space<vmem>>, vector<128x32xbf16>
    %c0_1 = arith.constant 0 : index
    %c0_2 = arith.constant 0 : index
    %1 = vector.load %arg2[%c0_1, %c0_2] : memref<32x32xbf16, #tpu.memory_space<vmem>>, vector<32x32xbf16>
    %cst = arith.constant dense<0.000000e+00> : vector<128x32xf32>
    %2 = tpu.matmul %0, %1, %cst {dimension_numbers = #tpu.dot_dimension_numbers<[1], [0], [0], [1], [0, 0, 1, 1], [], []>} : vector<128x32xbf16>, vector<32x32xbf16>, vector<128x32xf32> -> vector<128x32xf32>
    %c0_3 = arith.constant 0 : index
    %c0_4 = arith.constant 0 : index
    %3 = vector.load %arg3[%c0_3, %c0_4] : memref<1x32xf32, #tpu.memory_space<vmem>>, vector<1x32xf32>
    %4 = vector.broadcast %3 : vector<1x32xf32> to vector<128x32xf32>
    %5 = arith.mulf %2, %4 : vector<128x32xf32>
    %c0_5 = arith.constant 0 : index
    %c0_6 = arith.constant 0 : index
    %6 = vector.load %arg4[%c0_5, %c0_6] : memref<1x32xf32, #tpu.memory_space<vmem>>, vector<1x32xf32>
    %7 = vector.broadcast %6 : vector<1x32xf32> to vector<128x32xf32>
    %8 = arith.addf %5, %7 : vector<128x32xf32>
    %cst_7 = arith.constant 0.000000e+00 : f32
    %9 = vector.broadcast %cst_7 : f32 to vector<128x32xf32>
    %10 = arith.maximumf %8, %9 : vector<128x32xf32>
    %11 = arith.truncf %10 : vector<128x32xf32> to vector<128x32xbf16>
    %c0_8 = arith.constant 0 : index
    %c0_9 = arith.constant 0 : index
    %12 = vector.load %arg5[%c0_8, %c0_9] : memref<128x32xbf16, #tpu.memory_space<vmem>>, vector<128x32xbf16>
    tpu.vector_store %arg5[%c0_8, %c0_9], %11 {strides = array<i32>} : memref<128x32xbf16, #tpu.memory_space<vmem>>, vector<128x32xbf16>,
    return
  }
  func.func @transform_0(%arg0: i32) -> (i32, i32) {
    %c0_i32 = arith.constant 0 : i32
    %c0_i32_0 = arith.constant 0 : i32
    return %arg0, %c0_i32 : i32, i32
  }
  func.func @transform_1(%arg0: i32) -> (i32, i32) {
    %c0_i32 = arith.constant 0 : i32
    %c0_i32_0 = arith.constant 0 : i32
    %c0_i32_1 = arith.constant 0 : i32
    return %c0_i32, %c0_i32_0 : i32, i32
  }
  func.func @transform_2(%arg0: i32) -> (i32, i32) {
    %c0_i32 = arith.constant 0 : i32
    %c0_i32_0 = arith.constant 0 : i32
    %c0_i32_1 = arith.constant 0 : i32
    return %c0_i32, %c0_i32_0 : i32, i32
  }
  func.func @transform_3(%arg0: i32) -> (i32, i32) {
    %c0_i32 = arith.constant 0 : i32
    %c0_i32_0 = arith.constant 0 : i32
    %c0_i32_1 = arith.constant 0 : i32
    return %c0_i32, %c0_i32_0 : i32, i32
  }
  func.func @transform_4(%arg0: i32) -> (i32, i32) {
    %c0_i32 = arith.constant 0 : i32
    %c0_i32_0 = arith.constant 0 : i32
    return %arg0, %c0_i32 : i32, i32
  }
}

module attributes {stable_mosaic.version = 11 : i64} {
  func.func @_mm1_kernel(%arg0: i32, %arg1: memref<32x32xbf16, #tpu.memory_space<vmem>>, %arg2: memref<32x64xbf16, #tpu.memory_space<vmem>>, %arg3: memref<1x64xf32, #tpu.memory_space<vmem>>, %arg4: memref<1x64xf32, #tpu.memory_space<vmem>>, %arg5: memref<32x64xbf16, #tpu.memory_space<vmem>>) attributes {dimension_semantics = [#tpu.dimension_semantics<parallel>], iteration_bounds = array<i64: 1>, scalar_prefetch = 0 : i64, scratch_operands = 0 : i64, tpu.core_type = #tpu.core_type<tc>, window_params = [{transform_indices = @transform_0, window_bounds = array<i64: 32, 32>}, {pipeline_mode = #tpu.pipeline_mode<synchronous>, transform_indices = @transform_1, window_bounds = array<i64: 32, 64>}, {pipeline_mode = #tpu.pipeline_mode<synchronous>, transform_indices = @transform_2, window_bounds = array<i64: 1, 64>}, {pipeline_mode = #tpu.pipeline_mode<synchronous>, transform_indices = @transform_3, window_bounds = array<i64: 1, 64>}, {transform_indices = @transform_4, window_bounds = array<i64: 32, 64>}]} {
    %c0 = arith.constant 0 : index
    %c0_0 = arith.constant 0 : index
    %0 = vector.load %arg1[%c0, %c0_0] : memref<32x32xbf16, #tpu.memory_space<vmem>>, vector<32x32xbf16>
    %c0_1 = arith.constant 0 : index
    %c0_2 = arith.constant 0 : index
    %1 = vector.load %arg2[%c0_1, %c0_2] : memref<32x64xbf16, #tpu.memory_space<vmem>>, vector<32x64xbf16>
    %cst = arith.constant dense<0.000000e+00> : vector<32x64xf32>
    %2 = tpu.matmul %0, %1, %cst {dimension_numbers = #tpu.dot_dimension_numbers<[1], [0], [0], [1], [0, 0, 1, 1], [], []>} : vector<32x32xbf16>, vector<32x64xbf16>, vector<32x64xf32> -> vector<32x64xf32>
    %c0_3 = arith.constant 0 : index
    %c0_4 = arith.constant 0 : index
    %3 = vector.load %arg3[%c0_3, %c0_4] : memref<1x64xf32, #tpu.memory_space<vmem>>, vector<1x64xf32>
    %4 = vector.broadcast %3 : vector<1x64xf32> to vector<32x64xf32>
    %5 = arith.mulf %2, %4 : vector<32x64xf32>
    %c0_5 = arith.constant 0 : index
    %c0_6 = arith.constant 0 : index
    %6 = vector.load %arg4[%c0_5, %c0_6] : memref<1x64xf32, #tpu.memory_space<vmem>>, vector<1x64xf32>
    %7 = vector.broadcast %6 : vector<1x64xf32> to vector<32x64xf32>
    %8 = arith.addf %5, %7 : vector<32x64xf32>
    %9 = arith.truncf %8 : vector<32x64xf32> to vector<32x64xbf16>
    %c0_7 = arith.constant 0 : index
    %c0_8 = arith.constant 0 : index
    %10 = vector.load %arg5[%c0_7, %c0_8] : memref<32x64xbf16, #tpu.memory_space<vmem>>, vector<32x64xbf16>
    tpu.vector_store %arg5[%c0_7, %c0_8], %9 {strides = array<i32>} : memref<32x64xbf16, #tpu.memory_space<vmem>>, vector<32x64xbf16>,
    return
  }
  func.func @transform_0(%arg0: i32) -> (i32, i32) {
    %c0_i32 = arith.constant 0 : i32
    %c0_i32_0 = arith.constant 0 : i32
    return %arg0, %c0_i32 : i32, i32
  }
  func.func @transform_1(%arg0: i32) -> (i32, i32) {
    %c0_i32 = arith.constant 0 : i32
    %c0_i32_0 = arith.constant 0 : i32
    %c0_i32_1 = arith.constant 0 : i32
    return %c0_i32, %c0_i32_0 : i32, i32
  }
  func.func @transform_2(%arg0: i32) -> (i32, i32) {
    %c0_i32 = arith.constant 0 : i32
    %c0_i32_0 = arith.constant 0 : i32
    %c0_i32_1 = arith.constant 0 : i32
    return %c0_i32, %c0_i32_0 : i32, i32
  }
  func.func @transform_3(%arg0: i32) -> (i32, i32) {
    %c0_i32 = arith.constant 0 : i32
    %c0_i32_0 = arith.constant 0 : i32
    %c0_i32_1 = arith.constant 0 : i32
    return %c0_i32, %c0_i32_0 : i32, i32
  }
  func.func @transform_4(%arg0: i32) -> (i32, i32) {
    %c0_i32 = arith.constant 0 : i32
    %c0_i32_0 = arith.constant 0 : i32
    return %arg0, %c0_i32 : i32, i32
  }
}

module attributes {stable_mosaic.version = 11 : i64} {
  func.func @_mm1_kernel(%arg0: i32, %arg1: memref<32x288xbf16, #tpu.memory_space<vmem>>, %arg2: memref<288x32xbf16, #tpu.memory_space<vmem>>, %arg3: memref<1x32xf32, #tpu.memory_space<vmem>>, %arg4: memref<1x32xf32, #tpu.memory_space<vmem>>, %arg5: memref<32x32xbf16, #tpu.memory_space<vmem>>) attributes {dimension_semantics = [#tpu.dimension_semantics<parallel>], iteration_bounds = array<i64: 1>, scalar_prefetch = 0 : i64, scratch_operands = 0 : i64, tpu.core_type = #tpu.core_type<tc>, window_params = [{transform_indices = @transform_0, window_bounds = array<i64: 32, 288>}, {pipeline_mode = #tpu.pipeline_mode<synchronous>, transform_indices = @transform_1, window_bounds = array<i64: 288, 32>}, {pipeline_mode = #tpu.pipeline_mode<synchronous>, transform_indices = @transform_2, window_bounds = array<i64: 1, 32>}, {pipeline_mode = #tpu.pipeline_mode<synchronous>, transform_indices = @transform_3, window_bounds = array<i64: 1, 32>}, {transform_indices = @transform_4, window_bounds = array<i64: 32, 32>}]} {
    %c0 = arith.constant 0 : index
    %c0_0 = arith.constant 0 : index
    %0 = vector.load %arg1[%c0, %c0_0] : memref<32x288xbf16, #tpu.memory_space<vmem>>, vector<32x288xbf16>
    %c0_1 = arith.constant 0 : index
    %c0_2 = arith.constant 0 : index
    %1 = vector.load %arg2[%c0_1, %c0_2] : memref<288x32xbf16, #tpu.memory_space<vmem>>, vector<288x32xbf16>
    %cst = arith.constant dense<0.000000e+00> : vector<32x32xf32>
    %2 = tpu.matmul %0, %1, %cst {dimension_numbers = #tpu.dot_dimension_numbers<[1], [0], [0], [1], [0, 0, 1, 1], [], []>} : vector<32x288xbf16>, vector<288x32xbf16>, vector<32x32xf32> -> vector<32x32xf32>
    %c0_3 = arith.constant 0 : index
    %c0_4 = arith.constant 0 : index
    %3 = vector.load %arg3[%c0_3, %c0_4] : memref<1x32xf32, #tpu.memory_space<vmem>>, vector<1x32xf32>
    %4 = vector.broadcast %3 : vector<1x32xf32> to vector<32x32xf32>
    %5 = arith.mulf %2, %4 : vector<32x32xf32>
    %c0_5 = arith.constant 0 : index
    %c0_6 = arith.constant 0 : index
    %6 = vector.load %arg4[%c0_5, %c0_6] : memref<1x32xf32, #tpu.memory_space<vmem>>, vector<1x32xf32>
    %7 = vector.broadcast %6 : vector<1x32xf32> to vector<32x32xf32>
    %8 = arith.addf %5, %7 : vector<32x32xf32>
    %cst_7 = arith.constant 0.000000e+00 : f32
    %9 = vector.broadcast %cst_7 : f32 to vector<32x32xf32>
    %10 = arith.maximumf %8, %9 : vector<32x32xf32>
    %11 = arith.truncf %10 : vector<32x32xf32> to vector<32x32xbf16>
    %c0_8 = arith.constant 0 : index
    %c0_9 = arith.constant 0 : index
    %12 = vector.load %arg5[%c0_8, %c0_9] : memref<32x32xbf16, #tpu.memory_space<vmem>>, vector<32x32xbf16>
    tpu.vector_store %arg5[%c0_8, %c0_9], %11 {strides = array<i32>} : memref<32x32xbf16, #tpu.memory_space<vmem>>, vector<32x32xbf16>,
    return
  }
  func.func @transform_0(%arg0: i32) -> (i32, i32) {
    %c0_i32 = arith.constant 0 : i32
    %c0_i32_0 = arith.constant 0 : i32
    return %arg0, %c0_i32 : i32, i32
  }
  func.func @transform_1(%arg0: i32) -> (i32, i32) {
    %c0_i32 = arith.constant 0 : i32
    %c0_i32_0 = arith.constant 0 : i32
    %c0_i32_1 = arith.constant 0 : i32
    return %c0_i32, %c0_i32_0 : i32, i32
  }
  func.func @transform_2(%arg0: i32) -> (i32, i32) {
    %c0_i32 = arith.constant 0 : i32
    %c0_i32_0 = arith.constant 0 : i32
    %c0_i32_1 = arith.constant 0 : i32
    return %c0_i32, %c0_i32_0 : i32, i32
  }
  func.func @transform_3(%arg0: i32) -> (i32, i32) {
    %c0_i32 = arith.constant 0 : i32
    %c0_i32_0 = arith.constant 0 : i32
    %c0_i32_1 = arith.constant 0 : i32
    return %c0_i32, %c0_i32_0 : i32, i32
  }
  func.func @transform_4(%arg0: i32) -> (i32, i32) {
    %c0_i32 = arith.constant 0 : i32
    %c0_i32_0 = arith.constant 0 : i32
    return %arg0, %c0_i32 : i32, i32
  }
}

module attributes {stable_mosaic.version = 11 : i64} {
  func.func @_mm1_kernel(%arg0: i32, %arg1: memref<32x32xbf16, #tpu.memory_space<vmem>>, %arg2: memref<32x64xbf16, #tpu.memory_space<vmem>>, %arg3: memref<1x64xf32, #tpu.memory_space<vmem>>, %arg4: memref<1x64xf32, #tpu.memory_space<vmem>>, %arg5: memref<32x64xbf16, #tpu.memory_space<vmem>>, %arg6: memref<32x64xbf16, #tpu.memory_space<vmem>>) attributes {dimension_semantics = [#tpu.dimension_semantics<parallel>], iteration_bounds = array<i64: 1>, scalar_prefetch = 0 : i64, scratch_operands = 0 : i64, tpu.core_type = #tpu.core_type<tc>, window_params = [{transform_indices = @transform_0, window_bounds = array<i64: 32, 32>}, {pipeline_mode = #tpu.pipeline_mode<synchronous>, transform_indices = @transform_1, window_bounds = array<i64: 32, 64>}, {pipeline_mode = #tpu.pipeline_mode<synchronous>, transform_indices = @transform_2, window_bounds = array<i64: 1, 64>}, {pipeline_mode = #tpu.pipeline_mode<synchronous>, transform_indices = @transform_3, window_bounds = array<i64: 1, 64>}, {transform_indices = @transform_4, window_bounds = array<i64: 32, 64>}, {transform_indices = @transform_5, window_bounds = array<i64: 32, 64>}]} {
    %c0 = arith.constant 0 : index
    %c0_0 = arith.constant 0 : index
    %0 = vector.load %arg1[%c0, %c0_0] : memref<32x32xbf16, #tpu.memory_space<vmem>>, vector<32x32xbf16>
    %c0_1 = arith.constant 0 : index
    %c0_2 = arith.constant 0 : index
    %1 = vector.load %arg2[%c0_1, %c0_2] : memref<32x64xbf16, #tpu.memory_space<vmem>>, vector<32x64xbf16>
    %cst = arith.constant dense<0.000000e+00> : vector<32x64xf32>
    %2 = tpu.matmul %0, %1, %cst {dimension_numbers = #tpu.dot_dimension_numbers<[1], [0], [0], [1], [0, 0, 1, 1], [], []>} : vector<32x32xbf16>, vector<32x64xbf16>, vector<32x64xf32> -> vector<32x64xf32>
    %c0_3 = arith.constant 0 : index
    %c0_4 = arith.constant 0 : index
    %3 = vector.load %arg3[%c0_3, %c0_4] : memref<1x64xf32, #tpu.memory_space<vmem>>, vector<1x64xf32>
    %4 = vector.broadcast %3 : vector<1x64xf32> to vector<32x64xf32>
    %5 = arith.mulf %2, %4 : vector<32x64xf32>
    %c0_5 = arith.constant 0 : index
    %c0_6 = arith.constant 0 : index
    %6 = vector.load %arg4[%c0_5, %c0_6] : memref<1x64xf32, #tpu.memory_space<vmem>>, vector<1x64xf32>
    %7 = vector.broadcast %6 : vector<1x64xf32> to vector<32x64xf32>
    %8 = arith.addf %5, %7 : vector<32x64xf32>
    %c0_7 = arith.constant 0 : index
    %c0_8 = arith.constant 0 : index
    %9 = vector.load %arg5[%c0_7, %c0_8] : memref<32x64xbf16, #tpu.memory_space<vmem>>, vector<32x64xbf16>
    %10 = arith.extf %9 : vector<32x64xbf16> to vector<32x64xf32>
    %11 = arith.addf %8, %10 : vector<32x64xf32>
    %cst_9 = arith.constant 0.000000e+00 : f32
    %12 = vector.broadcast %cst_9 : f32 to vector<32x64xf32>
    %13 = arith.maximumf %11, %12 : vector<32x64xf32>
    %14 = arith.truncf %13 : vector<32x64xf32> to vector<32x64xbf16>
    %c0_10 = arith.constant 0 : index
    %c0_11 = arith.constant 0 : index
    %15 = vector.load %arg6[%c0_10, %c0_11] : memref<32x64xbf16, #tpu.memory_space<vmem>>, vector<32x64xbf16>
    tpu.vector_store %arg6[%c0_10, %c0_11], %14 {strides = array<i32>} : memref<32x64xbf16, #tpu.memory_space<vmem>>, vector<32x64xbf16>,
    return
  }
  func.func @transform_0(%arg0: i32) -> (i32, i32) {
    %c0_i32 = arith.constant 0 : i32
    %c0_i32_0 = arith.constant 0 : i32
    return %arg0, %c0_i32 : i32, i32
  }
  func.func @transform_1(%arg0: i32) -> (i32, i32) {
    %c0_i32 = arith.constant 0 : i32
    %c0_i32_0 = arith.constant 0 : i32
    %c0_i32_1 = arith.constant 0 : i32
    return %c0_i32, %c0_i32_0 : i32, i32
  }
  func.func @transform_2(%arg0: i32) -> (i32, i32) {
    %c0_i32 = arith.constant 0 : i32
    %c0_i32_0 = arith.constant 0 : i32
    %c0_i32_1 = arith.constant 0 : i32
    return %c0_i32, %c0_i32_0 : i32, i32
  }
  func.func @transform_3(%arg0: i32) -> (i32, i32) {
    %c0_i32 = arith.constant 0 : i32
    %c0_i32_0 = arith.constant 0 : i32
    %c0_i32_1 = arith.constant 0 : i32
    return %c0_i32, %c0_i32_0 : i32, i32
  }
  func.func @transform_4(%arg0: i32) -> (i32, i32) {
    %c0_i32 = arith.constant 0 : i32
    %c0_i32_0 = arith.constant 0 : i32
    return %arg0, %c0_i32 : i32, i32
  }
  func.func @transform_5(%arg0: i32) -> (i32, i32) {
    %c0_i32 = arith.constant 0 : i32
    %c0_i32_0 = arith.constant 0 : i32
    return %arg0, %c0_i32 : i32, i32
  }
}

module attributes {stable_mosaic.version = 11 : i64} {
  func.func @_mm1_kernel(%arg0: i32, %arg1: memref<32x64xbf16, #tpu.memory_space<vmem>>, %arg2: memref<64x64xbf16, #tpu.memory_space<vmem>>, %arg3: memref<1x64xf32, #tpu.memory_space<vmem>>, %arg4: memref<1x64xf32, #tpu.memory_space<vmem>>, %arg5: memref<32x64xbf16, #tpu.memory_space<vmem>>) attributes {dimension_semantics = [#tpu.dimension_semantics<parallel>], iteration_bounds = array<i64: 1>, scalar_prefetch = 0 : i64, scratch_operands = 0 : i64, tpu.core_type = #tpu.core_type<tc>, window_params = [{transform_indices = @transform_0, window_bounds = array<i64: 32, 64>}, {pipeline_mode = #tpu.pipeline_mode<synchronous>, transform_indices = @transform_1, window_bounds = array<i64: 64, 64>}, {pipeline_mode = #tpu.pipeline_mode<synchronous>, transform_indices = @transform_2, window_bounds = array<i64: 1, 64>}, {pipeline_mode = #tpu.pipeline_mode<synchronous>, transform_indices = @transform_3, window_bounds = array<i64: 1, 64>}, {transform_indices = @transform_4, window_bounds = array<i64: 32, 64>}]} {
    %c0 = arith.constant 0 : index
    %c0_0 = arith.constant 0 : index
    %0 = vector.load %arg1[%c0, %c0_0] : memref<32x64xbf16, #tpu.memory_space<vmem>>, vector<32x64xbf16>
    %c0_1 = arith.constant 0 : index
    %c0_2 = arith.constant 0 : index
    %1 = vector.load %arg2[%c0_1, %c0_2] : memref<64x64xbf16, #tpu.memory_space<vmem>>, vector<64x64xbf16>
    %cst = arith.constant dense<0.000000e+00> : vector<32x64xf32>
    %2 = tpu.matmul %0, %1, %cst {dimension_numbers = #tpu.dot_dimension_numbers<[1], [0], [0], [1], [0, 0, 1, 1], [], []>} : vector<32x64xbf16>, vector<64x64xbf16>, vector<32x64xf32> -> vector<32x64xf32>
    %c0_3 = arith.constant 0 : index
    %c0_4 = arith.constant 0 : index
    %3 = vector.load %arg3[%c0_3, %c0_4] : memref<1x64xf32, #tpu.memory_space<vmem>>, vector<1x64xf32>
    %4 = vector.broadcast %3 : vector<1x64xf32> to vector<32x64xf32>
    %5 = arith.mulf %2, %4 : vector<32x64xf32>
    %c0_5 = arith.constant 0 : index
    %c0_6 = arith.constant 0 : index
    %6 = vector.load %arg4[%c0_5, %c0_6] : memref<1x64xf32, #tpu.memory_space<vmem>>, vector<1x64xf32>
    %7 = vector.broadcast %6 : vector<1x64xf32> to vector<32x64xf32>
    %8 = arith.addf %5, %7 : vector<32x64xf32>
    %cst_7 = arith.constant 0.000000e+00 : f32
    %9 = vector.broadcast %cst_7 : f32 to vector<32x64xf32>
    %10 = arith.maximumf %8, %9 : vector<32x64xf32>
    %11 = arith.truncf %10 : vector<32x64xf32> to vector<32x64xbf16>
    %c0_8 = arith.constant 0 : index
    %c0_9 = arith.constant 0 : index
    %12 = vector.load %arg5[%c0_8, %c0_9] : memref<32x64xbf16, #tpu.memory_space<vmem>>, vector<32x64xbf16>
    tpu.vector_store %arg5[%c0_8, %c0_9], %11 {strides = array<i32>} : memref<32x64xbf16, #tpu.memory_space<vmem>>, vector<32x64xbf16>,
    return
  }
  func.func @transform_0(%arg0: i32) -> (i32, i32) {
    %c0_i32 = arith.constant 0 : i32
    %c0_i32_0 = arith.constant 0 : i32
    return %arg0, %c0_i32 : i32, i32
  }
  func.func @transform_1(%arg0: i32) -> (i32, i32) {
    %c0_i32 = arith.constant 0 : i32
    %c0_i32_0 = arith.constant 0 : i32
    %c0_i32_1 = arith.constant 0 : i32
    return %c0_i32, %c0_i32_0 : i32, i32
  }
  func.func @transform_2(%arg0: i32) -> (i32, i32) {
    %c0_i32 = arith.constant 0 : i32
    %c0_i32_0 = arith.constant 0 : i32
    %c0_i32_1 = arith.constant 0 : i32
    return %c0_i32, %c0_i32_0 : i32, i32
  }
  func.func @transform_3(%arg0: i32) -> (i32, i32) {
    %c0_i32 = arith.constant 0 : i32
    %c0_i32_0 = arith.constant 0 : i32
    %c0_i32_1 = arith.constant 0 : i32
    return %c0_i32, %c0_i32_0 : i32, i32
  }
  func.func @transform_4(%arg0: i32) -> (i32, i32) {
    %c0_i32 = arith.constant 0 : i32
    %c0_i32_0 = arith.constant 0 : i32
    return %arg0, %c0_i32 : i32, i32
  }
}

module attributes {stable_mosaic.version = 11 : i64} {
  func.func @_mm1_kernel(%arg0: i32, %arg1: memref<8x576xbf16, #tpu.memory_space<vmem>>, %arg2: memref<576x64xbf16, #tpu.memory_space<vmem>>, %arg3: memref<1x64xf32, #tpu.memory_space<vmem>>, %arg4: memref<1x64xf32, #tpu.memory_space<vmem>>, %arg5: memref<8x64xbf16, #tpu.memory_space<vmem>>) attributes {dimension_semantics = [#tpu.dimension_semantics<parallel>], iteration_bounds = array<i64: 1>, scalar_prefetch = 0 : i64, scratch_operands = 0 : i64, tpu.core_type = #tpu.core_type<tc>, window_params = [{transform_indices = @transform_0, window_bounds = array<i64: 8, 576>}, {pipeline_mode = #tpu.pipeline_mode<synchronous>, transform_indices = @transform_1, window_bounds = array<i64: 576, 64>}, {pipeline_mode = #tpu.pipeline_mode<synchronous>, transform_indices = @transform_2, window_bounds = array<i64: 1, 64>}, {pipeline_mode = #tpu.pipeline_mode<synchronous>, transform_indices = @transform_3, window_bounds = array<i64: 1, 64>}, {transform_indices = @transform_4, window_bounds = array<i64: 8, 64>}]} {
    %c0 = arith.constant 0 : index
    %c0_0 = arith.constant 0 : index
    %0 = vector.load %arg1[%c0, %c0_0] : memref<8x576xbf16, #tpu.memory_space<vmem>>, vector<8x576xbf16>
    %c0_1 = arith.constant 0 : index
    %c0_2 = arith.constant 0 : index
    %1 = vector.load %arg2[%c0_1, %c0_2] : memref<576x64xbf16, #tpu.memory_space<vmem>>, vector<576x64xbf16>
    %cst = arith.constant dense<0.000000e+00> : vector<8x64xf32>
    %2 = tpu.matmul %0, %1, %cst {dimension_numbers = #tpu.dot_dimension_numbers<[1], [0], [0], [1], [0, 0, 1, 1], [], []>} : vector<8x576xbf16>, vector<576x64xbf16>, vector<8x64xf32> -> vector<8x64xf32>
    %c0_3 = arith.constant 0 : index
    %c0_4 = arith.constant 0 : index
    %3 = vector.load %arg3[%c0_3, %c0_4] : memref<1x64xf32, #tpu.memory_space<vmem>>, vector<1x64xf32>
    %4 = vector.broadcast %3 : vector<1x64xf32> to vector<8x64xf32>
    %5 = arith.mulf %2, %4 : vector<8x64xf32>
    %c0_5 = arith.constant 0 : index
    %c0_6 = arith.constant 0 : index
    %6 = vector.load %arg4[%c0_5, %c0_6] : memref<1x64xf32, #tpu.memory_space<vmem>>, vector<1x64xf32>
    %7 = vector.broadcast %6 : vector<1x64xf32> to vector<8x64xf32>
    %8 = arith.addf %5, %7 : vector<8x64xf32>
    %cst_7 = arith.constant 0.000000e+00 : f32
    %9 = vector.broadcast %cst_7 : f32 to vector<8x64xf32>
    %10 = arith.maximumf %8, %9 : vector<8x64xf32>
    %11 = arith.truncf %10 : vector<8x64xf32> to vector<8x64xbf16>
    %c0_8 = arith.constant 0 : index
    %c0_9 = arith.constant 0 : index
    %12 = vector.load %arg5[%c0_8, %c0_9] : memref<8x64xbf16, #tpu.memory_space<vmem>>, vector<8x64xbf16>
    tpu.vector_store %arg5[%c0_8, %c0_9], %11 {strides = array<i32>} : memref<8x64xbf16, #tpu.memory_space<vmem>>, vector<8x64xbf16>,
    return
  }
  func.func @transform_0(%arg0: i32) -> (i32, i32) {
    %c0_i32 = arith.constant 0 : i32
    %c0_i32_0 = arith.constant 0 : i32
    return %arg0, %c0_i32 : i32, i32
  }
  func.func @transform_1(%arg0: i32) -> (i32, i32) {
    %c0_i32 = arith.constant 0 : i32
    %c0_i32_0 = arith.constant 0 : i32
    %c0_i32_1 = arith.constant 0 : i32
    return %c0_i32, %c0_i32_0 : i32, i32
  }
  func.func @transform_2(%arg0: i32) -> (i32, i32) {
    %c0_i32 = arith.constant 0 : i32
    %c0_i32_0 = arith.constant 0 : i32
    %c0_i32_1 = arith.constant 0 : i32
    return %c0_i32, %c0_i32_0 : i32, i32
  }
  func.func @transform_3(%arg0: i32) -> (i32, i32) {
    %c0_i32 = arith.constant 0 : i32
    %c0_i32_0 = arith.constant 0 : i32
    %c0_i32_1 = arith.constant 0 : i32
    return %c0_i32, %c0_i32_0 : i32, i32
  }
  func.func @transform_4(%arg0: i32) -> (i32, i32) {
    %c0_i32 = arith.constant 0 : i32
    %c0_i32_0 = arith.constant 0 : i32
    return %arg0, %c0_i32 : i32, i32
  }
}

module attributes {stable_mosaic.version = 11 : i64} {
  func.func @_mm1_kernel(%arg0: i32, %arg1: memref<8x64xbf16, #tpu.memory_space<vmem>>, %arg2: memref<64x128xbf16, #tpu.memory_space<vmem>>, %arg3: memref<1x128xf32, #tpu.memory_space<vmem>>, %arg4: memref<1x128xf32, #tpu.memory_space<vmem>>, %arg5: memref<8x128xbf16, #tpu.memory_space<vmem>>) attributes {dimension_semantics = [#tpu.dimension_semantics<parallel>], iteration_bounds = array<i64: 1>, scalar_prefetch = 0 : i64, scratch_operands = 0 : i64, tpu.core_type = #tpu.core_type<tc>, window_params = [{transform_indices = @transform_0, window_bounds = array<i64: 8, 64>}, {pipeline_mode = #tpu.pipeline_mode<synchronous>, transform_indices = @transform_1, window_bounds = array<i64: 64, 128>}, {pipeline_mode = #tpu.pipeline_mode<synchronous>, transform_indices = @transform_2, window_bounds = array<i64: 1, 128>}, {pipeline_mode = #tpu.pipeline_mode<synchronous>, transform_indices = @transform_3, window_bounds = array<i64: 1, 128>}, {transform_indices = @transform_4, window_bounds = array<i64: 8, 128>}]} {
    %c0 = arith.constant 0 : index
    %c0_0 = arith.constant 0 : index
    %0 = vector.load %arg1[%c0, %c0_0] : memref<8x64xbf16, #tpu.memory_space<vmem>>, vector<8x64xbf16>
    %c0_1 = arith.constant 0 : index
    %c0_2 = arith.constant 0 : index
    %1 = vector.load %arg2[%c0_1, %c0_2] : memref<64x128xbf16, #tpu.memory_space<vmem>>, vector<64x128xbf16>
    %cst = arith.constant dense<0.000000e+00> : vector<8x128xf32>
    %2 = tpu.matmul %0, %1, %cst {dimension_numbers = #tpu.dot_dimension_numbers<[1], [0], [0], [1], [0, 0, 1, 1], [], []>} : vector<8x64xbf16>, vector<64x128xbf16>, vector<8x128xf32> -> vector<8x128xf32>
    %c0_3 = arith.constant 0 : index
    %c0_4 = arith.constant 0 : index
    %3 = vector.load %arg3[%c0_3, %c0_4] : memref<1x128xf32, #tpu.memory_space<vmem>>, vector<1x128xf32>
    %4 = vector.broadcast %3 : vector<1x128xf32> to vector<8x128xf32>
    %5 = arith.mulf %2, %4 : vector<8x128xf32>
    %c0_5 = arith.constant 0 : index
    %c0_6 = arith.constant 0 : index
    %6 = vector.load %arg4[%c0_5, %c0_6] : memref<1x128xf32, #tpu.memory_space<vmem>>, vector<1x128xf32>
    %7 = vector.broadcast %6 : vector<1x128xf32> to vector<8x128xf32>
    %8 = arith.addf %5, %7 : vector<8x128xf32>
    %9 = arith.truncf %8 : vector<8x128xf32> to vector<8x128xbf16>
    %c0_7 = arith.constant 0 : index
    %c0_8 = arith.constant 0 : index
    %10 = vector.load %arg5[%c0_7, %c0_8] : memref<8x128xbf16, #tpu.memory_space<vmem>>, vector<8x128xbf16>
    tpu.vector_store %arg5[%c0_7, %c0_8], %9 {strides = array<i32>} : memref<8x128xbf16, #tpu.memory_space<vmem>>, vector<8x128xbf16>,
    return
  }
  func.func @transform_0(%arg0: i32) -> (i32, i32) {
    %c0_i32 = arith.constant 0 : i32
    %c0_i32_0 = arith.constant 0 : i32
    return %arg0, %c0_i32 : i32, i32
  }
  func.func @transform_1(%arg0: i32) -> (i32, i32) {
    %c0_i32 = arith.constant 0 : i32
    %c0_i32_0 = arith.constant 0 : i32
    %c0_i32_1 = arith.constant 0 : i32
    return %c0_i32, %c0_i32_0 : i32, i32
  }
  func.func @transform_2(%arg0: i32) -> (i32, i32) {
    %c0_i32 = arith.constant 0 : i32
    %c0_i32_0 = arith.constant 0 : i32
    %c0_i32_1 = arith.constant 0 : i32
    return %c0_i32, %c0_i32_0 : i32, i32
  }
  func.func @transform_3(%arg0: i32) -> (i32, i32) {
    %c0_i32 = arith.constant 0 : i32
    %c0_i32_0 = arith.constant 0 : i32
    %c0_i32_1 = arith.constant 0 : i32
    return %c0_i32, %c0_i32_0 : i32, i32
  }
  func.func @transform_4(%arg0: i32) -> (i32, i32) {
    %c0_i32 = arith.constant 0 : i32
    %c0_i32_0 = arith.constant 0 : i32
    return %arg0, %c0_i32 : i32, i32
  }
}

module attributes {stable_mosaic.version = 11 : i64} {
  func.func @_mm1_kernel(%arg0: i32, %arg1: memref<8x64xbf16, #tpu.memory_space<vmem>>, %arg2: memref<64x128xbf16, #tpu.memory_space<vmem>>, %arg3: memref<1x128xf32, #tpu.memory_space<vmem>>, %arg4: memref<1x128xf32, #tpu.memory_space<vmem>>, %arg5: memref<8x128xbf16, #tpu.memory_space<vmem>>, %arg6: memref<8x128xbf16, #tpu.memory_space<vmem>>) attributes {dimension_semantics = [#tpu.dimension_semantics<parallel>], iteration_bounds = array<i64: 1>, scalar_prefetch = 0 : i64, scratch_operands = 0 : i64, tpu.core_type = #tpu.core_type<tc>, window_params = [{transform_indices = @transform_0, window_bounds = array<i64: 8, 64>}, {pipeline_mode = #tpu.pipeline_mode<synchronous>, transform_indices = @transform_1, window_bounds = array<i64: 64, 128>}, {pipeline_mode = #tpu.pipeline_mode<synchronous>, transform_indices = @transform_2, window_bounds = array<i64: 1, 128>}, {pipeline_mode = #tpu.pipeline_mode<synchronous>, transform_indices = @transform_3, window_bounds = array<i64: 1, 128>}, {transform_indices = @transform_4, window_bounds = array<i64: 8, 128>}, {transform_indices = @transform_5, window_bounds = array<i64: 8, 128>}]} {
    %c0 = arith.constant 0 : index
    %c0_0 = arith.constant 0 : index
    %0 = vector.load %arg1[%c0, %c0_0] : memref<8x64xbf16, #tpu.memory_space<vmem>>, vector<8x64xbf16>
    %c0_1 = arith.constant 0 : index
    %c0_2 = arith.constant 0 : index
    %1 = vector.load %arg2[%c0_1, %c0_2] : memref<64x128xbf16, #tpu.memory_space<vmem>>, vector<64x128xbf16>
    %cst = arith.constant dense<0.000000e+00> : vector<8x128xf32>
    %2 = tpu.matmul %0, %1, %cst {dimension_numbers = #tpu.dot_dimension_numbers<[1], [0], [0], [1], [0, 0, 1, 1], [], []>} : vector<8x64xbf16>, vector<64x128xbf16>, vector<8x128xf32> -> vector<8x128xf32>
    %c0_3 = arith.constant 0 : index
    %c0_4 = arith.constant 0 : index
    %3 = vector.load %arg3[%c0_3, %c0_4] : memref<1x128xf32, #tpu.memory_space<vmem>>, vector<1x128xf32>
    %4 = vector.broadcast %3 : vector<1x128xf32> to vector<8x128xf32>
    %5 = arith.mulf %2, %4 : vector<8x128xf32>
    %c0_5 = arith.constant 0 : index
    %c0_6 = arith.constant 0 : index
    %6 = vector.load %arg4[%c0_5, %c0_6] : memref<1x128xf32, #tpu.memory_space<vmem>>, vector<1x128xf32>
    %7 = vector.broadcast %6 : vector<1x128xf32> to vector<8x128xf32>
    %8 = arith.addf %5, %7 : vector<8x128xf32>
    %c0_7 = arith.constant 0 : index
    %c0_8 = arith.constant 0 : index
    %9 = vector.load %arg5[%c0_7, %c0_8] : memref<8x128xbf16, #tpu.memory_space<vmem>>, vector<8x128xbf16>
    %10 = arith.extf %9 : vector<8x128xbf16> to vector<8x128xf32>
    %11 = arith.addf %8, %10 : vector<8x128xf32>
    %cst_9 = arith.constant 0.000000e+00 : f32
    %12 = vector.broadcast %cst_9 : f32 to vector<8x128xf32>
    %13 = arith.maximumf %11, %12 : vector<8x128xf32>
    %14 = arith.truncf %13 : vector<8x128xf32> to vector<8x128xbf16>
    %c0_10 = arith.constant 0 : index
    %c0_11 = arith.constant 0 : index
    %15 = vector.load %arg6[%c0_10, %c0_11] : memref<8x128xbf16, #tpu.memory_space<vmem>>, vector<8x128xbf16>
    tpu.vector_store %arg6[%c0_10, %c0_11], %14 {strides = array<i32>} : memref<8x128xbf16, #tpu.memory_space<vmem>>, vector<8x128xbf16>,
    return
  }
  func.func @transform_0(%arg0: i32) -> (i32, i32) {
    %c0_i32 = arith.constant 0 : i32
    %c0_i32_0 = arith.constant 0 : i32
    return %arg0, %c0_i32 : i32, i32
  }
  func.func @transform_1(%arg0: i32) -> (i32, i32) {
    %c0_i32 = arith.constant 0 : i32
    %c0_i32_0 = arith.constant 0 : i32
    %c0_i32_1 = arith.constant 0 : i32
    return %c0_i32, %c0_i32_0 : i32, i32
  }
  func.func @transform_2(%arg0: i32) -> (i32, i32) {
    %c0_i32 = arith.constant 0 : i32
    %c0_i32_0 = arith.constant 0 : i32
    %c0_i32_1 = arith.constant 0 : i32
    return %c0_i32, %c0_i32_0 : i32, i32
  }
  func.func @transform_3(%arg0: i32) -> (i32, i32) {
    %c0_i32 = arith.constant 0 : i32
    %c0_i32_0 = arith.constant 0 : i32
    %c0_i32_1 = arith.constant 0 : i32
    return %c0_i32, %c0_i32_0 : i32, i32
  }
  func.func @transform_4(%arg0: i32) -> (i32, i32) {
    %c0_i32 = arith.constant 0 : i32
    %c0_i32_0 = arith.constant 0 : i32
    return %arg0, %c0_i32 : i32, i32
  }
  func.func @transform_5(%arg0: i32) -> (i32, i32) {
    %c0_i32 = arith.constant 0 : i32
    %c0_i32_0 = arith.constant 0 : i32
    return %arg0, %c0_i32 : i32, i32
  }
}

module attributes {stable_mosaic.version = 11 : i64} {
  func.func @_mean_kernel(%arg0: i32, %arg1: memref<1x4x128xbf16, #tpu.memory_space<vmem>>, %arg2: memref<1x1x128xf32, #tpu.memory_space<vmem>>) attributes {dimension_semantics = [#tpu.dimension_semantics<parallel>], iteration_bounds = array<i64: 2>, scalar_prefetch = 0 : i64, scratch_operands = 0 : i64, tpu.core_type = #tpu.core_type<tc>, window_params = [{transform_indices = @transform_0, window_bounds = array<i64: 1, 4, 128>}, {transform_indices = @transform_1, window_bounds = array<i64: 1, 1, 128>}]} {
    %c0 = arith.constant 0 : index
    %c0_0 = arith.constant 0 : index
    %c0_1 = arith.constant 0 : index
    %0 = vector.load %arg1[%c0, %c0_0, %c0_1] : memref<1x4x128xbf16, #tpu.memory_space<vmem>>, vector<1x4x128xbf16>
    %1 = arith.extf %0 : vector<1x4x128xbf16> to vector<1x4x128xf32>
    %cst = arith.constant dense<0.000000e+00> : vector<1x128xf32>
    %2 = vector.multi_reduction <add>, %1, %cst [1] : vector<1x4x128xf32> to vector<1x128xf32>
    %3 = vector.shape_cast %2 : vector<1x128xf32> to vector<1x1x128xf32>
    %cst_2 = arith.constant 4.000000e+00 : f32
    %4 = vector.broadcast %cst_2 : f32 to vector<1x1x128xf32>
    %5 = arith.divf %3, %4 : vector<1x1x128xf32>
    %c0_3 = arith.constant 0 : index
    %c0_4 = arith.constant 0 : index
    %c0_5 = arith.constant 0 : index
    %6 = vector.load %arg2[%c0_3, %c0_4, %c0_5] : memref<1x1x128xf32, #tpu.memory_space<vmem>>, vector<1x1x128xf32>
    tpu.vector_store %arg2[%c0_3, %c0_4, %c0_5], %5 {strides = array<i32>} : memref<1x1x128xf32, #tpu.memory_space<vmem>>, vector<1x1x128xf32>,
    return
  }
  func.func @transform_0(%arg0: i32) -> (i32, i32, i32) {
    %c0_i32 = arith.constant 0 : i32
    %c0_i32_0 = arith.constant 0 : i32
    %c0_i32_1 = arith.constant 0 : i32
    return %arg0, %c0_i32, %c0_i32_0 : i32, i32, i32
  }
  func.func @transform_1(%arg0: i32) -> (i32, i32, i32) {
    %c0_i32 = arith.constant 0 : i32
    %c0_i32_0 = arith.constant 0 : i32
    %c0_i32_1 = arith.constant 0 : i32
    return %arg0, %c0_i32, %c0_i32_0 : i32, i32, i32
  }
}

module attributes {stable_mosaic.version = 11 : i64} {
  func.func @_mm1_kernel(%arg0: i32, %arg1: memref<8x128xbf16, #tpu.memory_space<vmem>>, %arg2: memref<128x32xbf16, #tpu.memory_space<vmem>>, %arg3: memref<1x32xf32, #tpu.memory_space<vmem>>, %arg4: memref<1x32xf32, #tpu.memory_space<vmem>>, %arg5: memref<8x32xbf16, #tpu.memory_space<vmem>>) attributes {dimension_semantics = [#tpu.dimension_semantics<parallel>], iteration_bounds = array<i64: 1>, scalar_prefetch = 0 : i64, scratch_operands = 0 : i64, tpu.core_type = #tpu.core_type<tc>, window_params = [{transform_indices = @transform_0, window_bounds = array<i64: 8, 128>}, {pipeline_mode = #tpu.pipeline_mode<synchronous>, transform_indices = @transform_1, window_bounds = array<i64: 128, 32>}, {pipeline_mode = #tpu.pipeline_mode<synchronous>, transform_indices = @transform_2, window_bounds = array<i64: 1, 32>}, {pipeline_mode = #tpu.pipeline_mode<synchronous>, transform_indices = @transform_3, window_bounds = array<i64: 1, 32>}, {transform_indices = @transform_4, window_bounds = array<i64: 8, 32>}]} {
    %c0 = arith.constant 0 : index
    %c0_0 = arith.constant 0 : index
    %0 = vector.load %arg1[%c0, %c0_0] : memref<8x128xbf16, #tpu.memory_space<vmem>>, vector<8x128xbf16>
    %c0_1 = arith.constant 0 : index
    %c0_2 = arith.constant 0 : index
    %1 = vector.load %arg2[%c0_1, %c0_2] : memref<128x32xbf16, #tpu.memory_space<vmem>>, vector<128x32xbf16>
    %cst = arith.constant dense<0.000000e+00> : vector<8x32xf32>
    %2 = tpu.matmul %0, %1, %cst {dimension_numbers = #tpu.dot_dimension_numbers<[1], [0], [0], [1], [0, 0, 1, 1], [], []>} : vector<8x128xbf16>, vector<128x32xbf16>, vector<8x32xf32> -> vector<8x32xf32>
    %c0_3 = arith.constant 0 : index
    %c0_4 = arith.constant 0 : index
    %3 = vector.load %arg3[%c0_3, %c0_4] : memref<1x32xf32, #tpu.memory_space<vmem>>, vector<1x32xf32>
    %4 = vector.broadcast %3 : vector<1x32xf32> to vector<8x32xf32>
    %5 = arith.mulf %2, %4 : vector<8x32xf32>
    %c0_5 = arith.constant 0 : index
    %c0_6 = arith.constant 0 : index
    %6 = vector.load %arg4[%c0_5, %c0_6] : memref<1x32xf32, #tpu.memory_space<vmem>>, vector<1x32xf32>
    %7 = vector.broadcast %6 : vector<1x32xf32> to vector<8x32xf32>
    %8 = arith.addf %5, %7 : vector<8x32xf32>
    %cst_7 = arith.constant 0.000000e+00 : f32
    %9 = vector.broadcast %cst_7 : f32 to vector<8x32xf32>
    %10 = arith.maximumf %8, %9 : vector<8x32xf32>
    %11 = arith.truncf %10 : vector<8x32xf32> to vector<8x32xbf16>
    %c0_8 = arith.constant 0 : index
    %c0_9 = arith.constant 0 : index
    %12 = vector.load %arg5[%c0_8, %c0_9] : memref<8x32xbf16, #tpu.memory_space<vmem>>, vector<8x32xbf16>
    tpu.vector_store %arg5[%c0_8, %c0_9], %11 {strides = array<i32>} : memref<8x32xbf16, #tpu.memory_space<vmem>>, vector<8x32xbf16>,
    return
  }
  func.func @transform_0(%arg0: i32) -> (i32, i32) {
    %c0_i32 = arith.constant 0 : i32
    %c0_i32_0 = arith.constant 0 : i32
    return %arg0, %c0_i32 : i32, i32
  }
  func.func @transform_1(%arg0: i32) -> (i32, i32) {
    %c0_i32 = arith.constant 0 : i32
    %c0_i32_0 = arith.constant 0 : i32
    %c0_i32_1 = arith.constant 0 : i32
    return %c0_i32, %c0_i32_0 : i32, i32
  }
  func.func @transform_2(%arg0: i32) -> (i32, i32) {
    %c0_i32 = arith.constant 0 : i32
    %c0_i32_0 = arith.constant 0 : i32
    %c0_i32_1 = arith.constant 0 : i32
    return %c0_i32, %c0_i32_0 : i32, i32
  }
  func.func @transform_3(%arg0: i32) -> (i32, i32) {
    %c0_i32 = arith.constant 0 : i32
    %c0_i32_0 = arith.constant 0 : i32
    %c0_i32_1 = arith.constant 0 : i32
    return %c0_i32, %c0_i32_0 : i32, i32
  }
  func.func @transform_4(%arg0: i32) -> (i32, i32) {
    %c0_i32 = arith.constant 0 : i32
    %c0_i32_0 = arith.constant 0 : i32
    return %arg0, %c0_i32 : i32, i32
  }
}

module attributes {stable_mosaic.version = 11 : i64} {
  func.func @_mm1_kernel(%arg0: i32, %arg1: memref<8x32xbf16, #tpu.memory_space<vmem>>, %arg2: memref<32x10xbf16, #tpu.memory_space<vmem>>, %arg3: memref<1x10xf32, #tpu.memory_space<vmem>>, %arg4: memref<1x10xf32, #tpu.memory_space<vmem>>, %arg5: memref<8x10xf32, #tpu.memory_space<vmem>>) attributes {dimension_semantics = [#tpu.dimension_semantics<parallel>], iteration_bounds = array<i64: 1>, scalar_prefetch = 0 : i64, scratch_operands = 0 : i64, tpu.core_type = #tpu.core_type<tc>, window_params = [{transform_indices = @transform_0, window_bounds = array<i64: 8, 32>}, {pipeline_mode = #tpu.pipeline_mode<synchronous>, transform_indices = @transform_1, window_bounds = array<i64: 32, 10>}, {pipeline_mode = #tpu.pipeline_mode<synchronous>, transform_indices = @transform_2, window_bounds = array<i64: 1, 10>}, {pipeline_mode = #tpu.pipeline_mode<synchronous>, transform_indices = @transform_3, window_bounds = array<i64: 1, 10>}, {transform_indices = @transform_4, window_bounds = array<i64: 8, 10>}]} {
    %c0 = arith.constant 0 : index
    %c0_0 = arith.constant 0 : index
    %0 = vector.load %arg1[%c0, %c0_0] : memref<8x32xbf16, #tpu.memory_space<vmem>>, vector<8x32xbf16>
    %c0_1 = arith.constant 0 : index
    %c0_2 = arith.constant 0 : index
    %1 = vector.load %arg2[%c0_1, %c0_2] : memref<32x10xbf16, #tpu.memory_space<vmem>>, vector<32x10xbf16>
    %cst = arith.constant dense<0.000000e+00> : vector<8x10xf32>
    %2 = tpu.matmul %0, %1, %cst {dimension_numbers = #tpu.dot_dimension_numbers<[1], [0], [0], [1], [0, 0, 1, 1], [], []>} : vector<8x32xbf16>, vector<32x10xbf16>, vector<8x10xf32> -> vector<8x10xf32>
    %c0_3 = arith.constant 0 : index
    %c0_4 = arith.constant 0 : index
    %3 = vector.load %arg3[%c0_3, %c0_4] : memref<1x10xf32, #tpu.memory_space<vmem>>, vector<1x10xf32>
    %4 = vector.broadcast %3 : vector<1x10xf32> to vector<8x10xf32>
    %5 = arith.mulf %2, %4 : vector<8x10xf32>
    %c0_5 = arith.constant 0 : index
    %c0_6 = arith.constant 0 : index
    %6 = vector.load %arg4[%c0_5, %c0_6] : memref<1x10xf32, #tpu.memory_space<vmem>>, vector<1x10xf32>
    %7 = vector.broadcast %6 : vector<1x10xf32> to vector<8x10xf32>
    %8 = arith.addf %5, %7 : vector<8x10xf32>
    %c0_7 = arith.constant 0 : index
    %c0_8 = arith.constant 0 : index
    %9 = vector.load %arg5[%c0_7, %c0_8] : memref<8x10xf32, #tpu.memory_space<vmem>>, vector<8x10xf32>
    tpu.vector_store %arg5[%c0_7, %c0_8], %8 {strides = array<i32>} : memref<8x10xf32, #tpu.memory_space<vmem>>, vector<8x10xf32>,
    return
  }
  func.func @transform_0(%arg0: i32) -> (i32, i32) {
    %c0_i32 = arith.constant 0 : i32
    %c0_i32_0 = arith.constant 0 : i32
    return %arg0, %c0_i32 : i32, i32
  }
  func.func @transform_1(%arg0: i32) -> (i32, i32) {
    %c0_i32 = arith.constant 0 : i32
    %c0_i32_0 = arith.constant 0 : i32
    %c0_i32_1 = arith.constant 0 : i32
    return %c0_i32, %c0_i32_0 : i32, i32
  }
  func.func @transform_2(%arg0: i32) -> (i32, i32) {
    %c0_i32 = arith.constant 0 : i32
    %c0_i32_0 = arith.constant 0 : i32
    %c0_i32_1 = arith.constant 0 : i32
    return %c0_i32, %c0_i32_0 : i32, i32
  }
  func.func @transform_3(%arg0: i32) -> (i32, i32) {
    %c0_i32 = arith.constant 0 : i32
    %c0_i32_0 = arith.constant 0 : i32
    %c0_i32_1 = arith.constant 0 : i32
    return %c0_i32, %c0_i32_0 : i32, i32
  }
  func.func @transform_4(%arg0: i32) -> (i32, i32) {
    %c0_i32 = arith.constant 0 : i32
    %c0_i32_0 = arith.constant 0 : i32
    return %arg0, %c0_i32 : i32, i32
  }
}

</mosaic_0001>

<bundles_post_ra>
// kernel: _lambda_.21
= control target key start
LH: loop header
LB: loop body
LE: loop exit
PB: predicated region body
PF: predicated region fallthrough
CT: control target
= control target key end

     0   :  { %s2029_s15 = smov 0   ;;  %s2446_s0 = inlined_call_operand.vmem [shape: bf16[2048,147], index: 0, kind: input, shape index: {}]   ;;  %s2447_s1 = inlined_call_operand.vmem [shape: bf16[147,64], index: 1, kind: input, shape index: {}]   ;;  %s2448_s2 = inlined_call_operand.vmem [shape: f32[1,64], index: 2, kind: input, shape index: {}]   ;;  %s2449_s3 = inlined_call_operand.vmem [shape: f32[1,64], index: 3, kind: input, shape index: {}]   ;;  %s2450_s4 = inlined_call_operand.vmem [shape: bf16[2048,64], index: 4, kind: output, shape index: {}]  }
   0x1 LB: > { %s1609_s16 = sadd.s32 4294967295, %s2000_s15   ;;  %p1613_p0 = scmp.ge.s32.totalorder %s2000_s15, 1  ;;  %s2000_s15 = sphi %s2029_s15, %s14_s15  }
   0x2   : > { %p164_p1 = scmp.lt.s32.totalorder %s2000_s15, 5 }
   0x4   : > { %p165_p2 = pnand %p1613_p0, %p164_p1 }
   0x5   : > { %s1614_s23 = sshll.u32 (!%p165_p2), %s1609_s16, 6 }
   0x6   : > { %168 = sbr.rel (%p165_p2) target bundleno = 378 (0x17a), region = 36  ;;  %p192_p3 = scmp.lt.s32.totalorder (!%p165_p2), %s1614_s23, 255 }
   0xb   : > { %v1888_v0 = vld [vmem:[%s2447_s1 + $0x38] sm:$0xff]   ;;  %v2002_v1 = vmov 0   ;;  %v1889_v2 = vld [vmem:[%s2447_s1 + $0x30] sm:$0xff]   ;;  %v1890_v3 = vld [vmem:[%s2447_s1 + $0x28] sm:$0xff]   ;;  %s2452_s23 = smov (!%p192_p3, %s1614_s23), 255  ;;  %vm633_vm0 = vcmask 154624  }
   0xc   : > { %737 = vmatprep.subr.bf16.mxu0 %v2002_v1  ;;  %1858 = vmatprep.subr.bf16.mxu1 %v2002_v1  ;;  %v1891_v4 = vld [vmem:[%s2447_s1 + $0x20] sm:$0xff]   ;;  %s1793_s26 = sshll.u32 %s2452_s23, 3  ;;  %v1892_v5 = vld [vmem:[%s2447_s1 + $0x18] sm:$0xff]   ;;  %v1893_v8 = vld [vmem:[%s2447_s1 + $0x10] sm:$0xff]   ;;  %vm730_vm1 = vcmask 1040384   ;;  %vm731_vm2 = vcmask 1041408  }
   0xd   : > { %738 = vmatpush1.bf16.msra.mxu0 %v1888_v0  ;;  %1868 = vmatpush1.bf16.msra.mxu1 %v1888_v0  ;;  %s2055_s29 = scalar_lea.vmem %s2446_s0, %s1793_s26  ;;  %v1894_v9 = vld [vmem:[%s2447_s1 + $0x8] sm:$0xff]   ;;  %v2003_v10 = vmov 65535   ;;  %v1895_v12 = vld [vmem:[%s2447_s1] sm:$0xff]   ;;  %s1618_s21 = sshll.u32 %s2452_s23, 2  ;;  %vm1488_vm3 = vcmask 519168  }
   0xe   : > { %739 = vmatprep.subr.bf16.mxu0 %v2002_v1  ;;  %1859 = vmatprep.subr.bf16.mxu1 %v2002_v1  ;;  %v1900_v6 = vld [vmem:[%s2055_s29 + $0x4] ss:$8 sps:$4 sm:$0xff]   ;;  %v732_v11 = vsel %vm730_vm1, 4294967295, %v2003_v10  ;;  %v1896_v13 = vld [vmem:[%s2447_s1 + $0x48] ss:$0 sps:$4 sm:$0x33]   ;;  %s2191_s25 = scalar_lea.vmem %s2450_s4, %s1618_s21 }
   0xf   : > { %v1903_v7 = vld [vmem:[%s2055_s29 + $0x104] ss:$8 sps:$4 sm:$0xff]   ;;  %1693 = vmatprep.mubr.msk.bf16.mxu0 %vm633_vm0, %v1900_v6  ;;  %v733_v14 = vsel %vm731_vm2, %v732_v11, 0  ;;  %v1898_v17 = vld [vmem:[%s2055_s29] ss:$8 sps:$4 sm:$0xff]  }
  0x10   : > { %1709 = vmatprep.mubr.msk.bf16.mxu1 %vm633_vm0, %v1903_v7  ;;  %v735_v15 = vand.u32 %v1896_v13, %v733_v14  ;;  %v1897_v16 = vld [vmem:[%s2447_s1 + $0x40] sm:$0xff]   ;;  %v1904_v19 = vld [vmem:[%s2055_s29 + $0x14] ss:$8 sps:$4 sm:$0xff]   ;;  %v1908_v21 = vld [vmem:[%s2055_s29 + $0x10] ss:$8 sps:$4 sm:$0xff]  }
  0x11   : > { %740 = vmatpush1.bf16.msra.mxu0 %v1889_v2  ;;  %1869 = vmatpush1.bf16.msra.mxu1 %v1889_v2  ;;  %v1901_v18 = vld [vmem:[%s2055_s29 + $0x100] ss:$8 sps:$4 sm:$0xff]   ;;  %v1906_v20 = vld [vmem:[%s2055_s29 + $0x114] ss:$8 sps:$4 sm:$0xff]   ;;  %v1909_v22 = vld [vmem:[%s2055_s29 + $0x110] ss:$8 sps:$4 sm:$0xff]  }
  0x12   : > { %741 = vmatprep.subr.bf16.mxu0 %v2002_v1  ;;  %1860 = vmatprep.subr.bf16.mxu1 %v2002_v1  ;;  %v1910_v23 = vld [vmem:[%s2055_s29 + $0x24] ss:$8 sps:$4 sm:$0xff]   ;;  %v1914_v25 = vld [vmem:[%s2055_s29 + $0x20] ss:$8 sps:$4 sm:$0xff]   ;;  %v1916_v27 = vld [vmem:[%s2055_s29 + $0x34] ss:$8 sps:$4 sm:$0xff]  }
  0x13   : > { %v1912_v24 = vld [vmem:[%s2055_s29 + $0x124] ss:$8 sps:$4 sm:$0xff]   ;;  %v1915_v26 = vld [vmem:[%s2055_s29 + $0x120] ss:$8 sps:$4 sm:$0xff]   ;;  %v1918_v28 = vld [vmem:[%s2055_s29 + $0x134] ss:$8 sps:$4 sm:$0xff]  }
  0x14   : > { %v1920_v29 = vld [vmem:[%s2055_s29 + $0x30] ss:$8 sps:$4 sm:$0xff]   ;;  %v1922_v31 = vld [vmem:[%s2055_s29 + $0x44] ss:$8 sps:$4 sm:$0xff]   ;;  %v1926_v33 = vld [vmem:[%s2055_s29 + $0x40] ss:$8 sps:$4 sm:$0xff]  }
  0x15   : > { %742 = vmatpush1.bf16.msra.mxu0 %v1890_v3  ;;  %1870 = vmatpush1.bf16.msra.mxu1 %v1890_v3  ;;  %v1921_v30 = vld [vmem:[%s2055_s29 + $0x130] ss:$8 sps:$4 sm:$0xff]   ;;  %v1924_v32 = vld [vmem:[%s2055_s29 + $0x144] ss:$8 sps:$4 sm:$0xff]   ;;  %v1927_v34 = vld [vmem:[%s2055_s29 + $0x140] ss:$8 sps:$4 sm:$0xff]  }
  0x16   : > { %743 = vmatprep.subr.bf16.mxu0 %v2002_v1  ;;  %1861 = vmatprep.subr.bf16.mxu1 %v2002_v1  ;;  %v1928_v35 = vld [vmem:[%s2055_s29 + $0x54] ss:$8 sps:$4 sm:$0xff]   ;;  %v1932_v37 = vld [vmem:[%s2055_s29 + $0x50] ss:$8 sps:$4 sm:$0xff]   ;;  %v1934_v39 = vld [vmem:[%s2055_s29 + $0x64] ss:$8 sps:$4 sm:$0xff]  }
  0x17   : > { %v1930_v36 = vld [vmem:[%s2055_s29 + $0x154] ss:$8 sps:$4 sm:$0xff]   ;;  %v1933_v38 = vld [vmem:[%s2055_s29 + $0x150] ss:$8 sps:$4 sm:$0xff]   ;;  %v1936_v40 = vld [vmem:[%s2055_s29 + $0x164] ss:$8 sps:$4 sm:$0xff]  }
  0x18   : > { %v1938_v41 = vld [vmem:[%s2055_s29 + $0x60] ss:$8 sps:$4 sm:$0xff]   ;;  %v1940_v43 = vld [vmem:[%s2055_s29 + $0x74] ss:$8 sps:$4 sm:$0xff]   ;;  %v1944_v45 = vld [vmem:[%s2055_s29 + $0x70] ss:$8 sps:$4 sm:$0xff]  }
  0x19   : > { %744 = vmatpush1.bf16.msra.mxu0 %v1891_v4  ;;  %1871 = vmatpush1.bf16.msra.mxu1 %v1891_v4  ;;  %v1939_v42 = vld [vmem:[%s2055_s29 + $0x160] ss:$8 sps:$4 sm:$0xff]   ;;  %v1942_v44 = vld [vmem:[%s2055_s29 + $0x174] ss:$8 sps:$4 sm:$0xff]   ;;  %v1945_v46 = vld [vmem:[%s2055_s29 + $0x170] ss:$8 sps:$4 sm:$0xff]  }
  0x1a   : > { %745 = vmatprep.subr.bf16.mxu0 %v2002_v1  ;;  %1862 = vmatprep.subr.bf16.mxu1 %v2002_v1  ;;  %v1946_v47 = vld [vmem:[%s2055_s29 + $0x84] ss:$8 sps:$4 sm:$0xff]   ;;  %v1950_v49 = vld [vmem:[%s2055_s29 + $0x80] ss:$8 sps:$4 sm:$0xff]   ;;  %v1952_v51 = vld [vmem:[%s2055_s29 + $0x94] ss:$8 sps:$4 sm:$0xff]  }
  0x1b   : > { %v1948_v48 = vld [vmem:[%s2055_s29 + $0x184] ss:$8 sps:$4 sm:$0xff]   ;;  %v1951_v50 = vld [vmem:[%s2055_s29 + $0x180] ss:$8 sps:$4 sm:$0xff]   ;;  %v1954_v52 = vld [vmem:[%s2055_s29 + $0x194] ss:$8 sps:$4 sm:$0xff]  }
  0x1c   : > { %v1956_v53 = vld [vmem:[%s2055_s29 + $0x90] ss:$8 sps:$4 sm:$0xff]   ;;  %v1958_v55 = vld [vmem:[%s2055_s29 + $0xa4] ss:$8 sps:$4 sm:$0xff]   ;;  %v1962_v57 = vld [vmem:[%s2055_s29 + $0xa0] ss:$8 sps:$4 sm:$0xff]  }
  0x1d   : > { %746 = vmatpush1.bf16.msra.mxu0 %v1892_v5  ;;  %1872 = vmatpush1.bf16.msra.mxu1 %v1892_v5  ;;  %v1957_v54 = vld [vmem:[%s2055_s29 + $0x190] ss:$8 sps:$4 sm:$0xff]   ;;  %v1960_v56 = vld [vmem:[%s2055_s29 + $0x1a4] ss:$8 sps:$4 sm:$0xff]   ;;  %v1963_v58 = vld [vmem:[%s2055_s29 + $0x1a0] ss:$8 sps:$4 sm:$0xff]  }
  0x1e   : > { %747 = vmatprep.subr.bf16.mxu0 %v2002_v1  ;;  %1863 = vmatprep.subr.bf16.mxu1 %v2002_v1  ;;  %v1964_v59 = vld [vmem:[%s2055_s29 + $0xb4] ss:$8 sps:$4 sm:$0xff]   ;;  %v1968_v61 = vld [vmem:[%s2055_s29 + $0xb0] ss:$8 sps:$4 sm:$0xff]   ;;  %v1970_v63 = vld [vmem:[%s2055_s29 + $0xc4] ss:$8 sps:$4 sm:$0xff]  }
  0x1f   : > { %v1966_v60 = vld [vmem:[%s2055_s29 + $0x1b4] ss:$8 sps:$4 sm:$0xff]   ;;  %v1969_v62 = vld [vmem:[%s2055_s29 + $0x1b0] ss:$8 sps:$4 sm:$0xff]   ;;  %v1972_v0 = vld [vmem:[%s2055_s29 + $0x1c4] ss:$8 sps:$4 sm:$0xff]  }
  0x20   : > { %v1975_v2 = vld [vmem:[%s2055_s29 + $0x1c0] ss:$8 sps:$4 sm:$0xff]   ;;  %v1976_v3 = vld [vmem:[%s2055_s29 + $0xd4] ss:$8 sps:$4 sm:$0xff]   ;;  %v1980_v5 = vld [vmem:[%s2055_s29 + $0xd0] ss:$8 sps:$4 sm:$0xff]  }
  0x21   : > { %748 = vmatpush1.bf16.msra.mxu0 %v1893_v8  ;;  %1873 = vmatpush1.bf16.msra.mxu1 %v1893_v8  ;;  %v1978_v4 = vld [vmem:[%s2055_s29 + $0x1d4] ss:$8 sps:$4 sm:$0xff]   ;;  %v1981_v6 = vld [vmem:[%s2055_s29 + $0x1d0] ss:$8 sps:$4 sm:$0xff]   ;;  %v1982_v7 = vld [vmem:[%s2055_s29 + $0xe4] ss:$8 sps:$4 sm:$0xff]  }
  0x22   : > { %749 = vmatprep.subr.bf16.mxu0 %v2002_v1  ;;  %1864 = vmatprep.subr.bf16.mxu1 %v2002_v1  ;;  %v1984_v8 = vld [vmem:[%s2055_s29 + $0x1e4] ss:$8 sps:$4 sm:$0xff]   ;;  %v1987_v10 = vld [vmem:[%s2055_s29 + $0x1e0] ss:$8 sps:$4 sm:$0xff]   ;;  %v1988_v11 = vld [vmem:[%s2055_s29 + $0xf4] ss:$8 sps:$4 sm:$0xff]  }
  0x23   : > { %v1992_v13 = vld [vmem:[%s2055_s29 + $0xf0] ss:$8 sps:$4 sm:$0xff]  }
  0x24   : > { %v1993_v14 = vld [vmem:[%s2055_s29 + $0x1f0] ss:$8 sps:$4 sm:$0xff]  }
  0x25   : > { %750 = vmatpush1.bf16.msra.mxu0 %v1894_v9  ;;  %1874 = vmatpush1.bf16.msra.mxu1 %v1894_v9  ;;  %v1986_v9 = vld [vmem:[%s2055_s29 + $0xe0] ss:$8 sps:$4 sm:$0xff]  }
  0x26   : > { %751 = vmatprep.subr.bf16.mxu0 %v2002_v1  ;;  %1865 = vmatprep.subr.bf16.mxu1 %v2002_v1 }
  0x29   : > { %752 = vmatpush1.bf16.msra.mxu0 %v1895_v12  ;;  %1875 = vmatpush1.bf16.msra.mxu1 %v1895_v12  ;;  %v1990_v12 = vld [vmem:[%s2055_s29 + $0x1f4] ss:$8 sps:$4 sm:$0xff]  }
  0x2a   : > { %765 = vmatprep.subr.bf16.mxu0 %v2002_v1  ;;  %1866 = vmatprep.subr.bf16.mxu1 %v2002_v1 }
  0x2d   : > { %766 = vmatpush2.bf16.msra.mxu0 %v735_v15  ;;  %1876 = vmatpush2.bf16.msra.mxu1 %v735_v15  ;;  %v2174_v15 = vld [vmem:[%s2448_s2] ss:$0 sm:$0xff] }
  0x2e   : > { %767 = vmatprep.subr.bf16.mxu0 %v2002_v1  ;;  %1867 = vmatprep.subr.bf16.mxu1 %v2002_v1  ;;  %v1974_v1 = vld [vmem:[%s2055_s29 + $0xc0] ss:$8 sps:$4 sm:$0xff]  }
  0x31   : > { %768 = vmatpush2.bf16.msra.mxu0 %v1897_v16  ;;  %1877 = vmatpush2.bf16.msra.mxu1 %v1897_v16 }
  0x34   : > { %770 = vmatmul.mubr.bf16.vlgmr.msra.gmra.mxu0 %v1898_v17  ;;  %898 = vmatmul.mubr.bf16.vlgmr.msra.gmra.mxu1 %v1901_v18  ;;  %v2179_v17 = vld [vmem:[%s2449_s3] ss:$0 sm:$0xff] }
  0x35   : > { %1694 = vmatprep.mubr.msk.bf16.mxu0 %vm633_vm0, %v1904_v19  ;;  %1710 = vmatprep.mubr.msk.bf16.mxu1 %vm633_vm0, %v1906_v20 }
  0x3c   : > { %778 = vmatmul.mubr.bf16.gmra.mxu0 %v1908_v21  ;;  %906 = vmatmul.mubr.bf16.gmra.mxu1 %v1909_v22 }
  0x3d   : > { %1695 = vmatprep.mubr.msk.bf16.mxu0 %vm633_vm0, %v1910_v23  ;;  %1711 = vmatprep.mubr.msk.bf16.mxu1 %vm633_vm0, %v1912_v24 }
  0x44   : > { %786 = vmatmul.mubr.bf16.gmra.mxu0 %v1914_v25  ;;  %914 = vmatmul.mubr.bf16.gmra.mxu1 %v1915_v26 }
  0x45   : > { %1696 = vmatprep.mubr.msk.bf16.mxu0 %vm633_vm0, %v1916_v27  ;;  %1712 = vmatprep.mubr.msk.bf16.mxu1 %vm633_vm0, %v1918_v28 }
  0x4c   : > { %794 = vmatmul.mubr.bf16.gmra.mxu0 %v1920_v29  ;;  %922 = vmatmul.mubr.bf16.gmra.mxu1 %v1921_v30 }
  0x4d   : > { %1697 = vmatprep.mubr.msk.bf16.mxu0 %vm633_vm0, %v1922_v31  ;;  %1713 = vmatprep.mubr.msk.bf16.mxu1 %vm633_vm0, %v1924_v32 }
  0x54   : > { %802 = vmatmul.mubr.bf16.gmra.mxu0 %v1926_v33  ;;  %930 = vmatmul.mubr.bf16.gmra.mxu1 %v1927_v34 }
  0x55   : > { %1698 = vmatprep.mubr.msk.bf16.mxu0 %vm633_vm0, %v1928_v35  ;;  %1714 = vmatprep.mubr.msk.bf16.mxu1 %vm633_vm0, %v1930_v36 }
  0x5c   : > { %810 = vmatmul.mubr.bf16.gmra.mxu0 %v1932_v37  ;;  %938 = vmatmul.mubr.bf16.gmra.mxu1 %v1933_v38 }
  0x5d   : > { %1699 = vmatprep.mubr.msk.bf16.mxu0 %vm633_vm0, %v1934_v39  ;;  %1715 = vmatprep.mubr.msk.bf16.mxu1 %vm633_vm0, %v1936_v40 }
  0x64   : > { %818 = vmatmul.mubr.bf16.gmra.mxu0 %v1938_v41  ;;  %946 = vmatmul.mubr.bf16.gmra.mxu1 %v1939_v42 }
  0x65   : > { %1700 = vmatprep.mubr.msk.bf16.mxu0 %vm633_vm0, %v1940_v43  ;;  %1716 = vmatprep.mubr.msk.bf16.mxu1 %vm633_vm0, %v1942_v44 }
  0x6c   : > { %826 = vmatmul.mubr.bf16.gmra.mxu0 %v1944_v45  ;;  %954 = vmatmul.mubr.bf16.gmra.mxu1 %v1945_v46 }
  0x6d   : > { %1701 = vmatprep.mubr.msk.bf16.mxu0 %vm633_vm0, %v1946_v47  ;;  %1717 = vmatprep.mubr.msk.bf16.mxu1 %vm633_vm0, %v1948_v48 }
  0x74   : > { %834 = vmatmul.mubr.bf16.gmra.mxu0 %v1950_v49  ;;  %962 = vmatmul.mubr.bf16.gmra.mxu1 %v1951_v50 }
  0x75   : > { %1702 = vmatprep.mubr.msk.bf16.mxu0 %vm633_vm0, %v1952_v51  ;;  %1718 = vmatprep.mubr.msk.bf16.mxu1 %vm633_vm0, %v1954_v52 }
  0x7c   : > { %842 = vmatmul.mubr.bf16.gmra.mxu0 %v1956_v53  ;;  %970 = vmatmul.mubr.bf16.gmra.mxu1 %v1957_v54 }
  0x7d   : > { %1703 = vmatprep.mubr.msk.bf16.mxu0 %vm633_vm0, %v1958_v55  ;;  %1719 = vmatprep.mubr.msk.bf16.mxu1 %vm633_vm0, %v1960_v56 }
  0x84   : > { %850 = vmatmul.mubr.bf16.gmra.mxu0 %v1962_v57  ;;  %978 = vmatmul.mubr.bf16.gmra.mxu1 %v1963_v58 }
  0x85   : > { %1704 = vmatprep.mubr.msk.bf16.mxu0 %vm633_vm0, %v1964_v59  ;;  %1720 = vmatprep.mubr.msk.bf16.mxu1 %vm633_vm0, %v1966_v60 }
  0x8c   : > { %858 = vmatmul.mubr.bf16.gmra.mxu0 %v1968_v61  ;;  %986 = vmatmul.mubr.bf16.gmra.mxu1 %v1969_v62 }
  0x8d   : > { %1705 = vmatprep.mubr.msk.bf16.mxu0 %vm633_vm0, %v1970_v63  ;;  %1721 = vmatprep.mubr.msk.bf16.mxu1 %vm633_vm0, %v1972_v0 }
  0x94   : > { %866 = vmatmul.mubr.bf16.gmra.mxu0 %v1974_v1  ;;  %994 = vmatmul.mubr.bf16.gmra.mxu1 %v1975_v2 }
  0x95   : > { %1706 = vmatprep.mubr.msk.bf16.mxu0 %vm633_vm0, %v1976_v3  ;;  %1722 = vmatprep.mubr.msk.bf16.mxu1 %vm633_vm0, %v1978_v4 }
  0x9c   : > { %874 = vmatmul.mubr.bf16.gmra.mxu0 %v1980_v5  ;;  %1002 = vmatmul.mubr.bf16.gmra.mxu1 %v1981_v6 }
  0x9d   : > { %1707 = vmatprep.mubr.msk.bf16.mxu0 %vm633_vm0, %v1982_v7  ;;  %1723 = vmatprep.mubr.msk.bf16.mxu1 %vm633_vm0, %v1984_v8 }
  0xa4   : > { %882 = vmatmul.mubr.bf16.gmra.mxu0 %v1986_v9  ;;  %1010 = vmatmul.mubr.bf16.gmra.mxu1 %v1987_v10 }
  0xa5   : > { %1708 = vmatprep.mubr.msk.bf16.mxu0 %vm633_vm0, %v1988_v11  ;;  %1724 = vmatprep.mubr.msk.bf16.mxu1 %vm633_vm0, %v1990_v12 }
  0xac   : > { %890 = vmatmul.mubr.bf16.gmra.mxu0 %v1992_v13  ;;  %1018 = vmatmul.mubr.bf16.gmra.mxu1 %v1993_v14 }
  0xf4   : > { %v771_v16 = vpop.f32.mrf.mxu0  ;;  %v899_v18 = vpop.f32.mrf.mxu1 }
  0xf5   : > { %v1033_v19 = vmul.f32 %v2174_v15, %v771_v16  ;;  %v1065_v20 = vmul.f32 %v2174_v15, %v899_v18 }
  0xf6   : > { %v773_v21 = vpop.f32.mrf.mxu0  ;;  %v901_v22 = vpop.f32.mrf.mxu1 }
  0xf7   : > { %v1104_v23 = vadd.f32 %v2179_v17, %v1033_v19  ;;  %v1136_v24 = vadd.f32 %v2179_v17, %v1065_v20 }
  0xf8   : > { %v774_v25 = vpop.f32.mrf.mxu0  ;;  %v902_v26 = vpop.f32.mrf.mxu1 }
  0xf9   : > { %v1168_v27 = vmax.f32 %v1104_v23, 0.0  ;;  %v1200_v28 = vmax.f32 %v1136_v24, 0.0  ;;  %v1034_v29 = vmul.f32 %v2174_v15, %v774_v25  ;;  %v1066_v30 = vmul.f32 %v2174_v15, %v902_v26 }
  0xfa   : > { %v776_v31 = vpop.f32.mrf.mxu0  ;;  %v904_v32 = vpop.f32.mrf.mxu1 }
  0xfb   : > { %v1794_v33 = vpack.c.bf16 %v1168_v27, %v1168_v27  ;;  %v1826_v34 = vpack.c.bf16 %v1200_v28, %v1200_v28  ;;  %v1105_v35 = vadd.f32 %v2179_v17, %v1034_v29  ;;  %v1137_v36 = vadd.f32 %v2179_v17, %v1066_v30 }
  0xfc   : > { %v779_v37 = vpop.f32.mrf.mxu0  ;;  %v907_v38 = vpop.f32.mrf.mxu1 }
  0xfd   : > { %1489 = vst.msk [vmem:[%s2191_s25] sm:$0xf] %vm1488_vm3, %v1794_v33  ;;  %1521 = vst.msk [vmem:[%s2191_s25 + $0x80] sm:$0xf] %vm1488_vm3, %v1826_v34  ;;  %v1169_v39 = vmax.f32 %v1105_v35, 0.0  ;;  %v1201_v40 = vmax.f32 %v1137_v36, 0.0  ;;  %v1035_v41 = vmul.f32 %v2174_v15, %v779_v37  ;;  %v1067_v42 = vmul.f32 %v2174_v15, %v907_v38 }
  0xfe   : > { %v781_v43 = vpop.f32.mrf.mxu0  ;;  %v909_v44 = vpop.f32.mrf.mxu1 }
  0xff   : > { %v1795_v45 = vpack.c.bf16 %v1169_v39, %v1169_v39  ;;  %v1827_v46 = vpack.c.bf16 %v1201_v40, %v1201_v40  ;;  %v1106_v47 = vadd.f32 %v2179_v17, %v1035_v41  ;;  %v1138_v48 = vadd.f32 %v2179_v17, %v1067_v42 }
 0x100   : > { %v782_v49 = vpop.f32.mrf.mxu0  ;;  %v910_v50 = vpop.f32.mrf.mxu1 }
 0x101   : > { %1490 = vst.msk [vmem:[%s2191_s25 + $0x4] sm:$0xf] %vm1488_vm3, %v1795_v45  ;;  %1522 = vst.msk [vmem:[%s2191_s25 + $0x84] sm:$0xf] %vm1488_vm3, %v1827_v46  ;;  %v1170_v51 = vmax.f32 %v1106_v47, 0.0  ;;  %v1202_v52 = vmax.f32 %v1138_v48, 0.0  ;;  %v1036_v53 = vmul.f32 %v2174_v15, %v782_v49  ;;  %v1068_v54 = vmul.f32 %v2174_v15, %v910_v50 }
 0x102   : > { %v784_v55 = vpop.f32.mrf.mxu0  ;;  %v912_v56 = vpop.f32.mrf.mxu1 }
 0x103   : > { %v1796_v57 = vpack.c.bf16 %v1170_v51, %v1170_v51  ;;  %v1828_v58 = vpack.c.bf16 %v1202_v52, %v1202_v52  ;;  %v1107_v59 = vadd.f32 %v2179_v17, %v1036_v53  ;;  %v1139_v60 = vadd.f32 %v2179_v17, %v1068_v54 }
 0x104   : > { %v787_v61 = vpop.f32.mrf.mxu0  ;;  %v915_v62 = vpop.f32.mrf.mxu1 }
 0x105   : > { %1491 = vst.msk [vmem:[%s2191_s25 + $0x8] sm:$0xf] %vm1488_vm3, %v1796_v57  ;;  %1523 = vst.msk [vmem:[%s2191_s25 + $0x88] sm:$0xf] %vm1488_vm3, %v1828_v58  ;;  %v1171_v63 = vmax.f32 %v1107_v59, 0.0  ;;  %v1203_v0 = vmax.f32 %v1139_v60, 0.0  ;;  %v1037_v1 = vmul.f32 %v2174_v15, %v787_v61  ;;  %v1069_v2 = vmul.f32 %v2174_v15, %v915_v62 }
 0x106   : > { %v789_v3 = vpop.f32.mrf.mxu0  ;;  %v917_v4 = vpop.f32.mrf.mxu1 }
 0x107   : > { %v1797_v5 = vpack.c.bf16 %v1171_v63, %v1171_v63  ;;  %v1829_v6 = vpack.c.bf16 %v1203_v0, %v1203_v0  ;;  %v1108_v7 = vadd.f32 %v2179_v17, %v1037_v1  ;;  %v1140_v8 = vadd.f32 %v2179_v17, %v1069_v2 }
 0x108   : > { %v790_v9 = vpop.f32.mrf.mxu0  ;;  %v918_v10 = vpop.f32.mrf.mxu1 }
 0x109   : > { %1492 = vst.msk [vmem:[%s2191_s25 + $0xc] sm:$0xf] %vm1488_vm3, %v1797_v5  ;;  %1524 = vst.msk [vmem:[%s2191_s25 + $0x8c] sm:$0xf] %vm1488_vm3, %v1829_v6  ;;  %v1172_v11 = vmax.f32 %v1108_v7, 0.0  ;;  %v1204_v12 = vmax.f32 %v1140_v8, 0.0  ;;  %v1038_v13 = vmul.f32 %v2174_v15, %v790_v9  ;;  %v1070_v14 = vmul.f32 %v2174_v15, %v918_v10 }
 0x10a   : > { %v792_v16 = vpop.f32.mrf.mxu0  ;;  %v920_v18 = vpop.f32.mrf.mxu1 }
 0x10b   : > { %v1798_v19 = vpack.c.bf16 %v1172_v11, %v1172_v11  ;;  %v1830_v20 = vpack.c.bf16 %v1204_v12, %v1204_v12  ;;  %v1109_v21 = vadd.f32 %v2179_v17, %v1038_v13  ;;  %v1141_v22 = vadd.f32 %v2179_v17, %v1070_v14 }
 0x10c   : > { %v795_v23 = vpop.f32.mrf.mxu0  ;;  %v923_v24 = vpop.f32.mrf.mxu1 }
 0x10d   : > { %1493 = vst.msk [vmem:[%s2191_s25 + $0x10] sm:$0xf] %vm1488_vm3, %v1798_v19  ;;  %1525 = vst.msk [vmem:[%s2191_s25 + $0x90] sm:$0xf] %vm1488_vm3, %v1830_v20  ;;  %v1173_v25 = vmax.f32 %v1109_v21, 0.0  ;;  %v1205_v26 = vmax.f32 %v1141_v22, 0.0  ;;  %v1039_v27 = vmul.f32 %v2174_v15, %v795_v23  ;;  %v1071_v28 = vmul.f32 %v2174_v15, %v923_v24 }
 0x10e   : > { %v797_v29 = vpop.f32.mrf.mxu0  ;;  %v925_v30 = vpop.f32.mrf.mxu1 }
 0x10f   : > { %v1799_v31 = vpack.c.bf16 %v1173_v25, %v1173_v25  ;;  %v1831_v32 = vpack.c.bf16 %v1205_v26, %v1205_v26  ;;  %v1110_v33 = vadd.f32 %v2179_v17, %v1039_v27  ;;  %v1142_v34 = vadd.f32 %v2179_v17, %v1071_v28 }
 0x110   : > { %v798_v35 = vpop.f32.mrf.mxu0  ;;  %v926_v36 = vpop.f32.mrf.mxu1 }
 0x111   : > { %1494 = vst.msk [vmem:[%s2191_s25 + $0x14] sm:$0xf] %vm1488_vm3, %v1799_v31  ;;  %1526 = vst.msk [vmem:[%s2191_s25 + $0x94] sm:$0xf] %vm1488_vm3, %v1831_v32  ;;  %v1174_v37 = vmax.f32 %v1110_v33, 0.0  ;;  %v1206_v38 = vmax.f32 %v1142_v34, 0.0  ;;  %v1040_v39 = vmul.f32 %v2174_v15, %v798_v35  ;;  %v1072_v40 = vmul.f32 %v2174_v15, %v926_v36 }
 0x112   : > { %v800_v41 = vpop.f32.mrf.mxu0  ;;  %v928_v42 = vpop.f32.mrf.mxu1 }
 0x113   : > { %v1800_v43 = vpack.c.bf16 %v1174_v37, %v1174_v37  ;;  %v1832_v44 = vpack.c.bf16 %v1206_v38, %v1206_v38  ;;  %v1111_v45 = vadd.f32 %v2179_v17, %v1040_v39  ;;  %v1143_v46 = vadd.f32 %v2179_v17, %v1072_v40 }
 0x114   : > { %v803_v47 = vpop.f32.mrf.mxu0  ;;  %v931_v48 = vpop.f32.mrf.mxu1 }
 0x115   : > { %1495 = vst.msk [vmem:[%s2191_s25 + $0x18] sm:$0xf] %vm1488_vm3, %v1800_v43  ;;  %1527 = vst.msk [vmem:[%s2191_s25 + $0x98] sm:$0xf] %vm1488_vm3, %v1832_v44  ;;  %v1175_v49 = vmax.f32 %v1111_v45, 0.0  ;;  %v1207_v50 = vmax.f32 %v1143_v46, 0.0  ;;  %v1041_v51 = vmul.f32 %v2174_v15, %v803_v47  ;;  %v1073_v52 = vmul.f32 %v2174_v15, %v931_v48 }
 0x116   : > { %v805_v53 = vpop.f32.mrf.mxu0  ;;  %v933_v54 = vpop.f32.mrf.mxu1 }
 0x117   : > { %v1801_v55 = vpack.c.bf16 %v1175_v49, %v1175_v49  ;;  %v1833_v56 = vpack.c.bf16 %v1207_v50, %v1207_v50  ;;  %v1112_v57 = vadd.f32 %v2179_v17, %v1041_v51  ;;  %v1144_v58 = vadd.f32 %v2179_v17, %v1073_v52 }
 0x118   : > { %v806_v59 = vpop.f32.mrf.mxu0  ;;  %v934_v60 = vpop.f32.mrf.mxu1 }
 0x119   : > { %1496 = vst.msk [vmem:[%s2191_s25 + $0x1c] sm:$0xf] %vm1488_vm3, %v1801_v55  ;;  %1528 = vst.msk [vmem:[%s2191_s25 + $0x9c] sm:$0xf] %vm1488_vm3, %v1833_v56  ;;  %v1176_v61 = vmax.f32 %v1112_v57, 0.0  ;;  %v1208_v62 = vmax.f32 %v1144_v58, 0.0  ;;  %v1042_v63 = vmul.f32 %v2174_v15, %v806_v59  ;;  %v1074_v0 = vmul.f32 %v2174_v15, %v934_v60 }
 0x11a   : > { %v808_v1 = vpop.f32.mrf.mxu0  ;;  %v936_v2 = vpop.f32.mrf.mxu1 }
 0x11b   : > { %v1802_v3 = vpack.c.bf16 %v1176_v61, %v1176_v61  ;;  %v1834_v4 = vpack.c.bf16 %v1208_v62, %v1208_v62  ;;  %v1113_v5 = vadd.f32 %v2179_v17, %v1042_v63  ;;  %v1145_v6 = vadd.f32 %v2179_v17, %v1074_v0 }
 0x11c   : > { %v811_v7 = vpop.f32.mrf.mxu0  ;;  %v939_v8 = vpop.f32.mrf.mxu1 }
 0x11d   : > { %1497 = vst.msk [vmem:[%s2191_s25 + $0x20] sm:$0xf] %vm1488_vm3, %v1802_v3  ;;  %1529 = vst.msk [vmem:[%s2191_s25 + $0xa0] sm:$0xf] %vm1488_vm3, %v1834_v4  ;;  %v1177_v9 = vmax.f32 %v1113_v5, 0.0  ;;  %v1209_v10 = vmax.f32 %v1145_v6, 0.0  ;;  %v1043_v11 = vmul.f32 %v2174_v15, %v811_v7  ;;  %v1075_v12 = vmul.f32 %v2174_v15, %v939_v8 }
 0x11e   : > { %v813_v13 = vpop.f32.mrf.mxu0  ;;  %v941_v14 = vpop.f32.mrf.mxu1 }
 0x11f   : > { %v1803_v16 = vpack.c.bf16 %v1177_v9, %v1177_v9  ;;  %v1835_v18 = vpack.c.bf16 %v1209_v10, %v1209_v10  ;;  %v1114_v19 = vadd.f32 %v2179_v17, %v1043_v11  ;;  %v1146_v20 = vadd.f32 %v2179_v17, %v1075_v12 }
 0x120   : > { %v814_v21 = vpop.f32.mrf.mxu0  ;;  %v942_v22 = vpop.f32.mrf.mxu1 }
 0x121   : > { %1498 = vst.msk [vmem:[%s2191_s25 + $0x24] sm:$0xf] %vm1488_vm3, %v1803_v16  ;;  %1530 = vst.msk [vmem:[%s2191_s25 + $0xa4] sm:$0xf] %vm1488_vm3, %v1835_v18  ;;  %v1178_v23 = vmax.f32 %v1114_v19, 0.0  ;;  %v1210_v24 = vmax.f32 %v1146_v20, 0.0  ;;  %v1044_v25 = vmul.f32 %v2174_v15, %v814_v21  ;;  %v1076_v26 = vmul.f32 %v2174_v15, %v942_v22 }
 0x122   : > { %v816_v27 = vpop.f32.mrf.mxu0  ;;  %v944_v28 = vpop.f32.mrf.mxu1 }
 0x123   : > { %v1804_v29 = vpack.c.bf16 %v1178_v23, %v1178_v23  ;;  %v1836_v30 = vpack.c.bf16 %v1210_v24, %v1210_v24  ;;  %v1115_v31 = vadd.f32 %v2179_v17, %v1044_v25  ;;  %v1147_v32 = vadd.f32 %v2179_v17, %v1076_v26 }
 0x124   : > { %v819_v33 = vpop.f32.mrf.mxu0  ;;  %v947_v34 = vpop.f32.mrf.mxu1 }
 0x125   : > { %1499 = vst.msk [vmem:[%s2191_s25 + $0x28] sm:$0xf] %vm1488_vm3, %v1804_v29  ;;  %1531 = vst.msk [vmem:[%s2191_s25 + $0xa8] sm:$0xf] %vm1488_vm3, %v1836_v30  ;;  %v1179_v35 = vmax.f32 %v1115_v31, 0.0  ;;  %v1211_v36 = vmax.f32 %v1147_v32, 0.0  ;;  %v1045_v37 = vmul.f32 %v2174_v15, %v819_v33  ;;  %v1077_v38 = vmul.f32 %v2174_v15, %v947_v34 }
 0x126   : > { %v821_v39 = vpop.f32.mrf.mxu0  ;;  %v949_v40 = vpop.f32.mrf.mxu1 }
 0x127   : > { %v1805_v41 = vpack.c.bf16 %v1179_v35, %v1179_v35  ;;  %v1837_v42 = vpack.c.bf16 %v1211_v36, %v1211_v36  ;;  %v1116_v43 = vadd.f32 %v2179_v17, %v1045_v37  ;;  %v1148_v44 = vadd.f32 %v2179_v17, %v1077_v38 }
 0x128   : > { %v822_v45 = vpop.f32.mrf.mxu0  ;;  %v950_v46 = vpop.f32.mrf.mxu1 }
 0x129   : > { %1500 = vst.msk [vmem:[%s2191_s25 + $0x2c] sm:$0xf] %vm1488_vm3, %v1805_v41  ;;  %1532 = vst.msk [vmem:[%s2191_s25 + $0xac] sm:$0xf] %vm1488_vm3, %v1837_v42  ;;  %v1180_v47 = vmax.f32 %v1116_v43, 0.0  ;;  %v1212_v48 = vmax.f32 %v1148_v44, 0.0  ;;  %v1046_v49 = vmul.f32 %v2174_v15, %v822_v45  ;;  %v1078_v50 = vmul.f32 %v2174_v15, %v950_v46 }
 0x12a   : > { %v824_v51 = vpop.f32.mrf.mxu0  ;;  %v952_v52 = vpop.f32.mrf.mxu1 }
 0x12b   : > { %v1806_v53 = vpack.c.bf16 %v1180_v47, %v1180_v47  ;;  %v1838_v54 = vpack.c.bf16 %v1212_v48, %v1212_v48  ;;  %v1117_v55 = vadd.f32 %v2179_v17, %v1046_v49  ;;  %v1149_v56 = vadd.f32 %v2179_v17, %v1078_v50 }
 0x12c   : > { %v827_v57 = vpop.f32.mrf.mxu0  ;;  %v955_v58 = vpop.f32.mrf.mxu1 }
 0x12d   : > { %1501 = vst.msk [vmem:[%s2191_s25 + $0x30] sm:$0xf] %vm1488_vm3, %v1806_v53  ;;  %1533 = vst.msk [vmem:[%s2191_s25 + $0xb0] sm:$0xf] %vm1488_vm3, %v1838_v54  ;;  %v1181_v59 = vmax.f32 %v1117_v55, 0.0  ;;  %v1213_v60 = vmax.f32 %v1149_v56, 0.0  ;;  %v1047_v61 = vmul.f32 %v2174_v15, %v827_v57  ;;  %v1079_v62 = vmul.f32 %v2174_v15, %v955_v58 }
 0x12e   : > { %v829_v63 = vpop.f32.mrf.mxu0  ;;  %v957_v0 = vpop.f32.mrf.mxu1 }
 0x12f   : > { %v1807_v1 = vpack.c.bf16 %v1181_v59, %v1181_v59  ;;  %v1839_v2 = vpack.c.bf16 %v1213_v60, %v1213_v60  ;;  %v1118_v3 = vadd.f32 %v2179_v17, %v1047_v61  ;;  %v1150_v4 = vadd.f32 %v2179_v17, %v1079_v62 }
 0x130   : > { %v830_v5 = vpop.f32.mrf.mxu0  ;;  %v958_v6 = vpop.f32.mrf.mxu1 }
 0x131   : > { %1502 = vst.msk [vmem:[%s2191_s25 + $0x34] sm:$0xf] %vm1488_vm3, %v1807_v1  ;;  %1534 = vst.msk [vmem:[%s2191_s25 + $0xb4] sm:$0xf] %vm1488_vm3, %v1839_v2  ;;  %v1182_v7 = vmax.f32 %v1118_v3, 0.0  ;;  %v1214_v8 = vmax.f32 %v1150_v4, 0.0  ;;  %v1048_v9 = vmul.f32 %v2174_v15, %v830_v5  ;;  %v1080_v10 = vmul.f32 %v2174_v15, %v958_v6 }
 0x132   : > { %v832_v11 = vpop.f32.mrf.mxu0  ;;  %v960_v12 = vpop.f32.mrf.mxu1 }
 0x133   : > { %v1808_v13 = vpack.c.bf16 %v1182_v7, %v1182_v7  ;;  %v1840_v14 = vpack.c.bf16 %v1214_v8, %v1214_v8  ;;  %v1119_v16 = vadd.f32 %v2179_v17, %v1048_v9  ;;  %v1151_v18 = vadd.f32 %v2179_v17, %v1080_v10 }
 0x134   : > { %v835_v19 = vpop.f32.mrf.mxu0  ;;  %v963_v20 = vpop.f32.mrf.mxu1 }
 0x135   : > { %1503 = vst.msk [vmem:[%s2191_s25 + $0x38] sm:$0xf] %vm1488_vm3, %v1808_v13  ;;  %1535 = vst.msk [vmem:[%s2191_s25 + $0xb8] sm:$0xf] %vm1488_vm3, %v1840_v14  ;;  %v1183_v21 = vmax.f32 %v1119_v16, 0.0  ;;  %v1215_v22 = vmax.f32 %v1151_v18, 0.0  ;;  %v1049_v23 = vmul.f32 %v2174_v15, %v835_v19  ;;  %v1081_v24 = vmul.f32 %v2174_v15, %v963_v20 }
 0x136   : > { %v837_v25 = vpop.f32.mrf.mxu0  ;;  %v965_v26 = vpop.f32.mrf.mxu1 }
 0x137   : > { %v1809_v27 = vpack.c.bf16 %v1183_v21, %v1183_v21  ;;  %v1841_v28 = vpack.c.bf16 %v1215_v22, %v1215_v22  ;;  %v1120_v29 = vadd.f32 %v2179_v17, %v1049_v23  ;;  %v1152_v30 = vadd.f32 %v2179_v17, %v1081_v24 }
 0x138   : > { %v838_v31 = vpop.f32.mrf.mxu0  ;;  %v966_v32 = vpop.f32.mrf.mxu1 }
 0x139   : > { %1504 = vst.msk [vmem:[%s2191_s25 + $0x3c] sm:$0xf] %vm1488_vm3, %v1809_v27  ;;  %1536 = vst.msk [vmem:[%s2191_s25 + $0xbc] sm:$0xf] %vm1488_vm3, %v1841_v28  ;;  %v1184_v33 = vmax.f32 %v1120_v29, 0.0  ;;  %v1216_v34 = vmax.f32 %v1152_v30, 0.0  ;;  %v1050_v35 = vmul.f32 %v2174_v15, %v838_v31  ;;  %v1082_v36 = vmul.f32 %v2174_v15, %v966_v32 }
 0x13a   : > { %v840_v37 = vpop.f32.mrf.mxu0  ;;  %v968_v38 = vpop.f32.mrf.mxu1 }
 0x13b   : > { %v1810_v39 = vpack.c.bf16 %v1184_v33, %v1184_v33  ;;  %v1842_v40 = vpack.c.bf16 %v1216_v34, %v1216_v34  ;;  %v1121_v41 = vadd.f32 %v2179_v17, %v1050_v35  ;;  %v1153_v42 = vadd.f32 %v2179_v17, %v1082_v36 }
 0x13c   : > { %v843_v43 = vpop.f32.mrf.mxu0  ;;  %v971_v44 = vpop.f32.mrf.mxu1 }
 0x13d   : > { %1505 = vst.msk [vmem:[%s2191_s25 + $0x40] sm:$0xf] %vm1488_vm3, %v1810_v39  ;;  %1537 = vst.msk [vmem:[%s2191_s25 + $0xc0] sm:$0xf] %vm1488_vm3, %v1842_v40  ;;  %v1185_v45 = vmax.f32 %v1121_v41, 0.0  ;;  %v1217_v46 = vmax.f32 %v1153_v42, 0.0  ;;  %v1051_v47 = vmul.f32 %v2174_v15, %v843_v43  ;;  %v1083_v48 = vmul.f32 %v2174_v15, %v971_v44 }
 0x13e   : > { %v845_v49 = vpop.f32.mrf.mxu0  ;;  %v973_v50 = vpop.f32.mrf.mxu1 }
 0x13f   : > { %v1811_v51 = vpack.c.bf16 %v1185_v45, %v1185_v45  ;;  %v1843_v52 = vpack.c.bf16 %v1217_v46, %v1217_v46  ;;  %v1122_v53 = vadd.f32 %v2179_v17, %v1051_v47  ;;  %v1154_v54 = vadd.f32 %v2179_v17, %v1083_v48 }
 0x140   : > { %v846_v55 = vpop.f32.mrf.mxu0  ;;  %v974_v56 = vpop.f32.mrf.mxu1 }
 0x141   : > { %1506 = vst.msk [vmem:[%s2191_s25 + $0x44] sm:$0xf] %vm1488_vm3, %v1811_v51  ;;  %1538 = vst.msk [vmem:[%s2191_s25 + $0xc4] sm:$0xf] %vm1488_vm3, %v1843_v52  ;;  %v1186_v57 = vmax.f32 %v1122_v53, 0.0  ;;  %v1218_v58 = vmax.f32 %v1154_v54, 0.0  ;;  %v1052_v59 = vmul.f32 %v2174_v15, %v846_v55  ;;  %v1084_v60 = vmul.f32 %v2174_v15, %v974_v56 }
 0x142   : > { %v848_v61 = vpop.f32.mrf.mxu0  ;;  %v976_v62 = vpop.f32.mrf.mxu1 }
 0x143   : > { %v1812_v63 = vpack.c.bf16 %v1186_v57, %v1186_v57  ;;  %v1844_v0 = vpack.c.bf16 %v1218_v58, %v1218_v58  ;;  %v1123_v1 = vadd.f32 %v2179_v17, %v1052_v59  ;;  %v1155_v2 = vadd.f32 %v2179_v17, %v1084_v60 }
 0x144   : > { %v851_v3 = vpop.f32.mrf.mxu0  ;;  %v979_v4 = vpop.f32.mrf.mxu1 }
 0x145   : > { %1507 = vst.msk [vmem:[%s2191_s25 + $0x48] sm:$0xf] %vm1488_vm3, %v1812_v63  ;;  %1539 = vst.msk [vmem:[%s2191_s25 + $0xc8] sm:$0xf] %vm1488_vm3, %v1844_v0  ;;  %v1187_v5 = vmax.f32 %v1123_v1, 0.0  ;;  %v1219_v6 = vmax.f32 %v1155_v2, 0.0  ;;  %v1053_v7 = vmul.f32 %v2174_v15, %v851_v3  ;;  %v1085_v8 = vmul.f32 %v2174_v15, %v979_v4 }
 0x146   : > { %v853_v9 = vpop.f32.mrf.mxu0  ;;  %v981_v10 = vpop.f32.mrf.mxu1 }
 0x147   : > { %v1813_v11 = vpack.c.bf16 %v1187_v5, %v1187_v5  ;;  %v1845_v12 = vpack.c.bf16 %v1219_v6, %v1219_v6  ;;  %v1124_v13 = vadd.f32 %v2179_v17, %v1053_v7  ;;  %v1156_v14 = vadd.f32 %v2179_v17, %v1085_v8 }
 0x148   : > { %v854_v16 = vpop.f32.mrf.mxu0  ;;  %v982_v18 = vpop.f32.mrf.mxu1 }
 0x149   : > { %1508 = vst.msk [vmem:[%s2191_s25 + $0x4c] sm:$0xf] %vm1488_vm3, %v1813_v11  ;;  %1540 = vst.msk [vmem:[%s2191_s25 + $0xcc] sm:$0xf] %vm1488_vm3, %v1845_v12  ;;  %v1188_v19 = vmax.f32 %v1124_v13, 0.0  ;;  %v1220_v20 = vmax.f32 %v1156_v14, 0.0  ;;  %v1054_v21 = vmul.f32 %v2174_v15, %v854_v16  ;;  %v1086_v22 = vmul.f32 %v2174_v15, %v982_v18 }
 0x14a   : > { %v856_v23 = vpop.f32.mrf.mxu0  ;;  %v984_v24 = vpop.f32.mrf.mxu1 }
 0x14b   : > { %v1814_v25 = vpack.c.bf16 %v1188_v19, %v1188_v19  ;;  %v1846_v26 = vpack.c.bf16 %v1220_v20, %v1220_v20  ;;  %v1125_v27 = vadd.f32 %v2179_v17, %v1054_v21  ;;  %v1157_v28 = vadd.f32 %v2179_v17, %v1086_v22 }
 0x14c   : > { %v859_v29 = vpop.f32.mrf.mxu0  ;;  %v987_v30 = vpop.f32.mrf.mxu1 }
 0x14d   : > { %1509 = vst.msk [vmem:[%s2191_s25 + $0x50] sm:$0xf] %vm1488_vm3, %v1814_v25  ;;  %1541 = vst.msk [vmem:[%s2191_s25 + $0xd0] sm:$0xf] %vm1488_vm3, %v1846_v26  ;;  %v1189_v31 = vmax.f32 %v1125_v27, 0.0  ;;  %v1221_v32 = vmax.f32 %v1157_v28, 0.0  ;;  %v1055_v33 = vmul.f32 %v2174_v15, %v859_v29  ;;  %v1087_v34 = vmul.f32 %v2174_v15, %v987_v30 }
 0x14e   : > { %v861_v35 = vpop.f32.mrf.mxu0  ;;  %v989_v36 = vpop.f32.mrf.mxu1 }
 0x14f   : > { %v1815_v37 = vpack.c.bf16 %v1189_v31, %v1189_v31  ;;  %v1847_v38 = vpack.c.bf16 %v1221_v32, %v1221_v32  ;;  %v1126_v39 = vadd.f32 %v2179_v17, %v1055_v33  ;;  %v1158_v40 = vadd.f32 %v2179_v17, %v1087_v34 }
 0x150   : > { %v862_v41 = vpop.f32.mrf.mxu0  ;;  %v990_v42 = vpop.f32.mrf.mxu1 }
 0x151   : > { %1510 = vst.msk [vmem:[%s2191_s25 + $0x54] sm:$0xf] %vm1488_vm3, %v1815_v37  ;;  %1542 = vst.msk [vmem:[%s2191_s25 + $0xd4] sm:$0xf] %vm1488_vm3, %v1847_v38  ;;  %v1190_v43 = vmax.f32 %v1126_v39, 0.0  ;;  %v1222_v44 = vmax.f32 %v1158_v40, 0.0  ;;  %v1056_v45 = vmul.f32 %v2174_v15, %v862_v41  ;;  %v1088_v46 = vmul.f32 %v2174_v15, %v990_v42 }
 0x152   : > { %v864_v47 = vpop.f32.mrf.mxu0  ;;  %v992_v48 = vpop.f32.mrf.mxu1 }
 0x153   : > { %v1816_v49 = vpack.c.bf16 %v1190_v43, %v1190_v43  ;;  %v1848_v50 = vpack.c.bf16 %v1222_v44, %v1222_v44  ;;  %v1127_v51 = vadd.f32 %v2179_v17, %v1056_v45  ;;  %v1159_v52 = vadd.f32 %v2179_v17, %v1088_v46 }
 0x154   : > { %v867_v53 = vpop.f32.mrf.mxu0  ;;  %v995_v54 = vpop.f32.mrf.mxu1 }
 0x155   : > { %1511 = vst.msk [vmem:[%s2191_s25 + $0x58] sm:$0xf] %vm1488_vm3, %v1816_v49  ;;  %1543 = vst.msk [vmem:[%s2191_s25 + $0xd8] sm:$0xf] %vm1488_vm3, %v1848_v50  ;;  %v1191_v55 = vmax.f32 %v1127_v51, 0.0  ;;  %v1223_v56 = vmax.f32 %v1159_v52, 0.0  ;;  %v1057_v57 = vmul.f32 %v2174_v15, %v867_v53  ;;  %v1089_v58 = vmul.f32 %v2174_v15, %v995_v54 }
 0x156   : > { %v869_v59 = vpop.f32.mrf.mxu0  ;;  %v997_v60 = vpop.f32.mrf.mxu1 }
 0x157   : > { %v1817_v61 = vpack.c.bf16 %v1191_v55, %v1191_v55  ;;  %v1849_v62 = vpack.c.bf16 %v1223_v56, %v1223_v56  ;;  %v1128_v63 = vadd.f32 %v2179_v17, %v1057_v57  ;;  %v1160_v0 = vadd.f32 %v2179_v17, %v1089_v58 }
 0x158   : > { %v870_v1 = vpop.f32.mrf.mxu0  ;;  %v998_v2 = vpop.f32.mrf.mxu1 }
 0x159   : > { %1512 = vst.msk [vmem:[%s2191_s25 + $0x5c] sm:$0xf] %vm1488_vm3, %v1817_v61  ;;  %1544 = vst.msk [vmem:[%s2191_s25 + $0xdc] sm:$0xf] %vm1488_vm3, %v1849_v62  ;;  %v1192_v3 = vmax.f32 %v1128_v63, 0.0  ;;  %v1224_v4 = vmax.f32 %v1160_v0, 0.0  ;;  %v1058_v5 = vmul.f32 %v2174_v15, %v870_v1  ;;  %v1090_v6 = vmul.f32 %v2174_v15, %v998_v2 }
 0x15a   : > { %v872_v7 = vpop.f32.mrf.mxu0  ;;  %v1000_v8 = vpop.f32.mrf.mxu1 }
 0x15b   : > { %v1818_v9 = vpack.c.bf16 %v1192_v3, %v1192_v3  ;;  %v1850_v10 = vpack.c.bf16 %v1224_v4, %v1224_v4  ;;  %v1129_v11 = vadd.f32 %v2179_v17, %v1058_v5  ;;  %v1161_v12 = vadd.f32 %v2179_v17, %v1090_v6 }
 0x15c   : > { %v875_v13 = vpop.f32.mrf.mxu0  ;;  %v1003_v14 = vpop.f32.mrf.mxu1 }
 0x15d   : > { %1513 = vst.msk [vmem:[%s2191_s25 + $0x60] sm:$0xf] %vm1488_vm3, %v1818_v9  ;;  %1545 = vst.msk [vmem:[%s2191_s25 + $0xe0] sm:$0xf] %vm1488_vm3, %v1850_v10  ;;  %v1193_v16 = vmax.f32 %v1129_v11, 0.0  ;;  %v1225_v18 = vmax.f32 %v1161_v12, 0.0  ;;  %v1059_v19 = vmul.f32 %v2174_v15, %v875_v13  ;;  %v1091_v20 = vmul.f32 %v2174_v15, %v1003_v14 }
 0x15e   : > { %v877_v21 = vpop.f32.mrf.mxu0  ;;  %v1005_v22 = vpop.f32.mrf.mxu1 }
 0x15f   : > { %v1819_v23 = vpack.c.bf16 %v1193_v16, %v1193_v16  ;;  %v1851_v24 = vpack.c.bf16 %v1225_v18, %v1225_v18  ;;  %v1130_v25 = vadd.f32 %v2179_v17, %v1059_v19  ;;  %v1162_v26 = vadd.f32 %v2179_v17, %v1091_v20 }
 0x160   : > { %v878_v27 = vpop.f32.mrf.mxu0  ;;  %v1006_v28 = vpop.f32.mrf.mxu1 }
 0x161   : > { %1514 = vst.msk [vmem:[%s2191_s25 + $0x64] sm:$0xf] %vm1488_vm3, %v1819_v23  ;;  %1546 = vst.msk [vmem:[%s2191_s25 + $0xe4] sm:$0xf] %vm1488_vm3, %v1851_v24  ;;  %v1194_v29 = vmax.f32 %v1130_v25, 0.0  ;;  %v1226_v30 = vmax.f32 %v1162_v26, 0.0  ;;  %v1060_v31 = vmul.f32 %v2174_v15, %v878_v27  ;;  %v1092_v32 = vmul.f32 %v2174_v15, %v1006_v28 }
 0x162   : > { %v880_v33 = vpop.f32.mrf.mxu0  ;;  %v1008_v34 = vpop.f32.mrf.mxu1 }
 0x163   : > { %v1820_v35 = vpack.c.bf16 %v1194_v29, %v1194_v29  ;;  %v1852_v36 = vpack.c.bf16 %v1226_v30, %v1226_v30  ;;  %v1131_v37 = vadd.f32 %v2179_v17, %v1060_v31  ;;  %v1163_v38 = vadd.f32 %v2179_v17, %v1092_v32 }
 0x164   : > { %v883_v39 = vpop.f32.mrf.mxu0  ;;  %v1011_v40 = vpop.f32.mrf.mxu1 }
 0x165   : > { %1515 = vst.msk [vmem:[%s2191_s25 + $0x68] sm:$0xf] %vm1488_vm3, %v1820_v35  ;;  %1547 = vst.msk [vmem:[%s2191_s25 + $0xe8] sm:$0xf] %vm1488_vm3, %v1852_v36  ;;  %v1195_v41 = vmax.f32 %v1131_v37, 0.0  ;;  %v1227_v42 = vmax.f32 %v1163_v38, 0.0  ;;  %v1061_v43 = vmul.f32 %v2174_v15, %v883_v39  ;;  %v1093_v44 = vmul.f32 %v2174_v15, %v1011_v40 }
 0x166   : > { %v885_v45 = vpop.f32.mrf.mxu0  ;;  %v1013_v46 = vpop.f32.mrf.mxu1 }
 0x167   : > { %v1821_v47 = vpack.c.bf16 %v1195_v41, %v1195_v41  ;;  %v1853_v48 = vpack.c.bf16 %v1227_v42, %v1227_v42  ;;  %v1132_v49 = vadd.f32 %v2179_v17, %v1061_v43  ;;  %v1164_v50 = vadd.f32 %v2179_v17, %v1093_v44 }
 0x168   : > { %v886_v51 = vpop.f32.mrf.mxu0  ;;  %v1014_v52 = vpop.f32.mrf.mxu1 }
 0x169   : > { %1516 = vst.msk [vmem:[%s2191_s25 + $0x6c] sm:$0xf] %vm1488_vm3, %v1821_v47  ;;  %1548 = vst.msk [vmem:[%s2191_s25 + $0xec] sm:$0xf] %vm1488_vm3, %v1853_v48  ;;  %v1196_v53 = vmax.f32 %v1132_v49, 0.0  ;;  %v1228_v54 = vmax.f32 %v1164_v50, 0.0  ;;  %v1062_v55 = vmul.f32 %v2174_v15, %v886_v51  ;;  %v1094_v56 = vmul.f32 %v2174_v15, %v1014_v52 }
 0x16a   : > { %v888_v57 = vpop.f32.mrf.mxu0  ;;  %v1016_v58 = vpop.f32.mrf.mxu1 }
 0x16b   : > { %v1822_v59 = vpack.c.bf16 %v1196_v53, %v1196_v53  ;;  %v1854_v60 = vpack.c.bf16 %v1228_v54, %v1228_v54  ;;  %v1133_v61 = vadd.f32 %v2179_v17, %v1062_v55  ;;  %v1165_v62 = vadd.f32 %v2179_v17, %v1094_v56 }
 0x16c   : > { %v891_v63 = vpop.f32.mrf.mxu0  ;;  %v1019_v0 = vpop.f32.mrf.mxu1 }
 0x16d   : > { %1517 = vst.msk [vmem:[%s2191_s25 + $0x70] sm:$0xf] %vm1488_vm3, %v1822_v59  ;;  %1549 = vst.msk [vmem:[%s2191_s25 + $0xf0] sm:$0xf] %vm1488_vm3, %v1854_v60  ;;  %v1197_v1 = vmax.f32 %v1133_v61, 0.0  ;;  %v1229_v2 = vmax.f32 %v1165_v62, 0.0  ;;  %v1063_v3 = vmul.f32 %v2174_v15, %v891_v63  ;;  %v1095_v4 = vmul.f32 %v2174_v15, %v1019_v0 }
 0x16e   : > { %v893_v5 = vpop.f32.mrf.mxu0  ;;  %v1021_v6 = vpop.f32.mrf.mxu1 }
 0x16f   : > { %v1823_v7 = vpack.c.bf16 %v1197_v1, %v1197_v1  ;;  %v1855_v8 = vpack.c.bf16 %v1229_v2, %v1229_v2  ;;  %v1134_v9 = vadd.f32 %v2179_v17, %v1063_v3  ;;  %v1166_v10 = vadd.f32 %v2179_v17, %v1095_v4 }
 0x170   : > { %v894_v11 = vpop.f32.mrf.mxu0  ;;  %v1022_v12 = vpop.f32.mrf.mxu1 }
 0x171   : > { %1518 = vst.msk [vmem:[%s2191_s25 + $0x74] sm:$0xf] %vm1488_vm3, %v1823_v7  ;;  %1550 = vst.msk [vmem:[%s2191_s25 + $0xf4] sm:$0xf] %vm1488_vm3, %v1855_v8  ;;  %v1198_v13 = vmax.f32 %v1134_v9, 0.0  ;;  %v1230_v14 = vmax.f32 %v1166_v10, 0.0  ;;  %v1064_v16 = vmul.f32 %v2174_v15, %v894_v11  ;;  %v1096_v18 = vmul.f32 %v2174_v15, %v1022_v12 }
 0x172   : > { %v896_v19 = vpop.f32.mrf.mxu0  ;;  %v1024_v20 = vpop.f32.mrf.mxu1 }
 0x173   : > { %v1824_v21 = vpack.c.bf16 %v1198_v13, %v1198_v13  ;;  %v1856_v22 = vpack.c.bf16 %v1230_v14, %v1230_v14  ;;  %v1135_v23 = vadd.f32 %v2179_v17, %v1064_v16  ;;  %v1167_v24 = vadd.f32 %v2179_v17, %v1096_v18 }
 0x175   : > { %1519 = vst.msk [vmem:[%s2191_s25 + $0x78] sm:$0xf] %vm1488_vm3, %v1824_v21  ;;  %1551 = vst.msk [vmem:[%s2191_s25 + $0xf8] sm:$0xf] %vm1488_vm3, %v1856_v22  ;;  %v1199_v25 = vmax.f32 %v1135_v23, 0.0  ;;  %v1231_v26 = vmax.f32 %v1167_v24, 0.0 }
 0x177   : > { %v1825_v27 = vpack.c.bf16 %v1199_v25, %v1199_v25  ;;  %v1857_v28 = vpack.c.bf16 %v1231_v26, %v1231_v26 }
 0x179   : > { %1520 = vst.msk [vmem:[%s2191_s25 + $0x7c] sm:$0xf] %vm1488_vm3, %v1825_v27  ;;  %1552 = vst.msk [vmem:[%s2191_s25 + $0xfc] sm:$0xf] %vm1488_vm3, %v1857_v28 }
 0x17a PF: > { %s14_s15 = sadd.s32 1, %s2000_s15  }
 0x17b   : > { %p11_p4 = scmp.ge.s32.totalorder %s14_s15, 6  }
 0x17d   :  { %13 = sbr.rel (!%p11_p4) target bundleno = 1 (0x1), region = 66 }

// kernel: _lambda_.23
= control target key start
LH: loop header
LB: loop body
LE: loop exit
PB: predicated region body
PF: predicated region fallthrough
CT: control target
= control target key end

     0   :  { %s1125_s15 = smov 0   ;;  %s1335_s0 = inlined_call_operand.vmem [shape: bf16[512,64], index: 0, kind: input, shape index: {}]   ;;  %s1336_s1 = inlined_call_operand.vmem [shape: bf16[64,8], index: 1, kind: input, shape index: {}]   ;;  %s1337_s2 = inlined_call_operand.vmem [shape: f32[1,8], index: 2, kind: input, shape index: {}]   ;;  %s1338_s3 = inlined_call_operand.vmem [shape: f32[1,8], index: 3, kind: input, shape index: {}]   ;;  %s1339_s4 = inlined_call_operand.vmem [shape: bf16[512,8], index: 4, kind: output, shape index: {}]  }
   0x1 LB: > { %s883_s16 = sadd.s32 4294967295, %s1098_s15   ;;  %p887_p0 = scmp.ge.s32.totalorder %s1098_s15, 1  ;;  %s1098_s15 = sphi %s1125_s15, %s14_s15  }
   0x2   : > { %p163_p1 = scmp.lt.s32.totalorder %s1098_s15, 3 }
   0x4   : > { %p164_p2 = pnand %p887_p0, %p163_p1 }
   0x5   : > { %s888_s19 = sshll.u32 (!%p164_p2), %s883_s16, 5 }
   0x6   : > { %167 = sbr.rel (%p164_p2) target bundleno = 263 (0x107), region = 36  ;;  %p190_p3 = scmp.lt.s32.totalorder (!%p164_p2), %s888_s19, 63 }
   0xb   : > { %v1072_v0 = vld [vmem:[%s1336_s1 + $0x18] sm:$0xff]   ;;  %v1073_v1 = vld [vmem:[%s1336_s1 + $0x10] sm:$0xff]   ;;  %s1341_s19 = smov (!%p190_p3, %s888_s19), 63  ;;  %v1074_v2 = vld [vmem:[%s1336_s1 + $0x8] sm:$0xff]   ;;  %vm346_vm0 = vcmask 523264   ;;  %vm794_vm1 = vcmask 60416  }
   0xc   : > { %1016 = vmatprep.subr.bf16.mxu0 %v1072_v0  ;;  %1056 = vmatprep.subr.bf16.mxu1 %v1072_v0  ;;  %s889_s24 = sshll.u32 %s1341_s19, 2  ;;  %v1075_v3 = vld [vmem:[%s1336_s1] sm:$0xff]  }
   0xd   : > { %1017 = vmatpush3.bf16.msra.mxu0 %v1072_v0  ;;  %1060 = vmatpush3.bf16.msra.mxu1 %v1072_v0  ;;  %s1153_s29 = scalar_lea.vmem %s1335_s0, %s889_s24  ;;  %v1190_v20 = vld [vmem:[%s1337_s2] ss:$0 sm:$0xff]  ;;  %s1210_s10 = scalar_lea.vmem %s1339_s4, %s889_s24 }
   0xe   : > { %1018 = vmatprep.subr.bf16.mxu0 %v1073_v1  ;;  %1057 = vmatprep.subr.bf16.mxu1 %v1073_v1  ;;  %v1076_v4 = vld [vmem:[%s1153_s29] sm:$0xff]   ;;  %v1078_v6 = vld [vmem:[%s1153_s29 + $0x8] sm:$0xff]   ;;  %v1080_v8 = vld [vmem:[%s1153_s29 + $0x10] sm:$0xff]  }
   0xf   : > { %v1077_v5 = vld [vmem:[%s1153_s29 + $0x40] sm:$0xff]   ;;  %1024 = vmatprep.mubr.msk.bf16.mxu0 %vm346_vm0, %v1076_v4  ;;  %v1079_v7 = vld [vmem:[%s1153_s29 + $0x48] sm:$0xff]   ;;  %v1081_v9 = vld [vmem:[%s1153_s29 + $0x50] sm:$0xff]  }
  0x10   : > { %1040 = vmatprep.mubr.msk.bf16.mxu1 %vm346_vm0, %v1077_v5  ;;  %v1082_v10 = vld [vmem:[%s1153_s29 + $0x18] sm:$0xff]   ;;  %v1084_v12 = vld [vmem:[%s1153_s29 + $0x20] sm:$0xff]   ;;  %v1086_v14 = vld [vmem:[%s1153_s29 + $0x28] sm:$0xff]  }
  0x11   : > { %1019 = vmatpush3.bf16.msra.mxu0 %v1073_v1  ;;  %1061 = vmatpush3.bf16.msra.mxu1 %v1073_v1  ;;  %v1083_v11 = vld [vmem:[%s1153_s29 + $0x58] sm:$0xff]   ;;  %v1085_v13 = vld [vmem:[%s1153_s29 + $0x60] sm:$0xff]   ;;  %v1087_v15 = vld [vmem:[%s1153_s29 + $0x68] sm:$0xff]  }
  0x12   : > { %1020 = vmatprep.subr.bf16.mxu0 %v1074_v2  ;;  %1058 = vmatprep.subr.bf16.mxu1 %v1074_v2  ;;  %v1088_v16 = vld [vmem:[%s1153_s29 + $0x30] sm:$0xff]   ;;  %v1090_v18 = vld [vmem:[%s1153_s29 + $0x38] sm:$0xff]   ;;  %v1195_v22 = vld [vmem:[%s1338_s3] ss:$0 sm:$0xff] }
  0x13   : > { %v1089_v17 = vld [vmem:[%s1153_s29 + $0x70] sm:$0xff]   ;;  %v1091_v19 = vld [vmem:[%s1153_s29 + $0x78] sm:$0xff]  }
  0x15   : > { %1021 = vmatpush3.bf16.msra.mxu0 %v1074_v2  ;;  %1062 = vmatpush3.bf16.msra.mxu1 %v1074_v2 }
  0x16   : > { %1022 = vmatprep.subr.bf16.mxu0 %v1075_v3  ;;  %1059 = vmatprep.subr.bf16.mxu1 %v1075_v3 }
  0x19   : > { %1023 = vmatpush3.bf16.msra.mxu0 %v1075_v3  ;;  %1063 = vmatpush3.bf16.msra.mxu1 %v1075_v3 }
  0x1c   : > { %1025 = vmatmul.mubr.msk.bf16.vlgmr.msra.gmra.mxu0 %vm346_vm0, %v1078_v6  ;;  %1041 = vmatmul.mubr.msk.bf16.vlgmr.msra.gmra.mxu1 %vm346_vm0, %v1079_v7 }
  0x1d   : > { %1028 = vmatprep.mubr.msk.bf16.mxu0 %vm346_vm0, %v1080_v8  ;;  %1044 = vmatprep.mubr.msk.bf16.mxu1 %vm346_vm0, %v1081_v9 }
  0x24   : > { %1029 = vmatmul.mubr.msk.bf16.gmra.mxu0 %vm346_vm0, %v1082_v10  ;;  %1045 = vmatmul.mubr.msk.bf16.gmra.mxu1 %vm346_vm0, %v1083_v11 }
  0x25   : > { %1032 = vmatprep.mubr.msk.bf16.mxu0 %vm346_vm0, %v1084_v12  ;;  %1048 = vmatprep.mubr.msk.bf16.mxu1 %vm346_vm0, %v1085_v13 }
  0x2c   : > { %1033 = vmatmul.mubr.msk.bf16.gmra.mxu0 %vm346_vm0, %v1086_v14  ;;  %1049 = vmatmul.mubr.msk.bf16.gmra.mxu1 %vm346_vm0, %v1087_v15 }
  0x2d   : > { %1036 = vmatprep.mubr.msk.bf16.mxu0 %vm346_vm0, %v1088_v16  ;;  %1052 = vmatprep.mubr.msk.bf16.mxu1 %vm346_vm0, %v1089_v17 }
  0x34   : > { %1037 = vmatmul.mubr.msk.bf16.gmra.mxu0 %vm346_vm0, %v1090_v18  ;;  %1053 = vmatmul.mubr.msk.bf16.gmra.mxu1 %vm346_vm0, %v1091_v19 }
  0xdc   : > { %v1026_v21 = vpop.f32.mrf.mxu0  ;;  %v1042_v23 = vpop.f32.mrf.mxu1 }
  0xdd   : > { %v565_v24 = vmul.f32 %v1026_v21, %v1190_v20  ;;  %v581_v25 = vmul.f32 %v1042_v23, %v1190_v20 }
  0xde   : > { %v429_v26 = vpop.f32.mrf.mxu0  ;;  %v493_v27 = vpop.f32.mrf.mxu1 }
  0xdf   : > { %v604_v28 = vadd.f32 %v1195_v22, %v565_v24  ;;  %v620_v29 = vadd.f32 %v1195_v22, %v581_v25  ;;  %v563_v30 = vmul.f32 %v1190_v20, %v429_v26  ;;  %v579_v31 = vmul.f32 %v1190_v20, %v493_v27 }
  0xe0   : > { %v1027_v32 = vpop.f32.mrf.mxu0  ;;  %v1043_v33 = vpop.f32.mrf.mxu1 }
  0xe1   : > { %v636_v34 = vmax.f32 %v604_v28, 0.0  ;;  %v652_v35 = vmax.f32 %v620_v29, 0.0  ;;  %v602_v36 = vadd.f32 %v1195_v22, %v563_v30  ;;  %v618_v37 = vadd.f32 %v1195_v22, %v579_v31 }
  0xe2   : > { %v566_v38 = vmul.f32 %v1027_v32, %v1190_v20  ;;  %v582_v39 = vmul.f32 %v1043_v33, %v1190_v20  ;;  %v432_v40 = vpop.f32.mrf.mxu0  ;;  %v496_v41 = vpop.f32.mrf.mxu1 }
  0xe3   : > { %v966_v42 = vpack.c.bf16 %v636_v34, %v636_v34  ;;  %v982_v43 = vpack.c.bf16 %v652_v35, %v652_v35  ;;  %v634_v44 = vmax.f32 %v602_v36, 0.0  ;;  %v650_v45 = vmax.f32 %v618_v37, 0.0 }
  0xe4   : > { %v605_v46 = vadd.f32 %v1195_v22, %v566_v38  ;;  %v621_v47 = vadd.f32 %v1195_v22, %v582_v39  ;;  %v564_v48 = vmul.f32 %v1190_v20, %v432_v40  ;;  %v580_v49 = vmul.f32 %v1190_v20, %v496_v41  ;;  %v1030_v50 = vpop.f32.mrf.mxu0  ;;  %v1046_v51 = vpop.f32.mrf.mxu1 }
  0xe5   : > { %797 = vst.msk [vmem:[%s1210_s10 + $0x8] sm:$0xf] %vm794_vm1, %v966_v42  ;;  %813 = vst.msk [vmem:[%s1210_s10 + $0x48] sm:$0xf] %vm794_vm1, %v982_v43  ;;  %v964_v52 = vpack.c.bf16 %v634_v44, %v634_v44  ;;  %v980_v53 = vpack.c.bf16 %v650_v45, %v650_v45  ;;  %v569_v54 = vmul.f32 %v1030_v50, %v1190_v20 }
  0xe6   : > { %v585_v55 = vmul.f32 %v1046_v51, %v1190_v20  ;;  %v637_v56 = vmax.f32 %v605_v46, 0.0  ;;  %v653_v57 = vmax.f32 %v621_v47, 0.0  ;;  %v603_v58 = vadd.f32 %v1195_v22, %v564_v48  ;;  %v445_v60 = vpop.f32.mrf.mxu0  ;;  %v509_v61 = vpop.f32.mrf.mxu1 }
  0xe7   : > { %v619_v59 = vadd.f32 %v1195_v22, %v580_v49  ;;  %795 = vst.msk [vmem:[%s1210_s10] sm:$0xf] %vm794_vm1, %v964_v52  ;;  %811 = vst.msk [vmem:[%s1210_s10 + $0x40] sm:$0xf] %vm794_vm1, %v980_v53  ;;  %v608_v62 = vadd.f32 %v1195_v22, %v569_v54  ;;  %v567_v0 = vmul.f32 %v1190_v20, %v445_v60 }
  0xe8   : > { %v624_v63 = vadd.f32 %v1195_v22, %v585_v55  ;;  %v583_v1 = vmul.f32 %v1190_v20, %v509_v61  ;;  %v967_v2 = vpack.c.bf16 %v637_v56, %v637_v56  ;;  %v983_v3 = vpack.c.bf16 %v653_v57, %v653_v57  ;;  %v1031_v6 = vpop.f32.mrf.mxu0  ;;  %v1047_v7 = vpop.f32.mrf.mxu1 }
  0xe9   : > { %v635_v4 = vmax.f32 %v603_v58, 0.0  ;;  %v651_v5 = vmax.f32 %v619_v59, 0.0  ;;  %v640_v8 = vmax.f32 %v608_v62, 0.0  ;;  %v606_v10 = vadd.f32 %v1195_v22, %v567_v0 }
  0xea   : > { %v656_v9 = vmax.f32 %v624_v63, 0.0  ;;  %v622_v11 = vadd.f32 %v1195_v22, %v583_v1  ;;  %798 = vst.msk [vmem:[%s1210_s10 + $0xc] sm:$0xf] %vm794_vm1, %v967_v2  ;;  %814 = vst.msk [vmem:[%s1210_s10 + $0x4c] sm:$0xf] %vm794_vm1, %v983_v3  ;;  %v570_v14 = vmul.f32 %v1031_v6, %v1190_v20  ;;  %v586_v15 = vmul.f32 %v1047_v7, %v1190_v20  ;;  %v448_v16 = vpop.f32.mrf.mxu0  ;;  %v512_v17 = vpop.f32.mrf.mxu1 }
  0xeb   : > { %v965_v12 = vpack.c.bf16 %v635_v4, %v635_v4  ;;  %v981_v13 = vpack.c.bf16 %v651_v5, %v651_v5  ;;  %v970_v18 = vpack.c.bf16 %v640_v8, %v640_v8  ;;  %v638_v21 = vmax.f32 %v606_v10, 0.0 }
  0xec   : > { %v986_v19 = vpack.c.bf16 %v656_v9, %v656_v9  ;;  %v654_v23 = vmax.f32 %v622_v11, 0.0  ;;  %v609_v24 = vadd.f32 %v1195_v22, %v570_v14  ;;  %v625_v25 = vadd.f32 %v1195_v22, %v586_v15  ;;  %v1034_v28 = vpop.f32.mrf.mxu0  ;;  %v1050_v29 = vpop.f32.mrf.mxu1 }
  0xed   : > { %796 = vst.msk [vmem:[%s1210_s10 + $0x4] sm:$0xf] %vm794_vm1, %v965_v12  ;;  %812 = vst.msk [vmem:[%s1210_s10 + $0x44] sm:$0xf] %vm794_vm1, %v981_v13  ;;  %v568_v26 = vmul.f32 %v1190_v20, %v448_v16  ;;  %v584_v27 = vmul.f32 %v1190_v20, %v512_v17  ;;  %v968_v30 = vpack.c.bf16 %v638_v21, %v638_v21 }
  0xee   : > { %801 = vst.msk [vmem:[%s1210_s10 + $0x18] sm:$0xf] %vm794_vm1, %v970_v18  ;;  %817 = vst.msk [vmem:[%s1210_s10 + $0x58] sm:$0xf] %vm794_vm1, %v986_v19  ;;  %v984_v31 = vpack.c.bf16 %v654_v23, %v654_v23  ;;  %v573_v32 = vmul.f32 %v1034_v28, %v1190_v20  ;;  %v589_v33 = vmul.f32 %v1050_v29, %v1190_v20  ;;  %v641_v34 = vmax.f32 %v609_v24, 0.0  ;;  %v461_v38 = vpop.f32.mrf.mxu0  ;;  %v525_v39 = vpop.f32.mrf.mxu1 }
  0xef   : > { %v657_v35 = vmax.f32 %v625_v25, 0.0  ;;  %v607_v36 = vadd.f32 %v1195_v22, %v568_v26  ;;  %v623_v37 = vadd.f32 %v1195_v22, %v584_v27  ;;  %799 = vst.msk [vmem:[%s1210_s10 + $0x10] sm:$0xf] %vm794_vm1, %v968_v30  ;;  %v571_v42 = vmul.f32 %v1190_v20, %v461_v38 }
  0xf0   : > { %815 = vst.msk [vmem:[%s1210_s10 + $0x50] sm:$0xf] %vm794_vm1, %v984_v31  ;;  %v612_v40 = vadd.f32 %v1195_v22, %v573_v32  ;;  %v628_v41 = vadd.f32 %v1195_v22, %v589_v33  ;;  %v587_v43 = vmul.f32 %v1190_v20, %v525_v39  ;;  %v971_v44 = vpack.c.bf16 %v641_v34, %v641_v34  ;;  %v1035_v48 = vpop.f32.mrf.mxu0  ;;  %v1051_v49 = vpop.f32.mrf.mxu1 }
  0xf1   : > { %v987_v45 = vpack.c.bf16 %v657_v35, %v657_v35  ;;  %v639_v46 = vmax.f32 %v607_v36, 0.0  ;;  %v655_v47 = vmax.f32 %v623_v37, 0.0  ;;  %v610_v52 = vadd.f32 %v1195_v22, %v571_v42 }
  0xf2   : > { %v644_v50 = vmax.f32 %v612_v40, 0.0  ;;  %v660_v51 = vmax.f32 %v628_v41, 0.0  ;;  %v626_v53 = vadd.f32 %v1195_v22, %v587_v43  ;;  %802 = vst.msk [vmem:[%s1210_s10 + $0x1c] sm:$0xf] %vm794_vm1, %v971_v44  ;;  %v574_v56 = vmul.f32 %v1035_v48, %v1190_v20  ;;  %v464_v58 = vpop.f32.mrf.mxu0  ;;  %v528_v59 = vpop.f32.mrf.mxu1 }
  0xf3   : > { %818 = vst.msk [vmem:[%s1210_s10 + $0x5c] sm:$0xf] %vm794_vm1, %v987_v45  ;;  %v969_v54 = vpack.c.bf16 %v639_v46, %v639_v46  ;;  %v985_v55 = vpack.c.bf16 %v655_v47, %v655_v47  ;;  %v590_v57 = vmul.f32 %v1051_v49, %v1190_v20  ;;  %v642_v62 = vmax.f32 %v610_v52, 0.0 }
  0xf4   : > { %v974_v60 = vpack.c.bf16 %v644_v50, %v644_v50  ;;  %v990_v61 = vpack.c.bf16 %v660_v51, %v660_v51  ;;  %v658_v63 = vmax.f32 %v626_v53, 0.0  ;;  %v613_v0 = vadd.f32 %v1195_v22, %v574_v56  ;;  %v1038_v4 = vpop.f32.mrf.mxu0  ;;  %v1054_v5 = vpop.f32.mrf.mxu1 }
  0xf5   : > { %800 = vst.msk [vmem:[%s1210_s10 + $0x14] sm:$0xf] %vm794_vm1, %v969_v54  ;;  %816 = vst.msk [vmem:[%s1210_s10 + $0x54] sm:$0xf] %vm794_vm1, %v985_v55  ;;  %v629_v1 = vadd.f32 %v1195_v22, %v590_v57  ;;  %v572_v2 = vmul.f32 %v1190_v20, %v464_v58  ;;  %v588_v3 = vmul.f32 %v1190_v20, %v528_v59 }
  0xf6   : > { %805 = vst.msk [vmem:[%s1210_s10 + $0x28] sm:$0xf] %vm794_vm1, %v974_v60  ;;  %821 = vst.msk [vmem:[%s1210_s10 + $0x68] sm:$0xf] %vm794_vm1, %v990_v61  ;;  %v972_v6 = vpack.c.bf16 %v642_v62, %v642_v62  ;;  %v988_v7 = vpack.c.bf16 %v658_v63, %v658_v63  ;;  %v577_v8 = vmul.f32 %v1038_v4, %v1190_v20  ;;  %v645_v10 = vmax.f32 %v613_v0, 0.0  ;;  %v477_v14 = vpop.f32.mrf.mxu0  ;;  %v541_v15 = vpop.f32.mrf.mxu1 }
  0xf7   : > { %v593_v9 = vmul.f32 %v1054_v5, %v1190_v20  ;;  %v661_v11 = vmax.f32 %v629_v1, 0.0  ;;  %v611_v12 = vadd.f32 %v1195_v22, %v572_v2  ;;  %v627_v13 = vadd.f32 %v1195_v22, %v588_v3 }
  0xf8   : > { %803 = vst.msk [vmem:[%s1210_s10 + $0x20] sm:$0xf] %vm794_vm1, %v972_v6  ;;  %819 = vst.msk [vmem:[%s1210_s10 + $0x60] sm:$0xf] %vm794_vm1, %v988_v7  ;;  %v616_v16 = vadd.f32 %v1195_v22, %v577_v8  ;;  %v575_v18 = vmul.f32 %v1190_v20, %v477_v14  ;;  %v591_v19 = vmul.f32 %v1190_v20, %v541_v15  ;;  %v1039_v26 = vpop.f32.mrf.mxu0  ;;  %v1055_v27 = vpop.f32.mrf.mxu1 }
  0xf9   : > { %v632_v17 = vadd.f32 %v1195_v22, %v593_v9  ;;  %v975_v21 = vpack.c.bf16 %v645_v10, %v645_v10  ;;  %v991_v23 = vpack.c.bf16 %v661_v11, %v661_v11  ;;  %v643_v24 = vmax.f32 %v611_v12, 0.0 }
  0xfa   : > { %v659_v25 = vmax.f32 %v627_v13, 0.0  ;;  %v648_v28 = vmax.f32 %v616_v16, 0.0  ;;  %v614_v30 = vadd.f32 %v1195_v22, %v575_v18  ;;  %v630_v31 = vadd.f32 %v1195_v22, %v591_v19  ;;  %v480_v36 = vpop.f32.mrf.mxu0  ;;  %v544_v37 = vpop.f32.mrf.mxu1 }
  0xfb   : > { %v664_v29 = vmax.f32 %v632_v17, 0.0  ;;  %806 = vst.msk [vmem:[%s1210_s10 + $0x2c] sm:$0xf] %vm794_vm1, %v975_v21  ;;  %822 = vst.msk [vmem:[%s1210_s10 + $0x6c] sm:$0xf] %vm794_vm1, %v991_v23  ;;  %v973_v32 = vpack.c.bf16 %v643_v24, %v643_v24  ;;  %v578_v34 = vmul.f32 %v1039_v26, %v1190_v20  ;;  %v594_v35 = vmul.f32 %v1055_v27, %v1190_v20 }
  0xfc   : > { %v989_v33 = vpack.c.bf16 %v659_v25, %v659_v25  ;;  %v978_v38 = vpack.c.bf16 %v648_v28, %v648_v28  ;;  %v646_v40 = vmax.f32 %v614_v30, 0.0  ;;  %v662_v41 = vmax.f32 %v630_v31, 0.0 }
  0xfd   : > { %v994_v39 = vpack.c.bf16 %v664_v29, %v664_v29  ;;  %804 = vst.msk [vmem:[%s1210_s10 + $0x24] sm:$0xf] %vm794_vm1, %v973_v32  ;;  %v617_v42 = vadd.f32 %v1195_v22, %v578_v34  ;;  %v633_v43 = vadd.f32 %v1195_v22, %v594_v35  ;;  %v576_v44 = vmul.f32 %v1190_v20, %v480_v36 }
  0xfe   : > { %820 = vst.msk [vmem:[%s1210_s10 + $0x64] sm:$0xf] %vm794_vm1, %v989_v33  ;;  %v592_v45 = vmul.f32 %v1190_v20, %v544_v37  ;;  %809 = vst.msk [vmem:[%s1210_s10 + $0x38] sm:$0xf] %vm794_vm1, %v978_v38  ;;  %v976_v46 = vpack.c.bf16 %v646_v40, %v646_v40  ;;  %v992_v47 = vpack.c.bf16 %v662_v41, %v662_v41 }
  0xff   : > { %825 = vst.msk [vmem:[%s1210_s10 + $0x78] sm:$0xf] %vm794_vm1, %v994_v39  ;;  %v649_v48 = vmax.f32 %v617_v42, 0.0  ;;  %v665_v49 = vmax.f32 %v633_v43, 0.0  ;;  %v615_v50 = vadd.f32 %v1195_v22, %v576_v44 }
 0x100   : > { %v631_v51 = vadd.f32 %v1195_v22, %v592_v45  ;;  %807 = vst.msk [vmem:[%s1210_s10 + $0x30] sm:$0xf] %vm794_vm1, %v976_v46  ;;  %823 = vst.msk [vmem:[%s1210_s10 + $0x70] sm:$0xf] %vm794_vm1, %v992_v47 }
 0x101   : > { %v979_v20 = vpack.c.bf16 %v649_v48, %v649_v48  ;;  %v995_v52 = vpack.c.bf16 %v665_v49, %v665_v49  ;;  %v647_v53 = vmax.f32 %v615_v50, 0.0 }
 0x102   : > { %v663_v54 = vmax.f32 %v631_v51, 0.0 }
 0x103   : > { %810 = vst.msk [vmem:[%s1210_s10 + $0x3c] sm:$0xf] %vm794_vm1, %v979_v20  ;;  %826 = vst.msk [vmem:[%s1210_s10 + $0x7c] sm:$0xf] %vm794_vm1, %v995_v52  ;;  %v977_v55 = vpack.c.bf16 %v647_v53, %v647_v53 }
 0x104   : > { %v993_v56 = vpack.c.bf16 %v663_v54, %v663_v54 }
 0x105   : > { %808 = vst.msk [vmem:[%s1210_s10 + $0x34] sm:$0xf] %vm794_vm1, %v977_v55 }
 0x106   : > { %824 = vst.msk [vmem:[%s1210_s10 + $0x74] sm:$0xf] %vm794_vm1, %v993_v56 }
 0x107 PF: > { %s14_s15 = sadd.s32 1, %s1098_s15  }
 0x108   : > { %p11_p4 = scmp.ge.s32.totalorder %s14_s15, 4  }
 0x10a   :  { %13 = sbr.rel (!%p11_p4) target bundleno = 1 (0x1), region = 66 }

// kernel: _lambda_.22
= control target key start
LH: loop header
LB: loop body
LE: loop exit
PB: predicated region body
PF: predicated region fallthrough
CT: control target
= control target key end

     0   :  { %s1334_s30 = smov 0   ;;  %s1759_s0 = inlined_call_operand.vmem [shape: bf16[512,64], index: 0, kind: input, shape index: {}]   ;;  %s1760_s1 = inlined_call_operand.vmem [shape: bf16[512,64], index: 1, kind: input, shape index: {}]   ;;  %s1761_s2 = inlined_call_operand.vmem [shape: bf16[512,64], index: 2, kind: input, shape index: {}]   ;;  %s1762_s3 = inlined_call_operand.vmem [shape: bf16[512,64], index: 3, kind: input, shape index: {}]   ;;  %s1763_s4 = inlined_call_operand.vmem [shape: bf16[512,64], index: 4, kind: input, shape index: {}]   ;;  %s1764_s5 = inlined_call_operand.vmem [shape: bf16[512,64], index: 5, kind: input, shape index: {}]   ;;  %s1765_s6 = inlined_call_operand.vmem [shape: bf16[512,64], index: 6, kind: input, shape index: {}]   ;;  %s1766_s7 = inlined_call_operand.vmem [shape: bf16[512,64], index: 7, kind: input, shape index: {}]   ;;  %s1767_s8 = inlined_call_operand.vmem [shape: bf16[512,64], index: 8, kind: input, shape index: {}]   ;;  %s1768_s9 = inlined_call_operand.vmem [shape: bf16[512,64], index: 9, kind: output, shape index: {}]  }
   0x1 LB: > { %s1241_s10 = sadd.s32 4294967295, %s1282_s30   ;;  %p1245_p0 = scmp.ge.s32.totalorder %s1282_s30, 1  ;;  %s1282_s30 = sphi %s1334_s30, %s19_s30  }
   0x2   : > { %p376_p1 = scmp.lt.s32.totalorder %s1282_s30, 3 }
   0x4   : > { %p377_p2 = pnand %p1245_p0, %p376_p1 }
   0x5   : > { %s1246_s11 = sshll.u32 (!%p377_p2), %s1241_s10, 5 }
   0x6   : > { %380 = sbr.rel (%p377_p2) target bundleno = 131 (0x83), region = 56  ;;  %p453_p3 = scmp.lt.s32.totalorder (!%p377_p2), %s1246_s11, 63 }
   0xb   : > { %s1770_s11 = smov (!%p453_p3, %s1246_s11), 63  ;;  %vm1056_vm0 = vcmask 519168  }
   0xc   : > { %s1342_s12 = sshll.u32 %s1770_s11, 2 }
   0xd   : > { %s1348_s15 = scalar_lea.vmem %s1759_s0, %s1342_s12  ;;  %s1354_s18 = scalar_lea.vmem %s1760_s1, %s1342_s12 }
   0xe   : > { %s1360_s21 = scalar_lea.vmem %s1761_s2, %s1342_s12  ;;  %s1366_s24 = scalar_lea.vmem %s1762_s3, %s1342_s12  ;;  %v512_v0 = vld [vmem:[%s1348_s15] sm:$0xf]  ;;  %v513_v2 = vld [vmem:[%s1348_s15 + $0x4] sm:$0xf]  ;;  %v514_v17 = vld [vmem:[%s1348_s15 + $0x8] sm:$0xf] }
   0xf   : > { %v544_v1 = vld [vmem:[%s1354_s18] sm:$0xf]  ;;  %s1375_s27 = scalar_lea.vmem %s1763_s4, %s1342_s12  ;;  %v545_v5 = vld [vmem:[%s1354_s18 + $0x4] sm:$0xf]  ;;  %s1383_s10 = scalar_lea.vmem %s1764_s5, %s1342_s12  ;;  %v546_v18 = vld [vmem:[%s1354_s18 + $0x8] sm:$0xf] }
  0x10   : > { %v576_v3 = vmax.bf16 %v544_v1, %v512_v0  ;;  %v608_v4 = vld [vmem:[%s1360_s21] sm:$0xf]  ;;  %v577_v7 = vmax.bf16 %v545_v5, %v513_v2  ;;  %v609_v8 = vld [vmem:[%s1360_s21 + $0x4] sm:$0xf]  ;;  %s1393_s14 = scalar_lea.vmem %s1765_s6, %s1342_s12  ;;  %v610_v19 = vld [vmem:[%s1360_s21 + $0x8] sm:$0xf]  ;;  %s1404_s19 = scalar_lea.vmem %s1766_s7, %s1342_s12  ;;  %v578_v22 = vmax.bf16 %v546_v18, %v514_v17 }
  0x11   : > { %v672_v6 = vld [vmem:[%s1366_s24] sm:$0xf]  ;;  %v673_v10 = vld [vmem:[%s1366_s24 + $0x4] sm:$0xf]  ;;  %s1410_s23 = scalar_lea.vmem %s1767_s8, %s1342_s12  ;;  %v674_v26 = vld [vmem:[%s1366_s24 + $0x8] sm:$0xf]  ;;  %s1434_s28 = scalar_lea.vmem %s1768_s9, %s1342_s12 }
  0x12   : > { %v640_v9 = vmax.bf16 %v608_v4, %v576_v3  ;;  %v736_v11 = vld [vmem:[%s1375_s27] sm:$0xf]  ;;  %v641_v12 = vmax.bf16 %v609_v8, %v577_v7  ;;  %v737_v15 = vld [vmem:[%s1375_s27 + $0x4] sm:$0xf]  ;;  %v642_v28 = vmax.bf16 %v610_v19, %v578_v22  ;;  %v515_v29 = vld [vmem:[%s1348_s15 + $0xc] sm:$0xf] }
  0x13   : > { %v800_v14 = vld [vmem:[%s1383_s10] sm:$0xf]  ;;  %v801_v21 = vld [vmem:[%s1383_s10 + $0x4] sm:$0xf]  ;;  %v547_v30 = vld [vmem:[%s1354_s18 + $0xc] sm:$0xf] }
  0x14   : > { %v704_v13 = vmax.bf16 %v672_v6, %v640_v9  ;;  %v705_v16 = vmax.bf16 %v673_v10, %v641_v12  ;;  %v864_v23 = vld [vmem:[%s1393_s14] sm:$0xf]  ;;  %v865_v25 = vld [vmem:[%s1393_s14 + $0x4] sm:$0xf]  ;;  %v611_v31 = vld [vmem:[%s1360_s21 + $0xc] sm:$0xf]  ;;  %v579_v36 = vmax.bf16 %v547_v30, %v515_v29  ;;  %v706_v39 = vmax.bf16 %v674_v26, %v642_v28 }
  0x15   : > { %v928_v32 = vld [vmem:[%s1404_s19] sm:$0xf]  ;;  %v738_v35 = vld [vmem:[%s1375_s27 + $0x8] sm:$0xf]  ;;  %v929_v38 = vld [vmem:[%s1404_s19 + $0x4] sm:$0xf] }
  0x16   : > { %v768_v20 = vmax.bf16 %v736_v11, %v704_v13  ;;  %v769_v24 = vmax.bf16 %v737_v15, %v705_v16  ;;  %v992_v33 = vld [vmem:[%s1410_s23] sm:$0xf]  ;;  %v802_v40 = vld [vmem:[%s1383_s10 + $0x8] sm:$0xf]  ;;  %v675_v41 = vld [vmem:[%s1366_s24 + $0xc] sm:$0xf]  ;;  %v643_v43 = vmax.bf16 %v611_v31, %v579_v36  ;;  %v770_v49 = vmax.bf16 %v738_v35, %v706_v39 }
  0x17   : > { %v516_v44 = vld [vmem:[%s1348_s15 + $0x10] sm:$0xf]  ;;  %v993_v48 = vld [vmem:[%s1410_s23 + $0x4] sm:$0xf]  ;;  %v739_v50 = vld [vmem:[%s1375_s27 + $0xc] sm:$0xf] }
  0x18   : > { %v832_v27 = vmax.bf16 %v800_v14, %v768_v20  ;;  %v833_v34 = vmax.bf16 %v801_v21, %v769_v24  ;;  %v548_v45 = vld [vmem:[%s1354_s18 + $0x10] sm:$0xf]  ;;  %v866_v53 = vld [vmem:[%s1393_s14 + $0x8] sm:$0xf]  ;;  %v707_v54 = vmax.bf16 %v675_v41, %v643_v43  ;;  %v803_v55 = vld [vmem:[%s1383_s10 + $0xc] sm:$0xf]  ;;  %v834_v58 = vmax.bf16 %v802_v40, %v770_v49 }
  0x19   : > { %v612_v46 = vld [vmem:[%s1360_s21 + $0x10] sm:$0xf]  ;;  %v580_v51 = vmax.bf16 %v548_v45, %v516_v44  ;;  %v517_v60 = vld [vmem:[%s1348_s15 + $0x14] sm:$0xf]  ;;  %v930_v0 = vld [vmem:[%s1404_s19 + $0x8] sm:$0xf] }
  0x1a   : > { %v896_v37 = vmax.bf16 %v864_v23, %v832_v27  ;;  %v897_v42 = vmax.bf16 %v865_v25, %v833_v34  ;;  %v676_v56 = vld [vmem:[%s1366_s24 + $0x10] sm:$0xf]  ;;  %v549_v61 = vld [vmem:[%s1354_s18 + $0x14] sm:$0xf]  ;;  %v994_v1 = vld [vmem:[%s1410_s23 + $0x8] sm:$0xf]  ;;  %v771_v2 = vmax.bf16 %v739_v50, %v707_v54  ;;  %v898_v5 = vmax.bf16 %v866_v53, %v834_v58 }
  0x1b   : > { %v644_v59 = vmax.bf16 %v612_v46, %v580_v51  ;;  %v613_v62 = vld [vmem:[%s1360_s21 + $0x14] sm:$0xf]  ;;  %v740_v3 = vld [vmem:[%s1375_s27 + $0x10] sm:$0xf]  ;;  %v581_v4 = vmax.bf16 %v549_v61, %v517_v60  ;;  %v867_v6 = vld [vmem:[%s1393_s14 + $0xc] sm:$0xf] }
  0x1c   : > { %v960_v47 = vmax.bf16 %v928_v32, %v896_v37  ;;  %v961_v52 = vmax.bf16 %v929_v38, %v897_v42  ;;  %v804_v8 = vld [vmem:[%s1383_s10 + $0x10] sm:$0xf]  ;;  %v677_v9 = vld [vmem:[%s1366_s24 + $0x14] sm:$0xf]  ;;  %v835_v10 = vmax.bf16 %v803_v55, %v771_v2  ;;  %v518_v12 = vld [vmem:[%s1348_s15 + $0x18] sm:$0xf]  ;;  %v962_v15 = vmax.bf16 %v930_v0, %v898_v5 }
  0x1d   : > { %v708_v7 = vmax.bf16 %v676_v56, %v644_v59  ;;  %v645_v11 = vmax.bf16 %v613_v62, %v581_v4  ;;  %v550_v13 = vld [vmem:[%s1354_s18 + $0x18] sm:$0xf]  ;;  %v931_v16 = vld [vmem:[%s1404_s19 + $0xc] sm:$0xf]  ;;  %v741_v19 = vld [vmem:[%s1375_s27 + $0x14] sm:$0xf] }
  0x1e   : > { %v1024_v57 = vmax.bf16 %v992_v33, %v960_v47  ;;  %v1025_v63 = vmax.bf16 %v993_v48, %v961_v52  ;;  %v614_v14 = vld [vmem:[%s1360_s21 + $0x18] sm:$0xf]  ;;  %v995_v17 = vld [vmem:[%s1410_s23 + $0xc] sm:$0xf]  ;;  %v582_v20 = vmax.bf16 %v550_v13, %v518_v12  ;;  %v899_v21 = vmax.bf16 %v867_v6, %v835_v10  ;;  %v868_v22 = vld [vmem:[%s1393_s14 + $0x10] sm:$0xf] }
  0x1f   : > { %v772_v18 = vmax.bf16 %v740_v3, %v708_v7  ;;  %v709_v23 = vmax.bf16 %v677_v9, %v645_v11  ;;  %v805_v24 = vld [vmem:[%s1383_s10 + $0x14] sm:$0xf]  ;;  %v678_v25 = vld [vmem:[%s1366_s24 + $0x18] sm:$0xf]  ;;  %v1026_v26 = vmax.bf16 %v994_v1, %v962_v15  ;;  %v519_v29 = vld [vmem:[%s1348_s15 + $0x1c] sm:$0xf] }
  0x20   : > { %1057 = vst.msk [vmem:[%s1434_s28] sm:$0xf] %vm1056_vm0, %v1024_v57  ;;  %1058 = vst.msk [vmem:[%s1434_s28 + $0x4] sm:$0xf] %vm1056_vm0, %v1025_v63  ;;  %v646_v28 = vmax.bf16 %v614_v14, %v582_v20  ;;  %v551_v30 = vld [vmem:[%s1354_s18 + $0x1c] sm:$0xf]  ;;  %v963_v32 = vmax.bf16 %v931_v16, %v899_v21 }
  0x21   : > { %v836_v27 = vmax.bf16 %v804_v8, %v772_v18  ;;  %v615_v31 = vld [vmem:[%s1360_s21 + $0x1c] sm:$0xf]  ;;  %v932_v33 = vld [vmem:[%s1404_s19 + $0x10] sm:$0xf]  ;;  %v773_v35 = vmax.bf16 %v741_v19, %v709_v23  ;;  %v742_v36 = vld [vmem:[%s1375_s27 + $0x18] sm:$0xf]  ;;  %v583_v37 = vmax.bf16 %v551_v30, %v519_v29 }
  0x22   : > { %v996_v34 = vld [vmem:[%s1410_s23 + $0x10] sm:$0xf]  ;;  %1059 = vst.msk [vmem:[%s1434_s28 + $0x8] sm:$0xf] %vm1056_vm0, %v1026_v26  ;;  %v869_v39 = vld [vmem:[%s1393_s14 + $0x14] sm:$0xf]  ;;  %v710_v40 = vmax.bf16 %v678_v25, %v646_v28  ;;  %v1027_v43 = vmax.bf16 %v995_v17, %v963_v32 }
  0x23   : > { %v900_v38 = vmax.bf16 %v868_v22, %v836_v27  ;;  %v806_v41 = vld [vmem:[%s1383_s10 + $0x18] sm:$0xf]  ;;  %v679_v42 = vld [vmem:[%s1366_s24 + $0x1c] sm:$0xf]  ;;  %v837_v44 = vmax.bf16 %v805_v24, %v773_v35  ;;  %v647_v45 = vmax.bf16 %v615_v31, %v583_v37  ;;  %v520_v46 = vld [vmem:[%s1348_s15 + $0x20] sm:$0xf] }
  0x24   : > { %v552_v47 = vld [vmem:[%s1354_s18 + $0x20] sm:$0xf]  ;;  %v933_v50 = vld [vmem:[%s1404_s19 + $0x14] sm:$0xf]  ;;  %v774_v52 = vmax.bf16 %v742_v36, %v710_v40  ;;  %v743_v53 = vld [vmem:[%s1375_s27 + $0x1c] sm:$0xf] }
  0x25   : > { %v616_v48 = vld [vmem:[%s1360_s21 + $0x20] sm:$0xf]  ;;  %v964_v49 = vmax.bf16 %v932_v33, %v900_v38  ;;  %v997_v51 = vld [vmem:[%s1410_s23 + $0x14] sm:$0xf]  ;;  %v584_v54 = vmax.bf16 %v552_v47, %v520_v46  ;;  %1060 = vst.msk [vmem:[%s1434_s28 + $0xc] sm:$0xf] %vm1056_vm0, %v1027_v43  ;;  %v901_v55 = vmax.bf16 %v869_v39, %v837_v44  ;;  %v711_v57 = vmax.bf16 %v679_v42, %v647_v45 }
  0x26   : > { %v870_v56 = vld [vmem:[%s1393_s14 + $0x18] sm:$0xf]  ;;  %v807_v58 = vld [vmem:[%s1383_s10 + $0x1c] sm:$0xf]  ;;  %v680_v59 = vld [vmem:[%s1366_s24 + $0x20] sm:$0xf]  ;;  %v838_v61 = vmax.bf16 %v806_v41, %v774_v52 }
  0x27   : > { %v1028_v60 = vmax.bf16 %v996_v34, %v964_v49  ;;  %v648_v62 = vmax.bf16 %v616_v48, %v584_v54  ;;  %v521_v63 = vld [vmem:[%s1348_s15 + $0x24] sm:$0xf]  ;;  %v965_v2 = vmax.bf16 %v933_v50, %v901_v55  ;;  %v934_v3 = vld [vmem:[%s1404_s19 + $0x18] sm:$0xf]  ;;  %v775_v5 = vmax.bf16 %v743_v53, %v711_v57  ;;  %v744_v6 = vld [vmem:[%s1375_s27 + $0x20] sm:$0xf] }
  0x28   : > { %v553_v0 = vld [vmem:[%s1354_s18 + $0x24] sm:$0xf]  ;;  %v998_v4 = vld [vmem:[%s1410_s23 + $0x18] sm:$0xf]  ;;  %v902_v8 = vmax.bf16 %v870_v56, %v838_v61  ;;  %v871_v9 = vld [vmem:[%s1393_s14 + $0x1c] sm:$0xf] }
  0x29   : > { %v617_v1 = vld [vmem:[%s1360_s21 + $0x24] sm:$0xf]  ;;  %v585_v7 = vmax.bf16 %v553_v0, %v521_v63  ;;  %1061 = vst.msk [vmem:[%s1434_s28 + $0x10] sm:$0xf] %vm1056_vm0, %v1028_v60  ;;  %v712_v10 = vmax.bf16 %v680_v59, %v648_v62  ;;  %v808_v11 = vld [vmem:[%s1383_s10 + $0x20] sm:$0xf]  ;;  %v1029_v13 = vmax.bf16 %v997_v51, %v965_v2  ;;  %v839_v14 = vmax.bf16 %v807_v58, %v775_v5 }
  0x2a   : > { %v681_v12 = vld [vmem:[%s1366_s24 + $0x24] sm:$0xf]  ;;  %v522_v16 = vld [vmem:[%s1348_s15 + $0x28] sm:$0xf]  ;;  %v966_v19 = vmax.bf16 %v934_v3, %v902_v8  ;;  %v935_v20 = vld [vmem:[%s1404_s19 + $0x1c] sm:$0xf] }
  0x2b   : > { %v649_v15 = vmax.bf16 %v617_v1, %v585_v7  ;;  %v554_v17 = vld [vmem:[%s1354_s18 + $0x28] sm:$0xf]  ;;  %v999_v21 = vld [vmem:[%s1410_s23 + $0x1c] sm:$0xf]  ;;  %v776_v22 = vmax.bf16 %v744_v6, %v712_v10  ;;  %v745_v23 = vld [vmem:[%s1375_s27 + $0x24] sm:$0xf]  ;;  %v903_v25 = vmax.bf16 %v871_v9, %v839_v14 }
  0x2c   : > { %v618_v18 = vld [vmem:[%s1360_s21 + $0x28] sm:$0xf]  ;;  %v586_v24 = vmax.bf16 %v554_v17, %v522_v16  ;;  %1062 = vst.msk [vmem:[%s1434_s28 + $0x14] sm:$0xf] %vm1056_vm0, %v1029_v13  ;;  %v872_v26 = vld [vmem:[%s1393_s14 + $0x20] sm:$0xf]  ;;  %v1030_v30 = vmax.bf16 %v998_v4, %v966_v19 }
  0x2d   : > { %v713_v27 = vmax.bf16 %v681_v12, %v649_v15  ;;  %v809_v28 = vld [vmem:[%s1383_s10 + $0x24] sm:$0xf]  ;;  %v682_v29 = vld [vmem:[%s1366_s24 + $0x28] sm:$0xf]  ;;  %v840_v31 = vmax.bf16 %v808_v11, %v776_v22  ;;  %v523_v33 = vld [vmem:[%s1348_s15 + $0x2c] sm:$0xf]  ;;  %v967_v36 = vmax.bf16 %v935_v20, %v903_v25 }
  0x2e   : > { %v650_v32 = vmax.bf16 %v618_v18, %v586_v24  ;;  %v555_v34 = vld [vmem:[%s1354_s18 + $0x2c] sm:$0xf]  ;;  %v936_v37 = vld [vmem:[%s1404_s19 + $0x20] sm:$0xf]  ;;  %v746_v40 = vld [vmem:[%s1375_s27 + $0x28] sm:$0xf] }
  0x2f   : > { %v619_v35 = vld [vmem:[%s1360_s21 + $0x2c] sm:$0xf]  ;;  %v1000_v38 = vld [vmem:[%s1410_s23 + $0x20] sm:$0xf]  ;;  %v777_v39 = vmax.bf16 %v745_v23, %v713_v27  ;;  %v587_v41 = vmax.bf16 %v555_v34, %v523_v33  ;;  %1063 = vst.msk [vmem:[%s1434_s28 + $0x18] sm:$0xf] %vm1056_vm0, %v1030_v30  ;;  %v904_v42 = vmax.bf16 %v872_v26, %v840_v31  ;;  %v1031_v47 = vmax.bf16 %v999_v21, %v967_v36 }
  0x30   : > { %v873_v43 = vld [vmem:[%s1393_s14 + $0x24] sm:$0xf]  ;;  %v714_v44 = vmax.bf16 %v682_v29, %v650_v32  ;;  %v810_v45 = vld [vmem:[%s1383_s10 + $0x28] sm:$0xf]  ;;  %v683_v46 = vld [vmem:[%s1366_s24 + $0x2c] sm:$0xf] }
  0x31   : > { %v841_v48 = vmax.bf16 %v809_v28, %v777_v39  ;;  %v651_v49 = vmax.bf16 %v619_v35, %v587_v41  ;;  %v524_v50 = vld [vmem:[%s1348_s15 + $0x30] sm:$0xf]  ;;  %v968_v53 = vmax.bf16 %v936_v37, %v904_v42  ;;  %v937_v54 = vld [vmem:[%s1404_s19 + $0x24] sm:$0xf]  ;;  %v747_v57 = vld [vmem:[%s1375_s27 + $0x2c] sm:$0xf] }
  0x32   : > { %v556_v51 = vld [vmem:[%s1354_s18 + $0x30] sm:$0xf]  ;;  %v1001_v55 = vld [vmem:[%s1410_s23 + $0x24] sm:$0xf]  ;;  %v778_v56 = vmax.bf16 %v746_v40, %v714_v44  ;;  %1064 = vst.msk [vmem:[%s1434_s28 + $0x1c] sm:$0xf] %vm1056_vm0, %v1031_v47 }
  0x33   : > { %v620_v52 = vld [vmem:[%s1360_s21 + $0x30] sm:$0xf]  ;;  %v588_v58 = vmax.bf16 %v556_v51, %v524_v50  ;;  %v905_v59 = vmax.bf16 %v873_v43, %v841_v48  ;;  %v874_v60 = vld [vmem:[%s1393_s14 + $0x28] sm:$0xf]  ;;  %v715_v61 = vmax.bf16 %v683_v46, %v651_v49  ;;  %v811_v62 = vld [vmem:[%s1383_s10 + $0x2c] sm:$0xf]  ;;  %v1032_v0 = vmax.bf16 %v1000_v38, %v968_v53 }
  0x34   : > { %v684_v63 = vld [vmem:[%s1366_s24 + $0x30] sm:$0xf]  ;;  %v842_v1 = vmax.bf16 %v810_v45, %v778_v56  ;;  %v525_v3 = vld [vmem:[%s1348_s15 + $0x34] sm:$0xf]  ;;  %v938_v7 = vld [vmem:[%s1404_s19 + $0x28] sm:$0xf] }
  0x35   : > { %v652_v2 = vmax.bf16 %v620_v52, %v588_v58  ;;  %v557_v4 = vld [vmem:[%s1354_s18 + $0x34] sm:$0xf]  ;;  %v969_v6 = vmax.bf16 %v937_v54, %v905_v59  ;;  %v1002_v8 = vld [vmem:[%s1410_s23 + $0x28] sm:$0xf]  ;;  %v779_v9 = vmax.bf16 %v747_v57, %v715_v61  ;;  %v748_v10 = vld [vmem:[%s1375_s27 + $0x30] sm:$0xf] }
  0x36   : > { %v621_v5 = vld [vmem:[%s1360_s21 + $0x34] sm:$0xf]  ;;  %v589_v11 = vmax.bf16 %v557_v4, %v525_v3  ;;  %1065 = vst.msk [vmem:[%s1434_s28 + $0x20] sm:$0xf] %vm1056_vm0, %v1032_v0  ;;  %v906_v12 = vmax.bf16 %v874_v60, %v842_v1  ;;  %v875_v13 = vld [vmem:[%s1393_s14 + $0x2c] sm:$0xf] }
  0x37   : > { %v716_v14 = vmax.bf16 %v684_v63, %v652_v2  ;;  %v812_v15 = vld [vmem:[%s1383_s10 + $0x30] sm:$0xf]  ;;  %v685_v16 = vld [vmem:[%s1366_s24 + $0x34] sm:$0xf]  ;;  %v1033_v17 = vmax.bf16 %v1001_v55, %v969_v6  ;;  %v843_v18 = vmax.bf16 %v811_v62, %v779_v9  ;;  %v526_v20 = vld [vmem:[%s1348_s15 + $0x38] sm:$0xf] }
  0x38   : > { %v653_v19 = vmax.bf16 %v621_v5, %v589_v11  ;;  %v558_v21 = vld [vmem:[%s1354_s18 + $0x38] sm:$0xf]  ;;  %v970_v23 = vmax.bf16 %v938_v7, %v906_v12  ;;  %v939_v24 = vld [vmem:[%s1404_s19 + $0x2c] sm:$0xf]  ;;  %v749_v27 = vld [vmem:[%s1375_s27 + $0x34] sm:$0xf] }
  0x39   : > { %v622_v22 = vld [vmem:[%s1360_s21 + $0x38] sm:$0xf]  ;;  %v1003_v25 = vld [vmem:[%s1410_s23 + $0x2c] sm:$0xf]  ;;  %v780_v26 = vmax.bf16 %v748_v10, %v716_v14  ;;  %v590_v28 = vmax.bf16 %v558_v21, %v526_v20  ;;  %1066 = vst.msk [vmem:[%s1434_s28 + $0x24] sm:$0xf] %vm1056_vm0, %v1033_v17  ;;  %v907_v29 = vmax.bf16 %v875_v13, %v843_v18 }
  0x3a   : > { %v876_v30 = vld [vmem:[%s1393_s14 + $0x30] sm:$0xf]  ;;  %v717_v31 = vmax.bf16 %v685_v16, %v653_v19  ;;  %v813_v32 = vld [vmem:[%s1383_s10 + $0x34] sm:$0xf]  ;;  %v686_v33 = vld [vmem:[%s1366_s24 + $0x38] sm:$0xf]  ;;  %v1034_v34 = vmax.bf16 %v1002_v8, %v970_v23 }
  0x3b   : > { %v844_v35 = vmax.bf16 %v812_v15, %v780_v26  ;;  %v654_v36 = vmax.bf16 %v622_v22, %v590_v28  ;;  %v527_v37 = vld [vmem:[%s1348_s15 + $0x3c] sm:$0xf]  ;;  %v971_v40 = vmax.bf16 %v939_v24, %v907_v29  ;;  %v940_v41 = vld [vmem:[%s1404_s19 + $0x30] sm:$0xf]  ;;  %v750_v44 = vld [vmem:[%s1375_s27 + $0x38] sm:$0xf] }
  0x3c   : > { %v559_v38 = vld [vmem:[%s1354_s18 + $0x3c] sm:$0xf]  ;;  %v1004_v42 = vld [vmem:[%s1410_s23 + $0x30] sm:$0xf]  ;;  %v781_v43 = vmax.bf16 %v749_v27, %v717_v31  ;;  %1067 = vst.msk [vmem:[%s1434_s28 + $0x28] sm:$0xf] %vm1056_vm0, %v1034_v34 }
  0x3d   : > { %v623_v39 = vld [vmem:[%s1360_s21 + $0x3c] sm:$0xf]  ;;  %v591_v45 = vmax.bf16 %v559_v38, %v527_v37  ;;  %v908_v46 = vmax.bf16 %v876_v30, %v844_v35  ;;  %v877_v47 = vld [vmem:[%s1393_s14 + $0x34] sm:$0xf]  ;;  %v718_v48 = vmax.bf16 %v686_v33, %v654_v36  ;;  %v814_v49 = vld [vmem:[%s1383_s10 + $0x38] sm:$0xf]  ;;  %v1035_v51 = vmax.bf16 %v1003_v25, %v971_v40 }
  0x3e   : > { %v687_v50 = vld [vmem:[%s1366_s24 + $0x3c] sm:$0xf]  ;;  %v845_v52 = vmax.bf16 %v813_v32, %v781_v43  ;;  %v528_v54 = vld [vmem:[%s1348_s15 + $0x40] sm:$0xf]  ;;  %v941_v58 = vld [vmem:[%s1404_s19 + $0x34] sm:$0xf] }
  0x3f   : > { %v655_v53 = vmax.bf16 %v623_v39, %v591_v45  ;;  %v560_v55 = vld [vmem:[%s1354_s18 + $0x40] sm:$0xf]  ;;  %v972_v57 = vmax.bf16 %v940_v41, %v908_v46  ;;  %v1005_v59 = vld [vmem:[%s1410_s23 + $0x34] sm:$0xf]  ;;  %v782_v60 = vmax.bf16 %v750_v44, %v718_v48  ;;  %v751_v61 = vld [vmem:[%s1375_s27 + $0x3c] sm:$0xf] }
  0x40   : > { %v624_v56 = vld [vmem:[%s1360_s21 + $0x40] sm:$0xf]  ;;  %v592_v62 = vmax.bf16 %v560_v55, %v528_v54  ;;  %1068 = vst.msk [vmem:[%s1434_s28 + $0x2c] sm:$0xf] %vm1056_vm0, %v1035_v51  ;;  %v909_v63 = vmax.bf16 %v877_v47, %v845_v52  ;;  %v878_v0 = vld [vmem:[%s1393_s14 + $0x38] sm:$0xf] }
  0x41   : > { %v719_v1 = vmax.bf16 %v687_v50, %v655_v53  ;;  %v815_v2 = vld [vmem:[%s1383_s10 + $0x3c] sm:$0xf]  ;;  %v688_v3 = vld [vmem:[%s1366_s24 + $0x40] sm:$0xf]  ;;  %v1036_v4 = vmax.bf16 %v1004_v42, %v972_v57  ;;  %v846_v5 = vmax.bf16 %v814_v49, %v782_v60  ;;  %v529_v7 = vld [vmem:[%s1348_s15 + $0x44] sm:$0xf] }
  0x42   : > { %v656_v6 = vmax.bf16 %v624_v56, %v592_v62  ;;  %v561_v8 = vld [vmem:[%s1354_s18 + $0x44] sm:$0xf]  ;;  %v973_v10 = vmax.bf16 %v941_v58, %v909_v63  ;;  %v942_v11 = vld [vmem:[%s1404_s19 + $0x38] sm:$0xf]  ;;  %v752_v14 = vld [vmem:[%s1375_s27 + $0x40] sm:$0xf] }
  0x43   : > { %v625_v9 = vld [vmem:[%s1360_s21 + $0x44] sm:$0xf]  ;;  %v1006_v12 = vld [vmem:[%s1410_s23 + $0x38] sm:$0xf]  ;;  %v783_v13 = vmax.bf16 %v751_v61, %v719_v1  ;;  %v593_v15 = vmax.bf16 %v561_v8, %v529_v7  ;;  %1069 = vst.msk [vmem:[%s1434_s28 + $0x30] sm:$0xf] %vm1056_vm0, %v1036_v4  ;;  %v910_v16 = vmax.bf16 %v878_v0, %v846_v5 }
  0x44   : > { %v879_v17 = vld [vmem:[%s1393_s14 + $0x3c] sm:$0xf]  ;;  %v720_v18 = vmax.bf16 %v688_v3, %v656_v6  ;;  %v816_v19 = vld [vmem:[%s1383_s10 + $0x40] sm:$0xf]  ;;  %v689_v20 = vld [vmem:[%s1366_s24 + $0x44] sm:$0xf]  ;;  %v1037_v21 = vmax.bf16 %v1005_v59, %v973_v10 }
  0x45   : > { %v847_v22 = vmax.bf16 %v815_v2, %v783_v13  ;;  %v657_v23 = vmax.bf16 %v625_v9, %v593_v15  ;;  %v530_v24 = vld [vmem:[%s1348_s15 + $0x48] sm:$0xf]  ;;  %v974_v27 = vmax.bf16 %v942_v11, %v910_v16  ;;  %v943_v28 = vld [vmem:[%s1404_s19 + $0x3c] sm:$0xf]  ;;  %v753_v31 = vld [vmem:[%s1375_s27 + $0x44] sm:$0xf] }
  0x46   : > { %v562_v25 = vld [vmem:[%s1354_s18 + $0x48] sm:$0xf]  ;;  %v1007_v29 = vld [vmem:[%s1410_s23 + $0x3c] sm:$0xf]  ;;  %v784_v30 = vmax.bf16 %v752_v14, %v720_v18  ;;  %1070 = vst.msk [vmem:[%s1434_s28 + $0x34] sm:$0xf] %vm1056_vm0, %v1037_v21 }
  0x47   : > { %v626_v26 = vld [vmem:[%s1360_s21 + $0x48] sm:$0xf]  ;;  %v594_v32 = vmax.bf16 %v562_v25, %v530_v24  ;;  %v911_v33 = vmax.bf16 %v879_v17, %v847_v22  ;;  %v880_v34 = vld [vmem:[%s1393_s14 + $0x40] sm:$0xf]  ;;  %v721_v35 = vmax.bf16 %v689_v20, %v657_v23  ;;  %v817_v36 = vld [vmem:[%s1383_s10 + $0x44] sm:$0xf]  ;;  %v1038_v38 = vmax.bf16 %v1006_v12, %v974_v27 }
  0x48   : > { %v690_v37 = vld [vmem:[%s1366_s24 + $0x48] sm:$0xf]  ;;  %v848_v39 = vmax.bf16 %v816_v19, %v784_v30  ;;  %v531_v41 = vld [vmem:[%s1348_s15 + $0x4c] sm:$0xf]  ;;  %v944_v45 = vld [vmem:[%s1404_s19 + $0x40] sm:$0xf] }
  0x49   : > { %v658_v40 = vmax.bf16 %v626_v26, %v594_v32  ;;  %v563_v42 = vld [vmem:[%s1354_s18 + $0x4c] sm:$0xf]  ;;  %v975_v44 = vmax.bf16 %v943_v28, %v911_v33  ;;  %v1008_v46 = vld [vmem:[%s1410_s23 + $0x40] sm:$0xf]  ;;  %v785_v47 = vmax.bf16 %v753_v31, %v721_v35  ;;  %v754_v48 = vld [vmem:[%s1375_s27 + $0x48] sm:$0xf] }
  0x4a   : > { %v627_v43 = vld [vmem:[%s1360_s21 + $0x4c] sm:$0xf]  ;;  %v595_v49 = vmax.bf16 %v563_v42, %v531_v41  ;;  %1071 = vst.msk [vmem:[%s1434_s28 + $0x38] sm:$0xf] %vm1056_vm0, %v1038_v38  ;;  %v912_v50 = vmax.bf16 %v880_v34, %v848_v39  ;;  %v881_v51 = vld [vmem:[%s1393_s14 + $0x44] sm:$0xf] }
  0x4b   : > { %v722_v52 = vmax.bf16 %v690_v37, %v658_v40  ;;  %v818_v53 = vld [vmem:[%s1383_s10 + $0x48] sm:$0xf]  ;;  %v691_v54 = vld [vmem:[%s1366_s24 + $0x4c] sm:$0xf]  ;;  %v1039_v55 = vmax.bf16 %v1007_v29, %v975_v44  ;;  %v849_v56 = vmax.bf16 %v817_v36, %v785_v47  ;;  %v532_v58 = vld [vmem:[%s1348_s15 + $0x50] sm:$0xf] }
  0x4c   : > { %v659_v57 = vmax.bf16 %v627_v43, %v595_v49  ;;  %v564_v59 = vld [vmem:[%s1354_s18 + $0x50] sm:$0xf]  ;;  %v976_v61 = vmax.bf16 %v944_v45, %v912_v50  ;;  %v945_v62 = vld [vmem:[%s1404_s19 + $0x44] sm:$0xf]  ;;  %v755_v1 = vld [vmem:[%s1375_s27 + $0x4c] sm:$0xf] }
  0x4d   : > { %v628_v60 = vld [vmem:[%s1360_s21 + $0x50] sm:$0xf]  ;;  %v1009_v63 = vld [vmem:[%s1410_s23 + $0x44] sm:$0xf]  ;;  %v786_v0 = vmax.bf16 %v754_v48, %v722_v52  ;;  %v596_v2 = vmax.bf16 %v564_v59, %v532_v58  ;;  %1072 = vst.msk [vmem:[%s1434_s28 + $0x3c] sm:$0xf] %vm1056_vm0, %v1039_v55  ;;  %v913_v3 = vmax.bf16 %v881_v51, %v849_v56 }
  0x4e   : > { %v882_v4 = vld [vmem:[%s1393_s14 + $0x48] sm:$0xf]  ;;  %v723_v5 = vmax.bf16 %v691_v54, %v659_v57  ;;  %v819_v6 = vld [vmem:[%s1383_s10 + $0x4c] sm:$0xf]  ;;  %v692_v7 = vld [vmem:[%s1366_s24 + $0x50] sm:$0xf]  ;;  %v1040_v8 = vmax.bf16 %v1008_v46, %v976_v61 }
  0x4f   : > { %v850_v9 = vmax.bf16 %v818_v53, %v786_v0  ;;  %v660_v10 = vmax.bf16 %v628_v60, %v596_v2  ;;  %v533_v11 = vld [vmem:[%s1348_s15 + $0x54] sm:$0xf]  ;;  %v977_v14 = vmax.bf16 %v945_v62, %v913_v3  ;;  %v946_v15 = vld [vmem:[%s1404_s19 + $0x48] sm:$0xf]  ;;  %v756_v18 = vld [vmem:[%s1375_s27 + $0x50] sm:$0xf] }
  0x50   : > { %v565_v12 = vld [vmem:[%s1354_s18 + $0x54] sm:$0xf]  ;;  %v1010_v16 = vld [vmem:[%s1410_s23 + $0x48] sm:$0xf]  ;;  %v787_v17 = vmax.bf16 %v755_v1, %v723_v5  ;;  %1073 = vst.msk [vmem:[%s1434_s28 + $0x40] sm:$0xf] %vm1056_vm0, %v1040_v8 }
  0x51   : > { %v629_v13 = vld [vmem:[%s1360_s21 + $0x54] sm:$0xf]  ;;  %v597_v19 = vmax.bf16 %v565_v12, %v533_v11  ;;  %v914_v20 = vmax.bf16 %v882_v4, %v850_v9  ;;  %v883_v21 = vld [vmem:[%s1393_s14 + $0x4c] sm:$0xf]  ;;  %v724_v22 = vmax.bf16 %v692_v7, %v660_v10  ;;  %v820_v23 = vld [vmem:[%s1383_s10 + $0x50] sm:$0xf]  ;;  %v1041_v25 = vmax.bf16 %v1009_v63, %v977_v14 }
  0x52   : > { %v693_v24 = vld [vmem:[%s1366_s24 + $0x54] sm:$0xf]  ;;  %v851_v26 = vmax.bf16 %v819_v6, %v787_v17  ;;  %v534_v28 = vld [vmem:[%s1348_s15 + $0x58] sm:$0xf]  ;;  %v947_v32 = vld [vmem:[%s1404_s19 + $0x4c] sm:$0xf] }
  0x53   : > { %v661_v27 = vmax.bf16 %v629_v13, %v597_v19  ;;  %v566_v29 = vld [vmem:[%s1354_s18 + $0x58] sm:$0xf]  ;;  %v978_v31 = vmax.bf16 %v946_v15, %v914_v20  ;;  %v1011_v33 = vld [vmem:[%s1410_s23 + $0x4c] sm:$0xf]  ;;  %v788_v34 = vmax.bf16 %v756_v18, %v724_v22  ;;  %v757_v35 = vld [vmem:[%s1375_s27 + $0x54] sm:$0xf] }
  0x54   : > { %v630_v30 = vld [vmem:[%s1360_s21 + $0x58] sm:$0xf]  ;;  %v598_v36 = vmax.bf16 %v566_v29, %v534_v28  ;;  %1074 = vst.msk [vmem:[%s1434_s28 + $0x44] sm:$0xf] %vm1056_vm0, %v1041_v25  ;;  %v915_v37 = vmax.bf16 %v883_v21, %v851_v26  ;;  %v884_v38 = vld [vmem:[%s1393_s14 + $0x50] sm:$0xf] }
  0x55   : > { %v725_v39 = vmax.bf16 %v693_v24, %v661_v27  ;;  %v821_v40 = vld [vmem:[%s1383_s10 + $0x54] sm:$0xf]  ;;  %v694_v41 = vld [vmem:[%s1366_s24 + $0x58] sm:$0xf]  ;;  %v1042_v42 = vmax.bf16 %v1010_v16, %v978_v31  ;;  %v852_v43 = vmax.bf16 %v820_v23, %v788_v34  ;;  %v535_v45 = vld [vmem:[%s1348_s15 + $0x5c] sm:$0xf] }
  0x56   : > { %v662_v44 = vmax.bf16 %v630_v30, %v598_v36  ;;  %v567_v46 = vld [vmem:[%s1354_s18 + $0x5c] sm:$0xf]  ;;  %v979_v48 = vmax.bf16 %v947_v32, %v915_v37  ;;  %v948_v49 = vld [vmem:[%s1404_s19 + $0x50] sm:$0xf]  ;;  %v758_v52 = vld [vmem:[%s1375_s27 + $0x58] sm:$0xf] }
  0x57   : > { %v631_v47 = vld [vmem:[%s1360_s21 + $0x5c] sm:$0xf]  ;;  %v1012_v50 = vld [vmem:[%s1410_s23 + $0x50] sm:$0xf]  ;;  %v789_v51 = vmax.bf16 %v757_v35, %v725_v39  ;;  %v599_v53 = vmax.bf16 %v567_v46, %v535_v45  ;;  %1075 = vst.msk [vmem:[%s1434_s28 + $0x48] sm:$0xf] %vm1056_vm0, %v1042_v42  ;;  %v916_v54 = vmax.bf16 %v884_v38, %v852_v43 }
  0x58   : > { %v885_v55 = vld [vmem:[%s1393_s14 + $0x54] sm:$0xf]  ;;  %v726_v56 = vmax.bf16 %v694_v41, %v662_v44  ;;  %v822_v57 = vld [vmem:[%s1383_s10 + $0x58] sm:$0xf]  ;;  %v695_v58 = vld [vmem:[%s1366_s24 + $0x5c] sm:$0xf]  ;;  %v1043_v59 = vmax.bf16 %v1011_v33, %v979_v48 }
  0x59   : > { %v853_v60 = vmax.bf16 %v821_v40, %v789_v51  ;;  %v663_v61 = vmax.bf16 %v631_v47, %v599_v53  ;;  %v536_v62 = vld [vmem:[%s1348_s15 + $0x60] sm:$0xf]  ;;  %v980_v1 = vmax.bf16 %v948_v49, %v916_v54  ;;  %v949_v2 = vld [vmem:[%s1404_s19 + $0x54] sm:$0xf]  ;;  %v759_v5 = vld [vmem:[%s1375_s27 + $0x5c] sm:$0xf] }
  0x5a   : > { %v568_v63 = vld [vmem:[%s1354_s18 + $0x60] sm:$0xf]  ;;  %v1013_v3 = vld [vmem:[%s1410_s23 + $0x54] sm:$0xf]  ;;  %v790_v4 = vmax.bf16 %v758_v52, %v726_v56  ;;  %1076 = vst.msk [vmem:[%s1434_s28 + $0x4c] sm:$0xf] %vm1056_vm0, %v1043_v59 }
  0x5b   : > { %v632_v0 = vld [vmem:[%s1360_s21 + $0x60] sm:$0xf]  ;;  %v600_v6 = vmax.bf16 %v568_v63, %v536_v62  ;;  %v917_v7 = vmax.bf16 %v885_v55, %v853_v60  ;;  %v886_v8 = vld [vmem:[%s1393_s14 + $0x58] sm:$0xf]  ;;  %v727_v9 = vmax.bf16 %v695_v58, %v663_v61  ;;  %v823_v10 = vld [vmem:[%s1383_s10 + $0x5c] sm:$0xf]  ;;  %v1044_v12 = vmax.bf16 %v1012_v50, %v980_v1 }
  0x5c   : > { %v696_v11 = vld [vmem:[%s1366_s24 + $0x60] sm:$0xf]  ;;  %v854_v13 = vmax.bf16 %v822_v57, %v790_v4  ;;  %v537_v15 = vld [vmem:[%s1348_s15 + $0x64] sm:$0xf]  ;;  %v950_v19 = vld [vmem:[%s1404_s19 + $0x58] sm:$0xf] }
  0x5d   : > { %v664_v14 = vmax.bf16 %v632_v0, %v600_v6  ;;  %v569_v16 = vld [vmem:[%s1354_s18 + $0x64] sm:$0xf]  ;;  %v981_v18 = vmax.bf16 %v949_v2, %v917_v7  ;;  %v1014_v20 = vld [vmem:[%s1410_s23 + $0x58] sm:$0xf]  ;;  %v791_v21 = vmax.bf16 %v759_v5, %v727_v9  ;;  %v760_v22 = vld [vmem:[%s1375_s27 + $0x60] sm:$0xf] }
  0x5e   : > { %v633_v17 = vld [vmem:[%s1360_s21 + $0x64] sm:$0xf]  ;;  %v601_v23 = vmax.bf16 %v569_v16, %v537_v15  ;;  %1077 = vst.msk [vmem:[%s1434_s28 + $0x50] sm:$0xf] %vm1056_vm0, %v1044_v12  ;;  %v918_v24 = vmax.bf16 %v886_v8, %v854_v13  ;;  %v887_v25 = vld [vmem:[%s1393_s14 + $0x5c] sm:$0xf] }
  0x5f   : > { %v728_v26 = vmax.bf16 %v696_v11, %v664_v14  ;;  %v824_v27 = vld [vmem:[%s1383_s10 + $0x60] sm:$0xf]  ;;  %v697_v28 = vld [vmem:[%s1366_s24 + $0x64] sm:$0xf]  ;;  %v1045_v29 = vmax.bf16 %v1013_v3, %v981_v18  ;;  %v855_v30 = vmax.bf16 %v823_v10, %v791_v21  ;;  %v538_v32 = vld [vmem:[%s1348_s15 + $0x68] sm:$0xf] }
  0x60   : > { %v665_v31 = vmax.bf16 %v633_v17, %v601_v23  ;;  %v570_v33 = vld [vmem:[%s1354_s18 + $0x68] sm:$0xf]  ;;  %v982_v35 = vmax.bf16 %v950_v19, %v918_v24  ;;  %v951_v36 = vld [vmem:[%s1404_s19 + $0x5c] sm:$0xf]  ;;  %v761_v39 = vld [vmem:[%s1375_s27 + $0x64] sm:$0xf] }
  0x61   : > { %v634_v34 = vld [vmem:[%s1360_s21 + $0x68] sm:$0xf]  ;;  %v1015_v37 = vld [vmem:[%s1410_s23 + $0x5c] sm:$0xf]  ;;  %v792_v38 = vmax.bf16 %v760_v22, %v728_v26  ;;  %v602_v40 = vmax.bf16 %v570_v33, %v538_v32  ;;  %1078 = vst.msk [vmem:[%s1434_s28 + $0x54] sm:$0xf] %vm1056_vm0, %v1045_v29  ;;  %v919_v41 = vmax.bf16 %v887_v25, %v855_v30 }
  0x62   : > { %v888_v42 = vld [vmem:[%s1393_s14 + $0x60] sm:$0xf]  ;;  %v729_v43 = vmax.bf16 %v697_v28, %v665_v31  ;;  %v825_v44 = vld [vmem:[%s1383_s10 + $0x64] sm:$0xf]  ;;  %v698_v45 = vld [vmem:[%s1366_s24 + $0x68] sm:$0xf]  ;;  %v1046_v46 = vmax.bf16 %v1014_v20, %v982_v35 }
  0x63   : > { %v856_v47 = vmax.bf16 %v824_v27, %v792_v38  ;;  %v666_v48 = vmax.bf16 %v634_v34, %v602_v40  ;;  %v539_v49 = vld [vmem:[%s1348_s15 + $0x6c] sm:$0xf]  ;;  %v983_v52 = vmax.bf16 %v951_v36, %v919_v41  ;;  %v952_v53 = vld [vmem:[%s1404_s19 + $0x60] sm:$0xf]  ;;  %v762_v56 = vld [vmem:[%s1375_s27 + $0x68] sm:$0xf] }
  0x64   : > { %v571_v50 = vld [vmem:[%s1354_s18 + $0x6c] sm:$0xf]  ;;  %v1016_v54 = vld [vmem:[%s1410_s23 + $0x60] sm:$0xf]  ;;  %v793_v55 = vmax.bf16 %v761_v39, %v729_v43  ;;  %1079 = vst.msk [vmem:[%s1434_s28 + $0x58] sm:$0xf] %vm1056_vm0, %v1046_v46 }
  0x65   : > { %v635_v51 = vld [vmem:[%s1360_s21 + $0x6c] sm:$0xf]  ;;  %v603_v57 = vmax.bf16 %v571_v50, %v539_v49  ;;  %v920_v58 = vmax.bf16 %v888_v42, %v856_v47  ;;  %v889_v59 = vld [vmem:[%s1393_s14 + $0x64] sm:$0xf]  ;;  %v730_v60 = vmax.bf16 %v698_v45, %v666_v48  ;;  %v826_v61 = vld [vmem:[%s1383_s10 + $0x68] sm:$0xf]  ;;  %v1047_v63 = vmax.bf16 %v1015_v37, %v983_v52 }
  0x66   : > { %v699_v62 = vld [vmem:[%s1366_s24 + $0x6c] sm:$0xf]  ;;  %v857_v0 = vmax.bf16 %v825_v44, %v793_v55  ;;  %v540_v2 = vld [vmem:[%s1348_s15 + $0x70] sm:$0xf]  ;;  %v953_v6 = vld [vmem:[%s1404_s19 + $0x64] sm:$0xf] }
  0x67   : > { %v667_v1 = vmax.bf16 %v635_v51, %v603_v57  ;;  %v572_v3 = vld [vmem:[%s1354_s18 + $0x70] sm:$0xf]  ;;  %v984_v5 = vmax.bf16 %v952_v53, %v920_v58  ;;  %v1017_v7 = vld [vmem:[%s1410_s23 + $0x64] sm:$0xf]  ;;  %v794_v8 = vmax.bf16 %v762_v56, %v730_v60  ;;  %v763_v9 = vld [vmem:[%s1375_s27 + $0x6c] sm:$0xf] }
  0x68   : > { %v636_v4 = vld [vmem:[%s1360_s21 + $0x70] sm:$0xf]  ;;  %v604_v10 = vmax.bf16 %v572_v3, %v540_v2  ;;  %1080 = vst.msk [vmem:[%s1434_s28 + $0x5c] sm:$0xf] %vm1056_vm0, %v1047_v63  ;;  %v921_v11 = vmax.bf16 %v889_v59, %v857_v0  ;;  %v890_v12 = vld [vmem:[%s1393_s14 + $0x68] sm:$0xf] }
  0x69   : > { %v731_v13 = vmax.bf16 %v699_v62, %v667_v1  ;;  %v827_v14 = vld [vmem:[%s1383_s10 + $0x6c] sm:$0xf]  ;;  %v700_v15 = vld [vmem:[%s1366_s24 + $0x70] sm:$0xf]  ;;  %v1048_v16 = vmax.bf16 %v1016_v54, %v984_v5  ;;  %v858_v17 = vmax.bf16 %v826_v61, %v794_v8  ;;  %v541_v19 = vld [vmem:[%s1348_s15 + $0x74] sm:$0xf] }
  0x6a   : > { %v668_v18 = vmax.bf16 %v636_v4, %v604_v10  ;;  %v573_v20 = vld [vmem:[%s1354_s18 + $0x74] sm:$0xf]  ;;  %v985_v22 = vmax.bf16 %v953_v6, %v921_v11  ;;  %v954_v23 = vld [vmem:[%s1404_s19 + $0x68] sm:$0xf]  ;;  %v764_v26 = vld [vmem:[%s1375_s27 + $0x70] sm:$0xf] }
  0x6b   : > { %v637_v21 = vld [vmem:[%s1360_s21 + $0x74] sm:$0xf]  ;;  %v1018_v24 = vld [vmem:[%s1410_s23 + $0x68] sm:$0xf]  ;;  %v795_v25 = vmax.bf16 %v763_v9, %v731_v13  ;;  %v605_v27 = vmax.bf16 %v573_v20, %v541_v19  ;;  %1081 = vst.msk [vmem:[%s1434_s28 + $0x60] sm:$0xf] %vm1056_vm0, %v1048_v16  ;;  %v922_v28 = vmax.bf16 %v890_v12, %v858_v17 }
  0x6c   : > { %v891_v29 = vld [vmem:[%s1393_s14 + $0x6c] sm:$0xf]  ;;  %v732_v30 = vmax.bf16 %v700_v15, %v668_v18  ;;  %v828_v31 = vld [vmem:[%s1383_s10 + $0x70] sm:$0xf]  ;;  %v701_v32 = vld [vmem:[%s1366_s24 + $0x74] sm:$0xf]  ;;  %v1049_v33 = vmax.bf16 %v1017_v7, %v985_v22 }
  0x6d   : > { %v859_v34 = vmax.bf16 %v827_v14, %v795_v25  ;;  %v669_v35 = vmax.bf16 %v637_v21, %v605_v27  ;;  %v542_v36 = vld [vmem:[%s1348_s15 + $0x78] sm:$0xf]  ;;  %v986_v39 = vmax.bf16 %v954_v23, %v922_v28  ;;  %v955_v40 = vld [vmem:[%s1404_s19 + $0x6c] sm:$0xf]  ;;  %v765_v43 = vld [vmem:[%s1375_s27 + $0x74] sm:$0xf] }
  0x6e   : > { %v574_v37 = vld [vmem:[%s1354_s18 + $0x78] sm:$0xf]  ;;  %v1019_v41 = vld [vmem:[%s1410_s23 + $0x6c] sm:$0xf]  ;;  %v796_v42 = vmax.bf16 %v764_v26, %v732_v30  ;;  %1082 = vst.msk [vmem:[%s1434_s28 + $0x64] sm:$0xf] %vm1056_vm0, %v1049_v33 }
  0x6f   : > { %v638_v38 = vld [vmem:[%s1360_s21 + $0x78] sm:$0xf]  ;;  %v606_v44 = vmax.bf16 %v574_v37, %v542_v36  ;;  %v923_v45 = vmax.bf16 %v891_v29, %v859_v34  ;;  %v892_v46 = vld [vmem:[%s1393_s14 + $0x70] sm:$0xf]  ;;  %v733_v47 = vmax.bf16 %v701_v32, %v669_v35  ;;  %v829_v48 = vld [vmem:[%s1383_s10 + $0x74] sm:$0xf]  ;;  %v1050_v50 = vmax.bf16 %v1018_v24, %v986_v39 }
  0x70   : > { %v702_v49 = vld [vmem:[%s1366_s24 + $0x78] sm:$0xf]  ;;  %v860_v51 = vmax.bf16 %v828_v31, %v796_v42  ;;  %v543_v53 = vld [vmem:[%s1348_s15 + $0x7c] sm:$0xf]  ;;  %v956_v57 = vld [vmem:[%s1404_s19 + $0x70] sm:$0xf] }
  0x71   : > { %v670_v52 = vmax.bf16 %v638_v38, %v606_v44  ;;  %v575_v54 = vld [vmem:[%s1354_s18 + $0x7c] sm:$0xf]  ;;  %v987_v56 = vmax.bf16 %v955_v40, %v923_v45  ;;  %v797_v58 = vmax.bf16 %v765_v43, %v733_v47  ;;  %v766_v59 = vld [vmem:[%s1375_s27 + $0x78] sm:$0xf]  ;;  %1083 = vst.msk [vmem:[%s1434_s28 + $0x68] sm:$0xf] %vm1056_vm0, %v1050_v50 }
  0x72   : > { %v639_v55 = vld [vmem:[%s1360_s21 + $0x7c] sm:$0xf]  ;;  %v607_v60 = vmax.bf16 %v575_v54, %v543_v53  ;;  %v924_v61 = vmax.bf16 %v892_v46, %v860_v51  ;;  %v893_v62 = vld [vmem:[%s1393_s14 + $0x74] sm:$0xf]  ;;  %v1020_v2 = vld [vmem:[%s1410_s23 + $0x70] sm:$0xf] }
  0x73   : > { %v734_v63 = vmax.bf16 %v702_v49, %v670_v52  ;;  %v703_v0 = vld [vmem:[%s1366_s24 + $0x7c] sm:$0xf]  ;;  %v1051_v1 = vmax.bf16 %v1019_v41, %v987_v56  ;;  %v861_v3 = vmax.bf16 %v829_v48, %v797_v58  ;;  %v830_v4 = vld [vmem:[%s1383_s10 + $0x78] sm:$0xf]  ;;  %v957_v7 = vld [vmem:[%s1404_s19 + $0x74] sm:$0xf] }
  0x74   : > { %v671_v5 = vmax.bf16 %v639_v55, %v607_v60  ;;  %v988_v6 = vmax.bf16 %v956_v57, %v924_v61  ;;  %v767_v9 = vld [vmem:[%s1375_s27 + $0x7c] sm:$0xf]  ;;  %v894_v11 = vld [vmem:[%s1393_s14 + $0x78] sm:$0xf]  ;;  %v1021_v14 = vld [vmem:[%s1410_s23 + $0x74] sm:$0xf] }
  0x75   : > { %v798_v8 = vmax.bf16 %v766_v59, %v734_v63  ;;  %1084 = vst.msk [vmem:[%s1434_s28 + $0x6c] sm:$0xf] %vm1056_vm0, %v1051_v1  ;;  %v925_v10 = vmax.bf16 %v893_v62, %v861_v3  ;;  %v831_v16 = vld [vmem:[%s1383_s10 + $0x7c] sm:$0xf]  ;;  %v958_v18 = vld [vmem:[%s1404_s19 + $0x78] sm:$0xf] }
  0x76   : > { %v735_v12 = vmax.bf16 %v703_v0, %v671_v5  ;;  %v1052_v13 = vmax.bf16 %v1020_v2, %v988_v6  ;;  %v895_v21 = vld [vmem:[%s1393_s14 + $0x7c] sm:$0xf]  ;;  %v1022_v23 = vld [vmem:[%s1410_s23 + $0x78] sm:$0xf] }
  0x77   : > { %v862_v15 = vmax.bf16 %v830_v4, %v798_v8  ;;  %v989_v17 = vmax.bf16 %v957_v7, %v925_v10  ;;  %v959_v26 = vld [vmem:[%s1404_s19 + $0x7c] sm:$0xf] }
  0x78   : > { %v799_v19 = vmax.bf16 %v767_v9, %v735_v12  ;;  %1085 = vst.msk [vmem:[%s1434_s28 + $0x70] sm:$0xf] %vm1056_vm0, %v1052_v13  ;;  %v1023_v29 = vld [vmem:[%s1410_s23 + $0x7c] sm:$0xf] }
  0x79   : > { %v926_v20 = vmax.bf16 %v894_v11, %v862_v15  ;;  %v1053_v22 = vmax.bf16 %v1021_v14, %v989_v17 }
  0x7a   : > { %v863_v24 = vmax.bf16 %v831_v16, %v799_v19 }
  0x7b   : > { %v990_v25 = vmax.bf16 %v958_v18, %v926_v20  ;;  %1086 = vst.msk [vmem:[%s1434_s28 + $0x74] sm:$0xf] %vm1056_vm0, %v1053_v22 }
  0x7c   : > { %v927_v27 = vmax.bf16 %v895_v21, %v863_v24 }
  0x7d   : > { %v1054_v28 = vmax.bf16 %v1022_v23, %v990_v25 }
  0x7e   : > { %v991_v30 = vmax.bf16 %v959_v26, %v927_v27 }
  0x7f   : > { %1087 = vst.msk [vmem:[%s1434_s28 + $0x78] sm:$0xf] %vm1056_vm0, %v1054_v28 }
  0x80   : > { %v1055_v31 = vmax.bf16 %v1023_v29, %v991_v30 }
  0x82   : > { %1088 = vst.msk [vmem:[%s1434_s28 + $0x7c] sm:$0xf] %vm1056_vm0, %v1055_v31 }
  0x83 PF: > { %s19_s30 = sadd.s32 1, %s1282_s30  }
  0x84   : > { %p16_p4 = scmp.ge.s32.totalorder %s19_s30, 4  }
  0x86   :  { %18 = sbr.rel (!%p16_p4) target bundleno = 1 (0x1), region = 110 }

// kernel: _lambda_.24
= control target key start
LH: loop header
LB: loop body
LE: loop exit
PB: predicated region body
PF: predicated region fallthrough
CT: control target
= control target key end

     0   :  { %s1142_s15 = smov 0   ;;  %s1355_s0 = inlined_call_operand.vmem [shape: bf16[512,72], index: 0, kind: input, shape index: {}]   ;;  %s1356_s1 = inlined_call_operand.vmem [shape: bf16[72,8], index: 1, kind: input, shape index: {}]   ;;  %s1357_s2 = inlined_call_operand.vmem [shape: f32[1,8], index: 2, kind: input, shape index: {}]   ;;  %s1358_s3 = inlined_call_operand.vmem [shape: f32[1,8], index: 3, kind: input, shape index: {}]   ;;  %s1359_s4 = inlined_call_operand.vmem [shape: bf16[512,8], index: 4, kind: output, shape index: {}]  }
   0x1 LB: > { %s891_s16 = sadd.s32 4294967295, %s1115_s15   ;;  %p895_p0 = scmp.ge.s32.totalorder %s1115_s15, 1  ;;  %s1115_s15 = sphi %s1142_s15, %s14_s15  }
   0x2   : > { %p163_p1 = scmp.lt.s32.totalorder %s1115_s15, 3 }
   0x4   : > { %p164_p2 = pnand %p895_p0, %p163_p1 }
   0x5   : > { %s896_s21 = sshll.u32 (!%p164_p2), %s891_s16, 5 }
   0x6   : > { %167 = sbr.rel (%p164_p2) target bundleno = 267 (0x10b), region = 36  ;;  %p190_p3 = scmp.lt.s32.totalorder (!%p164_p2), %s896_s21, 63 }
   0xb   : > { %v1088_v0 = vld [vmem:[%s1356_s1 + $0x20] ss:$0 sps:$4 sm:$0xff]   ;;  %vm399_vm0 = vcmask 1043456   ;;  %v1089_v1 = vld [vmem:[%s1356_s1 + $0x18] sm:$0xff]   ;;  %v1090_v3 = vld [vmem:[%s1356_s1 + $0x10] sm:$0xff]   ;;  %s1361_s21 = smov (!%p190_p3, %s896_s21), 63 }
   0xc   : > { %1078 = vmatprep.subr.msk.bf16.mxu0 %vm399_vm0, %v1088_v0  ;;  %1079 = vmatprep.subr.msk.bf16.mxu1 %vm399_vm0, %v1088_v0  ;;  %v401_v2 = vsel %vm399_vm0, %v1088_v0, 0  ;;  %v1091_v4 = vld [vmem:[%s1356_s1 + $0x8] sm:$0xff]   ;;  %s897_s26 = sshll.u32 %s1361_s21, 2  ;;  %vm350_vm1 = vcmask 588800   ;;  %v1092_v7 = vld [vmem:[%s1356_s1] sm:$0xff]   ;;  %vm802_vm2 = vcmask 60416  }
   0xd   : > { %1027 = vmatpush3.bf16.msra.mxu0 %v401_v2  ;;  %1073 = vmatpush3.bf16.msra.mxu1 %v401_v2  ;;  %s1170_s29 = scalar_lea.vmem %s1355_s0, %s897_s26  ;;  %v1210_v22 = vld [vmem:[%s1357_s2] ss:$0 sm:$0xff]  ;;  %s1230_s12 = scalar_lea.vmem %s1359_s4, %s897_s26 }
   0xe   : > { %1028 = vmatprep.subr.bf16.mxu0 %v1089_v1  ;;  %1069 = vmatprep.subr.bf16.mxu1 %v1089_v1  ;;  %v1093_v5 = vld [vmem:[%s1170_s29] sm:$0xff]   ;;  %v1095_v8 = vld [vmem:[%s1170_s29 + $0x8] sm:$0xff]   ;;  %v1097_v10 = vld [vmem:[%s1170_s29 + $0x10] sm:$0xff]  }
   0xf   : > { %v1094_v6 = vld [vmem:[%s1170_s29 + $0x40] sm:$0xff]   ;;  %1036 = vmatprep.mubr.msk.bf16.mxu0 %vm350_vm1, %v1093_v5  ;;  %v1096_v9 = vld [vmem:[%s1170_s29 + $0x48] sm:$0xff]   ;;  %v1098_v11 = vld [vmem:[%s1170_s29 + $0x50] sm:$0xff]  }
  0x10   : > { %1052 = vmatprep.mubr.msk.bf16.mxu1 %vm350_vm1, %v1094_v6  ;;  %v1099_v12 = vld [vmem:[%s1170_s29 + $0x18] sm:$0xff]   ;;  %v1101_v14 = vld [vmem:[%s1170_s29 + $0x20] sm:$0xff]   ;;  %v1103_v16 = vld [vmem:[%s1170_s29 + $0x28] sm:$0xff]  }
  0x11   : > { %1029 = vmatpush3.bf16.msra.mxu0 %v1089_v1  ;;  %1074 = vmatpush3.bf16.msra.mxu1 %v1089_v1  ;;  %v1100_v13 = vld [vmem:[%s1170_s29 + $0x58] sm:$0xff]   ;;  %v1102_v15 = vld [vmem:[%s1170_s29 + $0x60] sm:$0xff]   ;;  %v1104_v17 = vld [vmem:[%s1170_s29 + $0x68] sm:$0xff]  }
  0x12   : > { %1030 = vmatprep.subr.bf16.mxu0 %v1090_v3  ;;  %1070 = vmatprep.subr.bf16.mxu1 %v1090_v3  ;;  %v1105_v18 = vld [vmem:[%s1170_s29 + $0x30] sm:$0xff]   ;;  %v1107_v20 = vld [vmem:[%s1170_s29 + $0x38] sm:$0xff]   ;;  %v1215_v24 = vld [vmem:[%s1358_s3] ss:$0 sm:$0xff] }
  0x13   : > { %v1106_v19 = vld [vmem:[%s1170_s29 + $0x70] sm:$0xff]   ;;  %v1108_v21 = vld [vmem:[%s1170_s29 + $0x78] sm:$0xff]  }
  0x15   : > { %1031 = vmatpush3.bf16.msra.mxu0 %v1090_v3  ;;  %1075 = vmatpush3.bf16.msra.mxu1 %v1090_v3 }
  0x16   : > { %1032 = vmatprep.subr.bf16.mxu0 %v1091_v4  ;;  %1071 = vmatprep.subr.bf16.mxu1 %v1091_v4 }
  0x19   : > { %1033 = vmatpush3.bf16.msra.mxu0 %v1091_v4  ;;  %1076 = vmatpush3.bf16.msra.mxu1 %v1091_v4 }
  0x1a   : > { %1034 = vmatprep.subr.bf16.mxu0 %v1092_v7  ;;  %1072 = vmatprep.subr.bf16.mxu1 %v1092_v7 }
  0x1d   : > { %1035 = vmatpush3.bf16.msra.mxu0 %v1092_v7  ;;  %1077 = vmatpush3.bf16.msra.mxu1 %v1092_v7 }
  0x20   : > { %1037 = vmatmul.mubr.msk.bf16.vlgmr.msra.gmra.mxu0 %vm350_vm1, %v1095_v8  ;;  %1053 = vmatmul.mubr.msk.bf16.vlgmr.msra.gmra.mxu1 %vm350_vm1, %v1096_v9 }
  0x21   : > { %1040 = vmatprep.mubr.msk.bf16.mxu0 %vm350_vm1, %v1097_v10  ;;  %1056 = vmatprep.mubr.msk.bf16.mxu1 %vm350_vm1, %v1098_v11 }
  0x28   : > { %1041 = vmatmul.mubr.msk.bf16.gmra.mxu0 %vm350_vm1, %v1099_v12  ;;  %1057 = vmatmul.mubr.msk.bf16.gmra.mxu1 %vm350_vm1, %v1100_v13 }
  0x29   : > { %1044 = vmatprep.mubr.msk.bf16.mxu0 %vm350_vm1, %v1101_v14  ;;  %1060 = vmatprep.mubr.msk.bf16.mxu1 %vm350_vm1, %v1102_v15 }
  0x30   : > { %1045 = vmatmul.mubr.msk.bf16.gmra.mxu0 %vm350_vm1, %v1103_v16  ;;  %1061 = vmatmul.mubr.msk.bf16.gmra.mxu1 %vm350_vm1, %v1104_v17 }
  0x31   : > { %1048 = vmatprep.mubr.msk.bf16.mxu0 %vm350_vm1, %v1105_v18  ;;  %1064 = vmatprep.mubr.msk.bf16.mxu1 %vm350_vm1, %v1106_v19 }
  0x38   : > { %1049 = vmatmul.mubr.msk.bf16.gmra.mxu0 %vm350_vm1, %v1107_v20  ;;  %1065 = vmatmul.mubr.msk.bf16.gmra.mxu1 %vm350_vm1, %v1108_v21 }
  0xe0   : > { %v1038_v23 = vpop.f32.mrf.mxu0  ;;  %v1054_v25 = vpop.f32.mrf.mxu1 }
  0xe1   : > { %v573_v26 = vmul.f32 %v1038_v23, %v1210_v22  ;;  %v589_v27 = vmul.f32 %v1054_v25, %v1210_v22 }
  0xe2   : > { %v437_v28 = vpop.f32.mrf.mxu0  ;;  %v501_v29 = vpop.f32.mrf.mxu1 }
  0xe3   : > { %v612_v30 = vadd.f32 %v1215_v24, %v573_v26  ;;  %v628_v31 = vadd.f32 %v1215_v24, %v589_v27  ;;  %v571_v32 = vmul.f32 %v1210_v22, %v437_v28  ;;  %v587_v33 = vmul.f32 %v1210_v22, %v501_v29 }
  0xe4   : > { %v1039_v34 = vpop.f32.mrf.mxu0  ;;  %v1055_v35 = vpop.f32.mrf.mxu1 }
  0xe5   : > { %v644_v36 = vmax.f32 %v612_v30, 0.0  ;;  %v660_v37 = vmax.f32 %v628_v31, 0.0  ;;  %v610_v38 = vadd.f32 %v1215_v24, %v571_v32  ;;  %v626_v39 = vadd.f32 %v1215_v24, %v587_v33 }
  0xe6   : > { %v574_v40 = vmul.f32 %v1039_v34, %v1210_v22  ;;  %v590_v41 = vmul.f32 %v1055_v35, %v1210_v22  ;;  %v440_v42 = vpop.f32.mrf.mxu0  ;;  %v504_v43 = vpop.f32.mrf.mxu1 }
  0xe7   : > { %v975_v44 = vpack.c.bf16 %v644_v36, %v644_v36  ;;  %v991_v45 = vpack.c.bf16 %v660_v37, %v660_v37  ;;  %v642_v46 = vmax.f32 %v610_v38, 0.0  ;;  %v658_v47 = vmax.f32 %v626_v39, 0.0 }
  0xe8   : > { %v613_v48 = vadd.f32 %v1215_v24, %v574_v40  ;;  %v629_v49 = vadd.f32 %v1215_v24, %v590_v41  ;;  %v572_v50 = vmul.f32 %v1210_v22, %v440_v42  ;;  %v588_v51 = vmul.f32 %v1210_v22, %v504_v43  ;;  %v1042_v52 = vpop.f32.mrf.mxu0  ;;  %v1058_v53 = vpop.f32.mrf.mxu1 }
  0xe9   : > { %805 = vst.msk [vmem:[%s1230_s12 + $0x8] sm:$0xf] %vm802_vm2, %v975_v44  ;;  %821 = vst.msk [vmem:[%s1230_s12 + $0x48] sm:$0xf] %vm802_vm2, %v991_v45  ;;  %v973_v54 = vpack.c.bf16 %v642_v46, %v642_v46  ;;  %v989_v55 = vpack.c.bf16 %v658_v47, %v658_v47  ;;  %v577_v56 = vmul.f32 %v1042_v52, %v1210_v22 }
  0xea   : > { %v593_v57 = vmul.f32 %v1058_v53, %v1210_v22  ;;  %v645_v58 = vmax.f32 %v613_v48, 0.0  ;;  %v661_v59 = vmax.f32 %v629_v49, 0.0  ;;  %v611_v60 = vadd.f32 %v1215_v24, %v572_v50  ;;  %v453_v62 = vpop.f32.mrf.mxu0  ;;  %v517_v63 = vpop.f32.mrf.mxu1 }
  0xeb   : > { %v627_v61 = vadd.f32 %v1215_v24, %v588_v51  ;;  %803 = vst.msk [vmem:[%s1230_s12] sm:$0xf] %vm802_vm2, %v973_v54  ;;  %819 = vst.msk [vmem:[%s1230_s12 + $0x40] sm:$0xf] %vm802_vm2, %v989_v55  ;;  %v616_v0 = vadd.f32 %v1215_v24, %v577_v56  ;;  %v575_v2 = vmul.f32 %v1210_v22, %v453_v62 }
  0xec   : > { %v632_v1 = vadd.f32 %v1215_v24, %v593_v57  ;;  %v591_v3 = vmul.f32 %v1210_v22, %v517_v63  ;;  %v976_v4 = vpack.c.bf16 %v645_v58, %v645_v58  ;;  %v992_v5 = vpack.c.bf16 %v661_v59, %v661_v59  ;;  %v1043_v8 = vpop.f32.mrf.mxu0  ;;  %v1059_v9 = vpop.f32.mrf.mxu1 }
  0xed   : > { %v643_v6 = vmax.f32 %v611_v60, 0.0  ;;  %v659_v7 = vmax.f32 %v627_v61, 0.0  ;;  %v648_v10 = vmax.f32 %v616_v0, 0.0  ;;  %v614_v12 = vadd.f32 %v1215_v24, %v575_v2 }
  0xee   : > { %v664_v11 = vmax.f32 %v632_v1, 0.0  ;;  %v630_v13 = vadd.f32 %v1215_v24, %v591_v3  ;;  %806 = vst.msk [vmem:[%s1230_s12 + $0xc] sm:$0xf] %vm802_vm2, %v976_v4  ;;  %822 = vst.msk [vmem:[%s1230_s12 + $0x4c] sm:$0xf] %vm802_vm2, %v992_v5  ;;  %v578_v16 = vmul.f32 %v1043_v8, %v1210_v22  ;;  %v594_v17 = vmul.f32 %v1059_v9, %v1210_v22  ;;  %v456_v18 = vpop.f32.mrf.mxu0  ;;  %v520_v19 = vpop.f32.mrf.mxu1 }
  0xef   : > { %v974_v14 = vpack.c.bf16 %v643_v6, %v643_v6  ;;  %v990_v15 = vpack.c.bf16 %v659_v7, %v659_v7  ;;  %v979_v20 = vpack.c.bf16 %v648_v10, %v648_v10  ;;  %v646_v23 = vmax.f32 %v614_v12, 0.0 }
  0xf0   : > { %v995_v21 = vpack.c.bf16 %v664_v11, %v664_v11  ;;  %v662_v25 = vmax.f32 %v630_v13, 0.0  ;;  %v617_v26 = vadd.f32 %v1215_v24, %v578_v16  ;;  %v633_v27 = vadd.f32 %v1215_v24, %v594_v17  ;;  %v1046_v30 = vpop.f32.mrf.mxu0  ;;  %v1062_v31 = vpop.f32.mrf.mxu1 }
  0xf1   : > { %804 = vst.msk [vmem:[%s1230_s12 + $0x4] sm:$0xf] %vm802_vm2, %v974_v14  ;;  %820 = vst.msk [vmem:[%s1230_s12 + $0x44] sm:$0xf] %vm802_vm2, %v990_v15  ;;  %v576_v28 = vmul.f32 %v1210_v22, %v456_v18  ;;  %v592_v29 = vmul.f32 %v1210_v22, %v520_v19  ;;  %v977_v32 = vpack.c.bf16 %v646_v23, %v646_v23 }
  0xf2   : > { %809 = vst.msk [vmem:[%s1230_s12 + $0x18] sm:$0xf] %vm802_vm2, %v979_v20  ;;  %825 = vst.msk [vmem:[%s1230_s12 + $0x58] sm:$0xf] %vm802_vm2, %v995_v21  ;;  %v993_v33 = vpack.c.bf16 %v662_v25, %v662_v25  ;;  %v581_v34 = vmul.f32 %v1046_v30, %v1210_v22  ;;  %v597_v35 = vmul.f32 %v1062_v31, %v1210_v22  ;;  %v649_v36 = vmax.f32 %v617_v26, 0.0  ;;  %v469_v40 = vpop.f32.mrf.mxu0  ;;  %v533_v41 = vpop.f32.mrf.mxu1 }
  0xf3   : > { %v665_v37 = vmax.f32 %v633_v27, 0.0  ;;  %v615_v38 = vadd.f32 %v1215_v24, %v576_v28  ;;  %v631_v39 = vadd.f32 %v1215_v24, %v592_v29  ;;  %807 = vst.msk [vmem:[%s1230_s12 + $0x10] sm:$0xf] %vm802_vm2, %v977_v32  ;;  %v579_v44 = vmul.f32 %v1210_v22, %v469_v40 }
  0xf4   : > { %823 = vst.msk [vmem:[%s1230_s12 + $0x50] sm:$0xf] %vm802_vm2, %v993_v33  ;;  %v620_v42 = vadd.f32 %v1215_v24, %v581_v34  ;;  %v636_v43 = vadd.f32 %v1215_v24, %v597_v35  ;;  %v595_v45 = vmul.f32 %v1210_v22, %v533_v41  ;;  %v980_v46 = vpack.c.bf16 %v649_v36, %v649_v36  ;;  %v1047_v50 = vpop.f32.mrf.mxu0  ;;  %v1063_v51 = vpop.f32.mrf.mxu1 }
  0xf5   : > { %v996_v47 = vpack.c.bf16 %v665_v37, %v665_v37  ;;  %v647_v48 = vmax.f32 %v615_v38, 0.0  ;;  %v663_v49 = vmax.f32 %v631_v39, 0.0  ;;  %v618_v54 = vadd.f32 %v1215_v24, %v579_v44 }
  0xf6   : > { %v652_v52 = vmax.f32 %v620_v42, 0.0  ;;  %v668_v53 = vmax.f32 %v636_v43, 0.0  ;;  %v634_v55 = vadd.f32 %v1215_v24, %v595_v45  ;;  %810 = vst.msk [vmem:[%s1230_s12 + $0x1c] sm:$0xf] %vm802_vm2, %v980_v46  ;;  %v582_v58 = vmul.f32 %v1047_v50, %v1210_v22  ;;  %v472_v60 = vpop.f32.mrf.mxu0  ;;  %v536_v61 = vpop.f32.mrf.mxu1 }
  0xf7   : > { %826 = vst.msk [vmem:[%s1230_s12 + $0x5c] sm:$0xf] %vm802_vm2, %v996_v47  ;;  %v978_v56 = vpack.c.bf16 %v647_v48, %v647_v48  ;;  %v994_v57 = vpack.c.bf16 %v663_v49, %v663_v49  ;;  %v598_v59 = vmul.f32 %v1063_v51, %v1210_v22  ;;  %v650_v0 = vmax.f32 %v618_v54, 0.0 }
  0xf8   : > { %v983_v62 = vpack.c.bf16 %v652_v52, %v652_v52  ;;  %v999_v63 = vpack.c.bf16 %v668_v53, %v668_v53  ;;  %v666_v1 = vmax.f32 %v634_v55, 0.0  ;;  %v621_v2 = vadd.f32 %v1215_v24, %v582_v58  ;;  %v1050_v6 = vpop.f32.mrf.mxu0  ;;  %v1066_v7 = vpop.f32.mrf.mxu1 }
  0xf9   : > { %808 = vst.msk [vmem:[%s1230_s12 + $0x14] sm:$0xf] %vm802_vm2, %v978_v56  ;;  %824 = vst.msk [vmem:[%s1230_s12 + $0x54] sm:$0xf] %vm802_vm2, %v994_v57  ;;  %v637_v3 = vadd.f32 %v1215_v24, %v598_v59  ;;  %v580_v4 = vmul.f32 %v1210_v22, %v472_v60  ;;  %v596_v5 = vmul.f32 %v1210_v22, %v536_v61 }
  0xfa   : > { %813 = vst.msk [vmem:[%s1230_s12 + $0x28] sm:$0xf] %vm802_vm2, %v983_v62  ;;  %829 = vst.msk [vmem:[%s1230_s12 + $0x68] sm:$0xf] %vm802_vm2, %v999_v63  ;;  %v981_v8 = vpack.c.bf16 %v650_v0, %v650_v0  ;;  %v997_v9 = vpack.c.bf16 %v666_v1, %v666_v1  ;;  %v585_v10 = vmul.f32 %v1050_v6, %v1210_v22  ;;  %v653_v12 = vmax.f32 %v621_v2, 0.0  ;;  %v485_v16 = vpop.f32.mrf.mxu0  ;;  %v549_v17 = vpop.f32.mrf.mxu1 }
  0xfb   : > { %v601_v11 = vmul.f32 %v1066_v7, %v1210_v22  ;;  %v669_v13 = vmax.f32 %v637_v3, 0.0  ;;  %v619_v14 = vadd.f32 %v1215_v24, %v580_v4  ;;  %v635_v15 = vadd.f32 %v1215_v24, %v596_v5 }
  0xfc   : > { %811 = vst.msk [vmem:[%s1230_s12 + $0x20] sm:$0xf] %vm802_vm2, %v981_v8  ;;  %827 = vst.msk [vmem:[%s1230_s12 + $0x60] sm:$0xf] %vm802_vm2, %v997_v9  ;;  %v624_v18 = vadd.f32 %v1215_v24, %v585_v10  ;;  %v583_v20 = vmul.f32 %v1210_v22, %v485_v16  ;;  %v599_v21 = vmul.f32 %v1210_v22, %v549_v17  ;;  %v1051_v28 = vpop.f32.mrf.mxu0  ;;  %v1067_v29 = vpop.f32.mrf.mxu1 }
  0xfd   : > { %v640_v19 = vadd.f32 %v1215_v24, %v601_v11  ;;  %v984_v23 = vpack.c.bf16 %v653_v12, %v653_v12  ;;  %v1000_v25 = vpack.c.bf16 %v669_v13, %v669_v13  ;;  %v651_v26 = vmax.f32 %v619_v14, 0.0 }
  0xfe   : > { %v667_v27 = vmax.f32 %v635_v15, 0.0  ;;  %v656_v30 = vmax.f32 %v624_v18, 0.0  ;;  %v622_v32 = vadd.f32 %v1215_v24, %v583_v20  ;;  %v638_v33 = vadd.f32 %v1215_v24, %v599_v21  ;;  %v488_v38 = vpop.f32.mrf.mxu0  ;;  %v552_v39 = vpop.f32.mrf.mxu1 }
  0xff   : > { %v672_v31 = vmax.f32 %v640_v19, 0.0  ;;  %814 = vst.msk [vmem:[%s1230_s12 + $0x2c] sm:$0xf] %vm802_vm2, %v984_v23  ;;  %830 = vst.msk [vmem:[%s1230_s12 + $0x6c] sm:$0xf] %vm802_vm2, %v1000_v25  ;;  %v982_v34 = vpack.c.bf16 %v651_v26, %v651_v26  ;;  %v586_v36 = vmul.f32 %v1051_v28, %v1210_v22  ;;  %v602_v37 = vmul.f32 %v1067_v29, %v1210_v22 }
 0x100   : > { %v998_v35 = vpack.c.bf16 %v667_v27, %v667_v27  ;;  %v987_v40 = vpack.c.bf16 %v656_v30, %v656_v30  ;;  %v654_v42 = vmax.f32 %v622_v32, 0.0  ;;  %v670_v43 = vmax.f32 %v638_v33, 0.0 }
 0x101   : > { %v1003_v41 = vpack.c.bf16 %v672_v31, %v672_v31  ;;  %812 = vst.msk [vmem:[%s1230_s12 + $0x24] sm:$0xf] %vm802_vm2, %v982_v34  ;;  %v625_v44 = vadd.f32 %v1215_v24, %v586_v36  ;;  %v641_v45 = vadd.f32 %v1215_v24, %v602_v37  ;;  %v584_v46 = vmul.f32 %v1210_v22, %v488_v38 }
 0x102   : > { %828 = vst.msk [vmem:[%s1230_s12 + $0x64] sm:$0xf] %vm802_vm2, %v998_v35  ;;  %v600_v47 = vmul.f32 %v1210_v22, %v552_v39  ;;  %817 = vst.msk [vmem:[%s1230_s12 + $0x38] sm:$0xf] %vm802_vm2, %v987_v40  ;;  %v985_v48 = vpack.c.bf16 %v654_v42, %v654_v42  ;;  %v1001_v49 = vpack.c.bf16 %v670_v43, %v670_v43 }
 0x103   : > { %833 = vst.msk [vmem:[%s1230_s12 + $0x78] sm:$0xf] %vm802_vm2, %v1003_v41  ;;  %v657_v50 = vmax.f32 %v625_v44, 0.0  ;;  %v673_v51 = vmax.f32 %v641_v45, 0.0  ;;  %v623_v52 = vadd.f32 %v1215_v24, %v584_v46 }
 0x104   : > { %v639_v53 = vadd.f32 %v1215_v24, %v600_v47  ;;  %815 = vst.msk [vmem:[%s1230_s12 + $0x30] sm:$0xf] %vm802_vm2, %v985_v48  ;;  %831 = vst.msk [vmem:[%s1230_s12 + $0x70] sm:$0xf] %vm802_vm2, %v1001_v49 }
 0x105   : > { %v988_v22 = vpack.c.bf16 %v657_v50, %v657_v50  ;;  %v1004_v54 = vpack.c.bf16 %v673_v51, %v673_v51  ;;  %v655_v55 = vmax.f32 %v623_v52, 0.0 }
 0x106   : > { %v671_v56 = vmax.f32 %v639_v53, 0.0 }
 0x107   : > { %818 = vst.msk [vmem:[%s1230_s12 + $0x3c] sm:$0xf] %vm802_vm2, %v988_v22  ;;  %834 = vst.msk [vmem:[%s1230_s12 + $0x7c] sm:$0xf] %vm802_vm2, %v1004_v54  ;;  %v986_v57 = vpack.c.bf16 %v655_v55, %v655_v55 }
 0x108   : > { %v1002_v58 = vpack.c.bf16 %v671_v56, %v671_v56 }
 0x109   : > { %816 = vst.msk [vmem:[%s1230_s12 + $0x34] sm:$0xf] %vm802_vm2, %v986_v57 }
 0x10a   : > { %832 = vst.msk [vmem:[%s1230_s12 + $0x74] sm:$0xf] %vm802_vm2, %v1002_v58 }
 0x10b PF: > { %s14_s15 = sadd.s32 1, %s1115_s15  }
 0x10c   : > { %p11_p4 = scmp.ge.s32.totalorder %s14_s15, 4  }
 0x10e   :  { %13 = sbr.rel (!%p11_p4) target bundleno = 1 (0x1), region = 66 }

// kernel: _lambda_.25
= control target key start
LH: loop header
LB: loop body
LE: loop exit
PB: predicated region body
PF: predicated region fallthrough
CT: control target
= control target key end

     0   :  { %s1093_s15 = smov 0   ;;  %s1303_s0 = inlined_call_operand.vmem [shape: bf16[512,64], index: 0, kind: input, shape index: {}]   ;;  %s1304_s1 = inlined_call_operand.vmem [shape: bf16[64,16], index: 1, kind: input, shape index: {}]   ;;  %s1305_s2 = inlined_call_operand.vmem [shape: f32[1,16], index: 2, kind: input, shape index: {}]   ;;  %s1306_s3 = inlined_call_operand.vmem [shape: f32[1,16], index: 3, kind: input, shape index: {}]   ;;  %s1307_s4 = inlined_call_operand.vmem [shape: bf16[512,16], index: 4, kind: output, shape index: {}]  }
   0x1 LB: > { %s851_s16 = sadd.s32 4294967295, %s1066_s15   ;;  %p855_p0 = scmp.ge.s32.totalorder %s1066_s15, 1  ;;  %s1066_s15 = sphi %s1093_s15, %s14_s15  }
   0x2   : > { %p163_p1 = scmp.lt.s32.totalorder %s1066_s15, 3 }
   0x4   : > { %p164_p2 = pnand %p855_p0, %p163_p1 }
   0x5   : > { %s856_s19 = sshll.u32 (!%p164_p2), %s851_s16, 5 }
   0x6   : > { %167 = sbr.rel (%p164_p2) target bundleno = 258 (0x102), region = 36  ;;  %p190_p3 = scmp.lt.s32.totalorder (!%p164_p2), %s856_s19, 63 }
   0xb   : > { %v1040_v0 = vld [vmem:[%s1304_s1 + $0x18] sm:$0xff]   ;;  %v1041_v1 = vld [vmem:[%s1304_s1 + $0x10] sm:$0xff]   ;;  %s1309_s19 = smov (!%p190_p3, %s856_s19), 63  ;;  %v1042_v2 = vld [vmem:[%s1304_s1 + $0x8] sm:$0xff]   ;;  %vm346_vm0 = vcmask 523264   ;;  %vm762_vm1 = vcmask 125952  }
   0xc   : > { %984 = vmatprep.subr.bf16.mxu0 %v1040_v0  ;;  %1024 = vmatprep.subr.bf16.mxu1 %v1040_v0  ;;  %s857_s24 = sshll.u32 %s1309_s19, 2  ;;  %v1043_v3 = vld [vmem:[%s1304_s1] sm:$0xff]  }
   0xd   : > { %985 = vmatpush3.bf16.msra.mxu0 %v1040_v0  ;;  %1028 = vmatpush3.bf16.msra.mxu1 %v1040_v0  ;;  %s1121_s29 = scalar_lea.vmem %s1303_s0, %s857_s24  ;;  %v1158_v20 = vld [vmem:[%s1305_s2] ss:$0 sm:$0xff]  ;;  %s1176_s10 = scalar_lea.vmem %s1307_s4, %s857_s24 }
   0xe   : > { %986 = vmatprep.subr.bf16.mxu0 %v1041_v1  ;;  %1025 = vmatprep.subr.bf16.mxu1 %v1041_v1  ;;  %v1044_v4 = vld [vmem:[%s1121_s29] sm:$0xff]   ;;  %v1046_v6 = vld [vmem:[%s1121_s29 + $0x8] sm:$0xff]   ;;  %v1048_v8 = vld [vmem:[%s1121_s29 + $0x10] sm:$0xff]  }
   0xf   : > { %v1045_v5 = vld [vmem:[%s1121_s29 + $0x40] sm:$0xff]   ;;  %992 = vmatprep.mubr.msk.bf16.mxu0 %vm346_vm0, %v1044_v4  ;;  %v1047_v7 = vld [vmem:[%s1121_s29 + $0x48] sm:$0xff]   ;;  %v1049_v9 = vld [vmem:[%s1121_s29 + $0x50] sm:$0xff]  }
  0x10   : > { %1008 = vmatprep.mubr.msk.bf16.mxu1 %vm346_vm0, %v1045_v5  ;;  %v1050_v10 = vld [vmem:[%s1121_s29 + $0x18] sm:$0xff]   ;;  %v1052_v12 = vld [vmem:[%s1121_s29 + $0x20] sm:$0xff]   ;;  %v1054_v14 = vld [vmem:[%s1121_s29 + $0x28] sm:$0xff]  }
  0x11   : > { %987 = vmatpush3.bf16.msra.mxu0 %v1041_v1  ;;  %1029 = vmatpush3.bf16.msra.mxu1 %v1041_v1  ;;  %v1051_v11 = vld [vmem:[%s1121_s29 + $0x58] sm:$0xff]   ;;  %v1053_v13 = vld [vmem:[%s1121_s29 + $0x60] sm:$0xff]   ;;  %v1055_v15 = vld [vmem:[%s1121_s29 + $0x68] sm:$0xff]  }
  0x12   : > { %988 = vmatprep.subr.bf16.mxu0 %v1042_v2  ;;  %1026 = vmatprep.subr.bf16.mxu1 %v1042_v2  ;;  %v1056_v16 = vld [vmem:[%s1121_s29 + $0x30] sm:$0xff]   ;;  %v1058_v18 = vld [vmem:[%s1121_s29 + $0x38] sm:$0xff]   ;;  %v1163_v22 = vld [vmem:[%s1306_s3] ss:$0 sm:$0xff] }
  0x13   : > { %v1057_v17 = vld [vmem:[%s1121_s29 + $0x70] sm:$0xff]   ;;  %v1059_v19 = vld [vmem:[%s1121_s29 + $0x78] sm:$0xff]  }
  0x15   : > { %989 = vmatpush3.bf16.msra.mxu0 %v1042_v2  ;;  %1030 = vmatpush3.bf16.msra.mxu1 %v1042_v2 }
  0x16   : > { %990 = vmatprep.subr.bf16.mxu0 %v1043_v3  ;;  %1027 = vmatprep.subr.bf16.mxu1 %v1043_v3 }
  0x19   : > { %991 = vmatpush3.bf16.msra.mxu0 %v1043_v3  ;;  %1031 = vmatpush3.bf16.msra.mxu1 %v1043_v3 }
  0x1c   : > { %993 = vmatmul.mubr.msk.bf16.vlgmr.msra.gmra.mxu0 %vm346_vm0, %v1046_v6  ;;  %1009 = vmatmul.mubr.msk.bf16.vlgmr.msra.gmra.mxu1 %vm346_vm0, %v1047_v7 }
  0x1d   : > { %996 = vmatprep.mubr.msk.bf16.mxu0 %vm346_vm0, %v1048_v8  ;;  %1012 = vmatprep.mubr.msk.bf16.mxu1 %vm346_vm0, %v1049_v9 }
  0x24   : > { %997 = vmatmul.mubr.msk.bf16.gmra.mxu0 %vm346_vm0, %v1050_v10  ;;  %1013 = vmatmul.mubr.msk.bf16.gmra.mxu1 %vm346_vm0, %v1051_v11 }
  0x25   : > { %1000 = vmatprep.mubr.msk.bf16.mxu0 %vm346_vm0, %v1052_v12  ;;  %1016 = vmatprep.mubr.msk.bf16.mxu1 %vm346_vm0, %v1053_v13 }
  0x2c   : > { %1001 = vmatmul.mubr.msk.bf16.gmra.mxu0 %vm346_vm0, %v1054_v14  ;;  %1017 = vmatmul.mubr.msk.bf16.gmra.mxu1 %vm346_vm0, %v1055_v15 }
  0x2d   : > { %1004 = vmatprep.mubr.msk.bf16.mxu0 %vm346_vm0, %v1056_v16  ;;  %1020 = vmatprep.mubr.msk.bf16.mxu1 %vm346_vm0, %v1057_v17 }
  0x34   : > { %1005 = vmatmul.mubr.msk.bf16.gmra.mxu0 %vm346_vm0, %v1058_v18  ;;  %1021 = vmatmul.mubr.msk.bf16.gmra.mxu1 %vm346_vm0, %v1059_v19 }
  0xdc   : > { %v994_v21 = vpop.f32.mrf.mxu0  ;;  %v1010_v23 = vpop.f32.mrf.mxu1 }
  0xdd   : > { %v565_v24 = vmul.f32 %v994_v21, %v1158_v20  ;;  %v581_v25 = vmul.f32 %v1010_v23, %v1158_v20 }
  0xde   : > { %v429_v26 = vpop.f32.mrf.mxu0  ;;  %v493_v27 = vpop.f32.mrf.mxu1 }
  0xdf   : > { %v604_v28 = vadd.f32 %v1163_v22, %v565_v24  ;;  %v620_v29 = vadd.f32 %v1163_v22, %v581_v25  ;;  %v563_v30 = vmul.f32 %v1158_v20, %v429_v26  ;;  %v579_v31 = vmul.f32 %v1158_v20, %v493_v27 }
  0xe0   : > { %v995_v32 = vpop.f32.mrf.mxu0  ;;  %v1011_v33 = vpop.f32.mrf.mxu1 }
  0xe1   : > { %v934_v34 = vpack.c.bf16 %v604_v28, %v604_v28  ;;  %v950_v35 = vpack.c.bf16 %v620_v29, %v620_v29  ;;  %v602_v36 = vadd.f32 %v1163_v22, %v563_v30  ;;  %v618_v37 = vadd.f32 %v1163_v22, %v579_v31 }
  0xe2   : > { %v566_v38 = vmul.f32 %v995_v32, %v1158_v20  ;;  %v582_v39 = vmul.f32 %v1011_v33, %v1158_v20  ;;  %v432_v40 = vpop.f32.mrf.mxu0  ;;  %v496_v41 = vpop.f32.mrf.mxu1 }
  0xe3   : > { %765 = vst.msk [vmem:[%s1176_s10 + $0x8] sm:$0xf] %vm762_vm1, %v934_v34  ;;  %781 = vst.msk [vmem:[%s1176_s10 + $0x48] sm:$0xf] %vm762_vm1, %v950_v35  ;;  %v932_v42 = vpack.c.bf16 %v602_v36, %v602_v36  ;;  %v948_v43 = vpack.c.bf16 %v618_v37, %v618_v37  ;;  %v564_v44 = vmul.f32 %v1158_v20, %v432_v40 }
  0xe4   : > { %v580_v45 = vmul.f32 %v1158_v20, %v496_v41  ;;  %v605_v46 = vadd.f32 %v1163_v22, %v566_v38  ;;  %v621_v47 = vadd.f32 %v1163_v22, %v582_v39  ;;  %v998_v48 = vpop.f32.mrf.mxu0  ;;  %v1014_v49 = vpop.f32.mrf.mxu1 }
  0xe5   : > { %763 = vst.msk [vmem:[%s1176_s10] sm:$0xf] %vm762_vm1, %v932_v42  ;;  %779 = vst.msk [vmem:[%s1176_s10 + $0x40] sm:$0xf] %vm762_vm1, %v948_v43  ;;  %v603_v50 = vadd.f32 %v1163_v22, %v564_v44  ;;  %v569_v52 = vmul.f32 %v998_v48, %v1158_v20  ;;  %v585_v53 = vmul.f32 %v1014_v49, %v1158_v20 }
  0xe6   : > { %v619_v51 = vadd.f32 %v1163_v22, %v580_v45  ;;  %v935_v54 = vpack.c.bf16 %v605_v46, %v605_v46  ;;  %v951_v55 = vpack.c.bf16 %v621_v47, %v621_v47  ;;  %v445_v56 = vpop.f32.mrf.mxu0  ;;  %v509_v57 = vpop.f32.mrf.mxu1 }
  0xe7   : > { %v933_v58 = vpack.c.bf16 %v603_v50, %v603_v50  ;;  %v608_v60 = vadd.f32 %v1163_v22, %v569_v52  ;;  %v624_v61 = vadd.f32 %v1163_v22, %v585_v53  ;;  %v567_v62 = vmul.f32 %v1158_v20, %v445_v56 }
  0xe8   : > { %v949_v59 = vpack.c.bf16 %v619_v51, %v619_v51  ;;  %766 = vst.msk [vmem:[%s1176_s10 + $0xc] sm:$0xf] %vm762_vm1, %v935_v54  ;;  %782 = vst.msk [vmem:[%s1176_s10 + $0x4c] sm:$0xf] %vm762_vm1, %v951_v55  ;;  %v583_v63 = vmul.f32 %v1158_v20, %v509_v57  ;;  %v999_v0 = vpop.f32.mrf.mxu0  ;;  %v1015_v1 = vpop.f32.mrf.mxu1 }
  0xe9   : > { %764 = vst.msk [vmem:[%s1176_s10 + $0x4] sm:$0xf] %vm762_vm1, %v933_v58  ;;  %v938_v2 = vpack.c.bf16 %v608_v60, %v608_v60  ;;  %v954_v3 = vpack.c.bf16 %v624_v61, %v624_v61  ;;  %v570_v4 = vmul.f32 %v999_v0, %v1158_v20  ;;  %v586_v5 = vmul.f32 %v1015_v1, %v1158_v20 }
  0xea   : > { %780 = vst.msk [vmem:[%s1176_s10 + $0x44] sm:$0xf] %vm762_vm1, %v949_v59  ;;  %v606_v6 = vadd.f32 %v1163_v22, %v567_v62  ;;  %v622_v7 = vadd.f32 %v1163_v22, %v583_v63  ;;  %v448_v8 = vpop.f32.mrf.mxu0  ;;  %v512_v9 = vpop.f32.mrf.mxu1 }
  0xeb   : > { %769 = vst.msk [vmem:[%s1176_s10 + $0x18] sm:$0xf] %vm762_vm1, %v938_v2  ;;  %785 = vst.msk [vmem:[%s1176_s10 + $0x58] sm:$0xf] %vm762_vm1, %v954_v3  ;;  %v609_v10 = vadd.f32 %v1163_v22, %v570_v4  ;;  %v625_v11 = vadd.f32 %v1163_v22, %v586_v5  ;;  %v568_v12 = vmul.f32 %v1158_v20, %v448_v8 }
  0xec   : > { %v584_v13 = vmul.f32 %v1158_v20, %v512_v9  ;;  %v936_v14 = vpack.c.bf16 %v606_v6, %v606_v6  ;;  %v952_v15 = vpack.c.bf16 %v622_v7, %v622_v7  ;;  %v1002_v16 = vpop.f32.mrf.mxu0  ;;  %v1018_v17 = vpop.f32.mrf.mxu1 }
  0xed   : > { %v939_v18 = vpack.c.bf16 %v609_v10, %v609_v10  ;;  %v955_v19 = vpack.c.bf16 %v625_v11, %v625_v11  ;;  %v607_v21 = vadd.f32 %v1163_v22, %v568_v12  ;;  %v573_v24 = vmul.f32 %v1002_v16, %v1158_v20 }
  0xee   : > { %v623_v23 = vadd.f32 %v1163_v22, %v584_v13  ;;  %767 = vst.msk [vmem:[%s1176_s10 + $0x10] sm:$0xf] %vm762_vm1, %v936_v14  ;;  %783 = vst.msk [vmem:[%s1176_s10 + $0x50] sm:$0xf] %vm762_vm1, %v952_v15  ;;  %v589_v25 = vmul.f32 %v1018_v17, %v1158_v20  ;;  %v461_v26 = vpop.f32.mrf.mxu0  ;;  %v525_v27 = vpop.f32.mrf.mxu1 }
  0xef   : > { %770 = vst.msk [vmem:[%s1176_s10 + $0x1c] sm:$0xf] %vm762_vm1, %v939_v18  ;;  %786 = vst.msk [vmem:[%s1176_s10 + $0x5c] sm:$0xf] %vm762_vm1, %v955_v19  ;;  %v937_v28 = vpack.c.bf16 %v607_v21, %v607_v21  ;;  %v571_v30 = vmul.f32 %v1158_v20, %v461_v26  ;;  %v587_v31 = vmul.f32 %v1158_v20, %v525_v27 }
  0xf0   : > { %v953_v29 = vpack.c.bf16 %v623_v23, %v623_v23  ;;  %v612_v32 = vadd.f32 %v1163_v22, %v573_v24  ;;  %v628_v33 = vadd.f32 %v1163_v22, %v589_v25  ;;  %v1003_v34 = vpop.f32.mrf.mxu0  ;;  %v1019_v35 = vpop.f32.mrf.mxu1 }
  0xf1   : > { %768 = vst.msk [vmem:[%s1176_s10 + $0x14] sm:$0xf] %vm762_vm1, %v937_v28  ;;  %v610_v36 = vadd.f32 %v1163_v22, %v571_v30  ;;  %v626_v37 = vadd.f32 %v1163_v22, %v587_v31  ;;  %v574_v38 = vmul.f32 %v1003_v34, %v1158_v20  ;;  %v590_v39 = vmul.f32 %v1019_v35, %v1158_v20 }
  0xf2   : > { %784 = vst.msk [vmem:[%s1176_s10 + $0x54] sm:$0xf] %vm762_vm1, %v953_v29  ;;  %v942_v40 = vpack.c.bf16 %v612_v32, %v612_v32  ;;  %v958_v41 = vpack.c.bf16 %v628_v33, %v628_v33  ;;  %v464_v42 = vpop.f32.mrf.mxu0  ;;  %v528_v43 = vpop.f32.mrf.mxu1 }
  0xf3   : > { %v940_v44 = vpack.c.bf16 %v610_v36, %v610_v36  ;;  %v956_v45 = vpack.c.bf16 %v626_v37, %v626_v37  ;;  %v613_v46 = vadd.f32 %v1163_v22, %v574_v38  ;;  %v629_v47 = vadd.f32 %v1163_v22, %v590_v39 }
  0xf4   : > { %773 = vst.msk [vmem:[%s1176_s10 + $0x28] sm:$0xf] %vm762_vm1, %v942_v40  ;;  %789 = vst.msk [vmem:[%s1176_s10 + $0x68] sm:$0xf] %vm762_vm1, %v958_v41  ;;  %v572_v48 = vmul.f32 %v1158_v20, %v464_v42  ;;  %v588_v49 = vmul.f32 %v1158_v20, %v528_v43  ;;  %v1006_v50 = vpop.f32.mrf.mxu0  ;;  %v1022_v51 = vpop.f32.mrf.mxu1 }
  0xf5   : > { %771 = vst.msk [vmem:[%s1176_s10 + $0x20] sm:$0xf] %vm762_vm1, %v940_v44  ;;  %787 = vst.msk [vmem:[%s1176_s10 + $0x60] sm:$0xf] %vm762_vm1, %v956_v45  ;;  %v943_v52 = vpack.c.bf16 %v613_v46, %v613_v46  ;;  %v959_v53 = vpack.c.bf16 %v629_v47, %v629_v47  ;;  %v577_v54 = vmul.f32 %v1006_v50, %v1158_v20 }
  0xf6   : > { %v593_v55 = vmul.f32 %v1022_v51, %v1158_v20  ;;  %v611_v56 = vadd.f32 %v1163_v22, %v572_v48  ;;  %v627_v57 = vadd.f32 %v1163_v22, %v588_v49  ;;  %v477_v58 = vpop.f32.mrf.mxu0  ;;  %v541_v59 = vpop.f32.mrf.mxu1 }
  0xf7   : > { %774 = vst.msk [vmem:[%s1176_s10 + $0x2c] sm:$0xf] %vm762_vm1, %v943_v52  ;;  %790 = vst.msk [vmem:[%s1176_s10 + $0x6c] sm:$0xf] %vm762_vm1, %v959_v53  ;;  %v616_v60 = vadd.f32 %v1163_v22, %v577_v54  ;;  %v575_v62 = vmul.f32 %v1158_v20, %v477_v58  ;;  %v591_v63 = vmul.f32 %v1158_v20, %v541_v59 }
  0xf8   : > { %v632_v61 = vadd.f32 %v1163_v22, %v593_v55  ;;  %v941_v0 = vpack.c.bf16 %v611_v56, %v611_v56  ;;  %v957_v1 = vpack.c.bf16 %v627_v57, %v627_v57  ;;  %v1007_v2 = vpop.f32.mrf.mxu0  ;;  %v1023_v3 = vpop.f32.mrf.mxu1 }
  0xf9   : > { %v946_v4 = vpack.c.bf16 %v616_v60, %v616_v60  ;;  %v614_v6 = vadd.f32 %v1163_v22, %v575_v62  ;;  %v630_v7 = vadd.f32 %v1163_v22, %v591_v63  ;;  %v578_v8 = vmul.f32 %v1007_v2, %v1158_v20 }
  0xfa   : > { %v962_v5 = vpack.c.bf16 %v632_v61, %v632_v61  ;;  %772 = vst.msk [vmem:[%s1176_s10 + $0x24] sm:$0xf] %vm762_vm1, %v941_v0  ;;  %788 = vst.msk [vmem:[%s1176_s10 + $0x64] sm:$0xf] %vm762_vm1, %v957_v1  ;;  %v594_v9 = vmul.f32 %v1023_v3, %v1158_v20  ;;  %v480_v10 = vpop.f32.mrf.mxu0  ;;  %v544_v11 = vpop.f32.mrf.mxu1 }
  0xfb   : > { %777 = vst.msk [vmem:[%s1176_s10 + $0x38] sm:$0xf] %vm762_vm1, %v946_v4  ;;  %v944_v12 = vpack.c.bf16 %v614_v6, %v614_v6  ;;  %v960_v13 = vpack.c.bf16 %v630_v7, %v630_v7  ;;  %v576_v14 = vmul.f32 %v1158_v20, %v480_v10  ;;  %v592_v15 = vmul.f32 %v1158_v20, %v544_v11 }
  0xfc   : > { %793 = vst.msk [vmem:[%s1176_s10 + $0x78] sm:$0xf] %vm762_vm1, %v962_v5  ;;  %v617_v16 = vadd.f32 %v1163_v22, %v578_v8  ;;  %v633_v17 = vadd.f32 %v1163_v22, %v594_v9 }
  0xfd   : > { %775 = vst.msk [vmem:[%s1176_s10 + $0x30] sm:$0xf] %vm762_vm1, %v944_v12  ;;  %791 = vst.msk [vmem:[%s1176_s10 + $0x70] sm:$0xf] %vm762_vm1, %v960_v13  ;;  %v615_v18 = vadd.f32 %v1163_v22, %v576_v14  ;;  %v631_v19 = vadd.f32 %v1163_v22, %v592_v15 }
  0xfe   : > { %v947_v21 = vpack.c.bf16 %v617_v16, %v617_v16  ;;  %v963_v23 = vpack.c.bf16 %v633_v17, %v633_v17 }
  0xff   : > { %v945_v24 = vpack.c.bf16 %v615_v18, %v615_v18  ;;  %v961_v25 = vpack.c.bf16 %v631_v19, %v631_v19 }
 0x100   : > { %778 = vst.msk [vmem:[%s1176_s10 + $0x3c] sm:$0xf] %vm762_vm1, %v947_v21  ;;  %794 = vst.msk [vmem:[%s1176_s10 + $0x7c] sm:$0xf] %vm762_vm1, %v963_v23 }
 0x101   : > { %776 = vst.msk [vmem:[%s1176_s10 + $0x34] sm:$0xf] %vm762_vm1, %v945_v24  ;;  %792 = vst.msk [vmem:[%s1176_s10 + $0x74] sm:$0xf] %vm762_vm1, %v961_v25 }
 0x102 PF: > { %s14_s15 = sadd.s32 1, %s1066_s15  }
 0x103   : > { %p11_p4 = scmp.ge.s32.totalorder %s14_s15, 4  }
 0x105   :  { %13 = sbr.rel (!%p11_p4) target bundleno = 1 (0x1), region = 66 }

// kernel: _lambda_.26
= control target key start
LH: loop header
LB: loop body
LE: loop exit
PB: predicated region body
PF: predicated region fallthrough
CT: control target
= control target key end

     0   :  { %s1320_s18 = smov 0   ;;  %s1662_s0 = inlined_call_operand.vmem [shape: bf16[512,8], index: 0, kind: input, shape index: {}]   ;;  %s1663_s1 = inlined_call_operand.vmem [shape: bf16[8,16], index: 1, kind: input, shape index: {}]   ;;  %s1664_s2 = inlined_call_operand.vmem [shape: f32[1,16], index: 2, kind: input, shape index: {}]   ;;  %s1665_s3 = inlined_call_operand.vmem [shape: f32[1,16], index: 3, kind: input, shape index: {}]   ;;  %s1666_s4 = inlined_call_operand.vmem [shape: bf16[512,16], index: 4, kind: input, shape index: {}]   ;;  %s1667_s5 = inlined_call_operand.vmem [shape: bf16[512,16], index: 5, kind: output, shape index: {}]  }
   0x1 LB: > { %s1013_s19 = sadd.s32 4294967295, %s1288_s18   ;;  %p1017_p0 = scmp.ge.s32.totalorder %s1288_s18, 1  ;;  %s1288_s18 = sphi %s1320_s18, %s15_s18  }
   0x2   : > { %p199_p1 = scmp.lt.s32.totalorder %s1288_s18, 3 }
   0x4   : > { %p200_p2 = pnand %p1017_p0, %p199_p1 }
   0x5   : > { %s1018_s22 = sshll.u32 (!%p200_p2), %s1013_s19, 5 }
   0x6   : > { %203 = sbr.rel (%p200_p2) target bundleno = 258 (0x102), region = 40  ;;  %p233_p3 = scmp.lt.s32.totalorder (!%p200_p2), %s1018_s22, 63 }
   0xb   : > { %v283_v0 = vld [vmem:[%s1663_s1] sm:$0xf]  ;;  %vm413_vm0 = vcmask 1043456   ;;  %s1672_s22 = smov (!%p233_p3, %s1018_s22), 63  ;;  %vm364_vm1 = vcmask 64512   ;;  %vm912_vm2 = vcmask 125952  }
   0xc   : > { %1256 = vmatprep.subr.msk.bf16.mxu0 %vm413_vm0, %v283_v0  ;;  %1257 = vmatprep.subr.msk.bf16.mxu1 %vm413_vm0, %v283_v0  ;;  %v415_v1 = vsel %vm413_vm0, %v283_v0, 0  ;;  %s1331_s23 = sshll.u32 %s1672_s22, 2  ;;  %v1424_v38 = vld [vmem:[%s1664_s2] ss:$0 sm:$0xff] }
   0xd   : > { %1221 = vmatpush3.bf16.msra.mxu0 %v415_v1  ;;  %1255 = vmatpush3.bf16.msra.mxu1 %v415_v1  ;;  %s1337_s26 = scalar_lea.vmem %s1662_s0, %s1331_s23  ;;  %s1375_s29 = scalar_lea.vmem %s1666_s4, %s1331_s23  ;;  %v1443_v50 = vld [vmem:[%s1665_s3] ss:$0 sm:$0xff] }
   0xe   : > { %v1266_v2 = vld [vmem:[%s1337_s26] sm:$0xff]   ;;  %v1268_v4 = vld [vmem:[%s1337_s26 + $0x8] sm:$0xff]   ;;  %v1270_v6 = vld [vmem:[%s1337_s26 + $0x10] sm:$0xff]   ;;  %s1483_s11 = scalar_lea.vmem %s1667_s5, %s1331_s23 }
   0xf   : > { %v1267_v3 = vld [vmem:[%s1337_s26 + $0x40] sm:$0xff]   ;;  %1222 = vmatprep.mubr.msk.bf16.mxu0 %vm364_vm1, %v1266_v2  ;;  %v1269_v5 = vld [vmem:[%s1337_s26 + $0x48] sm:$0xff]   ;;  %v1271_v7 = vld [vmem:[%s1337_s26 + $0x50] sm:$0xff]  }
  0x10   : > { %1238 = vmatprep.mubr.msk.bf16.mxu1 %vm364_vm1, %v1267_v3  ;;  %1223 = vmatmul.mubr.msk.bf16.vlgmr.msra.gmra.mxu0 %vm364_vm1, %v1268_v4  ;;  %v1272_v8 = vld [vmem:[%s1337_s26 + $0x18] sm:$0xff]   ;;  %v1274_v10 = vld [vmem:[%s1337_s26 + $0x20] sm:$0xff]   ;;  %v1276_v12 = vld [vmem:[%s1337_s26 + $0x28] sm:$0xff]  }
  0x11   : > { %1239 = vmatmul.mubr.msk.bf16.vlgmr.msra.gmra.mxu1 %vm364_vm1, %v1269_v5  ;;  %1226 = vmatprep.mubr.msk.bf16.mxu0 %vm364_vm1, %v1270_v6  ;;  %v1273_v9 = vld [vmem:[%s1337_s26 + $0x58] sm:$0xff]   ;;  %v1275_v11 = vld [vmem:[%s1337_s26 + $0x60] sm:$0xff]   ;;  %v1277_v13 = vld [vmem:[%s1337_s26 + $0x68] sm:$0xff]  }
  0x12   : > { %1242 = vmatprep.mubr.msk.bf16.mxu1 %vm364_vm1, %v1271_v7  ;;  %v1278_v14 = vld [vmem:[%s1337_s26 + $0x30] sm:$0xff]   ;;  %v1280_v16 = vld [vmem:[%s1337_s26 + $0x38] sm:$0xff]   ;;  %v1378_v18 = vld [vmem:[%s1375_s29 + $0x8] sm:$0xff]  }
  0x13   : > { %v1279_v15 = vld [vmem:[%s1337_s26 + $0x70] sm:$0xff]   ;;  %v1281_v17 = vld [vmem:[%s1337_s26 + $0x78] sm:$0xff]   ;;  %v1381_v19 = vld [vmem:[%s1375_s29 + $0x48] sm:$0xff]   ;;  %v1130_v26 = vunpack.c.l.bf16 %v1378_v18  ;;  %v1131_v31 = vunpack.c.h.bf16 %v1378_v18 }
  0x14   : > { %v1384_v20 = vld [vmem:[%s1375_s29] sm:$0xff]   ;;  %v1390_v22 = vld [vmem:[%s1375_s29 + $0x18] sm:$0xff]   ;;  %v1396_v24 = vld [vmem:[%s1375_s29 + $0x10] sm:$0xff]   ;;  %v1162_v27 = vunpack.c.l.bf16 %v1381_v19  ;;  %v1163_v32 = vunpack.c.h.bf16 %v1381_v19 }
  0x15   : > { %v1387_v21 = vld [vmem:[%s1375_s29 + $0x40] sm:$0xff]   ;;  %v1393_v23 = vld [vmem:[%s1375_s29 + $0x58] sm:$0xff]   ;;  %v1399_v25 = vld [vmem:[%s1375_s29 + $0x50] sm:$0xff]   ;;  %v1126_v28 = vunpack.c.l.bf16 %v1384_v20  ;;  %v1127_v33 = vunpack.c.h.bf16 %v1384_v20  ;;  %v1138_v39 = vunpack.c.l.bf16 %v1390_v22  ;;  %v1134_v41 = vunpack.c.l.bf16 %v1396_v24 }
  0x16   : > { %v1158_v29 = vunpack.c.l.bf16 %v1387_v21  ;;  %v1406_v30 = vld [vmem:[%s1375_s29 + $0x28] sm:$0xff]   ;;  %v1159_v34 = vunpack.c.h.bf16 %v1387_v21  ;;  %v1416_v36 = vld [vmem:[%s1375_s29 + $0x20] sm:$0xff]   ;;  %v1170_v40 = vunpack.c.l.bf16 %v1393_v23  ;;  %v1166_v42 = vunpack.c.l.bf16 %v1399_v25  ;;  %v1435_v47 = vld [vmem:[%s1375_s29 + $0x38] sm:$0xff]  }
  0x17   : > { %v1413_v35 = vld [vmem:[%s1375_s29 + $0x68] sm:$0xff]   ;;  %v1419_v37 = vld [vmem:[%s1375_s29 + $0x60] sm:$0xff]   ;;  %v1139_v43 = vunpack.c.h.bf16 %v1390_v22  ;;  %v1171_v44 = vunpack.c.h.bf16 %v1393_v23  ;;  %v1135_v45 = vunpack.c.h.bf16 %v1396_v24  ;;  %v1167_v46 = vunpack.c.h.bf16 %v1399_v25  ;;  %v1438_v48 = vld [vmem:[%s1375_s29 + $0x78] sm:$0xff]  }
  0x18   : > { %1227 = vmatmul.mubr.msk.bf16.gmra.mxu0 %vm364_vm1, %v1272_v8  ;;  %v1146_v51 = vunpack.c.l.bf16 %v1406_v30  ;;  %v1178_v52 = vunpack.c.l.bf16 %v1413_v35  ;;  %v1142_v53 = vunpack.c.l.bf16 %v1416_v36  ;;  %v1174_v54 = vunpack.c.l.bf16 %v1419_v37  ;;  %v1450_v55 = vld [vmem:[%s1375_s29 + $0x30] sm:$0xff]  }
  0x19   : > { %1243 = vmatmul.mubr.msk.bf16.gmra.mxu1 %vm364_vm1, %v1273_v9  ;;  %1230 = vmatprep.mubr.msk.bf16.mxu0 %vm364_vm1, %v1274_v10  ;;  %v1453_v56 = vld [vmem:[%s1375_s29 + $0x70] sm:$0xff]   ;;  %v1147_v59 = vunpack.c.h.bf16 %v1406_v30  ;;  %v1179_v60 = vunpack.c.h.bf16 %v1413_v35  ;;  %v1143_v61 = vunpack.c.h.bf16 %v1416_v36  ;;  %v1175_v0 = vunpack.c.h.bf16 %v1419_v37 }
  0x1a   : > { %1246 = vmatprep.mubr.msk.bf16.mxu1 %vm364_vm1, %v1275_v11  ;;  %v1154_v1 = vunpack.c.l.bf16 %v1435_v47  ;;  %v1186_v2 = vunpack.c.l.bf16 %v1438_v48  ;;  %v1150_v6 = vunpack.c.l.bf16 %v1450_v55  ;;  %v1182_v7 = vunpack.c.l.bf16 %v1453_v56 }
  0x20   : > { %1231 = vmatmul.mubr.msk.bf16.gmra.mxu0 %vm364_vm1, %v1276_v12 }
  0x21   : > { %1247 = vmatmul.mubr.msk.bf16.gmra.mxu1 %vm364_vm1, %v1277_v13  ;;  %1234 = vmatprep.mubr.msk.bf16.mxu0 %vm364_vm1, %v1278_v14 }
  0x22   : > { %1250 = vmatprep.mubr.msk.bf16.mxu1 %vm364_vm1, %v1279_v15 }
  0x28   : > { %1235 = vmatmul.mubr.msk.bf16.gmra.mxu0 %vm364_vm1, %v1280_v16 }
  0x29   : > { %1251 = vmatmul.mubr.msk.bf16.gmra.mxu1 %vm364_vm1, %v1281_v17  ;;  %v1151_v17 = vunpack.c.h.bf16 %v1450_v55 }
  0xd0   : > { %v1224_v49 = vpop.f32.mrf.mxu0 }
  0xd1   : > { %v587_v57 = vmul.f32 %v1224_v49, %v1424_v38  ;;  %v1240_v58 = vpop.f32.mrf.mxu1 }
  0xd2   : > { %v603_v62 = vmul.f32 %v1240_v58, %v1424_v38  ;;  %v451_v63 = vpop.f32.mrf.mxu0 }
  0xd3   : > { %v626_v3 = vadd.f32 %v1443_v50, %v587_v57  ;;  %v585_v4 = vmul.f32 %v1424_v38, %v451_v63  ;;  %v515_v5 = vpop.f32.mrf.mxu1 }
  0xd4   : > { %v642_v8 = vadd.f32 %v1443_v50, %v603_v62  ;;  %v601_v9 = vmul.f32 %v1424_v38, %v515_v5  ;;  %v1225_v10 = vpop.f32.mrf.mxu0 }
  0xd5   : > { %v722_v13 = vadd.f32 %v1130_v26, %v626_v3  ;;  %v624_v14 = vadd.f32 %v1443_v50, %v585_v4  ;;  %v588_v15 = vmul.f32 %v1225_v10, %v1424_v38  ;;  %v1241_v16 = vpop.f32.mrf.mxu1 }
  0xd6   : > { %v738_v49 = vadd.f32 %v1162_v27, %v642_v8  ;;  %v640_v57 = vadd.f32 %v1443_v50, %v601_v9  ;;  %v604_v58 = vmul.f32 %v1241_v16, %v1424_v38  ;;  %v454_v62 = vpop.f32.mrf.mxu0 }
  0xd7   : > { %v754_v5 = vmax.f32 %v722_v13, 0.0  ;;  %v720_v11 = vadd.f32 %v1126_v28, %v624_v14  ;;  %v627_v12 = vadd.f32 %v1443_v50, %v588_v15  ;;  %v586_v26 = vmul.f32 %v1424_v38, %v454_v62  ;;  %v518_v3 = vpop.f32.mrf.mxu1 }
  0xd8   : > { %v770_v27 = vmax.f32 %v738_v49, 0.0  ;;  %v736_v4 = vadd.f32 %v1158_v29, %v640_v57  ;;  %v643_v8 = vadd.f32 %v1443_v50, %v604_v58  ;;  %v602_v9 = vmul.f32 %v1424_v38, %v518_v3  ;;  %v1228_v28 = vpop.f32.mrf.mxu0 }
  0xd9   : > { %v1094_v10 = vpack.c.bf16 %v754_v5, %v754_v5  ;;  %v752_v13 = vmax.f32 %v720_v11, 0.0  ;;  %v723_v14 = vadd.f32 %v1131_v31, %v627_v12  ;;  %v625_v15 = vadd.f32 %v1443_v50, %v586_v26  ;;  %v1244_v16 = vpop.f32.mrf.mxu1 }
  0xda   : > { %v1110_v62 = vpack.c.bf16 %v770_v27, %v770_v27  ;;  %v768_v63 = vmax.f32 %v736_v4, 0.0  ;;  %v739_v29 = vadd.f32 %v1163_v32, %v643_v8  ;;  %v641_v49 = vadd.f32 %v1443_v50, %v602_v9  ;;  %v467_v57 = vpop.f32.mrf.mxu0 }
  0xdb   : > { %915 = vst.msk [vmem:[%s1483_s11 + $0x8] sm:$0xf] %vm912_vm2, %v1094_v10  ;;  %v1092_v58 = vpack.c.bf16 %v752_v13, %v752_v13  ;;  %v755_v5 = vmax.f32 %v723_v14, 0.0  ;;  %v721_v18 = vadd.f32 %v1127_v33, %v625_v15  ;;  %v591_v31 = vmul.f32 %v1228_v28, %v1424_v38  ;;  %v531_v11 = vpop.f32.mrf.mxu1 }
  0xdc   : > { %931 = vst.msk [vmem:[%s1483_s11 + $0x48] sm:$0xf] %vm912_vm2, %v1110_v62  ;;  %v1108_v12 = vpack.c.bf16 %v768_v63, %v768_v63  ;;  %v771_v19 = vmax.f32 %v739_v29, 0.0  ;;  %v737_v32 = vadd.f32 %v1159_v34, %v641_v49  ;;  %v607_v26 = vmul.f32 %v1244_v16, %v1424_v38  ;;  %v1229_v3 = vpop.f32.mrf.mxu0 }
  0xdd   : > { %913 = vst.msk [vmem:[%s1483_s11] sm:$0xf] %vm912_vm2, %v1092_v58  ;;  %v1095_v27 = vpack.c.bf16 %v755_v5, %v755_v5  ;;  %v753_v20 = vmax.f32 %v721_v18, 0.0  ;;  %v630_v33 = vadd.f32 %v1443_v50, %v591_v31  ;;  %v589_v4 = vmul.f32 %v1424_v38, %v467_v57  ;;  %v1245_v8 = vpop.f32.mrf.mxu1 }
  0xde   : > { %929 = vst.msk [vmem:[%s1483_s11 + $0x40] sm:$0xf] %vm912_vm2, %v1108_v12  ;;  %v1111_v63 = vpack.c.bf16 %v771_v19, %v771_v19  ;;  %v769_v9 = vmax.f32 %v737_v32, 0.0  ;;  %v646_v21 = vadd.f32 %v1443_v50, %v607_v26  ;;  %v605_v34 = vmul.f32 %v1424_v38, %v531_v11  ;;  %v470_v28 = vpop.f32.mrf.mxu0 }
  0xdf   : > { %916 = vst.msk [vmem:[%s1483_s11 + $0xc] sm:$0xf] %vm912_vm2, %v1095_v27  ;;  %v1093_v10 = vpack.c.bf16 %v753_v20, %v753_v20  ;;  %v726_v13 = vadd.f32 %v1138_v39, %v630_v33  ;;  %v628_v14 = vadd.f32 %v1443_v50, %v589_v4  ;;  %v592_v15 = vmul.f32 %v1229_v3, %v1424_v38  ;;  %v534_v16 = vpop.f32.mrf.mxu1 }
  0xe0   : > { %932 = vst.msk [vmem:[%s1483_s11 + $0x4c] sm:$0xf] %vm912_vm2, %v1111_v63  ;;  %v1109_v62 = vpack.c.bf16 %v769_v9, %v769_v9  ;;  %v742_v29 = vadd.f32 %v1170_v40, %v646_v21  ;;  %v644_v49 = vadd.f32 %v1443_v50, %v605_v34  ;;  %v608_v57 = vmul.f32 %v1245_v8, %v1424_v38  ;;  %v1232_v58 = vpop.f32.mrf.mxu0 }
  0xe1   : > { %914 = vst.msk [vmem:[%s1483_s11 + $0x4] sm:$0xf] %vm912_vm2, %v1093_v10  ;;  %v758_v39 = vmax.f32 %v726_v13, 0.0  ;;  %v724_v5 = vadd.f32 %v1134_v41, %v628_v14  ;;  %v631_v18 = vadd.f32 %v1443_v50, %v592_v15  ;;  %v590_v31 = vmul.f32 %v1424_v38, %v470_v28  ;;  %v1248_v11 = vpop.f32.mrf.mxu1 }
  0xe2   : > { %930 = vst.msk [vmem:[%s1483_s11 + $0x44] sm:$0xf] %vm912_vm2, %v1109_v62  ;;  %v774_v40 = vmax.f32 %v742_v29, 0.0  ;;  %v740_v12 = vadd.f32 %v1166_v42, %v644_v49  ;;  %v647_v19 = vadd.f32 %v1443_v50, %v608_v57  ;;  %v606_v32 = vmul.f32 %v1424_v38, %v534_v16  ;;  %v483_v26 = vpop.f32.mrf.mxu0 }
  0xe3   : > { %v1098_v3 = vpack.c.bf16 %v758_v39, %v758_v39  ;;  %v756_v41 = vmax.f32 %v724_v5, 0.0  ;;  %v727_v27 = vadd.f32 %v1139_v43, %v631_v18  ;;  %v629_v20 = vadd.f32 %v1443_v50, %v590_v31  ;;  %v547_v33 = vpop.f32.mrf.mxu1 }
  0xe4   : > { %v1114_v4 = vpack.c.bf16 %v774_v40, %v774_v40  ;;  %v772_v8 = vmax.f32 %v740_v12, 0.0  ;;  %v743_v42 = vadd.f32 %v1171_v44, %v647_v19  ;;  %v645_v63 = vadd.f32 %v1443_v50, %v606_v32  ;;  %v1233_v9 = vpop.f32.mrf.mxu0 }
  0xe5   : > { %919 = vst.msk [vmem:[%s1483_s11 + $0x18] sm:$0xf] %vm912_vm2, %v1098_v3  ;;  %v1096_v21 = vpack.c.bf16 %v756_v41, %v756_v41  ;;  %v759_v34 = vmax.f32 %v727_v27, 0.0  ;;  %v725_v22 = vadd.f32 %v1135_v45, %v629_v20  ;;  %v595_v43 = vmul.f32 %v1232_v58, %v1424_v38  ;;  %v1249_v28 = vpop.f32.mrf.mxu1 }
  0xe6   : > { %935 = vst.msk [vmem:[%s1483_s11 + $0x58] sm:$0xf] %vm912_vm2, %v1114_v4  ;;  %v1112_v10 = vpack.c.bf16 %v772_v8, %v772_v8  ;;  %v775_v23 = vmax.f32 %v743_v42, 0.0  ;;  %v741_v44 = vadd.f32 %v1167_v46, %v645_v63  ;;  %v611_v13 = vmul.f32 %v1248_v11, %v1424_v38  ;;  %v486_v14 = vpop.f32.mrf.mxu0 }
  0xe7   : > { %917 = vst.msk [vmem:[%s1483_s11 + $0x10] sm:$0xf] %vm912_vm2, %v1096_v21  ;;  %v1099_v15 = vpack.c.bf16 %v759_v34, %v759_v34  ;;  %v757_v24 = vmax.f32 %v725_v22, 0.0  ;;  %v634_v45 = vadd.f32 %v1443_v50, %v595_v43  ;;  %v593_v16 = vmul.f32 %v1424_v38, %v483_v26  ;;  %v550_v62 = vpop.f32.mrf.mxu1 }
  0xe8   : > { %933 = vst.msk [vmem:[%s1483_s11 + $0x50] sm:$0xf] %vm912_vm2, %v1112_v10  ;;  %v1115_v29 = vpack.c.bf16 %v775_v23, %v775_v23  ;;  %v773_v49 = vmax.f32 %v741_v44, 0.0  ;;  %v650_v25 = vadd.f32 %v1443_v50, %v611_v13  ;;  %v609_v46 = vmul.f32 %v1424_v38, %v547_v33  ;;  %v1236_v57 = vpop.f32.mrf.mxu0 }
  0xe9   : > { %920 = vst.msk [vmem:[%s1483_s11 + $0x1c] sm:$0xf] %vm912_vm2, %v1099_v15  ;;  %v1097_v58 = vpack.c.bf16 %v757_v24, %v757_v24  ;;  %v730_v39 = vadd.f32 %v1146_v51, %v634_v45  ;;  %v632_v5 = vadd.f32 %v1443_v50, %v593_v16  ;;  %v596_v18 = vmul.f32 %v1233_v9, %v1424_v38  ;;  %v1252_v31 = vpop.f32.mrf.mxu1 }
  0xea   : > { %936 = vst.msk [vmem:[%s1483_s11 + $0x5c] sm:$0xf] %vm912_vm2, %v1115_v29  ;;  %v1113_v11 = vpack.c.bf16 %v773_v49, %v773_v49  ;;  %v746_v40 = vadd.f32 %v1178_v52, %v650_v25  ;;  %v648_v12 = vadd.f32 %v1443_v50, %v609_v46  ;;  %v612_v19 = vmul.f32 %v1249_v28, %v1424_v38  ;;  %v499_v32 = vpop.f32.mrf.mxu0 }
  0xeb   : > { %918 = vst.msk [vmem:[%s1483_s11 + $0x14] sm:$0xf] %vm912_vm2, %v1097_v58  ;;  %v762_v51 = vmax.f32 %v730_v39, 0.0  ;;  %v728_v26 = vadd.f32 %v1142_v53, %v632_v5  ;;  %v635_v3 = vadd.f32 %v1443_v50, %v596_v18  ;;  %v594_v41 = vmul.f32 %v1424_v38, %v486_v14  ;;  %v563_v27 = vpop.f32.mrf.mxu1 }
  0xec   : > { %934 = vst.msk [vmem:[%s1483_s11 + $0x54] sm:$0xf] %vm912_vm2, %v1113_v11  ;;  %v778_v52 = vmax.f32 %v746_v40, 0.0  ;;  %v744_v20 = vadd.f32 %v1174_v54, %v648_v12  ;;  %v651_v33 = vadd.f32 %v1443_v50, %v612_v19  ;;  %v610_v4 = vmul.f32 %v1424_v38, %v550_v62  ;;  %v1237_v22 = vpop.f32.mrf.mxu0 }
  0xed   : > { %v1102_v8 = vpack.c.bf16 %v762_v51, %v762_v51  ;;  %v760_v42 = vmax.f32 %v728_v26, 0.0  ;;  %v731_v53 = vadd.f32 %v1147_v59, %v635_v3  ;;  %v633_v63 = vadd.f32 %v1443_v50, %v594_v41  ;;  %v1253_v10 = vpop.f32.mrf.mxu1 }
  0xee   : > { %v1118_v9 = vpack.c.bf16 %v778_v52, %v778_v52  ;;  %v776_v21 = vmax.f32 %v744_v20, 0.0  ;;  %v747_v34 = vadd.f32 %v1179_v60, %v651_v33  ;;  %v649_v54 = vadd.f32 %v1443_v50, %v610_v4 }
  0xef   : > { %923 = vst.msk [vmem:[%s1483_s11 + $0x28] sm:$0xf] %vm912_vm2, %v1102_v8  ;;  %v1100_v43 = vpack.c.bf16 %v760_v42, %v760_v42  ;;  %v763_v28 = vmax.f32 %v731_v53, 0.0  ;;  %v729_v30 = vadd.f32 %v1143_v61, %v633_v63  ;;  %v599_v59 = vmul.f32 %v1236_v57, %v1424_v38  ;;  %v566_v25 = vpop.f32.mrf.mxu1 }
  0xf0   : > { %939 = vst.msk [vmem:[%s1483_s11 + $0x68] sm:$0xf] %vm912_vm2, %v1118_v9  ;;  %v1116_v23 = vpack.c.bf16 %v776_v21, %v776_v21  ;;  %v779_v35 = vmax.f32 %v747_v34, 0.0  ;;  %v745_v60 = vadd.f32 %v1175_v0, %v649_v54  ;;  %v615_v44 = vmul.f32 %v1252_v31, %v1424_v38  ;;  %v502_v0 = vpop.f32.mrf.mxu0 }
  0xf1   : > { %921 = vst.msk [vmem:[%s1483_s11 + $0x20] sm:$0xf] %vm912_vm2, %v1100_v43  ;;  %v1103_v13 = vpack.c.bf16 %v763_v28, %v763_v28  ;;  %v761_v14 = vmax.f32 %v729_v30, 0.0  ;;  %v638_v36 = vadd.f32 %v1443_v50, %v599_v59  ;;  %v597_v61 = vmul.f32 %v1424_v38, %v499_v32 }
  0xf2   : > { %937 = vst.msk [vmem:[%s1483_s11 + $0x60] sm:$0xf] %vm912_vm2, %v1116_v23  ;;  %v1119_v15 = vpack.c.bf16 %v779_v35, %v779_v35  ;;  %v777_v24 = vmax.f32 %v745_v60, 0.0  ;;  %v654_v45 = vadd.f32 %v1443_v50, %v615_v44  ;;  %v613_v37 = vmul.f32 %v1424_v38, %v563_v27 }
  0xf3   : > { %924 = vst.msk [vmem:[%s1483_s11 + $0x2c] sm:$0xf] %vm912_vm2, %v1103_v13  ;;  %v1101_v16 = vpack.c.bf16 %v761_v14, %v761_v14  ;;  %v734_v62 = vadd.f32 %v1154_v1, %v638_v36  ;;  %v636_v29 = vadd.f32 %v1443_v50, %v597_v61  ;;  %v600_v49 = vmul.f32 %v1237_v22, %v1424_v38 }
  0xf4   : > { %940 = vst.msk [vmem:[%s1483_s11 + $0x6c] sm:$0xf] %vm912_vm2, %v1119_v15  ;;  %v1117_v46 = vpack.c.bf16 %v777_v24, %v777_v24  ;;  %v750_v57 = vadd.f32 %v1186_v2, %v654_v45  ;;  %v652_v58 = vadd.f32 %v1443_v50, %v613_v37  ;;  %v616_v39 = vmul.f32 %v1253_v10, %v1424_v38 }
  0xf5   : > { %922 = vst.msk [vmem:[%s1483_s11 + $0x24] sm:$0xf] %vm912_vm2, %v1101_v16  ;;  %v766_v5 = vmax.f32 %v734_v62, 0.0  ;;  %v732_v1 = vadd.f32 %v1150_v6, %v636_v29  ;;  %v639_v18 = vadd.f32 %v1443_v50, %v600_v49  ;;  %v598_v31 = vmul.f32 %v1424_v38, %v502_v0 }
  0xf6   : > { %938 = vst.msk [vmem:[%s1483_s11 + $0x64] sm:$0xf] %vm912_vm2, %v1117_v46  ;;  %v782_v11 = vmax.f32 %v750_v57, 0.0  ;;  %v748_v2 = vadd.f32 %v1182_v7, %v652_v58  ;;  %v655_v40 = vadd.f32 %v1443_v50, %v616_v39  ;;  %v614_v12 = vmul.f32 %v1424_v38, %v566_v25 }
  0xf7   : > { %v1106_v19 = vpack.c.bf16 %v766_v5, %v766_v5  ;;  %v764_v32 = vmax.f32 %v732_v1, 0.0  ;;  %v1668_v6 = vunpack.c.h.bf16 %v1435_v47  ;;  %v637_v26 = vadd.f32 %v1443_v50, %v598_v31 }
  0xf8   : > { %v1122_v3 = vpack.c.bf16 %v782_v11, %v782_v11  ;;  %v780_v41 = vmax.f32 %v748_v2, 0.0  ;;  %v1669_v27 = vunpack.c.h.bf16 %v1438_v48  ;;  %v653_v7 = vadd.f32 %v1443_v50, %v614_v12 }
  0xf9   : > { %v735_v51 = vadd.f32 %v1668_v6, %v639_v18  ;;  %927 = vst.msk [vmem:[%s1483_s11 + $0x38] sm:$0xf] %vm912_vm2, %v1106_v19  ;;  %v1104_v38 = vpack.c.bf16 %v764_v32, %v764_v32  ;;  %v733_v47 = vadd.f32 %v1151_v17, %v637_v26  ;;  %v1670_v48 = vunpack.c.h.bf16 %v1453_v56 }
  0xfa   : > { %v751_v52 = vadd.f32 %v1669_v27, %v655_v40  ;;  %943 = vst.msk [vmem:[%s1483_s11 + $0x78] sm:$0xf] %vm912_vm2, %v1122_v3  ;;  %v1120_v33 = vpack.c.bf16 %v780_v41, %v780_v41 }
  0xfb   : > { %v767_v20 = vmax.f32 %v735_v51, 0.0  ;;  %v749_v8 = vadd.f32 %v1670_v48, %v653_v7  ;;  %925 = vst.msk [vmem:[%s1483_s11 + $0x30] sm:$0xf] %vm912_vm2, %v1104_v38  ;;  %v765_v42 = vmax.f32 %v733_v47, 0.0 }
  0xfc   : > { %v783_v4 = vmax.f32 %v751_v52, 0.0  ;;  %941 = vst.msk [vmem:[%s1483_s11 + $0x70] sm:$0xf] %vm912_vm2, %v1120_v33 }
  0xfd   : > { %v1107_v50 = vpack.c.bf16 %v767_v20, %v767_v20  ;;  %v781_v63 = vmax.f32 %v749_v8, 0.0  ;;  %v1105_v55 = vpack.c.bf16 %v765_v42, %v765_v42 }
  0xfe   : > { %v1123_v53 = vpack.c.bf16 %v783_v4, %v783_v4 }
  0xff   : > { %928 = vst.msk [vmem:[%s1483_s11 + $0x3c] sm:$0xf] %vm912_vm2, %v1107_v50  ;;  %v1121_v17 = vpack.c.bf16 %v781_v63, %v781_v63  ;;  %926 = vst.msk [vmem:[%s1483_s11 + $0x34] sm:$0xf] %vm912_vm2, %v1105_v55 }
 0x100   : > { %944 = vst.msk [vmem:[%s1483_s11 + $0x7c] sm:$0xf] %vm912_vm2, %v1123_v53 }
 0x101   : > { %942 = vst.msk [vmem:[%s1483_s11 + $0x74] sm:$0xf] %vm912_vm2, %v1121_v17 }
 0x102 PF: > { %s15_s18 = sadd.s32 1, %s1288_s18  }
 0x103   : > { %p12_p4 = scmp.ge.s32.totalorder %s15_s18, 4  }
 0x105   :  { %14 = sbr.rel (!%p12_p4) target bundleno = 1 (0x1), region = 73 }

// kernel: _lambda_.27
= control target key start
LH: loop header
LB: loop body
LE: loop exit
PB: predicated region body
PF: predicated region fallthrough
CT: control target
= control target key end

     0   :  { %s1080_s15 = smov 0   ;;  %s1281_s0 = inlined_call_operand.vmem [shape: bf16[512,16], index: 0, kind: input, shape index: {}]   ;;  %s1282_s1 = inlined_call_operand.vmem [shape: bf16[16,16], index: 1, kind: input, shape index: {}]   ;;  %s1283_s2 = inlined_call_operand.vmem [shape: f32[1,16], index: 2, kind: input, shape index: {}]   ;;  %s1284_s3 = inlined_call_operand.vmem [shape: f32[1,16], index: 3, kind: input, shape index: {}]   ;;  %s1285_s4 = inlined_call_operand.vmem [shape: bf16[512,16], index: 4, kind: output, shape index: {}]  }
   0x1 LB: > { %s859_s16 = sadd.s32 4294967295, %s1053_s15   ;;  %p863_p0 = scmp.ge.s32.totalorder %s1053_s15, 1  ;;  %s1053_s15 = sphi %s1080_s15, %s14_s15  }
   0x2   : > { %p163_p1 = scmp.lt.s32.totalorder %s1053_s15, 3 }
   0x4   : > { %p164_p2 = pnand %p863_p0, %p163_p1 }
   0x5   : > { %s864_s19 = sshll.u32 (!%p164_p2), %s859_s16, 5 }
   0x6   : > { %167 = sbr.rel (%p164_p2) target bundleno = 249 (0xf9), region = 36  ;;  %p190_p3 = scmp.lt.s32.totalorder (!%p164_p2), %s864_s19, 63 }
   0xb   : > { %v1030_v0 = vld [vmem:[%s1282_s1] sm:$0xff]   ;;  %s1287_s19 = smov (!%p190_p3, %s864_s19), 63  ;;  %vm322_vm0 = vcmask 130048   ;;  %vm770_vm1 = vcmask 125952  }
   0xc   : > { %986 = vmatprep.subr.bf16.mxu0 %v1030_v0  ;;  %1020 = vmatprep.subr.bf16.mxu1 %v1030_v0  ;;  %s865_s20 = sshll.u32 %s1287_s19, 2  ;;  %v1136_v17 = vld [vmem:[%s1283_s2] ss:$0 sm:$0xff] }
   0xd   : > { %987 = vmatpush3.bf16.msra.mxu0 %v1030_v0  ;;  %1021 = vmatpush3.bf16.msra.mxu1 %v1030_v0  ;;  %s1099_s23 = scalar_lea.vmem %s1281_s0, %s865_s20  ;;  %v1141_v19 = vld [vmem:[%s1284_s3] ss:$0 sm:$0xff]  ;;  %s1156_s30 = scalar_lea.vmem %s1285_s4, %s865_s20 }
   0xe   : > { %v1031_v1 = vld [vmem:[%s1099_s23] sm:$0xff]   ;;  %v1033_v3 = vld [vmem:[%s1099_s23 + $0x8] sm:$0xff]   ;;  %v1035_v5 = vld [vmem:[%s1099_s23 + $0x10] sm:$0xff]  }
   0xf   : > { %v1032_v2 = vld [vmem:[%s1099_s23 + $0x40] sm:$0xff]   ;;  %988 = vmatprep.mubr.msk.bf16.mxu0 %vm322_vm0, %v1031_v1  ;;  %v1034_v4 = vld [vmem:[%s1099_s23 + $0x48] sm:$0xff]   ;;  %v1036_v6 = vld [vmem:[%s1099_s23 + $0x50] sm:$0xff]  }
  0x10   : > { %1004 = vmatprep.mubr.msk.bf16.mxu1 %vm322_vm0, %v1032_v2  ;;  %989 = vmatmul.mubr.msk.bf16.vlgmr.msra.gmra.mxu0 %vm322_vm0, %v1033_v3  ;;  %v1037_v7 = vld [vmem:[%s1099_s23 + $0x18] sm:$0xff]   ;;  %v1039_v9 = vld [vmem:[%s1099_s23 + $0x20] sm:$0xff]   ;;  %v1041_v11 = vld [vmem:[%s1099_s23 + $0x28] sm:$0xff]  }
  0x11   : > { %1005 = vmatmul.mubr.msk.bf16.vlgmr.msra.gmra.mxu1 %vm322_vm0, %v1034_v4  ;;  %992 = vmatprep.mubr.msk.bf16.mxu0 %vm322_vm0, %v1035_v5  ;;  %v1038_v8 = vld [vmem:[%s1099_s23 + $0x58] sm:$0xff]   ;;  %v1040_v10 = vld [vmem:[%s1099_s23 + $0x60] sm:$0xff]   ;;  %v1042_v12 = vld [vmem:[%s1099_s23 + $0x68] sm:$0xff]  }
  0x12   : > { %1008 = vmatprep.mubr.msk.bf16.mxu1 %vm322_vm0, %v1036_v6  ;;  %v1043_v13 = vld [vmem:[%s1099_s23 + $0x30] sm:$0xff]   ;;  %v1045_v15 = vld [vmem:[%s1099_s23 + $0x38] sm:$0xff]  }
  0x13   : > { %v1044_v14 = vld [vmem:[%s1099_s23 + $0x70] sm:$0xff]   ;;  %v1046_v16 = vld [vmem:[%s1099_s23 + $0x78] sm:$0xff]  }
  0x18   : > { %993 = vmatmul.mubr.msk.bf16.gmra.mxu0 %vm322_vm0, %v1037_v7 }
  0x19   : > { %1009 = vmatmul.mubr.msk.bf16.gmra.mxu1 %vm322_vm0, %v1038_v8  ;;  %996 = vmatprep.mubr.msk.bf16.mxu0 %vm322_vm0, %v1039_v9 }
  0x1a   : > { %1012 = vmatprep.mubr.msk.bf16.mxu1 %vm322_vm0, %v1040_v10 }
  0x20   : > { %997 = vmatmul.mubr.msk.bf16.gmra.mxu0 %vm322_vm0, %v1041_v11 }
  0x21   : > { %1013 = vmatmul.mubr.msk.bf16.gmra.mxu1 %vm322_vm0, %v1042_v12  ;;  %1000 = vmatprep.mubr.msk.bf16.mxu0 %vm322_vm0, %v1043_v13 }
  0x22   : > { %1016 = vmatprep.mubr.msk.bf16.mxu1 %vm322_vm0, %v1044_v14 }
  0x28   : > { %1001 = vmatmul.mubr.msk.bf16.gmra.mxu0 %vm322_vm0, %v1045_v15 }
  0x29   : > { %1017 = vmatmul.mubr.msk.bf16.gmra.mxu1 %vm322_vm0, %v1046_v16 }
  0xd0   : > { %v990_v18 = vpop.f32.mrf.mxu0 }
  0xd1   : > { %v541_v20 = vmul.f32 %v990_v18, %v1136_v17  ;;  %v1006_v21 = vpop.f32.mrf.mxu1 }
  0xd2   : > { %v557_v22 = vmul.f32 %v1006_v21, %v1136_v17  ;;  %v405_v23 = vpop.f32.mrf.mxu0 }
  0xd3   : > { %v580_v24 = vadd.f32 %v1141_v19, %v541_v20  ;;  %v539_v25 = vmul.f32 %v1136_v17, %v405_v23  ;;  %v469_v26 = vpop.f32.mrf.mxu1 }
  0xd4   : > { %v596_v27 = vadd.f32 %v1141_v19, %v557_v22  ;;  %v555_v28 = vmul.f32 %v1136_v17, %v469_v26  ;;  %v991_v29 = vpop.f32.mrf.mxu0 }
  0xd5   : > { %v612_v30 = vmax.f32 %v580_v24, 0.0  ;;  %v578_v31 = vadd.f32 %v1141_v19, %v539_v25  ;;  %v542_v32 = vmul.f32 %v991_v29, %v1136_v17  ;;  %v1007_v33 = vpop.f32.mrf.mxu1 }
  0xd6   : > { %v628_v34 = vmax.f32 %v596_v27, 0.0  ;;  %v594_v35 = vadd.f32 %v1141_v19, %v555_v28  ;;  %v558_v36 = vmul.f32 %v1007_v33, %v1136_v17  ;;  %v408_v37 = vpop.f32.mrf.mxu0 }
  0xd7   : > { %v939_v38 = vpack.c.bf16 %v612_v30, %v612_v30  ;;  %v610_v39 = vmax.f32 %v578_v31, 0.0  ;;  %v581_v40 = vadd.f32 %v1141_v19, %v542_v32  ;;  %v540_v41 = vmul.f32 %v1136_v17, %v408_v37  ;;  %v472_v42 = vpop.f32.mrf.mxu1 }
  0xd8   : > { %v955_v43 = vpack.c.bf16 %v628_v34, %v628_v34  ;;  %v626_v44 = vmax.f32 %v594_v35, 0.0  ;;  %v597_v45 = vadd.f32 %v1141_v19, %v558_v36  ;;  %v556_v46 = vmul.f32 %v1136_v17, %v472_v42  ;;  %v994_v47 = vpop.f32.mrf.mxu0 }
  0xd9   : > { %773 = vst.msk [vmem:[%s1156_s30 + $0x8] sm:$0xf] %vm770_vm1, %v939_v38  ;;  %v937_v48 = vpack.c.bf16 %v610_v39, %v610_v39  ;;  %v613_v49 = vmax.f32 %v581_v40, 0.0  ;;  %v579_v50 = vadd.f32 %v1141_v19, %v540_v41  ;;  %v545_v51 = vmul.f32 %v994_v47, %v1136_v17  ;;  %v1010_v52 = vpop.f32.mrf.mxu1 }
  0xda   : > { %789 = vst.msk [vmem:[%s1156_s30 + $0x48] sm:$0xf] %vm770_vm1, %v955_v43  ;;  %v953_v53 = vpack.c.bf16 %v626_v44, %v626_v44  ;;  %v629_v54 = vmax.f32 %v597_v45, 0.0  ;;  %v595_v55 = vadd.f32 %v1141_v19, %v556_v46  ;;  %v561_v56 = vmul.f32 %v1010_v52, %v1136_v17  ;;  %v421_v57 = vpop.f32.mrf.mxu0 }
  0xdb   : > { %771 = vst.msk [vmem:[%s1156_s30] sm:$0xf] %vm770_vm1, %v937_v48  ;;  %v940_v58 = vpack.c.bf16 %v613_v49, %v613_v49  ;;  %v611_v59 = vmax.f32 %v579_v50, 0.0  ;;  %v584_v60 = vadd.f32 %v1141_v19, %v545_v51  ;;  %v543_v61 = vmul.f32 %v1136_v17, %v421_v57  ;;  %v485_v62 = vpop.f32.mrf.mxu1 }
  0xdc   : > { %787 = vst.msk [vmem:[%s1156_s30 + $0x40] sm:$0xf] %vm770_vm1, %v953_v53  ;;  %v956_v63 = vpack.c.bf16 %v629_v54, %v629_v54  ;;  %v627_v0 = vmax.f32 %v595_v55, 0.0  ;;  %v600_v1 = vadd.f32 %v1141_v19, %v561_v56  ;;  %v559_v2 = vmul.f32 %v1136_v17, %v485_v62  ;;  %v995_v3 = vpop.f32.mrf.mxu0 }
  0xdd   : > { %774 = vst.msk [vmem:[%s1156_s30 + $0xc] sm:$0xf] %vm770_vm1, %v940_v58  ;;  %v938_v4 = vpack.c.bf16 %v611_v59, %v611_v59  ;;  %v616_v5 = vmax.f32 %v584_v60, 0.0  ;;  %v582_v6 = vadd.f32 %v1141_v19, %v543_v61  ;;  %v546_v7 = vmul.f32 %v995_v3, %v1136_v17  ;;  %v1011_v8 = vpop.f32.mrf.mxu1 }
  0xde   : > { %790 = vst.msk [vmem:[%s1156_s30 + $0x4c] sm:$0xf] %vm770_vm1, %v956_v63  ;;  %v954_v9 = vpack.c.bf16 %v627_v0, %v627_v0  ;;  %v632_v10 = vmax.f32 %v600_v1, 0.0  ;;  %v598_v11 = vadd.f32 %v1141_v19, %v559_v2  ;;  %v562_v12 = vmul.f32 %v1011_v8, %v1136_v17  ;;  %v424_v13 = vpop.f32.mrf.mxu0 }
  0xdf   : > { %772 = vst.msk [vmem:[%s1156_s30 + $0x4] sm:$0xf] %vm770_vm1, %v938_v4  ;;  %v943_v14 = vpack.c.bf16 %v616_v5, %v616_v5  ;;  %v614_v15 = vmax.f32 %v582_v6, 0.0  ;;  %v585_v16 = vadd.f32 %v1141_v19, %v546_v7  ;;  %v544_v18 = vmul.f32 %v1136_v17, %v424_v13  ;;  %v488_v20 = vpop.f32.mrf.mxu1 }
  0xe0   : > { %788 = vst.msk [vmem:[%s1156_s30 + $0x44] sm:$0xf] %vm770_vm1, %v954_v9  ;;  %v959_v21 = vpack.c.bf16 %v632_v10, %v632_v10  ;;  %v630_v22 = vmax.f32 %v598_v11, 0.0  ;;  %v601_v23 = vadd.f32 %v1141_v19, %v562_v12  ;;  %v560_v24 = vmul.f32 %v1136_v17, %v488_v20  ;;  %v998_v25 = vpop.f32.mrf.mxu0 }
  0xe1   : > { %777 = vst.msk [vmem:[%s1156_s30 + $0x18] sm:$0xf] %vm770_vm1, %v943_v14  ;;  %v941_v26 = vpack.c.bf16 %v614_v15, %v614_v15  ;;  %v617_v27 = vmax.f32 %v585_v16, 0.0  ;;  %v583_v28 = vadd.f32 %v1141_v19, %v544_v18  ;;  %v549_v29 = vmul.f32 %v998_v25, %v1136_v17  ;;  %v1014_v30 = vpop.f32.mrf.mxu1 }
  0xe2   : > { %793 = vst.msk [vmem:[%s1156_s30 + $0x58] sm:$0xf] %vm770_vm1, %v959_v21  ;;  %v957_v31 = vpack.c.bf16 %v630_v22, %v630_v22  ;;  %v633_v32 = vmax.f32 %v601_v23, 0.0  ;;  %v599_v33 = vadd.f32 %v1141_v19, %v560_v24  ;;  %v565_v34 = vmul.f32 %v1014_v30, %v1136_v17  ;;  %v437_v35 = vpop.f32.mrf.mxu0 }
  0xe3   : > { %775 = vst.msk [vmem:[%s1156_s30 + $0x10] sm:$0xf] %vm770_vm1, %v941_v26  ;;  %v944_v36 = vpack.c.bf16 %v617_v27, %v617_v27  ;;  %v615_v37 = vmax.f32 %v583_v28, 0.0  ;;  %v588_v38 = vadd.f32 %v1141_v19, %v549_v29  ;;  %v547_v39 = vmul.f32 %v1136_v17, %v437_v35  ;;  %v501_v40 = vpop.f32.mrf.mxu1 }
  0xe4   : > { %791 = vst.msk [vmem:[%s1156_s30 + $0x50] sm:$0xf] %vm770_vm1, %v957_v31  ;;  %v960_v41 = vpack.c.bf16 %v633_v32, %v633_v32  ;;  %v631_v42 = vmax.f32 %v599_v33, 0.0  ;;  %v604_v43 = vadd.f32 %v1141_v19, %v565_v34  ;;  %v563_v44 = vmul.f32 %v1136_v17, %v501_v40  ;;  %v999_v45 = vpop.f32.mrf.mxu0 }
  0xe5   : > { %778 = vst.msk [vmem:[%s1156_s30 + $0x1c] sm:$0xf] %vm770_vm1, %v944_v36  ;;  %v942_v46 = vpack.c.bf16 %v615_v37, %v615_v37  ;;  %v620_v47 = vmax.f32 %v588_v38, 0.0  ;;  %v586_v48 = vadd.f32 %v1141_v19, %v547_v39  ;;  %v550_v49 = vmul.f32 %v999_v45, %v1136_v17  ;;  %v1015_v50 = vpop.f32.mrf.mxu1 }
  0xe6   : > { %794 = vst.msk [vmem:[%s1156_s30 + $0x5c] sm:$0xf] %vm770_vm1, %v960_v41  ;;  %v958_v51 = vpack.c.bf16 %v631_v42, %v631_v42  ;;  %v636_v52 = vmax.f32 %v604_v43, 0.0  ;;  %v602_v53 = vadd.f32 %v1141_v19, %v563_v44  ;;  %v566_v54 = vmul.f32 %v1015_v50, %v1136_v17  ;;  %v440_v55 = vpop.f32.mrf.mxu0 }
  0xe7   : > { %776 = vst.msk [vmem:[%s1156_s30 + $0x14] sm:$0xf] %vm770_vm1, %v942_v46  ;;  %v947_v56 = vpack.c.bf16 %v620_v47, %v620_v47  ;;  %v618_v57 = vmax.f32 %v586_v48, 0.0  ;;  %v589_v58 = vadd.f32 %v1141_v19, %v550_v49  ;;  %v548_v59 = vmul.f32 %v1136_v17, %v440_v55  ;;  %v504_v60 = vpop.f32.mrf.mxu1 }
  0xe8   : > { %792 = vst.msk [vmem:[%s1156_s30 + $0x54] sm:$0xf] %vm770_vm1, %v958_v51  ;;  %v963_v61 = vpack.c.bf16 %v636_v52, %v636_v52  ;;  %v634_v62 = vmax.f32 %v602_v53, 0.0  ;;  %v605_v63 = vadd.f32 %v1141_v19, %v566_v54  ;;  %v564_v0 = vmul.f32 %v1136_v17, %v504_v60  ;;  %v1002_v1 = vpop.f32.mrf.mxu0 }
  0xe9   : > { %781 = vst.msk [vmem:[%s1156_s30 + $0x28] sm:$0xf] %vm770_vm1, %v947_v56  ;;  %v945_v2 = vpack.c.bf16 %v618_v57, %v618_v57  ;;  %v621_v3 = vmax.f32 %v589_v58, 0.0  ;;  %v587_v4 = vadd.f32 %v1141_v19, %v548_v59  ;;  %v553_v5 = vmul.f32 %v1002_v1, %v1136_v17  ;;  %v1018_v6 = vpop.f32.mrf.mxu1 }
  0xea   : > { %797 = vst.msk [vmem:[%s1156_s30 + $0x68] sm:$0xf] %vm770_vm1, %v963_v61  ;;  %v961_v7 = vpack.c.bf16 %v634_v62, %v634_v62  ;;  %v637_v8 = vmax.f32 %v605_v63, 0.0  ;;  %v603_v9 = vadd.f32 %v1141_v19, %v564_v0  ;;  %v569_v10 = vmul.f32 %v1018_v6, %v1136_v17  ;;  %v453_v11 = vpop.f32.mrf.mxu0 }
  0xeb   : > { %779 = vst.msk [vmem:[%s1156_s30 + $0x20] sm:$0xf] %vm770_vm1, %v945_v2  ;;  %v948_v12 = vpack.c.bf16 %v621_v3, %v621_v3  ;;  %v619_v13 = vmax.f32 %v587_v4, 0.0  ;;  %v592_v14 = vadd.f32 %v1141_v19, %v553_v5  ;;  %v551_v15 = vmul.f32 %v1136_v17, %v453_v11  ;;  %v517_v16 = vpop.f32.mrf.mxu1 }
  0xec   : > { %795 = vst.msk [vmem:[%s1156_s30 + $0x60] sm:$0xf] %vm770_vm1, %v961_v7  ;;  %v964_v18 = vpack.c.bf16 %v637_v8, %v637_v8  ;;  %v635_v20 = vmax.f32 %v603_v9, 0.0  ;;  %v608_v21 = vadd.f32 %v1141_v19, %v569_v10  ;;  %v567_v22 = vmul.f32 %v1136_v17, %v517_v16  ;;  %v1003_v23 = vpop.f32.mrf.mxu0 }
  0xed   : > { %782 = vst.msk [vmem:[%s1156_s30 + $0x2c] sm:$0xf] %vm770_vm1, %v948_v12  ;;  %v946_v24 = vpack.c.bf16 %v619_v13, %v619_v13  ;;  %v624_v25 = vmax.f32 %v592_v14, 0.0  ;;  %v590_v26 = vadd.f32 %v1141_v19, %v551_v15  ;;  %v554_v27 = vmul.f32 %v1003_v23, %v1136_v17  ;;  %v1019_v28 = vpop.f32.mrf.mxu1 }
  0xee   : > { %798 = vst.msk [vmem:[%s1156_s30 + $0x6c] sm:$0xf] %vm770_vm1, %v964_v18  ;;  %v962_v29 = vpack.c.bf16 %v635_v20, %v635_v20  ;;  %v640_v30 = vmax.f32 %v608_v21, 0.0  ;;  %v606_v31 = vadd.f32 %v1141_v19, %v567_v22  ;;  %v570_v32 = vmul.f32 %v1019_v28, %v1136_v17  ;;  %v456_v33 = vpop.f32.mrf.mxu0 }
  0xef   : > { %780 = vst.msk [vmem:[%s1156_s30 + $0x24] sm:$0xf] %vm770_vm1, %v946_v24  ;;  %v951_v34 = vpack.c.bf16 %v624_v25, %v624_v25  ;;  %v622_v35 = vmax.f32 %v590_v26, 0.0  ;;  %v593_v36 = vadd.f32 %v1141_v19, %v554_v27  ;;  %v552_v37 = vmul.f32 %v1136_v17, %v456_v33  ;;  %v520_v38 = vpop.f32.mrf.mxu1 }
  0xf0   : > { %796 = vst.msk [vmem:[%s1156_s30 + $0x64] sm:$0xf] %vm770_vm1, %v962_v29  ;;  %v967_v39 = vpack.c.bf16 %v640_v30, %v640_v30  ;;  %v638_v40 = vmax.f32 %v606_v31, 0.0  ;;  %v609_v41 = vadd.f32 %v1141_v19, %v570_v32  ;;  %v568_v42 = vmul.f32 %v1136_v17, %v520_v38 }
  0xf1   : > { %785 = vst.msk [vmem:[%s1156_s30 + $0x38] sm:$0xf] %vm770_vm1, %v951_v34  ;;  %v949_v43 = vpack.c.bf16 %v622_v35, %v622_v35  ;;  %v625_v44 = vmax.f32 %v593_v36, 0.0  ;;  %v591_v45 = vadd.f32 %v1141_v19, %v552_v37 }
  0xf2   : > { %801 = vst.msk [vmem:[%s1156_s30 + $0x78] sm:$0xf] %vm770_vm1, %v967_v39  ;;  %v965_v46 = vpack.c.bf16 %v638_v40, %v638_v40  ;;  %v641_v47 = vmax.f32 %v609_v41, 0.0  ;;  %v607_v48 = vadd.f32 %v1141_v19, %v568_v42 }
  0xf3   : > { %783 = vst.msk [vmem:[%s1156_s30 + $0x30] sm:$0xf] %vm770_vm1, %v949_v43  ;;  %v952_v49 = vpack.c.bf16 %v625_v44, %v625_v44  ;;  %v623_v50 = vmax.f32 %v591_v45, 0.0 }
  0xf4   : > { %799 = vst.msk [vmem:[%s1156_s30 + $0x70] sm:$0xf] %vm770_vm1, %v965_v46  ;;  %v968_v17 = vpack.c.bf16 %v641_v47, %v641_v47  ;;  %v639_v51 = vmax.f32 %v607_v48, 0.0 }
  0xf5   : > { %786 = vst.msk [vmem:[%s1156_s30 + $0x3c] sm:$0xf] %vm770_vm1, %v952_v49  ;;  %v950_v52 = vpack.c.bf16 %v623_v50, %v623_v50 }
  0xf6   : > { %802 = vst.msk [vmem:[%s1156_s30 + $0x7c] sm:$0xf] %vm770_vm1, %v968_v17  ;;  %v966_v53 = vpack.c.bf16 %v639_v51, %v639_v51 }
  0xf7   : > { %784 = vst.msk [vmem:[%s1156_s30 + $0x34] sm:$0xf] %vm770_vm1, %v950_v52 }
  0xf8   : > { %800 = vst.msk [vmem:[%s1156_s30 + $0x74] sm:$0xf] %vm770_vm1, %v966_v53 }
  0xf9 PF: > { %s14_s15 = sadd.s32 1, %s1053_s15  }
  0xfa   : > { %p11_p4 = scmp.ge.s32.totalorder %s14_s15, 4  }
  0xfc   :  { %13 = sbr.rel (!%p11_p4) target bundleno = 1 (0x1), region = 66 }

// kernel: _lambda_.28
= control target key start
LH: loop header
LB: loop body
LE: loop exit
PB: predicated region body
PF: predicated region fallthrough
CT: control target
= control target key end

     0   :  { %v566_v0 = vmov 0   ;;  %vm178_vm0 = vcmask 130048   ;;  %vm426_vm1 = vcmask 125952   ;;  %s781_s1 = inlined_call_operand.vmem [shape: bf16[144,16], index: 1, kind: input, shape index: {}]   ;;  %s782_s0 = inlined_call_operand.vmem [shape: bf16[128,144], index: 0, kind: input, shape index: {}]   ;;  %s783_s2 = inlined_call_operand.vmem [shape: f32[1,16], index: 2, kind: input, shape index: {}]   ;;  %s784_s3 = inlined_call_operand.vmem [shape: f32[1,16], index: 3, kind: input, shape index: {}]   ;;  %s785_s4 = inlined_call_operand.vmem [shape: bf16[128,16], index: 4, kind: output, shape index: {}]  }
   0x1   :  { %203 = vmatprep.subr.bf16.mxu0 %v566_v0  ;;  %514 = vmatprep.subr.bf16.mxu1 %v566_v0  ;;  %v533_v1 = vld [vmem:[%s781_s1 + $0x38] sm:$0xff]   ;;  %v534_v2 = vld [vmem:[%s781_s1 + $0x30] sm:$0xff]   ;;  %v535_v3 = vld [vmem:[%s781_s1 + $0x28] sm:$0xff]  }
   0x2   :  { %204 = vmatpush1.bf16.msra.mxu0 %v533_v1  ;;  %523 = vmatpush1.bf16.msra.mxu1 %v533_v1  ;;  %v536_v4 = vld [vmem:[%s781_s1 + $0x20] sm:$0xff]   ;;  %v537_v7 = vld [vmem:[%s781_s1 + $0x18] sm:$0xff]   ;;  %v538_v8 = vld [vmem:[%s781_s1 + $0x10] sm:$0xff]  }
   0x3   :  { %205 = vmatprep.subr.bf16.mxu0 %v566_v0  ;;  %515 = vmatprep.subr.bf16.mxu1 %v566_v0  ;;  %v544_v5 = vld [vmem:[%s782_s0 + $0x4] ss:$8 sps:$4 sm:$0xff]   ;;  %v542_v12 = vld [vmem:[%s782_s0] ss:$8 sps:$4 sm:$0xff]   ;;  %v548_v14 = vld [vmem:[%s782_s0 + $0x14] ss:$8 sps:$4 sm:$0xff]  }
   0x4   :  { %v547_v6 = vld [vmem:[%s782_s0 + $0x44] ss:$8 sps:$4 sm:$0xff]   ;;  %472 = vmatprep.mubr.msk.bf16.mxu0 %vm178_vm0, %v544_v5  ;;  %v545_v13 = vld [vmem:[%s782_s0 + $0x40] ss:$8 sps:$4 sm:$0xff]   ;;  %v550_v15 = vld [vmem:[%s782_s0 + $0x54] ss:$8 sps:$4 sm:$0xff]  }
   0x5   :  { %476 = vmatprep.mubr.msk.bf16.mxu1 %vm178_vm0, %v547_v6  ;;  %v539_v9 = vld [vmem:[%s781_s1 + $0x8] sm:$0xff]   ;;  %v540_v10 = vld [vmem:[%s781_s1] sm:$0xff]   ;;  %v552_v16 = vld [vmem:[%s782_s0 + $0x10] ss:$8 sps:$4 sm:$0xff]  }
   0x6   :  { %206 = vmatpush1.bf16.msra.mxu0 %v534_v2  ;;  %524 = vmatpush1.bf16.msra.mxu1 %v534_v2  ;;  %v541_v11 = vld [vmem:[%s781_s1 + $0x40] sm:$0xff]   ;;  %v553_v17 = vld [vmem:[%s782_s0 + $0x50] ss:$8 sps:$4 sm:$0xff]   ;;  %v560_v22 = vld [vmem:[%s782_s0 + $0x34] ss:$8 sps:$4 sm:$0xff]  }
   0x7   :  { %207 = vmatprep.subr.bf16.mxu0 %v566_v0  ;;  %516 = vmatprep.subr.bf16.mxu1 %v566_v0  ;;  %v554_v18 = vld [vmem:[%s782_s0 + $0x24] ss:$8 sps:$4 sm:$0xff]   ;;  %v558_v20 = vld [vmem:[%s782_s0 + $0x20] ss:$8 sps:$4 sm:$0xff]   ;;  %v562_v23 = vld [vmem:[%s782_s0 + $0x74] ss:$8 sps:$4 sm:$0xff]  }
   0x8   :  { %v556_v19 = vld [vmem:[%s782_s0 + $0x64] ss:$8 sps:$4 sm:$0xff]   ;;  %v559_v21 = vld [vmem:[%s782_s0 + $0x60] ss:$8 sps:$4 sm:$0xff]   ;;  %v564_v24 = vld [vmem:[%s782_s0 + $0x30] ss:$8 sps:$4 sm:$0xff]  }
   0x9   :  { %v565_v25 = vld [vmem:[%s782_s0 + $0x70] ss:$8 sps:$4 sm:$0xff]   ;;  %v678_v26 = vld [vmem:[%s783_s2] ss:$0 sm:$0xff] }
   0xa   :  { %208 = vmatpush1.bf16.msra.mxu0 %v535_v3  ;;  %525 = vmatpush1.bf16.msra.mxu1 %v535_v3  ;;  %v683_v28 = vld [vmem:[%s784_s3] ss:$0 sm:$0xff] }
   0xb   :  { %209 = vmatprep.subr.bf16.mxu0 %v566_v0  ;;  %517 = vmatprep.subr.bf16.mxu1 %v566_v0 }
   0xe   :  { %210 = vmatpush1.bf16.msra.mxu0 %v536_v4  ;;  %526 = vmatpush1.bf16.msra.mxu1 %v536_v4 }
   0xf   :  { %211 = vmatprep.subr.bf16.mxu0 %v566_v0  ;;  %518 = vmatprep.subr.bf16.mxu1 %v566_v0 }
  0x12   :  { %212 = vmatpush1.bf16.msra.mxu0 %v537_v7  ;;  %527 = vmatpush1.bf16.msra.mxu1 %v537_v7 }
  0x13   :  { %213 = vmatprep.subr.bf16.mxu0 %v566_v0  ;;  %519 = vmatprep.subr.bf16.mxu1 %v566_v0 }
  0x16   :  { %214 = vmatpush1.bf16.msra.mxu0 %v538_v8  ;;  %528 = vmatpush1.bf16.msra.mxu1 %v538_v8 }
  0x17   :  { %215 = vmatprep.subr.bf16.mxu0 %v566_v0  ;;  %520 = vmatprep.subr.bf16.mxu1 %v566_v0 }
  0x1a   :  { %216 = vmatpush1.bf16.msra.mxu0 %v539_v9  ;;  %529 = vmatpush1.bf16.msra.mxu1 %v539_v9 }
  0x1b   :  { %217 = vmatprep.subr.bf16.mxu0 %v566_v0  ;;  %521 = vmatprep.subr.bf16.mxu1 %v566_v0 }
  0x1e   :  { %218 = vmatpush1.bf16.msra.mxu0 %v540_v10  ;;  %530 = vmatpush1.bf16.msra.mxu1 %v540_v10 }
  0x1f   :  { %233 = vmatprep.subr.bf16.mxu0 %v566_v0  ;;  %522 = vmatprep.subr.bf16.mxu1 %v566_v0 }
  0x22   :  { %234 = vmatpush2.bf16.msra.mxu0 %v541_v11  ;;  %531 = vmatpush2.bf16.msra.mxu1 %v541_v11 }
  0x25   :  { %236 = vmatmul.mubr.bf16.vlgmr.msra.gmra.mxu0 %v542_v12  ;;  %268 = vmatmul.mubr.bf16.vlgmr.msra.gmra.mxu1 %v545_v13 }
  0x26   :  { %473 = vmatprep.mubr.msk.bf16.mxu0 %vm178_vm0, %v548_v14  ;;  %477 = vmatprep.mubr.msk.bf16.mxu1 %vm178_vm0, %v550_v15 }
  0x2d   :  { %244 = vmatmul.mubr.bf16.gmra.mxu0 %v552_v16  ;;  %276 = vmatmul.mubr.bf16.gmra.mxu1 %v553_v17 }
  0x2e   :  { %474 = vmatprep.mubr.msk.bf16.mxu0 %vm178_vm0, %v554_v18  ;;  %478 = vmatprep.mubr.msk.bf16.mxu1 %vm178_vm0, %v556_v19 }
  0x35   :  { %252 = vmatmul.mubr.bf16.gmra.mxu0 %v558_v20  ;;  %284 = vmatmul.mubr.bf16.gmra.mxu1 %v559_v21 }
  0x36   :  { %475 = vmatprep.mubr.msk.bf16.mxu0 %vm178_vm0, %v560_v22  ;;  %479 = vmatprep.mubr.msk.bf16.mxu1 %vm178_vm0, %v562_v23 }
  0x3d   :  { %260 = vmatmul.mubr.bf16.gmra.mxu0 %v564_v24  ;;  %292 = vmatmul.mubr.bf16.gmra.mxu1 %v565_v25 }
  0xe5   :  { %v237_v27 = vpop.f32.mrf.mxu0  ;;  %v269_v29 = vpop.f32.mrf.mxu1 }
  0xe6   :  { %v307_v30 = vmul.f32 %v678_v26, %v237_v27  ;;  %v315_v31 = vmul.f32 %v678_v26, %v269_v29 }
  0xe7   :  { %v239_v32 = vpop.f32.mrf.mxu0  ;;  %v271_v33 = vpop.f32.mrf.mxu1 }
  0xe8   :  { %v330_v34 = vadd.f32 %v683_v28, %v307_v30  ;;  %v338_v35 = vadd.f32 %v683_v28, %v315_v31 }
  0xe9   :  { %v240_v36 = vpop.f32.mrf.mxu0  ;;  %v272_v37 = vpop.f32.mrf.mxu1 }
  0xea   :  { %v346_v38 = vmax.f32 %v330_v34, 0.0  ;;  %v354_v39 = vmax.f32 %v338_v35, 0.0  ;;  %v308_v40 = vmul.f32 %v678_v26, %v240_v36  ;;  %v316_v41 = vmul.f32 %v678_v26, %v272_v37 }
  0xeb   :  { %v242_v42 = vpop.f32.mrf.mxu0  ;;  %v274_v43 = vpop.f32.mrf.mxu1 }
  0xec   :  { %v498_v44 = vpack.c.bf16 %v346_v38, %v346_v38  ;;  %v506_v45 = vpack.c.bf16 %v354_v39, %v354_v39  ;;  %v331_v46 = vadd.f32 %v683_v28, %v308_v40  ;;  %v339_v47 = vadd.f32 %v683_v28, %v316_v41 }
  0xed   :  { %v245_v48 = vpop.f32.mrf.mxu0  ;;  %v277_v49 = vpop.f32.mrf.mxu1 }
  0xee   :  { %427 = vst.msk [vmem:[%s785_s4] sm:$0xf] %vm426_vm1, %v498_v44  ;;  %435 = vst.msk [vmem:[%s785_s4 + $0x20] sm:$0xf] %vm426_vm1, %v506_v45  ;;  %v347_v50 = vmax.f32 %v331_v46, 0.0  ;;  %v355_v51 = vmax.f32 %v339_v47, 0.0  ;;  %v309_v52 = vmul.f32 %v678_v26, %v245_v48  ;;  %v317_v53 = vmul.f32 %v678_v26, %v277_v49 }
  0xef   :  { %v247_v54 = vpop.f32.mrf.mxu0  ;;  %v279_v55 = vpop.f32.mrf.mxu1 }
  0xf0   :  { %v499_v56 = vpack.c.bf16 %v347_v50, %v347_v50  ;;  %v507_v57 = vpack.c.bf16 %v355_v51, %v355_v51  ;;  %v332_v58 = vadd.f32 %v683_v28, %v309_v52  ;;  %v340_v59 = vadd.f32 %v683_v28, %v317_v53 }
  0xf1   :  { %v248_v60 = vpop.f32.mrf.mxu0  ;;  %v280_v61 = vpop.f32.mrf.mxu1 }
  0xf2   :  { %428 = vst.msk [vmem:[%s785_s4 + $0x4] sm:$0xf] %vm426_vm1, %v499_v56  ;;  %436 = vst.msk [vmem:[%s785_s4 + $0x24] sm:$0xf] %vm426_vm1, %v507_v57  ;;  %v348_v62 = vmax.f32 %v332_v58, 0.0  ;;  %v356_v63 = vmax.f32 %v340_v59, 0.0  ;;  %v310_v0 = vmul.f32 %v678_v26, %v248_v60  ;;  %v318_v1 = vmul.f32 %v678_v26, %v280_v61 }
  0xf3   :  { %v250_v2 = vpop.f32.mrf.mxu0  ;;  %v282_v3 = vpop.f32.mrf.mxu1 }
  0xf4   :  { %v500_v4 = vpack.c.bf16 %v348_v62, %v348_v62  ;;  %v508_v5 = vpack.c.bf16 %v356_v63, %v356_v63  ;;  %v333_v6 = vadd.f32 %v683_v28, %v310_v0  ;;  %v341_v7 = vadd.f32 %v683_v28, %v318_v1 }
  0xf5   :  { %v253_v8 = vpop.f32.mrf.mxu0  ;;  %v285_v9 = vpop.f32.mrf.mxu1 }
  0xf6   :  { %429 = vst.msk [vmem:[%s785_s4 + $0x8] sm:$0xf] %vm426_vm1, %v500_v4  ;;  %437 = vst.msk [vmem:[%s785_s4 + $0x28] sm:$0xf] %vm426_vm1, %v508_v5  ;;  %v349_v10 = vmax.f32 %v333_v6, 0.0  ;;  %v357_v11 = vmax.f32 %v341_v7, 0.0  ;;  %v311_v12 = vmul.f32 %v678_v26, %v253_v8  ;;  %v319_v13 = vmul.f32 %v678_v26, %v285_v9 }
  0xf7   :  { %v255_v14 = vpop.f32.mrf.mxu0  ;;  %v287_v15 = vpop.f32.mrf.mxu1 }
  0xf8   :  { %v501_v16 = vpack.c.bf16 %v349_v10, %v349_v10  ;;  %v509_v17 = vpack.c.bf16 %v357_v11, %v357_v11  ;;  %v334_v18 = vadd.f32 %v683_v28, %v311_v12  ;;  %v342_v19 = vadd.f32 %v683_v28, %v319_v13 }
  0xf9   :  { %v256_v20 = vpop.f32.mrf.mxu0  ;;  %v288_v21 = vpop.f32.mrf.mxu1 }
  0xfa   :  { %430 = vst.msk [vmem:[%s785_s4 + $0xc] sm:$0xf] %vm426_vm1, %v501_v16  ;;  %438 = vst.msk [vmem:[%s785_s4 + $0x2c] sm:$0xf] %vm426_vm1, %v509_v17  ;;  %v350_v22 = vmax.f32 %v334_v18, 0.0  ;;  %v358_v23 = vmax.f32 %v342_v19, 0.0  ;;  %v312_v24 = vmul.f32 %v678_v26, %v256_v20  ;;  %v320_v25 = vmul.f32 %v678_v26, %v288_v21 }
  0xfb   :  { %v258_v27 = vpop.f32.mrf.mxu0  ;;  %v290_v29 = vpop.f32.mrf.mxu1 }
  0xfc   :  { %v502_v30 = vpack.c.bf16 %v350_v22, %v350_v22  ;;  %v510_v31 = vpack.c.bf16 %v358_v23, %v358_v23  ;;  %v335_v32 = vadd.f32 %v683_v28, %v312_v24  ;;  %v343_v33 = vadd.f32 %v683_v28, %v320_v25 }
  0xfd   :  { %v261_v34 = vpop.f32.mrf.mxu0  ;;  %v293_v35 = vpop.f32.mrf.mxu1 }
  0xfe   :  { %431 = vst.msk [vmem:[%s785_s4 + $0x10] sm:$0xf] %vm426_vm1, %v502_v30  ;;  %439 = vst.msk [vmem:[%s785_s4 + $0x30] sm:$0xf] %vm426_vm1, %v510_v31  ;;  %v351_v36 = vmax.f32 %v335_v32, 0.0  ;;  %v359_v37 = vmax.f32 %v343_v33, 0.0  ;;  %v313_v38 = vmul.f32 %v678_v26, %v261_v34  ;;  %v321_v39 = vmul.f32 %v678_v26, %v293_v35 }
  0xff   :  { %v263_v40 = vpop.f32.mrf.mxu0  ;;  %v295_v41 = vpop.f32.mrf.mxu1 }
 0x100   :  { %v503_v42 = vpack.c.bf16 %v351_v36, %v351_v36  ;;  %v511_v43 = vpack.c.bf16 %v359_v37, %v359_v37  ;;  %v336_v44 = vadd.f32 %v683_v28, %v313_v38  ;;  %v344_v45 = vadd.f32 %v683_v28, %v321_v39 }
 0x101   :  { %v264_v46 = vpop.f32.mrf.mxu0  ;;  %v296_v47 = vpop.f32.mrf.mxu1 }
 0x102   :  { %432 = vst.msk [vmem:[%s785_s4 + $0x14] sm:$0xf] %vm426_vm1, %v503_v42  ;;  %440 = vst.msk [vmem:[%s785_s4 + $0x34] sm:$0xf] %vm426_vm1, %v511_v43  ;;  %v352_v48 = vmax.f32 %v336_v44, 0.0  ;;  %v360_v49 = vmax.f32 %v344_v45, 0.0  ;;  %v314_v50 = vmul.f32 %v678_v26, %v264_v46  ;;  %v322_v51 = vmul.f32 %v678_v26, %v296_v47 }
 0x103   :  { %v266_v52 = vpop.f32.mrf.mxu0  ;;  %v298_v53 = vpop.f32.mrf.mxu1 }
 0x104   :  { %v504_v54 = vpack.c.bf16 %v352_v48, %v352_v48  ;;  %v512_v55 = vpack.c.bf16 %v360_v49, %v360_v49  ;;  %v337_v56 = vadd.f32 %v683_v28, %v314_v50  ;;  %v345_v57 = vadd.f32 %v683_v28, %v322_v51 }
 0x106   :  { %433 = vst.msk [vmem:[%s785_s4 + $0x18] sm:$0xf] %vm426_vm1, %v504_v54  ;;  %441 = vst.msk [vmem:[%s785_s4 + $0x38] sm:$0xf] %vm426_vm1, %v512_v55  ;;  %v353_v58 = vmax.f32 %v337_v56, 0.0  ;;  %v361_v26 = vmax.f32 %v345_v57, 0.0 }
 0x108   :  { %v505_v59 = vpack.c.bf16 %v353_v58, %v353_v58  ;;  %v513_v60 = vpack.c.bf16 %v361_v26, %v361_v26 }
 0x10a   :  { %434 = vst.msk [vmem:[%s785_s4 + $0x1c] sm:$0xf] %vm426_vm1, %v505_v59  ;;  %442 = vst.msk [vmem:[%s785_s4 + $0x3c] sm:$0xf] %vm426_vm1, %v513_v60 }

// kernel: _lambda_.29
= control target key start
LH: loop header
LB: loop body
LE: loop exit
PB: predicated region body
PF: predicated region fallthrough
CT: control target
= control target key end

     0   :  { %vm82_vm0 = vcmask 130048   ;;  %vm314_vm1 = vcmask 257024   ;;  %s590_s1 = inlined_call_operand.vmem [shape: bf16[16,32], index: 1, kind: input, shape index: {}]   ;;  %s591_s0 = inlined_call_operand.vmem [shape: bf16[128,16], index: 0, kind: input, shape index: {}]   ;;  %s592_s2 = inlined_call_operand.vmem [shape: f32[1,32], index: 2, kind: input, shape index: {}]   ;;  %s593_s3 = inlined_call_operand.vmem [shape: f32[1,32], index: 3, kind: input, shape index: {}]   ;;  %s594_s4 = inlined_call_operand.vmem [shape: bf16[128,32], index: 4, kind: output, shape index: {}]  }
   0x1   :  { %v415_v0 = vld [vmem:[%s590_s1] sm:$0xff]   ;;  %v418_v3 = vld [vmem:[%s591_s0 + $0x8] sm:$0xff]   ;;  %v420_v5 = vld [vmem:[%s591_s0 + $0x10] sm:$0xff]  }
   0x2   :  { %v416_v1 = vld [vmem:[%s591_s0] sm:$0xff]   ;;  %395 = vmatprep.subr.bf16.mxu0 %v415_v0  ;;  %413 = vmatprep.subr.bf16.mxu1 %v415_v0  ;;  %v419_v4 = vld [vmem:[%s591_s0 + $0x28] sm:$0xff]   ;;  %v421_v6 = vld [vmem:[%s591_s0 + $0x30] sm:$0xff]  }
   0x3   :  { %v417_v2 = vld [vmem:[%s591_s0 + $0x20] sm:$0xff]   ;;  %396 = vmatpush3.bf16.msra.mxu0 %v415_v0  ;;  %414 = vmatpush3.bf16.msra.mxu1 %v415_v0  ;;  %v422_v7 = vld [vmem:[%s591_s0 + $0x18] sm:$0xff]  }
   0x4   :  { %397 = vmatprep.mubr.msk.bf16.mxu0 %vm82_vm0, %v416_v1  ;;  %405 = vmatprep.mubr.msk.bf16.mxu1 %vm82_vm0, %v417_v2  ;;  %v423_v8 = vld [vmem:[%s591_s0 + $0x38] sm:$0xff]   ;;  %v487_v9 = vld [vmem:[%s592_s2] ss:$0 sm:$0xff] }
   0x5   :  { %v492_v11 = vld [vmem:[%s593_s3] ss:$0 sm:$0xff] }
   0x6   :  { %398 = vmatmul.mubr.msk.bf16.vlgmr.msra.gmra.mxu0 %vm82_vm0, %v418_v3  ;;  %406 = vmatmul.mubr.msk.bf16.vlgmr.msra.gmra.mxu1 %vm82_vm0, %v419_v4 }
   0x7   :  { %401 = vmatprep.mubr.msk.bf16.mxu0 %vm82_vm0, %v420_v5  ;;  %409 = vmatprep.mubr.msk.bf16.mxu1 %vm82_vm0, %v421_v6 }
   0xe   :  { %402 = vmatmul.mubr.msk.bf16.gmra.mxu0 %vm82_vm0, %v422_v7  ;;  %410 = vmatmul.mubr.msk.bf16.gmra.mxu1 %vm82_vm0, %v423_v8 }
  0xc6   :  { %v399_v10 = vpop.f32.mrf.mxu0  ;;  %v407_v12 = vpop.f32.mrf.mxu1 }
  0xc7   :  { %v213_v13 = vmul.f32 %v399_v10, %v487_v9  ;;  %v221_v14 = vmul.f32 %v407_v12, %v487_v9 }
  0xc8   :  { %v141_v15 = vpop.f32.mrf.mxu0  ;;  %v173_v16 = vpop.f32.mrf.mxu1 }
  0xc9   :  { %v236_v17 = vadd.f32 %v492_v11, %v213_v13  ;;  %v244_v18 = vadd.f32 %v492_v11, %v221_v14  ;;  %v211_v19 = vmul.f32 %v487_v9, %v141_v15  ;;  %v219_v20 = vmul.f32 %v487_v9, %v173_v16 }
  0xca   :  { %v400_v21 = vpop.f32.mrf.mxu0  ;;  %v408_v22 = vpop.f32.mrf.mxu1 }
  0xcb   :  { %v372_v23 = vpack.c.bf16 %v236_v17, %v236_v17  ;;  %v380_v24 = vpack.c.bf16 %v244_v18, %v244_v18  ;;  %v234_v25 = vadd.f32 %v492_v11, %v211_v19  ;;  %v242_v26 = vadd.f32 %v492_v11, %v219_v20 }
  0xcc   :  { %v214_v27 = vmul.f32 %v400_v21, %v487_v9  ;;  %v222_v28 = vmul.f32 %v408_v22, %v487_v9  ;;  %v144_v29 = vpop.f32.mrf.mxu0  ;;  %v176_v30 = vpop.f32.mrf.mxu1 }
  0xcd   :  { %317 = vst.msk [vmem:[%s594_s4 + $0x8] sm:$0xf] %vm314_vm1, %v372_v23  ;;  %325 = vst.msk [vmem:[%s594_s4 + $0x28] sm:$0xf] %vm314_vm1, %v380_v24  ;;  %v370_v31 = vpack.c.bf16 %v234_v25, %v234_v25  ;;  %v378_v32 = vpack.c.bf16 %v242_v26, %v242_v26  ;;  %v212_v33 = vmul.f32 %v487_v9, %v144_v29 }
  0xce   :  { %v220_v34 = vmul.f32 %v487_v9, %v176_v30  ;;  %v237_v35 = vadd.f32 %v492_v11, %v214_v27  ;;  %v245_v36 = vadd.f32 %v492_v11, %v222_v28  ;;  %v403_v37 = vpop.f32.mrf.mxu0  ;;  %v411_v38 = vpop.f32.mrf.mxu1 }
  0xcf   :  { %315 = vst.msk [vmem:[%s594_s4] sm:$0xf] %vm314_vm1, %v370_v31  ;;  %323 = vst.msk [vmem:[%s594_s4 + $0x20] sm:$0xf] %vm314_vm1, %v378_v32  ;;  %v235_v39 = vadd.f32 %v492_v11, %v212_v33  ;;  %v217_v41 = vmul.f32 %v403_v37, %v487_v9  ;;  %v225_v42 = vmul.f32 %v411_v38, %v487_v9 }
  0xd0   :  { %v243_v40 = vadd.f32 %v492_v11, %v220_v34  ;;  %v373_v43 = vpack.c.bf16 %v237_v35, %v237_v35  ;;  %v381_v44 = vpack.c.bf16 %v245_v36, %v245_v36  ;;  %v157_v45 = vpop.f32.mrf.mxu0  ;;  %v189_v46 = vpop.f32.mrf.mxu1 }
  0xd1   :  { %v371_v47 = vpack.c.bf16 %v235_v39, %v235_v39  ;;  %v240_v49 = vadd.f32 %v492_v11, %v217_v41  ;;  %v248_v50 = vadd.f32 %v492_v11, %v225_v42  ;;  %v215_v51 = vmul.f32 %v487_v9, %v157_v45 }
  0xd2   :  { %v379_v48 = vpack.c.bf16 %v243_v40, %v243_v40  ;;  %318 = vst.msk [vmem:[%s594_s4 + $0xc] sm:$0xf] %vm314_vm1, %v373_v43  ;;  %326 = vst.msk [vmem:[%s594_s4 + $0x2c] sm:$0xf] %vm314_vm1, %v381_v44  ;;  %v223_v52 = vmul.f32 %v487_v9, %v189_v46  ;;  %v404_v53 = vpop.f32.mrf.mxu0  ;;  %v412_v54 = vpop.f32.mrf.mxu1 }
  0xd3   :  { %316 = vst.msk [vmem:[%s594_s4 + $0x4] sm:$0xf] %vm314_vm1, %v371_v47  ;;  %v376_v55 = vpack.c.bf16 %v240_v49, %v240_v49  ;;  %v384_v56 = vpack.c.bf16 %v248_v50, %v248_v50  ;;  %v218_v57 = vmul.f32 %v404_v53, %v487_v9  ;;  %v226_v58 = vmul.f32 %v412_v54, %v487_v9 }
  0xd4   :  { %324 = vst.msk [vmem:[%s594_s4 + $0x24] sm:$0xf] %vm314_vm1, %v379_v48  ;;  %v238_v59 = vadd.f32 %v492_v11, %v215_v51  ;;  %v246_v60 = vadd.f32 %v492_v11, %v223_v52  ;;  %v160_v61 = vpop.f32.mrf.mxu0  ;;  %v192_v62 = vpop.f32.mrf.mxu1 }
  0xd5   :  { %321 = vst.msk [vmem:[%s594_s4 + $0x18] sm:$0xf] %vm314_vm1, %v376_v55  ;;  %329 = vst.msk [vmem:[%s594_s4 + $0x38] sm:$0xf] %vm314_vm1, %v384_v56  ;;  %v241_v63 = vadd.f32 %v492_v11, %v218_v57  ;;  %v249_v0 = vadd.f32 %v492_v11, %v226_v58  ;;  %v216_v1 = vmul.f32 %v487_v9, %v160_v61 }
  0xd6   :  { %v224_v2 = vmul.f32 %v487_v9, %v192_v62  ;;  %v374_v3 = vpack.c.bf16 %v238_v59, %v238_v59  ;;  %v382_v4 = vpack.c.bf16 %v246_v60, %v246_v60 }
  0xd7   :  { %v377_v5 = vpack.c.bf16 %v241_v63, %v241_v63  ;;  %v385_v6 = vpack.c.bf16 %v249_v0, %v249_v0  ;;  %v239_v7 = vadd.f32 %v492_v11, %v216_v1 }
  0xd8   :  { %v247_v8 = vadd.f32 %v492_v11, %v224_v2  ;;  %319 = vst.msk [vmem:[%s594_s4 + $0x10] sm:$0xf] %vm314_vm1, %v374_v3  ;;  %327 = vst.msk [vmem:[%s594_s4 + $0x30] sm:$0xf] %vm314_vm1, %v382_v4 }
  0xd9   :  { %322 = vst.msk [vmem:[%s594_s4 + $0x1c] sm:$0xf] %vm314_vm1, %v377_v5  ;;  %330 = vst.msk [vmem:[%s594_s4 + $0x3c] sm:$0xf] %vm314_vm1, %v385_v6  ;;  %v375_v9 = vpack.c.bf16 %v239_v7, %v239_v7 }
  0xda   :  { %v383_v10 = vpack.c.bf16 %v247_v8, %v247_v8 }
  0xdb   :  { %320 = vst.msk [vmem:[%s594_s4 + $0x14] sm:$0xf] %vm314_vm1, %v375_v9 }
  0xdc   :  { %328 = vst.msk [vmem:[%s594_s4 + $0x34] sm:$0xf] %vm314_vm1, %v383_v10 }

// kernel: _lambda_.30
= control target key start
LH: loop header
LB: loop body
LE: loop exit
PB: predicated region body
PF: predicated region fallthrough
CT: control target
= control target key end

     0   :  { %vm85_vm0 = vcmask 130048   ;;  %vm381_vm1 = vcmask 257024   ;;  %s773_s1 = inlined_call_operand.vmem [shape: bf16[16,32], index: 1, kind: input, shape index: {}]   ;;  %s774_s0 = inlined_call_operand.vmem [shape: bf16[128,16], index: 0, kind: input, shape index: {}]   ;;  %s775_s4 = inlined_call_operand.vmem [shape: bf16[128,32], index: 4, kind: input, shape index: {}]   ;;  %s776_s2 = inlined_call_operand.vmem [shape: f32[1,32], index: 2, kind: input, shape index: {}]   ;;  %s777_s3 = inlined_call_operand.vmem [shape: f32[1,32], index: 3, kind: input, shape index: {}]   ;;  %s778_s5 = inlined_call_operand.vmem [shape: bf16[128,32], index: 5, kind: output, shape index: {}]  }
   0x1   :  { %v521_v0 = vld [vmem:[%s773_s1] sm:$0xff]   ;;  %v524_v3 = vld [vmem:[%s774_s0 + $0x8] sm:$0xff]   ;;  %v526_v5 = vld [vmem:[%s774_s0 + $0x10] sm:$0xff]  }
   0x2   :  { %v522_v1 = vld [vmem:[%s774_s0] sm:$0xff]   ;;  %501 = vmatprep.subr.bf16.mxu0 %v521_v0  ;;  %519 = vmatprep.subr.bf16.mxu1 %v521_v0  ;;  %v525_v4 = vld [vmem:[%s774_s0 + $0x28] sm:$0xff]   ;;  %v527_v6 = vld [vmem:[%s774_s0 + $0x30] sm:$0xff]  }
   0x3   :  { %v523_v2 = vld [vmem:[%s774_s0 + $0x20] sm:$0xff]   ;;  %502 = vmatpush3.bf16.msra.mxu0 %v521_v0  ;;  %520 = vmatpush3.bf16.msra.mxu1 %v521_v0  ;;  %v528_v7 = vld [vmem:[%s774_s0 + $0x18] sm:$0xff]   ;;  %v598_v9 = vld [vmem:[%s775_s4 + $0x8] sm:$0xff]  }
   0x4   :  { %503 = vmatprep.mubr.msk.bf16.mxu0 %vm85_vm0, %v522_v1  ;;  %511 = vmatprep.mubr.msk.bf16.mxu1 %vm85_vm0, %v523_v2  ;;  %v529_v8 = vld [vmem:[%s774_s0 + $0x38] sm:$0xff]   ;;  %v603_v10 = vld [vmem:[%s775_s4 + $0x28] sm:$0xff]   ;;  %v608_v11 = vld [vmem:[%s775_s4] sm:$0xff]   ;;  %v459_v14 = vunpack.c.l.bf16 %v598_v9  ;;  %v460_v23 = vunpack.c.h.bf16 %v598_v9 }
   0x5   :  { %v613_v12 = vld [vmem:[%s775_s4 + $0x20] sm:$0xff]   ;;  %v624_v15 = vld [vmem:[%s775_s4 + $0x18] sm:$0xff]   ;;  %v475_v20 = vunpack.c.l.bf16 %v603_v10  ;;  %v455_v21 = vunpack.c.l.bf16 %v608_v11  ;;  %v476_v26 = vunpack.c.h.bf16 %v603_v10  ;;  %v646_v27 = vld [vmem:[%s775_s4 + $0x10] sm:$0xff]   ;;  %v456_v31 = vunpack.c.h.bf16 %v608_v11 }
   0x6   :  { %504 = vmatmul.mubr.msk.bf16.vlgmr.msra.gmra.mxu0 %vm85_vm0, %v524_v3  ;;  %512 = vmatmul.mubr.msk.bf16.vlgmr.msra.gmra.mxu1 %vm85_vm0, %v525_v4  ;;  %v618_v13 = vld [vmem:[%s776_s2] ss:$0 sm:$0xff]  ;;  %v629_v16 = vld [vmem:[%s775_s4 + $0x38] sm:$0xff]   ;;  %v471_v22 = vunpack.c.l.bf16 %v613_v12  ;;  %v651_v28 = vld [vmem:[%s775_s4 + $0x30] sm:$0xff]   ;;  %v472_v32 = vunpack.c.h.bf16 %v613_v12  ;;  %v467_v33 = vunpack.c.l.bf16 %v624_v15  ;;  %v463_v41 = vunpack.c.l.bf16 %v646_v27 }
   0x7   :  { %507 = vmatprep.mubr.msk.bf16.mxu0 %vm85_vm0, %v526_v5  ;;  %515 = vmatprep.mubr.msk.bf16.mxu1 %vm85_vm0, %v527_v6  ;;  %v634_v18 = vld [vmem:[%s777_s3] ss:$0 sm:$0xff]  ;;  %v483_v34 = vunpack.c.l.bf16 %v629_v16  ;;  %v479_v42 = vunpack.c.l.bf16 %v651_v28  ;;  %v468_v43 = vunpack.c.h.bf16 %v624_v15  ;;  %v484_v44 = vunpack.c.h.bf16 %v629_v16 }
   0x8   :  { %v464_v53 = vunpack.c.h.bf16 %v646_v27  ;;  %v480_v54 = vunpack.c.h.bf16 %v651_v28 }
   0xe   :  { %508 = vmatmul.mubr.msk.bf16.gmra.mxu0 %vm85_vm0, %v528_v7  ;;  %516 = vmatmul.mubr.msk.bf16.gmra.mxu1 %vm85_vm0, %v529_v8 }
  0xc6   :  { %v505_v17 = vpop.f32.mrf.mxu0  ;;  %v513_v19 = vpop.f32.mrf.mxu1 }
  0xc7   :  { %v216_v24 = vmul.f32 %v505_v17, %v618_v13  ;;  %v224_v25 = vmul.f32 %v513_v19, %v618_v13 }
  0xc8   :  { %v144_v29 = vpop.f32.mrf.mxu0  ;;  %v176_v30 = vpop.f32.mrf.mxu1 }
  0xc9   :  { %v239_v35 = vadd.f32 %v634_v18, %v216_v24  ;;  %v247_v36 = vadd.f32 %v634_v18, %v224_v25  ;;  %v214_v37 = vmul.f32 %v618_v13, %v144_v29  ;;  %v222_v38 = vmul.f32 %v618_v13, %v176_v30 }
  0xca   :  { %v506_v39 = vpop.f32.mrf.mxu0  ;;  %v514_v40 = vpop.f32.mrf.mxu1 }
  0xcb   :  { %v287_v45 = vadd.f32 %v459_v14, %v239_v35  ;;  %v295_v46 = vadd.f32 %v475_v20, %v247_v36  ;;  %v237_v47 = vadd.f32 %v634_v18, %v214_v37  ;;  %v245_v48 = vadd.f32 %v634_v18, %v222_v38 }
  0xcc   :  { %v217_v49 = vmul.f32 %v506_v39, %v618_v13  ;;  %v225_v50 = vmul.f32 %v514_v40, %v618_v13  ;;  %v147_v51 = vpop.f32.mrf.mxu0  ;;  %v179_v52 = vpop.f32.mrf.mxu1 }
  0xcd   :  { %v303_v55 = vmax.f32 %v287_v45, 0.0  ;;  %v311_v56 = vmax.f32 %v295_v46, 0.0  ;;  %v285_v57 = vadd.f32 %v455_v21, %v237_v47  ;;  %v293_v58 = vadd.f32 %v471_v22, %v245_v48 }
  0xce   :  { %v240_v59 = vadd.f32 %v634_v18, %v217_v49  ;;  %v248_v60 = vadd.f32 %v634_v18, %v225_v50  ;;  %v215_v61 = vmul.f32 %v618_v13, %v147_v51  ;;  %v223_v62 = vmul.f32 %v618_v13, %v179_v52  ;;  %v509_v63 = vpop.f32.mrf.mxu0  ;;  %v517_v0 = vpop.f32.mrf.mxu1 }
  0xcf   :  { %v439_v1 = vpack.c.bf16 %v303_v55, %v303_v55  ;;  %v447_v2 = vpack.c.bf16 %v311_v56, %v311_v56  ;;  %v301_v3 = vmax.f32 %v285_v57, 0.0  ;;  %v309_v4 = vmax.f32 %v293_v58, 0.0 }
  0xd0   :  { %v288_v5 = vadd.f32 %v460_v23, %v240_v59  ;;  %v296_v6 = vadd.f32 %v476_v26, %v248_v60  ;;  %v238_v7 = vadd.f32 %v634_v18, %v215_v61  ;;  %v246_v8 = vadd.f32 %v634_v18, %v223_v62  ;;  %v160_v9 = vpop.f32.mrf.mxu0  ;;  %v192_v10 = vpop.f32.mrf.mxu1 }
  0xd1   :  { %384 = vst.msk [vmem:[%s778_s5 + $0x8] sm:$0xf] %vm381_vm1, %v439_v1  ;;  %392 = vst.msk [vmem:[%s778_s5 + $0x28] sm:$0xf] %vm381_vm1, %v447_v2  ;;  %v437_v11 = vpack.c.bf16 %v301_v3, %v301_v3  ;;  %v445_v12 = vpack.c.bf16 %v309_v4, %v309_v4  ;;  %v220_v14 = vmul.f32 %v509_v63, %v618_v13 }
  0xd2   :  { %v228_v17 = vmul.f32 %v517_v0, %v618_v13  ;;  %v304_v19 = vmax.f32 %v288_v5, 0.0  ;;  %v312_v20 = vmax.f32 %v296_v6, 0.0  ;;  %v286_v21 = vadd.f32 %v456_v31, %v238_v7  ;;  %v510_v23 = vpop.f32.mrf.mxu0  ;;  %v518_v24 = vpop.f32.mrf.mxu1 }
  0xd3   :  { %v294_v22 = vadd.f32 %v472_v32, %v246_v8  ;;  %382 = vst.msk [vmem:[%s778_s5] sm:$0xf] %vm381_vm1, %v437_v11  ;;  %390 = vst.msk [vmem:[%s778_s5 + $0x20] sm:$0xf] %vm381_vm1, %v445_v12  ;;  %v243_v25 = vadd.f32 %v634_v18, %v220_v14  ;;  %v218_v29 = vmul.f32 %v618_v13, %v160_v9 }
  0xd4   :  { %v251_v26 = vadd.f32 %v634_v18, %v228_v17  ;;  %v226_v30 = vmul.f32 %v618_v13, %v192_v10  ;;  %v440_v31 = vpack.c.bf16 %v304_v19, %v304_v19  ;;  %v448_v32 = vpack.c.bf16 %v312_v20, %v312_v20  ;;  %v163_v45 = vpop.f32.mrf.mxu0  ;;  %v195_v46 = vpop.f32.mrf.mxu1 }
  0xd5   :  { %v302_v35 = vmax.f32 %v286_v21, 0.0  ;;  %v310_v36 = vmax.f32 %v294_v22, 0.0  ;;  %v291_v37 = vadd.f32 %v467_v33, %v243_v25  ;;  %v241_v39 = vadd.f32 %v634_v18, %v218_v29 }
  0xd6   :  { %v299_v38 = vadd.f32 %v483_v34, %v251_v26  ;;  %v249_v40 = vadd.f32 %v634_v18, %v226_v30  ;;  %385 = vst.msk [vmem:[%s778_s5 + $0xc] sm:$0xf] %vm381_vm1, %v440_v31  ;;  %393 = vst.msk [vmem:[%s778_s5 + $0x2c] sm:$0xf] %vm381_vm1, %v448_v32  ;;  %v221_v34 = vmul.f32 %v510_v23, %v618_v13 }
  0xd7   :  { %v438_v33 = vpack.c.bf16 %v302_v35, %v302_v35  ;;  %v446_v47 = vpack.c.bf16 %v310_v36, %v310_v36  ;;  %v229_v48 = vmul.f32 %v518_v24, %v618_v13  ;;  %v307_v49 = vmax.f32 %v291_v37, 0.0 }
  0xd8   :  { %v315_v50 = vmax.f32 %v299_v38, 0.0  ;;  %v289_v51 = vadd.f32 %v463_v41, %v241_v39  ;;  %v297_v52 = vadd.f32 %v479_v42, %v249_v40  ;;  %v244_v55 = vadd.f32 %v634_v18, %v221_v34 }
  0xd9   :  { %383 = vst.msk [vmem:[%s778_s5 + $0x4] sm:$0xf] %vm381_vm1, %v438_v33  ;;  %391 = vst.msk [vmem:[%s778_s5 + $0x24] sm:$0xf] %vm381_vm1, %v446_v47  ;;  %v252_v56 = vadd.f32 %v634_v18, %v229_v48  ;;  %v219_v57 = vmul.f32 %v618_v13, %v163_v45  ;;  %v227_v41 = vmul.f32 %v618_v13, %v195_v46 }
  0xda   :  { %v443_v58 = vpack.c.bf16 %v307_v49, %v307_v49  ;;  %v451_v42 = vpack.c.bf16 %v315_v50, %v315_v50  ;;  %v305_v59 = vmax.f32 %v289_v51, 0.0  ;;  %v313_v60 = vmax.f32 %v297_v52, 0.0 }
  0xdb   :  { %v292_v61 = vadd.f32 %v468_v43, %v244_v55  ;;  %v300_v62 = vadd.f32 %v484_v44, %v252_v56  ;;  %v242_v63 = vadd.f32 %v634_v18, %v219_v57  ;;  %v250_v0 = vadd.f32 %v634_v18, %v227_v41 }
  0xdc   :  { %388 = vst.msk [vmem:[%s778_s5 + $0x18] sm:$0xf] %vm381_vm1, %v443_v58  ;;  %396 = vst.msk [vmem:[%s778_s5 + $0x38] sm:$0xf] %vm381_vm1, %v451_v42  ;;  %v441_v13 = vpack.c.bf16 %v305_v59, %v305_v59  ;;  %v449_v15 = vpack.c.bf16 %v313_v60, %v313_v60 }
  0xdd   :  { %v308_v43 = vmax.f32 %v292_v61, 0.0  ;;  %v316_v1 = vmax.f32 %v300_v62, 0.0  ;;  %v290_v16 = vadd.f32 %v464_v53, %v242_v63  ;;  %v298_v18 = vadd.f32 %v480_v54, %v250_v0 }
  0xde   :  { %386 = vst.msk [vmem:[%s778_s5 + $0x10] sm:$0xf] %vm381_vm1, %v441_v13  ;;  %394 = vst.msk [vmem:[%s778_s5 + $0x30] sm:$0xf] %vm381_vm1, %v449_v15 }
  0xdf   :  { %v444_v44 = vpack.c.bf16 %v308_v43, %v308_v43  ;;  %v452_v2 = vpack.c.bf16 %v316_v1, %v316_v1  ;;  %v306_v3 = vmax.f32 %v290_v16, 0.0  ;;  %v314_v4 = vmax.f32 %v298_v18, 0.0 }
  0xe1   :  { %389 = vst.msk [vmem:[%s778_s5 + $0x1c] sm:$0xf] %vm381_vm1, %v444_v44  ;;  %397 = vst.msk [vmem:[%s778_s5 + $0x3c] sm:$0xf] %vm381_vm1, %v452_v2  ;;  %v442_v27 = vpack.c.bf16 %v306_v3, %v306_v3  ;;  %v450_v28 = vpack.c.bf16 %v314_v4, %v314_v4 }
  0xe3   :  { %387 = vst.msk [vmem:[%s778_s5 + $0x14] sm:$0xf] %vm381_vm1, %v442_v27  ;;  %395 = vst.msk [vmem:[%s778_s5 + $0x34] sm:$0xf] %vm381_vm1, %v450_v28 }

// kernel: _lambda_.31
= control target key start
LH: loop header
LB: loop body
LE: loop exit
PB: predicated region body
PF: predicated region fallthrough
CT: control target
= control target key end

     0   :  { %vm90_vm0 = vcmask 261120   ;;  %vm338_vm1 = vcmask 257024   ;;  %s624_s1 = inlined_call_operand.vmem [shape: bf16[32,32], index: 1, kind: input, shape index: {}]   ;;  %s625_s0 = inlined_call_operand.vmem [shape: bf16[128,32], index: 0, kind: input, shape index: {}]   ;;  %s626_s2 = inlined_call_operand.vmem [shape: f32[1,32], index: 2, kind: input, shape index: {}]   ;;  %s627_s3 = inlined_call_operand.vmem [shape: f32[1,32], index: 3, kind: input, shape index: {}]   ;;  %s628_s4 = inlined_call_operand.vmem [shape: bf16[128,32], index: 4, kind: output, shape index: {}]  }
   0x1   :  { %v445_v0 = vld [vmem:[%s624_s1 + $0x8] sm:$0xff]   ;;  %v446_v1 = vld [vmem:[%s624_s1] sm:$0xff]   ;;  %v451_v6 = vld [vmem:[%s625_s0 + $0x10] sm:$0xff]  }
   0x2   :  { %421 = vmatprep.subr.bf16.mxu0 %v445_v0  ;;  %441 = vmatprep.subr.bf16.mxu1 %v445_v0  ;;  %v447_v2 = vld [vmem:[%s625_s0] sm:$0xff]   ;;  %v449_v4 = vld [vmem:[%s625_s0 + $0x8] sm:$0xff]   ;;  %v452_v7 = vld [vmem:[%s625_s0 + $0x30] sm:$0xff]  }
   0x3   :  { %422 = vmatpush3.bf16.msra.mxu0 %v445_v0  ;;  %443 = vmatpush3.bf16.msra.mxu1 %v445_v0  ;;  %v448_v3 = vld [vmem:[%s625_s0 + $0x20] sm:$0xff]   ;;  %v450_v5 = vld [vmem:[%s625_s0 + $0x28] sm:$0xff]   ;;  %v453_v8 = vld [vmem:[%s625_s0 + $0x18] sm:$0xff]  }
   0x4   :  { %423 = vmatprep.subr.bf16.mxu0 %v446_v1  ;;  %442 = vmatprep.subr.bf16.mxu1 %v446_v1  ;;  %v454_v9 = vld [vmem:[%s625_s0 + $0x38] sm:$0xff]   ;;  %v521_v10 = vld [vmem:[%s626_s2] ss:$0 sm:$0xff] }
   0x5   :  { %425 = vmatprep.mubr.msk.bf16.mxu0 %vm90_vm0, %v447_v2  ;;  %433 = vmatprep.mubr.msk.bf16.mxu1 %vm90_vm0, %v448_v3  ;;  %v526_v12 = vld [vmem:[%s627_s3] ss:$0 sm:$0xff] }
   0x7   :  { %424 = vmatpush3.bf16.msra.mxu0 %v446_v1  ;;  %444 = vmatpush3.bf16.msra.mxu1 %v446_v1 }
   0xa   :  { %426 = vmatmul.mubr.msk.bf16.vlgmr.msra.gmra.mxu0 %vm90_vm0, %v449_v4  ;;  %434 = vmatmul.mubr.msk.bf16.vlgmr.msra.gmra.mxu1 %vm90_vm0, %v450_v5 }
   0xb   :  { %429 = vmatprep.mubr.msk.bf16.mxu0 %vm90_vm0, %v451_v6  ;;  %437 = vmatprep.mubr.msk.bf16.mxu1 %vm90_vm0, %v452_v7 }
  0x12   :  { %430 = vmatmul.mubr.msk.bf16.gmra.mxu0 %vm90_vm0, %v453_v8  ;;  %438 = vmatmul.mubr.msk.bf16.gmra.mxu1 %vm90_vm0, %v454_v9 }
  0xca   :  { %v427_v11 = vpop.f32.mrf.mxu0  ;;  %v435_v13 = vpop.f32.mrf.mxu1 }
  0xcb   :  { %v221_v14 = vmul.f32 %v427_v11, %v521_v10  ;;  %v229_v15 = vmul.f32 %v435_v13, %v521_v10 }
  0xcc   :  { %v149_v16 = vpop.f32.mrf.mxu0  ;;  %v181_v17 = vpop.f32.mrf.mxu1 }
  0xcd   :  { %v244_v18 = vadd.f32 %v526_v12, %v221_v14  ;;  %v252_v19 = vadd.f32 %v526_v12, %v229_v15  ;;  %v219_v20 = vmul.f32 %v521_v10, %v149_v16  ;;  %v227_v21 = vmul.f32 %v521_v10, %v181_v17 }
  0xce   :  { %v428_v22 = vpop.f32.mrf.mxu0  ;;  %v436_v23 = vpop.f32.mrf.mxu1 }
  0xcf   :  { %v260_v24 = vmax.f32 %v244_v18, 0.0  ;;  %v268_v25 = vmax.f32 %v252_v19, 0.0  ;;  %v242_v26 = vadd.f32 %v526_v12, %v219_v20  ;;  %v250_v27 = vadd.f32 %v526_v12, %v227_v21 }
  0xd0   :  { %v222_v28 = vmul.f32 %v428_v22, %v521_v10  ;;  %v230_v29 = vmul.f32 %v436_v23, %v521_v10  ;;  %v152_v30 = vpop.f32.mrf.mxu0  ;;  %v184_v31 = vpop.f32.mrf.mxu1 }
  0xd1   :  { %v397_v32 = vpack.c.bf16 %v260_v24, %v260_v24  ;;  %v405_v33 = vpack.c.bf16 %v268_v25, %v268_v25  ;;  %v258_v34 = vmax.f32 %v242_v26, 0.0  ;;  %v266_v35 = vmax.f32 %v250_v27, 0.0 }
  0xd2   :  { %v245_v36 = vadd.f32 %v526_v12, %v222_v28  ;;  %v253_v37 = vadd.f32 %v526_v12, %v230_v29  ;;  %v220_v38 = vmul.f32 %v521_v10, %v152_v30  ;;  %v228_v39 = vmul.f32 %v521_v10, %v184_v31  ;;  %v431_v40 = vpop.f32.mrf.mxu0  ;;  %v439_v41 = vpop.f32.mrf.mxu1 }
  0xd3   :  { %341 = vst.msk [vmem:[%s628_s4 + $0x8] sm:$0xf] %vm338_vm1, %v397_v32  ;;  %349 = vst.msk [vmem:[%s628_s4 + $0x28] sm:$0xf] %vm338_vm1, %v405_v33  ;;  %v395_v42 = vpack.c.bf16 %v258_v34, %v258_v34  ;;  %v403_v43 = vpack.c.bf16 %v266_v35, %v266_v35  ;;  %v225_v44 = vmul.f32 %v431_v40, %v521_v10 }
  0xd4   :  { %v233_v45 = vmul.f32 %v439_v41, %v521_v10  ;;  %v261_v46 = vmax.f32 %v245_v36, 0.0  ;;  %v269_v47 = vmax.f32 %v253_v37, 0.0  ;;  %v243_v48 = vadd.f32 %v526_v12, %v220_v38  ;;  %v165_v50 = vpop.f32.mrf.mxu0  ;;  %v197_v51 = vpop.f32.mrf.mxu1 }
  0xd5   :  { %v251_v49 = vadd.f32 %v526_v12, %v228_v39  ;;  %339 = vst.msk [vmem:[%s628_s4] sm:$0xf] %vm338_vm1, %v395_v42  ;;  %347 = vst.msk [vmem:[%s628_s4 + $0x20] sm:$0xf] %vm338_vm1, %v403_v43  ;;  %v248_v52 = vadd.f32 %v526_v12, %v225_v44  ;;  %v223_v54 = vmul.f32 %v521_v10, %v165_v50 }
  0xd6   :  { %v256_v53 = vadd.f32 %v526_v12, %v233_v45  ;;  %v231_v55 = vmul.f32 %v521_v10, %v197_v51  ;;  %v398_v56 = vpack.c.bf16 %v261_v46, %v261_v46  ;;  %v406_v57 = vpack.c.bf16 %v269_v47, %v269_v47  ;;  %v432_v60 = vpop.f32.mrf.mxu0  ;;  %v440_v61 = vpop.f32.mrf.mxu1 }
  0xd7   :  { %v259_v58 = vmax.f32 %v243_v48, 0.0  ;;  %v267_v59 = vmax.f32 %v251_v49, 0.0  ;;  %v264_v62 = vmax.f32 %v248_v52, 0.0  ;;  %v246_v0 = vadd.f32 %v526_v12, %v223_v54 }
  0xd8   :  { %v272_v63 = vmax.f32 %v256_v53, 0.0  ;;  %v254_v1 = vadd.f32 %v526_v12, %v231_v55  ;;  %342 = vst.msk [vmem:[%s628_s4 + $0xc] sm:$0xf] %vm338_vm1, %v398_v56  ;;  %350 = vst.msk [vmem:[%s628_s4 + $0x2c] sm:$0xf] %vm338_vm1, %v406_v57  ;;  %v226_v4 = vmul.f32 %v432_v60, %v521_v10  ;;  %v234_v5 = vmul.f32 %v440_v61, %v521_v10  ;;  %v168_v6 = vpop.f32.mrf.mxu0  ;;  %v200_v7 = vpop.f32.mrf.mxu1 }
  0xd9   :  { %v396_v2 = vpack.c.bf16 %v259_v58, %v259_v58  ;;  %v404_v3 = vpack.c.bf16 %v267_v59, %v267_v59  ;;  %v401_v8 = vpack.c.bf16 %v264_v62, %v264_v62  ;;  %v262_v11 = vmax.f32 %v246_v0, 0.0 }
  0xda   :  { %v409_v9 = vpack.c.bf16 %v272_v63, %v272_v63  ;;  %v270_v13 = vmax.f32 %v254_v1, 0.0  ;;  %v249_v14 = vadd.f32 %v526_v12, %v226_v4  ;;  %v257_v15 = vadd.f32 %v526_v12, %v234_v5 }
  0xdb   :  { %340 = vst.msk [vmem:[%s628_s4 + $0x4] sm:$0xf] %vm338_vm1, %v396_v2  ;;  %348 = vst.msk [vmem:[%s628_s4 + $0x24] sm:$0xf] %vm338_vm1, %v404_v3  ;;  %v224_v16 = vmul.f32 %v521_v10, %v168_v6  ;;  %v232_v17 = vmul.f32 %v521_v10, %v200_v7  ;;  %v399_v18 = vpack.c.bf16 %v262_v11, %v262_v11 }
  0xdc   :  { %345 = vst.msk [vmem:[%s628_s4 + $0x18] sm:$0xf] %vm338_vm1, %v401_v8  ;;  %353 = vst.msk [vmem:[%s628_s4 + $0x38] sm:$0xf] %vm338_vm1, %v409_v9  ;;  %v407_v19 = vpack.c.bf16 %v270_v13, %v270_v13  ;;  %v265_v20 = vmax.f32 %v249_v14, 0.0  ;;  %v273_v21 = vmax.f32 %v257_v15, 0.0 }
  0xdd   :  { %v247_v22 = vadd.f32 %v526_v12, %v224_v16  ;;  %v255_v23 = vadd.f32 %v526_v12, %v232_v17  ;;  %343 = vst.msk [vmem:[%s628_s4 + $0x10] sm:$0xf] %vm338_vm1, %v399_v18 }
  0xde   :  { %351 = vst.msk [vmem:[%s628_s4 + $0x30] sm:$0xf] %vm338_vm1, %v407_v19  ;;  %v402_v10 = vpack.c.bf16 %v265_v20, %v265_v20  ;;  %v410_v24 = vpack.c.bf16 %v273_v21, %v273_v21 }
  0xdf   :  { %v263_v25 = vmax.f32 %v247_v22, 0.0  ;;  %v271_v26 = vmax.f32 %v255_v23, 0.0 }
  0xe0   :  { %346 = vst.msk [vmem:[%s628_s4 + $0x1c] sm:$0xf] %vm338_vm1, %v402_v10  ;;  %354 = vst.msk [vmem:[%s628_s4 + $0x3c] sm:$0xf] %vm338_vm1, %v410_v24 }
  0xe1   :  { %v400_v12 = vpack.c.bf16 %v263_v25, %v263_v25  ;;  %v408_v27 = vpack.c.bf16 %v271_v26, %v271_v26 }
  0xe3   :  { %344 = vst.msk [vmem:[%s628_s4 + $0x14] sm:$0xf] %vm338_vm1, %v400_v12  ;;  %352 = vst.msk [vmem:[%s628_s4 + $0x34] sm:$0xf] %vm338_vm1, %v408_v27 }

// kernel: _lambda_.33
= control target key start
LH: loop header
LB: loop body
LE: loop exit
PB: predicated region body
PF: predicated region fallthrough
CT: control target
= control target key end

     0   :  { %vm48_vm0 = vcmask 261120   ;;  %vm142_vm1 = vcmask 519168   ;;  %s238_s1 = inlined_call_operand.vmem [shape: bf16[32,64], index: 1, kind: input, shape index: {}]   ;;  %s239_s0 = inlined_call_operand.vmem [shape: bf16[32,32], index: 0, kind: input, shape index: {}]   ;;  %s240_s2 = inlined_call_operand.vmem [shape: f32[1,64], index: 2, kind: input, shape index: {}]   ;;  %s241_s3 = inlined_call_operand.vmem [shape: f32[1,64], index: 3, kind: input, shape index: {}]   ;;  %s242_s4 = inlined_call_operand.vmem [shape: bf16[32,64], index: 4, kind: output, shape index: {}]  }
   0x1   :  { %v179_v0 = vld [vmem:[%s238_s1 + $0x8] sm:$0xff]   ;;  %v180_v1 = vld [vmem:[%s238_s1] sm:$0xff]  }
   0x2   :  { %171 = vmatprep.subr.bf16.mxu0 %v179_v0  ;;  %v181_v2 = vld [vmem:[%s239_s0] sm:$0xff]   ;;  %v182_v3 = vld [vmem:[%s239_s0 + $0x8] sm:$0xff]  }
   0x3   :  { %172 = vmatpush3.bf16.msra.mxu0 %v179_v0  ;;  %175 = vmatprep.mubr.msk.bf16.mxu0 %vm48_vm0, %v181_v2  ;;  %v157_v4 = vld [vmem:[%s240_s2] ss:$0 sm:$0xff] }
   0x4   :  { %173 = vmatprep.subr.bf16.mxu0 %v180_v1  ;;  %v158_v6 = vld [vmem:[%s241_s3] ss:$0 sm:$0xff] }
   0x7   :  { %174 = vmatpush3.bf16.msra.mxu0 %v180_v1 }
   0xa   :  { %176 = vmatmul.mubr.msk.bf16.vlgmr.msra.gmra.mxu0 %vm48_vm0, %v182_v3 }
  0xca   :  { %v177_v5 = vpop.f32.mrf.mxu0 }
  0xcb   :  { %v113_v7 = vmul.f32 %v177_v5, %v157_v4 }
  0xcc   :  { %v89_v8 = vpop.f32.mrf.mxu0 }
  0xcd   :  { %v124_v9 = vadd.f32 %v158_v6, %v113_v7  ;;  %v111_v10 = vmul.f32 %v157_v4, %v89_v8 }
  0xce   :  { %v178_v11 = vpop.f32.mrf.mxu0 }
  0xcf   :  { %v165_v12 = vpack.c.bf16 %v124_v9, %v124_v9  ;;  %v122_v13 = vadd.f32 %v158_v6, %v111_v10  ;;  %v114_v14 = vmul.f32 %v178_v11, %v157_v4 }
  0xd0   :  { %v92_v15 = vpop.f32.mrf.mxu0 }
  0xd1   :  { %145 = vst.msk [vmem:[%s242_s4 + $0x8] sm:$0xf] %vm142_vm1, %v165_v12  ;;  %v163_v16 = vpack.c.bf16 %v122_v13, %v122_v13  ;;  %v125_v17 = vadd.f32 %v158_v6, %v114_v14  ;;  %v112_v18 = vmul.f32 %v157_v4, %v92_v15 }
  0xd3   :  { %143 = vst.msk [vmem:[%s242_s4] sm:$0xf] %vm142_vm1, %v163_v16  ;;  %v166_v19 = vpack.c.bf16 %v125_v17, %v125_v17  ;;  %v123_v20 = vadd.f32 %v158_v6, %v112_v18 }
  0xd5   :  { %146 = vst.msk [vmem:[%s242_s4 + $0xc] sm:$0xf] %vm142_vm1, %v166_v19  ;;  %v164_v21 = vpack.c.bf16 %v123_v20, %v123_v20 }
  0xd7   :  { %144 = vst.msk [vmem:[%s242_s4 + $0x4] sm:$0xf] %vm142_vm1, %v164_v21 }

// kernel: _lambda_.34
= control target key start
LH: loop header
LB: loop body
LE: loop exit
PB: predicated region body
PF: predicated region fallthrough
CT: control target
= control target key end

     0   :  { %vm51_vm0 = vcmask 261120   ;;  %vm161_vm1 = vcmask 519168   ;;  %s277_s1 = inlined_call_operand.vmem [shape: bf16[32,64], index: 1, kind: input, shape index: {}]   ;;  %s278_s0 = inlined_call_operand.vmem [shape: bf16[32,32], index: 0, kind: input, shape index: {}]   ;;  %s279_s2 = inlined_call_operand.vmem [shape: f32[1,64], index: 2, kind: input, shape index: {}]   ;;  %s280_s4 = inlined_call_operand.vmem [shape: bf16[32,64], index: 4, kind: input, shape index: {}]   ;;  %s281_s3 = inlined_call_operand.vmem [shape: f32[1,64], index: 3, kind: input, shape index: {}]   ;;  %s282_s5 = inlined_call_operand.vmem [shape: bf16[32,64], index: 5, kind: output, shape index: {}]  }
   0x1   :  { %v207_v0 = vld [vmem:[%s277_s1 + $0x8] sm:$0xff]   ;;  %v208_v1 = vld [vmem:[%s277_s1] sm:$0xff]  }
   0x2   :  { %199 = vmatprep.subr.bf16.mxu0 %v207_v0  ;;  %v209_v2 = vld [vmem:[%s278_s0] sm:$0xff]   ;;  %v210_v3 = vld [vmem:[%s278_s0 + $0x8] sm:$0xff]  }
   0x3   :  { %200 = vmatpush3.bf16.msra.mxu0 %v207_v0  ;;  %203 = vmatprep.mubr.msk.bf16.mxu0 %vm51_vm0, %v209_v2  ;;  %v176_v4 = vld [vmem:[%s279_s2] ss:$0 sm:$0xff]  ;;  %v194_v5 = vld [vmem:[%s280_s4 + $0x8] sm:$0xff]  }
   0x4   :  { %201 = vmatprep.subr.bf16.mxu0 %v208_v1  ;;  %v177_v7 = vld [vmem:[%s281_s3] ss:$0 sm:$0xff]  ;;  %v192_v10 = vunpack.c.l.bf16 %v194_v5  ;;  %v193_v19 = vunpack.c.h.bf16 %v194_v5 }
   0x5   :  { %v187_v8 = vld [vmem:[%s280_s4] sm:$0xff]  }
   0x6   :  { %v188_v14 = vunpack.c.l.bf16 %v187_v8  ;;  %v189_v21 = vunpack.c.h.bf16 %v187_v8 }
   0x7   :  { %202 = vmatpush3.bf16.msra.mxu0 %v208_v1 }
   0xa   :  { %204 = vmatmul.mubr.msk.bf16.vlgmr.msra.gmra.mxu0 %vm51_vm0, %v210_v3 }
  0xca   :  { %v205_v6 = vpop.f32.mrf.mxu0 }
  0xcb   :  { %v116_v9 = vmul.f32 %v205_v6, %v176_v4 }
  0xcc   :  { %v92_v11 = vpop.f32.mrf.mxu0 }
  0xcd   :  { %v127_v12 = vadd.f32 %v177_v7, %v116_v9  ;;  %v114_v13 = vmul.f32 %v176_v4, %v92_v11 }
  0xce   :  { %v206_v15 = vpop.f32.mrf.mxu0 }
  0xcf   :  { %v139_v16 = vadd.f32 %v192_v10, %v127_v12  ;;  %v125_v17 = vadd.f32 %v177_v7, %v114_v13  ;;  %v117_v18 = vmul.f32 %v206_v15, %v176_v4 }
  0xd0   :  { %v95_v20 = vpop.f32.mrf.mxu0 }
  0xd1   :  { %v143_v22 = vmax.f32 %v139_v16, 0.0  ;;  %v137_v23 = vadd.f32 %v188_v14, %v125_v17  ;;  %v128_v24 = vadd.f32 %v177_v7, %v117_v18  ;;  %v115_v25 = vmul.f32 %v176_v4, %v95_v20 }
  0xd3   :  { %v184_v26 = vpack.c.bf16 %v143_v22, %v143_v22  ;;  %v141_v27 = vmax.f32 %v137_v23, 0.0  ;;  %v140_v28 = vadd.f32 %v193_v19, %v128_v24  ;;  %v126_v29 = vadd.f32 %v177_v7, %v115_v25 }
  0xd5   :  { %164 = vst.msk [vmem:[%s282_s5 + $0x8] sm:$0xf] %vm161_vm1, %v184_v26  ;;  %v182_v30 = vpack.c.bf16 %v141_v27, %v141_v27  ;;  %v144_v31 = vmax.f32 %v140_v28, 0.0  ;;  %v138_v32 = vadd.f32 %v189_v21, %v126_v29 }
  0xd7   :  { %162 = vst.msk [vmem:[%s282_s5] sm:$0xf] %vm161_vm1, %v182_v30  ;;  %v185_v33 = vpack.c.bf16 %v144_v31, %v144_v31  ;;  %v142_v34 = vmax.f32 %v138_v32, 0.0 }
  0xd9   :  { %165 = vst.msk [vmem:[%s282_s5 + $0xc] sm:$0xf] %vm161_vm1, %v185_v33  ;;  %v183_v35 = vpack.c.bf16 %v142_v34, %v142_v34 }
  0xdb   :  { %163 = vst.msk [vmem:[%s282_s5 + $0x4] sm:$0xf] %vm161_vm1, %v183_v35 }

// kernel: _lambda_.32
= control target key start
LH: loop header
LB: loop body
LE: loop exit
PB: predicated region body
PF: predicated region fallthrough
CT: control target
= control target key end

     0   :  { %vm200_vm0 = vcmask 261120   ;;  %vm347_vm1 = vcmask 257024   ;;  %s577_s1 = inlined_call_operand.vmem [shape: bf16[288,32], index: 1, kind: input, shape index: {}]   ;;  %s578_s0 = inlined_call_operand.vmem [shape: bf16[32,288], index: 0, kind: input, shape index: {}]   ;;  %s579_s2 = inlined_call_operand.vmem [shape: f32[1,32], index: 2, kind: input, shape index: {}]   ;;  %s580_s3 = inlined_call_operand.vmem [shape: f32[1,32], index: 3, kind: input, shape index: {}]   ;;  %s581_s4 = inlined_call_operand.vmem [shape: bf16[32,32], index: 4, kind: output, shape index: {}]  }
   0x1   :  { %v432_v0 = vld [vmem:[%s577_s1 + $0x78] sm:$0xff]   ;;  %v434_v2 = vld [vmem:[%s577_s1 + $0x70] sm:$0xff]   ;;  %v436_v4 = vld [vmem:[%s577_s1 + $0x68] sm:$0xff]  }
   0x2   :  { %v433_v1 = vld [vmem:[%s577_s1 + $0x38] sm:$0xff]   ;;  %392 = vmatprep.subr.bf16.mxu0 %v432_v0  ;;  %v435_v3 = vld [vmem:[%s577_s1 + $0x30] sm:$0xff]   ;;  %v437_v5 = vld [vmem:[%s577_s1 + $0x28] sm:$0xff]  }
   0x3   :  { %393 = vmatpush3.bf16.msra.mxu0 %v433_v1  ;;  %v438_v6 = vld [vmem:[%s577_s1 + $0x60] sm:$0xff]   ;;  %v440_v8 = vld [vmem:[%s577_s1 + $0x58] sm:$0xff]   ;;  %v446_v9 = vld [vmem:[%s577_s1 + $0x88] sm:$0xff]  }
   0x4   :  { %394 = vmatprep.subr.bf16.mxu0 %v434_v2  ;;  %v439_v7 = vld [vmem:[%s577_s1 + $0x20] sm:$0xff]   ;;  %v441_v10 = vld [vmem:[%s577_s1 + $0x18] sm:$0xff]   ;;  %v442_v11 = vld [vmem:[%s577_s1 + $0x50] sm:$0xff]   ;;  %424 = vmatprep.subr.bf16.mxu1 %v446_v9 }
   0x5   :  { %v443_v12 = vld [vmem:[%s577_s1 + $0x10] sm:$0xff]   ;;  %425 = vmatpush3.bf16.msra.mxu1 %v446_v9  ;;  %v449_v13 = vld [vmem:[%s577_s1 + $0x80] sm:$0xff]   ;;  %v444_v14 = vld [vmem:[%s577_s1 + $0x48] sm:$0xff]  }
   0x6   :  { %426 = vmatprep.subr.bf16.mxu1 %v449_v13  ;;  %v452_v15 = vld [vmem:[%s578_s0 + $0x4] ss:$12 sps:$4 sm:$0xff]   ;;  %v453_v16 = vld [vmem:[%s578_s0 + $0x8] ss:$12 sps:$4 sm:$0xff]   ;;  %v454_v17 = vld [vmem:[%s578_s0 + $0x20] ss:$12 sps:$4 sm:$0xff]  }
   0x7   :  { %395 = vmatpush3.bf16.msra.mxu0 %v435_v3  ;;  %239 = vmatprep.mubr.bf16.mxu0 %v452_v15  ;;  %v445_v18 = vld [vmem:[%s577_s1 + $0x8] sm:$0xff]   ;;  %v447_v19 = vld [vmem:[%s577_s1 + $0x40] sm:$0xff]  }
   0x8   :  { %396 = vmatprep.subr.bf16.mxu0 %v436_v4  ;;  %428 = vmatprep.mubr.msk.bf16.mxu1 %vm200_vm0, %v453_v16  ;;  %v448_v20 = vld [vmem:[%s577_s1] sm:$0xff]   ;;  %v455_v22 = vld [vmem:[%s578_s0 + $0x1c] ss:$12 sps:$4 sm:$0xff]  }
   0x9   :  { %427 = vmatpush3.bf16.msra.mxu1 %v449_v13  ;;  %v450_v21 = vld [vmem:[%s578_s0] ss:$12 sps:$4 sm:$0xff]   ;;  %v457_v23 = vld [vmem:[%s578_s0 + $0x18] ss:$12 sps:$4 sm:$0xff]  }
   0xa   :  { %v382_v31 = vld [vmem:[%s579_s2] ss:$0 sm:$0xff] }
   0xb   :  { %397 = vmatpush3.bf16.msra.mxu0 %v437_v5  ;;  %v383_v33 = vld [vmem:[%s580_s3] ss:$0 sm:$0xff] }
   0xc   :  { %398 = vmatprep.subr.bf16.mxu0 %v438_v6  ;;  %429 = vmatmul.mubr.msk.bf16.vlgmr.msra.gmra.mxu1 %vm200_vm0, %v454_v17 }
   0xf   :  { %399 = vmatpush3.bf16.msra.mxu0 %v439_v7 }
  0x10   :  { %400 = vmatprep.subr.bf16.mxu0 %v440_v8 }
  0x13   :  { %401 = vmatpush3.bf16.msra.mxu0 %v441_v10 }
  0x14   :  { %402 = vmatprep.subr.bf16.mxu0 %v442_v11 }
  0x17   :  { %403 = vmatpush3.bf16.msra.mxu0 %v443_v12 }
  0x18   :  { %404 = vmatprep.subr.bf16.mxu0 %v444_v14 }
  0x1b   :  { %405 = vmatpush3.bf16.msra.mxu0 %v445_v18 }
  0x1c   :  { %406 = vmatprep.subr.bf16.mxu0 %v447_v19 }
  0x1f   :  { %407 = vmatpush3.bf16.msra.mxu0 %v448_v20 }
  0x22   :  { %240 = vmatmul.mubr.bf16.vlgmr.msra.gmra.mxu0 %v450_v21 }
  0x23   :  { %247 = vmatprep.mubr.bf16.mxu0 %v455_v22 }
  0x2a   :  { %248 = vmatmul.mubr.bf16.gmra.mxu0 %v457_v23 }
  0xcc   :  { %v430_v24 = vpop.f32.mrf.mxu1 }
  0xce   :  { %v290_v25 = vpop.f32.mrf.mxu1 }
  0xd0   :  { %v431_v28 = vpop.f32.mrf.mxu1 }
  0xd2   :  { %v293_v35 = vpop.f32.mrf.mxu1 }
  0xe2   :  { %v408_v26 = vpop.f32.mrf.mxu0 }
  0xe4   :  { %v409_v27 = vpop.f32.mrf.mxu0 }
  0xe5   :  { %v410_v29 = vadd.f32 %v409_v27, %v408_v26 }
  0xe6   :  { %v411_v30 = vpop.f32.mrf.mxu0 }
  0xe7   :  { %v291_v32 = vadd.f32 %v410_v29, %v290_v25 }
  0xe8   :  { %v412_v34 = vpop.f32.mrf.mxu0 }
  0xe9   :  { %v312_v36 = vmul.f32 %v382_v31, %v291_v32  ;;  %v413_v37 = vadd.f32 %v412_v34, %v411_v30 }
  0xea   :  { %v414_v38 = vpop.f32.mrf.mxu0 }
  0xeb   :  { %v323_v39 = vadd.f32 %v383_v33, %v312_v36  ;;  %v294_v40 = vadd.f32 %v413_v37, %v293_v35 }
  0xec   :  { %v415_v41 = vpop.f32.mrf.mxu0 }
  0xed   :  { %v327_v42 = vmax.f32 %v323_v39, 0.0  ;;  %v313_v43 = vmul.f32 %v382_v31, %v294_v40  ;;  %v416_v44 = vadd.f32 %v415_v41, %v414_v38 }
  0xee   :  { %v417_v45 = vpop.f32.mrf.mxu0 }
  0xef   :  { %v388_v46 = vpack.c.bf16 %v327_v42, %v327_v42  ;;  %v324_v47 = vadd.f32 %v383_v33, %v313_v43  ;;  %v299_v48 = vadd.f32 %v430_v24, %v416_v44 }
  0xf0   :  { %v418_v49 = vpop.f32.mrf.mxu0 }
  0xf1   :  { %348 = vst.msk [vmem:[%s581_s4] sm:$0xf] %vm347_vm1, %v388_v46  ;;  %v328_v50 = vmax.f32 %v324_v47, 0.0  ;;  %v314_v51 = vmul.f32 %v382_v31, %v299_v48  ;;  %v419_v52 = vadd.f32 %v418_v49, %v417_v45 }
  0xf3   :  { %v389_v53 = vpack.c.bf16 %v328_v50, %v328_v50  ;;  %v325_v54 = vadd.f32 %v383_v33, %v314_v51  ;;  %v302_v55 = vadd.f32 %v431_v28, %v419_v52 }
  0xf5   :  { %349 = vst.msk [vmem:[%s581_s4 + $0x4] sm:$0xf] %vm347_vm1, %v389_v53  ;;  %v329_v56 = vmax.f32 %v325_v54, 0.0  ;;  %v315_v57 = vmul.f32 %v382_v31, %v302_v55 }
  0xf7   :  { %v390_v58 = vpack.c.bf16 %v329_v56, %v329_v56  ;;  %v326_v59 = vadd.f32 %v383_v33, %v315_v57 }
  0xf9   :  { %350 = vst.msk [vmem:[%s581_s4 + $0x8] sm:$0xf] %vm347_vm1, %v390_v58  ;;  %v330_v60 = vmax.f32 %v326_v59, 0.0 }
  0xfb   :  { %v391_v61 = vpack.c.bf16 %v330_v60, %v330_v60 }
  0xfd   :  { %351 = vst.msk [vmem:[%s581_s4 + $0xc] sm:$0xf] %vm347_vm1, %v391_v61 }

// kernel: _lambda_.35
= control target key start
LH: loop header
LB: loop body
LE: loop exit
PB: predicated region body
PF: predicated region fallthrough
CT: control target
= control target key end

     0   :  { %vm64_vm0 = vcmask 523264   ;;  %vm162_vm1 = vcmask 519168   ;;  %s274_s1 = inlined_call_operand.vmem [shape: bf16[64,64], index: 1, kind: input, shape index: {}]   ;;  %s275_s0 = inlined_call_operand.vmem [shape: bf16[32,64], index: 0, kind: input, shape index: {}]   ;;  %s276_s2 = inlined_call_operand.vmem [shape: f32[1,64], index: 2, kind: input, shape index: {}]   ;;  %s277_s3 = inlined_call_operand.vmem [shape: f32[1,64], index: 3, kind: input, shape index: {}]   ;;  %s278_s4 = inlined_call_operand.vmem [shape: bf16[32,64], index: 4, kind: output, shape index: {}]  }
   0x1   :  { %v207_v0 = vld [vmem:[%s274_s1 + $0x18] sm:$0xff]   ;;  %v208_v1 = vld [vmem:[%s274_s1 + $0x10] sm:$0xff]   ;;  %v209_v2 = vld [vmem:[%s274_s1 + $0x8] sm:$0xff]  }
   0x2   :  { %195 = vmatprep.subr.bf16.mxu0 %v207_v0  ;;  %v211_v3 = vld [vmem:[%s275_s0] sm:$0xff]   ;;  %v212_v5 = vld [vmem:[%s275_s0 + $0x8] sm:$0xff]  }
   0x3   :  { %196 = vmatpush3.bf16.msra.mxu0 %v207_v0  ;;  %203 = vmatprep.mubr.msk.bf16.mxu0 %vm64_vm0, %v211_v3  ;;  %v210_v4 = vld [vmem:[%s274_s1] sm:$0xff]  }
   0x4   :  { %197 = vmatprep.subr.bf16.mxu0 %v208_v1  ;;  %v179_v6 = vld [vmem:[%s276_s2] ss:$0 sm:$0xff] }
   0x5   :  { %v180_v8 = vld [vmem:[%s277_s3] ss:$0 sm:$0xff] }
   0x7   :  { %198 = vmatpush3.bf16.msra.mxu0 %v208_v1 }
   0x8   :  { %199 = vmatprep.subr.bf16.mxu0 %v209_v2 }
   0xb   :  { %200 = vmatpush3.bf16.msra.mxu0 %v209_v2 }
   0xc   :  { %201 = vmatprep.subr.bf16.mxu0 %v210_v4 }
   0xf   :  { %202 = vmatpush3.bf16.msra.mxu0 %v210_v4 }
  0x12   :  { %204 = vmatmul.mubr.msk.bf16.vlgmr.msra.gmra.mxu0 %vm64_vm0, %v212_v5 }
  0xd2   :  { %v205_v7 = vpop.f32.mrf.mxu0 }
  0xd3   :  { %v129_v9 = vmul.f32 %v205_v7, %v179_v6 }
  0xd4   :  { %v105_v10 = vpop.f32.mrf.mxu0 }
  0xd5   :  { %v140_v11 = vadd.f32 %v180_v8, %v129_v9  ;;  %v127_v12 = vmul.f32 %v179_v6, %v105_v10 }
  0xd6   :  { %v206_v13 = vpop.f32.mrf.mxu0 }
  0xd7   :  { %v144_v14 = vmax.f32 %v140_v11, 0.0  ;;  %v138_v15 = vadd.f32 %v180_v8, %v127_v12  ;;  %v130_v16 = vmul.f32 %v206_v13, %v179_v6 }
  0xd8   :  { %v108_v17 = vpop.f32.mrf.mxu0 }
  0xd9   :  { %v187_v18 = vpack.c.bf16 %v144_v14, %v144_v14  ;;  %v142_v19 = vmax.f32 %v138_v15, 0.0  ;;  %v141_v20 = vadd.f32 %v180_v8, %v130_v16  ;;  %v128_v21 = vmul.f32 %v179_v6, %v108_v17 }
  0xdb   :  { %165 = vst.msk [vmem:[%s278_s4 + $0x8] sm:$0xf] %vm162_vm1, %v187_v18  ;;  %v185_v22 = vpack.c.bf16 %v142_v19, %v142_v19  ;;  %v145_v23 = vmax.f32 %v141_v20, 0.0  ;;  %v139_v24 = vadd.f32 %v180_v8, %v128_v21 }
  0xdd   :  { %163 = vst.msk [vmem:[%s278_s4] sm:$0xf] %vm162_vm1, %v185_v22  ;;  %v188_v25 = vpack.c.bf16 %v145_v23, %v145_v23  ;;  %v143_v26 = vmax.f32 %v139_v24, 0.0 }
  0xdf   :  { %166 = vst.msk [vmem:[%s278_s4 + $0xc] sm:$0xf] %vm162_vm1, %v188_v25  ;;  %v186_v27 = vpack.c.bf16 %v143_v26, %v143_v26 }
  0xe1   :  { %164 = vst.msk [vmem:[%s278_s4 + $0x4] sm:$0xf] %vm162_vm1, %v186_v27 }

// kernel: _lambda_.37
= control target key start
LH: loop header
LB: loop body
LE: loop exit
PB: predicated region body
PF: predicated region fallthrough
CT: control target
= control target key end

     0   :  { %v147_v0 = vmov 0.0   ;;  %vm148_vm0 = vmmov 0   ;;  %vm51_vm1 = vcmask 523264   ;;  %s198_s1 = inlined_call_operand.vmem [shape: bf16[64,128], index: 1, kind: input, shape index: {}]   ;;  %s199_s0 = inlined_call_operand.vmem [shape: bf16[8,64], index: 0, kind: input, shape index: {}]   ;;  %s200_s2 = inlined_call_operand.vmem [shape: f32[1,128], index: 2, kind: input, shape index: {}]   ;;  %s201_s3 = inlined_call_operand.vmem [shape: f32[1,128], index: 3, kind: input, shape index: {}]   ;;  %s202_s4 = inlined_call_operand.vmem [shape: bf16[8,128], index: 4, kind: output, shape index: {}]  }
   0x1   :  { %129 = vmatprep.subr.bf16.mxu0 %v147_v0  ;;  %v143_v1 = vld [vmem:[%s198_s1 + $0x18] sm:$0xff]   ;;  %137 = vmatprep.mubr.msk.bf16.mxu0 %vm148_vm0, %v147_v0  ;;  %v144_v2 = vld [vmem:[%s198_s1 + $0x10] sm:$0xff]   ;;  %v145_v3 = vld [vmem:[%s198_s1 + $0x8] sm:$0xff]  }
   0x2   :  { %130 = vmatpush3.bf16.msra.mxu0 %v143_v1  ;;  %v146_v4 = vld [vmem:[%s198_s1] sm:$0xff]  }
   0x3   :  { %131 = vmatprep.subr.bf16.mxu0 %v147_v0  ;;  %v18_v5 = vld [vmem:[%s199_s0] sm:$0xf] }
   0x4   :  { %v122_v6 = vld [vmem:[%s200_s2] ss:$0 sm:$0xff] }
   0x5   :  { %v123_v8 = vld [vmem:[%s201_s3] ss:$0 sm:$0xff] }
   0x6   :  { %132 = vmatpush3.bf16.msra.mxu0 %v144_v2 }
   0x7   :  { %133 = vmatprep.subr.bf16.mxu0 %v147_v0 }
   0xa   :  { %134 = vmatpush3.bf16.msra.mxu0 %v145_v3 }
   0xb   :  { %135 = vmatprep.subr.bf16.mxu0 %v147_v0 }
   0xe   :  { %136 = vmatpush3.bf16.msra.mxu0 %v146_v4 }
  0x11   :  { %138 = vmatmul.mubr.msk.bf16.vlgmr.msra.gmra.mxu0 %vm51_vm1, %v18_v5 }
  0xd1   :  { %v89_v7 = vpop.f32.mrf.mxu0 }
  0xd2   :  { %v102_v9 = vmul.f32 %v122_v6, %v89_v7 }
  0xd3   :  { %v139_v10 = vpop.f32.mrf.mxu0 }
  0xd4   :  { %v110_v11 = vadd.f32 %v123_v8, %v102_v9 }
  0xd5   :  { %v92_v12 = vpop.f32.mrf.mxu0 }
  0xd6   :  { %v111_v13 = vpack.c.bf16 %v110_v11, %v110_v11 }
  0xd7   :  { %v140_v14 = vpop.f32.mrf.mxu0 }
  0xd8   :  { %112 = vst [vmem:[%s202_s4] sm:$0xf] %v111_v13 }

// kernel: _lambda_.38
= control target key start
LH: loop header
LB: loop body
LE: loop exit
PB: predicated region body
PF: predicated region fallthrough
CT: control target
= control target key end

     0   :  { %v154_v0 = vmov 0.0   ;;  %vm155_vm0 = vmmov 0   ;;  %vm54_vm1 = vcmask 523264   ;;  %s213_s1 = inlined_call_operand.vmem [shape: bf16[64,128], index: 1, kind: input, shape index: {}]   ;;  %s214_s0 = inlined_call_operand.vmem [shape: bf16[8,64], index: 0, kind: input, shape index: {}]   ;;  %s215_s2 = inlined_call_operand.vmem [shape: f32[1,128], index: 2, kind: input, shape index: {}]   ;;  %s216_s4 = inlined_call_operand.vmem [shape: bf16[8,128], index: 4, kind: input, shape index: {}]   ;;  %s217_s3 = inlined_call_operand.vmem [shape: f32[1,128], index: 3, kind: input, shape index: {}]   ;;  %s218_s5 = inlined_call_operand.vmem [shape: bf16[8,128], index: 5, kind: output, shape index: {}]  }
   0x1   :  { %136 = vmatprep.subr.bf16.mxu0 %v154_v0  ;;  %v150_v1 = vld [vmem:[%s213_s1 + $0x18] sm:$0xff]   ;;  %144 = vmatprep.mubr.msk.bf16.mxu0 %vm155_vm0, %v154_v0  ;;  %v151_v2 = vld [vmem:[%s213_s1 + $0x10] sm:$0xff]   ;;  %v152_v3 = vld [vmem:[%s213_s1 + $0x8] sm:$0xff]  }
   0x2   :  { %137 = vmatpush3.bf16.msra.mxu0 %v150_v1  ;;  %v153_v4 = vld [vmem:[%s213_s1] sm:$0xff]  }
   0x3   :  { %138 = vmatprep.subr.bf16.mxu0 %v154_v0  ;;  %v21_v5 = vld [vmem:[%s214_s0] sm:$0xf] }
   0x4   :  { %v129_v6 = vld [vmem:[%s215_s2] ss:$0 sm:$0xff] }
   0x5   :  { %v114_v7 = vld [vmem:[%s216_s4] sm:$0xf] }
   0x6   :  { %139 = vmatpush3.bf16.msra.mxu0 %v151_v2  ;;  %v130_v9 = vld [vmem:[%s217_s3] ss:$0 sm:$0xff]  ;;  %v115_v11 = vunpack.c.l.bf16 %v114_v7 }
   0x7   :  { %140 = vmatprep.subr.bf16.mxu0 %v154_v0 }
   0xa   :  { %141 = vmatpush3.bf16.msra.mxu0 %v152_v3 }
   0xb   :  { %142 = vmatprep.subr.bf16.mxu0 %v154_v0 }
   0xe   :  { %143 = vmatpush3.bf16.msra.mxu0 %v153_v4 }
  0x11   :  { %145 = vmatmul.mubr.msk.bf16.vlgmr.msra.gmra.mxu0 %vm54_vm1, %v21_v5 }
  0xd1   :  { %v92_v8 = vpop.f32.mrf.mxu0 }
  0xd2   :  { %v105_v10 = vmul.f32 %v129_v6, %v92_v8 }
  0xd3   :  { %v146_v12 = vpop.f32.mrf.mxu0 }
  0xd4   :  { %v113_v13 = vadd.f32 %v130_v9, %v105_v10 }
  0xd5   :  { %v95_v14 = vpop.f32.mrf.mxu0 }
  0xd6   :  { %v116_v15 = vadd.f32 %v115_v11, %v113_v13 }
  0xd7   :  { %v147_v16 = vpop.f32.mrf.mxu0 }
  0xd8   :  { %v117_v17 = vmax.f32 %v116_v15, 0.0 }
  0xda   :  { %v118_v18 = vpack.c.bf16 %v117_v17, %v117_v17 }
  0xdc   :  { %119 = vst [vmem:[%s218_s5] sm:$0xf] %v118_v18 }

// kernel: _lambda_.36
= control target key start
LH: loop header
LB: loop body
LE: loop exit
PB: predicated region body
PF: predicated region fallthrough
CT: control target
= control target key end

     0   :  { %v622_v36 = vmov 0.0   ;;  %vm623_vm0 = vmmov 0   ;;  %vm326_vm1 = vcmask 523264   ;;  %vm468_vm2 = vcmask 519168   ;;  %s775_s1 = inlined_call_operand.vmem [shape: bf16[576,64], index: 1, kind: input, shape index: {}]   ;;  %s776_s0 = inlined_call_operand.vmem [shape: bf16[8,576], index: 0, kind: input, shape index: {}]   ;;  %s777_s2 = inlined_call_operand.vmem [shape: f32[1,64], index: 2, kind: input, shape index: {}]   ;;  %s778_s3 = inlined_call_operand.vmem [shape: f32[1,64], index: 3, kind: input, shape index: {}]   ;;  %s779_s4 = inlined_call_operand.vmem [shape: bf16[8,64], index: 4, kind: output, shape index: {}]  }
   0x1   :  { %v581_v0 = vld [vmem:[%s775_s1 + $0x78] sm:$0xff]   ;;  %v585_v4 = vld [vmem:[%s775_s1 + $0x70] sm:$0xff]   ;;  %v589_v8 = vld [vmem:[%s775_s1 + $0x68] sm:$0xff]  }
   0x2   :  { %v582_v1 = vld [vmem:[%s775_s1 + $0xf8] sm:$0xff]   ;;  %518 = vmatprep.subr.bf16.mxu0 %v581_v0  ;;  %v586_v5 = vld [vmem:[%s775_s1 + $0xf0] sm:$0xff]   ;;  %v590_v9 = vld [vmem:[%s775_s1 + $0xe8] sm:$0xff]  }
   0x3   :  { %v583_v2 = vld [vmem:[%s775_s1 + $0x38] sm:$0xff]   ;;  %540 = vmatprep.subr.bf16.mxu1 %v582_v1  ;;  %v587_v6 = vld [vmem:[%s775_s1 + $0x30] sm:$0xff]   ;;  %v591_v10 = vld [vmem:[%s775_s1 + $0x28] sm:$0xff]  }
   0x4   :  { %v584_v3 = vld [vmem:[%s775_s1 + $0xb8] sm:$0xff]   ;;  %519 = vmatpush3.bf16.msra.mxu0 %v583_v2  ;;  %v588_v7 = vld [vmem:[%s775_s1 + $0xb0] sm:$0xff]   ;;  %v592_v11 = vld [vmem:[%s775_s1 + $0xa8] sm:$0xff]  }
   0x5   :  { %541 = vmatpush3.bf16.msra.mxu1 %v584_v3  ;;  %520 = vmatprep.subr.bf16.mxu0 %v585_v4  ;;  %v593_v12 = vld [vmem:[%s775_s1 + $0x60] sm:$0xff]   ;;  %v597_v16 = vld [vmem:[%s775_s1 + $0x58] sm:$0xff]   ;;  %v601_v20 = vld [vmem:[%s775_s1 + $0x50] sm:$0xff]  }
   0x6   :  { %542 = vmatprep.subr.bf16.mxu1 %v586_v5  ;;  %v594_v13 = vld [vmem:[%s775_s1 + $0xe0] sm:$0xff]   ;;  %v598_v17 = vld [vmem:[%s775_s1 + $0xd8] sm:$0xff]   ;;  %v602_v21 = vld [vmem:[%s775_s1 + $0xd0] sm:$0xff]  }
   0x7   :  { %v595_v14 = vld [vmem:[%s775_s1 + $0x20] sm:$0xff]   ;;  %v599_v18 = vld [vmem:[%s775_s1 + $0x18] sm:$0xff]   ;;  %v603_v22 = vld [vmem:[%s775_s1 + $0x10] sm:$0xff]  }
   0x8   :  { %521 = vmatpush3.bf16.msra.mxu0 %v587_v6  ;;  %v596_v15 = vld [vmem:[%s775_s1 + $0xa0] sm:$0xff]   ;;  %v600_v19 = vld [vmem:[%s775_s1 + $0x98] sm:$0xff]   ;;  %v604_v23 = vld [vmem:[%s775_s1 + $0x90] sm:$0xff]  }
   0x9   :  { %543 = vmatpush3.bf16.msra.mxu1 %v588_v7  ;;  %522 = vmatprep.subr.bf16.mxu0 %v589_v8  ;;  %v605_v24 = vld [vmem:[%s775_s1 + $0x48] sm:$0xff]   ;;  %v609_v28 = vld [vmem:[%s775_s1 + $0x40] sm:$0xff]   ;;  %v618_v39 = vld [vmem:[%s775_s1 + $0x118] sm:$0xff]  }
   0xa   :  { %544 = vmatprep.subr.bf16.mxu1 %v590_v9  ;;  %v606_v25 = vld [vmem:[%s775_s1 + $0xc8] sm:$0xff]   ;;  %v610_v29 = vld [vmem:[%s775_s1 + $0xc0] sm:$0xff]   ;;  %v619_v40 = vld [vmem:[%s775_s1 + $0x110] sm:$0xff]  }
   0xb   :  { %v607_v26 = vld [vmem:[%s775_s1 + $0x8] sm:$0xff]   ;;  %v611_v30 = vld [vmem:[%s775_s1] sm:$0xff]   ;;  %v615_v43 = vld [vmem:[%s776_s0 + $0x10] ss:$0 sps:$4 sm:$0xff]  }
   0xc   :  { %523 = vmatpush3.bf16.msra.mxu0 %v591_v10  ;;  %v608_v27 = vld [vmem:[%s775_s1 + $0x88] sm:$0xff]   ;;  %v612_v31 = vld [vmem:[%s775_s1 + $0x80] sm:$0xff]  }
   0xd   :  { %545 = vmatpush3.bf16.msra.mxu1 %v592_v11  ;;  %524 = vmatprep.subr.bf16.mxu0 %v593_v12  ;;  %v18_v32 = vld [vmem:[%s776_s0] sm:$0xff]  ;;  %v19_v35 = vld [vmem:[%s776_s0 + $0x8] sm:$0xff] }
   0xe   :  { %546 = vmatprep.subr.bf16.mxu1 %v594_v13  ;;  %v474_v33 = vcombine.low %v18_v32, %v18_v32  ;;  %v475_v34 = vcombine.high %v18_v32, %v18_v32  ;;  %v476_v37 = vcombine.low %v19_v35, %v19_v35  ;;  %v477_v38 = vcombine.high %v19_v35, %v19_v35  ;;  %v620_v41 = vld [vmem:[%s775_s1 + $0x108] sm:$0xff]   ;;  %v621_v42 = vld [vmem:[%s775_s1 + $0x100] sm:$0xff]  }
   0xf   :  { %v516_v56 = vld [vmem:[%s777_s2] ss:$0 sm:$0xff] }
  0x10   :  { %525 = vmatpush3.bf16.msra.mxu0 %v595_v14  ;;  %362 = vmatprep.mubr.bf16.mxu0 %v475_v34  ;;  %v517_v58 = vld [vmem:[%s778_s3] ss:$0 sm:$0xff] }
  0x11   :  { %547 = vmatpush3.bf16.msra.mxu1 %v596_v15  ;;  %526 = vmatprep.subr.bf16.mxu0 %v597_v16 }
  0x12   :  { %548 = vmatprep.subr.bf16.mxu1 %v598_v17  ;;  %402 = vmatprep.mubr.bf16.mxu1 %v477_v38 }
  0x14   :  { %527 = vmatpush3.bf16.msra.mxu0 %v599_v18 }
  0x15   :  { %549 = vmatpush3.bf16.msra.mxu1 %v600_v19  ;;  %528 = vmatprep.subr.bf16.mxu0 %v601_v20 }
  0x16   :  { %550 = vmatprep.subr.bf16.mxu1 %v602_v21 }
  0x18   :  { %529 = vmatpush3.bf16.msra.mxu0 %v603_v22 }
  0x19   :  { %551 = vmatpush3.bf16.msra.mxu1 %v604_v23  ;;  %530 = vmatprep.subr.bf16.mxu0 %v605_v24 }
  0x1a   :  { %552 = vmatprep.subr.bf16.mxu1 %v606_v25 }
  0x1c   :  { %531 = vmatpush3.bf16.msra.mxu0 %v607_v26 }
  0x1d   :  { %553 = vmatpush3.bf16.msra.mxu1 %v608_v27  ;;  %532 = vmatprep.subr.bf16.mxu0 %v609_v28 }
  0x1e   :  { %554 = vmatprep.subr.bf16.mxu1 %v610_v29 }
  0x20   :  { %533 = vmatpush3.bf16.msra.mxu0 %v611_v30 }
  0x21   :  { %555 = vmatpush3.bf16.msra.mxu1 %v612_v31  ;;  %567 = vmatprep.subr.bf16.mxu0 %v622_v36 }
  0x23   :  { %363 = vmatmul.mubr.bf16.vlgmr.msra.gmra.mxu0 %v474_v33 }
  0x24   :  { %403 = vmatmul.mubr.bf16.vlgmr.msra.gmra.mxu1 %v476_v37  ;;  %568 = vmatpush3.bf16.msra.mxu0 %v618_v39 }
  0x25   :  { %569 = vmatprep.subr.bf16.mxu0 %v622_v36  ;;  %575 = vmatprep.mubr.msk.bf16.mxu0 %vm623_vm0, %v622_v36 }
  0x28   :  { %570 = vmatpush3.bf16.msra.mxu0 %v619_v40 }
  0x29   :  { %571 = vmatprep.subr.bf16.mxu0 %v622_v36 }
  0x2c   :  { %572 = vmatpush3.bf16.msra.mxu0 %v620_v41 }
  0x2d   :  { %573 = vmatprep.subr.bf16.mxu0 %v622_v36 }
  0x30   :  { %574 = vmatpush3.bf16.msra.mxu0 %v621_v42 }
  0x33   :  { %576 = vmatmul.mubr.msk.bf16.vlgmr.msra.gmra.mxu0 %vm326_vm1, %v615_v43 }
  0xe3   :  { %v534_v44 = vpop.f32.mrf.mxu0 }
  0xe4   :  { %v556_v45 = vpop.f32.mrf.mxu1 }
  0xe5   :  { %v535_v46 = vpop.f32.mrf.mxu0 }
  0xe6   :  { %v557_v47 = vpop.f32.mrf.mxu1  ;;  %v536_v52 = vadd.f32 %v535_v46, %v534_v44 }
  0xe7   :  { %v537_v48 = vpop.f32.mrf.mxu0  ;;  %v558_v53 = vadd.f32 %v557_v47, %v556_v45 }
  0xe8   :  { %v559_v49 = vpop.f32.mrf.mxu1 }
  0xe9   :  { %v538_v50 = vpop.f32.mrf.mxu0  ;;  %v405_v54 = vadd.f32 %v558_v53, %v536_v52 }
  0xea   :  { %v560_v51 = vpop.f32.mrf.mxu1 }
  0xf3   :  { %v444_v55 = vpop.f32.mrf.mxu0 }
  0xf4   :  { %v445_v57 = vadd.f32 %v444_v55, %v405_v54 }
  0xf5   :  { %v577_v59 = vpop.f32.mrf.mxu0 }
  0xf6   :  { %v457_v60 = vmul.f32 %v516_v56, %v445_v57 }
  0xf7   :  { %v447_v61 = vpop.f32.mrf.mxu0 }
  0xf8   :  { %v465_v62 = vadd.f32 %v517_v58, %v457_v60 }
  0xf9   :  { %v578_v63 = vpop.f32.mrf.mxu0 }
  0xfa   :  { %v466_v0 = vmax.f32 %v465_v62, 0.0 }
  0xfc   :  { %v467_v1 = vpack.c.bf16 %v466_v0, %v466_v0 }
  0xfe   :  { %469 = vst.msk [vmem:[%s779_s4] sm:$0xf] %vm468_vm2, %v467_v1 }

// kernel: _lambda_.39
= control target key start
LH: loop header
LB: loop body
LE: loop exit
PB: predicated region body
PF: predicated region fallthrough
CT: control target
= control target key end

     0   :  { %s204_s6 = smov 0   ;;  %s215_s0 = inlined_call_operand.vmem [shape: bf16[2,4,128], index: 0, kind: input, shape index: {}]   ;;  %s216_s1 = inlined_call_operand.vmem [shape: f32[2,1,128], index: 1, kind: output, shape index: {}]  }
   0x1 LB: > { %s170_s7 = sadd.s32 4294967295, %s192_s6   ;;  %p174_p0 = scmp.ge.s32.totalorder %s192_s6, 1  ;;  %s192_s6 = sphi %s204_s6, %s11_s6  }
   0x2   : > { %p86_p1 = scmp.lt.s32.totalorder %s192_s6, 3 }
   0x4   : > { %p87_p2 = pnand %p174_p0, %p86_p1 }
   0x5   : > { %p103_p3 = scmp.lt.s32.totalorder (!%p87_p2), %s170_s7, 1 }
   0x6   : > { %90 = sbr.rel (%p87_p2) target bundleno = 33 (0x21), region = 24 }
   0xb   : > { %s218_s7 = smov (!%p103_p3, %s170_s7), 1  ;;  %vm112_vm0 = vcmask 1043456  }
   0xc   : > { %s175_s8 = sshll.u32 %s218_s7, 1  ;;  %s109_s14 = scalar_lea.vmem %s216_s1, %s218_s7 }
   0xd   : > { %s106_s11 = scalar_lea.vmem %s215_s0, %s175_s8 }
   0xe   : > { %v110_v0 = vld [vmem:[%s106_s11] sm:$0x3] }
   0xf   : > { %v111_v1 = vunpack.c.l.bf16 %v110_v0 }
  0x11   : > { %v113_v2 = vsel %vm112_vm0, %v111_v1, 0.0 }
  0x12   : > { %v114_v3 = vrot.slane %v113_v2, 4 }
  0x14   : > { %v115_v4 = vadd.f32 %v114_v3, %v113_v2 }
  0x16   : > { %v116_v5 = vrot.slane %v115_v4, 2 }
  0x18   : > { %v117_v6 = vadd.f32 %v116_v5, %v115_v4 }
  0x1a   : > { %v118_v7 = vrot.slane %v117_v6, 1 }
  0x1c   : > { %v119_v8 = vadd.f32 %v118_v7, %v117_v6 }
  0x1e   : > { %v121_v9 = vmul.f32 0.25, %v119_v8 }
  0x20   : > { %122 = vst [vmem:[%s109_s14] sm:$0x1] %v121_v9 }
  0x21 PF: > { %s11_s6 = sadd.s32 1, %s192_s6  }
  0x22   : > { %p8_p4 = scmp.ge.s32.totalorder %s11_s6, 4  }
  0x24   :  { %10 = sbr.rel (!%p8_p4) target bundleno = 1 (0x1), region = 54 }

// kernel: _lambda_.41
= control target key start
LH: loop header
LB: loop body
LE: loop exit
PB: predicated region body
PF: predicated region fallthrough
CT: control target
= control target key end

     0   :  { %v121_v0 = vmov 0.0   ;;  %vm122_vm0 = vmmov 0   ;;  %vm35_vm1 = vcmask 261120   ;;  %vm95_vm2 = vcmask 80896   ;;  %s166_s1 = inlined_call_operand.vmem [shape: bf16[32,10], index: 1, kind: input, shape index: {}]   ;;  %s167_s0 = inlined_call_operand.vmem [shape: bf16[8,32], index: 0, kind: input, shape index: {}]   ;;  %s168_s2 = inlined_call_operand.vmem [shape: f32[1,10], index: 2, kind: input, shape index: {}]   ;;  %s169_s3 = inlined_call_operand.vmem [shape: f32[1,10], index: 3, kind: input, shape index: {}]   ;;  %s170_s4 = inlined_call_operand.vmem [shape: f32[8,10], index: 4, kind: output, shape index: {}]  }
   0x1   :  { %109 = vmatprep.subr.bf16.mxu0 %v121_v0  ;;  %v119_v1 = vld [vmem:[%s166_s1 + $0x8] sm:$0xff]   ;;  %113 = vmatprep.mubr.msk.bf16.mxu0 %vm122_vm0, %v121_v0  ;;  %v120_v2 = vld [vmem:[%s166_s1] sm:$0xff]  }
   0x2   :  { %110 = vmatpush3.bf16.msra.mxu0 %v119_v1  ;;  %v18_v3 = vld [vmem:[%s167_s0] sm:$0xf] }
   0x3   :  { %111 = vmatprep.subr.bf16.mxu0 %v121_v0  ;;  %v104_v4 = vld [vmem:[%s168_s2] ss:$0 sm:$0xff] }
   0x4   :  { %v105_v6 = vld [vmem:[%s169_s3] ss:$0 sm:$0xff] }
   0x6   :  { %112 = vmatpush3.bf16.msra.mxu0 %v120_v2 }
   0x9   :  { %114 = vmatmul.mubr.msk.bf16.vlgmr.msra.gmra.mxu0 %vm35_vm1, %v18_v3 }
  0xc9   :  { %v73_v5 = vpop.f32.mrf.mxu0 }
  0xca   :  { %v86_v7 = vmul.f32 %v104_v4, %v73_v5 }
  0xcb   :  { %v115_v8 = vpop.f32.mrf.mxu0 }
  0xcc   :  { %v94_v9 = vadd.f32 %v105_v6, %v86_v7 }
  0xcd   :  { %v76_v10 = vpop.f32.mrf.mxu0 }
  0xce   :  { %96 = vst.msk [vmem:[%s170_s4] sm:$0xff] %vm95_vm2, %v94_v9 }
  0xcf   :  { %v116_v11 = vpop.f32.mrf.mxu0 }

// kernel: _lambda_.40
= control target key start
LH: loop header
LB: loop body
LE: loop exit
PB: predicated region body
PF: predicated region fallthrough
CT: control target
= control target key end

     0   :  { %v196_v0 = vmov 0.0   ;;  %vm197_vm0 = vmmov 0   ;;  %vm141_vm1 = vcmask 257024   ;;  %s259_s1 = inlined_call_operand.vmem [shape: bf16[128,32], index: 1, kind: input, shape index: {}]   ;;  %s260_s0 = inlined_call_operand.vmem [shape: bf16[8,128], index: 0, kind: input, shape index: {}]   ;;  %s261_s2 = inlined_call_operand.vmem [shape: f32[1,32], index: 2, kind: input, shape index: {}]   ;;  %s262_s3 = inlined_call_operand.vmem [shape: f32[1,32], index: 3, kind: input, shape index: {}]   ;;  %s263_s4 = inlined_call_operand.vmem [shape: bf16[8,32], index: 4, kind: output, shape index: {}]  }
   0x1   :  { %166 = vmatprep.subr.bf16.mxu0 %v196_v0  ;;  %v188_v1 = vld [vmem:[%s259_s1 + $0x38] sm:$0xff]   ;;  %182 = vmatprep.mubr.msk.bf16.mxu0 %vm197_vm0, %v196_v0  ;;  %v189_v2 = vld [vmem:[%s259_s1 + $0x30] sm:$0xff]   ;;  %v190_v3 = vld [vmem:[%s259_s1 + $0x28] sm:$0xff]  }
   0x2   :  { %167 = vmatpush3.bf16.msra.mxu0 %v188_v1  ;;  %v191_v4 = vld [vmem:[%s259_s1 + $0x20] sm:$0xff]   ;;  %v192_v5 = vld [vmem:[%s259_s1 + $0x18] sm:$0xff]   ;;  %v193_v6 = vld [vmem:[%s259_s1 + $0x10] sm:$0xff]  }
   0x3   :  { %168 = vmatprep.subr.bf16.mxu0 %v196_v0  ;;  %v194_v7 = vld [vmem:[%s259_s1 + $0x8] sm:$0xff]   ;;  %v195_v8 = vld [vmem:[%s259_s1] sm:$0xff]  }
   0x4   :  { %v18_v9 = vld [vmem:[%s260_s0] sm:$0xf] }
   0x5   :  { %v155_v10 = vld [vmem:[%s261_s2] ss:$0 sm:$0xff] }
   0x6   :  { %169 = vmatpush3.bf16.msra.mxu0 %v189_v2  ;;  %v156_v12 = vld [vmem:[%s262_s3] ss:$0 sm:$0xff] }
   0x7   :  { %170 = vmatprep.subr.bf16.mxu0 %v196_v0 }
   0xa   :  { %171 = vmatpush3.bf16.msra.mxu0 %v190_v3 }
   0xb   :  { %172 = vmatprep.subr.bf16.mxu0 %v196_v0 }
   0xe   :  { %173 = vmatpush3.bf16.msra.mxu0 %v191_v4 }
   0xf   :  { %174 = vmatprep.subr.bf16.mxu0 %v196_v0 }
  0x12   :  { %175 = vmatpush3.bf16.msra.mxu0 %v192_v5 }
  0x13   :  { %176 = vmatprep.subr.bf16.mxu0 %v196_v0 }
  0x16   :  { %177 = vmatpush3.bf16.msra.mxu0 %v193_v6 }
  0x17   :  { %178 = vmatprep.subr.bf16.mxu0 %v196_v0 }
  0x1a   :  { %179 = vmatpush3.bf16.msra.mxu0 %v194_v7 }
  0x1b   :  { %180 = vmatprep.subr.bf16.mxu0 %v196_v0 }
  0x1e   :  { %181 = vmatpush3.bf16.msra.mxu0 %v195_v8 }
  0x21   :  { %183 = vmatmul.mubr.bf16.vlgmr.msra.gmra.mxu0 %v18_v9 }
  0xe1   :  { %v117_v11 = vpop.f32.mrf.mxu0 }
  0xe2   :  { %v130_v13 = vmul.f32 %v155_v10, %v117_v11 }
  0xe3   :  { %v184_v14 = vpop.f32.mrf.mxu0 }
  0xe4   :  { %v138_v15 = vadd.f32 %v156_v12, %v130_v13 }
  0xe5   :  { %v120_v16 = vpop.f32.mrf.mxu0 }
  0xe6   :  { %v139_v17 = vmax.f32 %v138_v15, 0.0 }
  0xe7   :  { %v185_v18 = vpop.f32.mrf.mxu0 }
  0xe8   :  { %v140_v19 = vpack.c.bf16 %v139_v17, %v139_v17 }
  0xea   :  { %142 = vst.msk [vmem:[%s263_s4] sm:$0xf] %vm141_vm1, %v140_v19 }

</bundles_post_ra>
